<compile_context>
chip_gen: v7x
topology: tpu7x:2x2x1
jax: 0.10.0
libtpu: 0.0.40
codegen_flags: <defaults>
</compile_context>

<pallas_src>
import functools

import jax
import jax.numpy as jnp
from jax.experimental import pallas as pl
from jax.experimental.pallas import tpu as pltpu


# --------------------------------------------------------------------------
# Fused recurrent kernel: one grid step == one timestep (all layers + conv_last)
# --------------------------------------------------------------------------
def _make_kernel(num_layers, batch, Hn, Wn, ksize):
    r = ksize // 2
    Hp, Wp = Hn + 2 * r, Wn + 2 * r
    P_pad = batch * Hp * Wp              # rows of the zero-halo NHWC slabs
    maxoff = r * Wp + r                  # largest |row offset| of a conv tap
    P_c = P_pad - 2 * maxoff             # rows actually computed (covers all interior)
    taps = [(dy, dx) for dy in range(-r, r + 1) for dx in range(-r, r + 1)]
    forget_bias = 1.0

    def kernel(*refs):
        frames_ref, mask_ref, interior_ref = refs[0], refs[1], refs[2]
        pos = 3
        layer_w = []
        for _ in range(num_layers):
            layer_w.append(refs[pos:pos + 7])
            pos += 7
        wcl_ref = refs[pos]                       # network conv_last (1x1)
        out_ref = refs[pos + 1]
        scr = refs[pos + 2:]
        h_scr = [scr[2 * l] for l in range(num_layers)]
        c_scr = [scr[2 * l + 1] for l in range(num_layers)]
        mem_scr = scr[2 * num_layers]             # spatiotemporal memory
        xg_scr = scr[2 * num_layers + 1]          # previous x_gen
        net_scr = scr[2 * num_layers + 2]         # blended layer-0 input

        # t == 0: zero all recurrent state.  Halo rows stay 0 forever because
        # afterwards only the interior compute window is written.
        @pl.when(pl.program_id(0) == 0)
        def _init():
            for l in range(num_layers):
                h_scr[l][...] = jnp.zeros_like(h_scr[l])
                c_scr[l][...] = jnp.zeros_like(c_scr[l])
            mem_scr[...] = jnp.zeros_like(mem_scr)
            xg_scr[...] = jnp.zeros_like(xg_scr)

        interior = interior_ref[...]              # [P_c, 1] 1.0 on interior rows

        # scheduled-sampling blend (mask == 1 on teacher-forced steps).
        # Halo rows stay 0 because both the frame slab and x_gen have zero halos.
        net_scr[...] = (mask_ref[0, :, :] * frames_ref[0, :, :]
                        + (1.0 - mask_ref[0, :, :]) * xg_scr[...])

        def dot(a, b):
            return jnp.dot(a, b, preferred_element_type=jnp.float32)

        def cell_step(x_ref, h_ref, c_ref, m_ref, weights):
            wx, wh, wm, woc, wom, wlc, wlm = weights
            nh = wh.shape[1]

            # 3x3 convs as shifted-row matmuls; gate groups fused along N.
            gx = jnp.zeros((P_c, 7 * nh), jnp.float32)
            gh = jnp.zeros((P_c, 4 * nh), jnp.float32)
            gm = jnp.zeros((P_c, 3 * nh), jnp.float32)
            for j, (dy, dx) in enumerate(taps):
                s = maxoff + dy * Wp + dx
                gx = gx + dot(x_ref[s:s + P_c, :], wx[j])
                gh = gh + dot(h_ref[s:s + P_c, :], wh[j])
                gm = gm + dot(m_ref[s:s + P_c, :], wm[j])

            c_old = c_ref[maxoff:maxoff + P_c, :]
            m_old = m_ref[maxoff:maxoff + P_c, :]

            i_t = jax.nn.sigmoid(gx[:, 0:nh] + gh[:, 0:nh])
            f_t = jax.nn.sigmoid(gx[:, nh:2 * nh] + gh[:, nh:2 * nh]
                                 + forget_bias)
            g_t = jnp.tanh(gx[:, 2 * nh:3 * nh] + gh[:, 2 * nh:3 * nh])
            c_new = (f_t * c_old + i_t * g_t) * interior       # zero on halo rows

            i_p = jax.nn.sigmoid(gx[:, 3 * nh:4 * nh] + gm[:, 0:nh])
            f_p = jax.nn.sigmoid(gx[:, 4 * nh:5 * nh] + gm[:, nh:2 * nh]
                                 + forget_bias)
            g_p = jnp.tanh(gx[:, 5 * nh:6 * nh] + gm[:, 2 * nh:3 * nh])
            m_new = (f_p * m_old + i_p * g_p) * interior

            o_xh = gx[:, 6 * nh:7 * nh] + gh[:, 3 * nh:4 * nh]

            # write the new c / m so conv_o can read their spatial neighbours
            c_ref[maxoff:maxoff + P_c, :] = c_new
            m_ref[maxoff:maxoff + P_c, :] = m_new

            o_conv = jnp.zeros((P_c, nh), jnp.float32)
            for j, (dy, dx) in enumerate(taps):
                s = maxoff + dy * Wp + dx
                o_conv = o_conv + dot(c_ref[s:s + P_c, :], woc[j])
                o_conv = o_conv + dot(m_ref[s:s + P_c, :], wom[j])
            o_t = jax.nn.sigmoid(o_xh + o_conv)

            last = dot(c_new, wlc[...]) + dot(m_new, wlm[...])   # cell 1x1
            h_new = o_t * jnp.tanh(last)       # exactly 0 on halo rows (mem == 0)
            h_ref[maxoff:maxoff + P_c, :] = h_new
            return h_new

        x_ref = net_scr
        h_mid = None
        for l in range(num_layers):
            h_mid = cell_step(x_ref, h_scr[l], c_scr[l], mem_scr, layer_w[l])
            x_ref = h_scr[l]                    # next layer consumes updated h

        # network conv_last (1x1), fused into the same kernel
        xg_scr[maxoff:maxoff + P_c, :] = dot(h_mid, wcl_ref[...])
        out_ref[0, :, :] = xg_scr[...]

    return kernel


def _run_recurrence(frames_slab, mask_eff, interior, cell_params, conv_last_w,
                    num_layers, num_hidden, frame_ch, batch, Hn, Wn, ksize, T1):
    r = ksize // 2
    Hp, Wp = Hn + 2 * r, Wn + 2 * r
    P_pad = batch * Hp * Wp

    kernel = _make_kernel(num_layers, batch, Hn, Wn, ksize)

    args = [frames_slab, mask_eff, interior]
    in_specs = [
        pl.BlockSpec((1, P_pad, frame_ch), lambda t: (t, 0, 0)),
        pl.BlockSpec((1, P_pad, frame_ch), lambda t: (t, 0, 0)),
        pl.BlockSpec(interior.shape, lambda t: (0, 0)),
    ]
    # weights: constant index_map -> DMA'd into VMEM once, resident across t
    for l in range(num_layers):
        for name in ('wx', 'wh', 'wm', 'woc', 'wom', 'wlc', 'wlm'):
            w = cell_params[l][name]
            args.append(w)
            in_specs.append(pl.BlockSpec(w.shape,
                                         lambda t, nd=w.ndim: (0,) * nd))
    args.append(conv_last_w)
    in_specs.append(pl.BlockSpec(conv_last_w.shape, lambda t: (0, 0)))

    scratch = []
    for l in range(num_layers):
        scratch.append(pltpu.VMEM((P_pad, num_hidden[l]), jnp.float32))   # h_t[l]
        scratch.append(pltpu.VMEM((P_pad, num_hidden[l]), jnp.float32))   # c_t[l]
    scratch += [
        pltpu.VMEM((P_pad, num_hidden[0]), jnp.float32),   # spatiotemporal memory
        pltpu.VMEM((P_pad, frame_ch), jnp.float32),        # x_gen
        pltpu.VMEM((P_pad, frame_ch), jnp.float32),        # blended layer-0 input
    ]

    return pl.pallas_call(
        kernel,
        grid=(T1,),
        in_specs=in_specs,
        out_specs=pl.BlockSpec((1, P_pad, frame_ch), lambda t: (t, 0, 0)),
        out_shape=jax.ShapeDtypeStruct((T1, P_pad, frame_ch), jnp.float32),
        scratch_shapes=scratch,
        compiler_params=pltpu.CompilerParams(
            dimension_semantics=("arbitrary",)),    # sequential recurrence over t
    )(*args)


# --------------------------------------------------------------------------
# Full PredRNNBase.forward
# --------------------------------------------------------------------------
def predrnn_forward(frames, mask_true, cell_params, conv_last_w, cfg):
    # frames: [length, batch, img_channel, H, W]  (PyTorch layout)
    # mask_true: [batch, T_mask, Hn, Wn, frame_channel]
    L, B, C, H, W = frames.shape
    p = cfg['patch_size']
    ksize = cfg['filter_size']
    Hn = (cfg['img_height'] - 1) // p + 1
    Wn = (cfg['img_width'] - 1) // p + 1
    num_layers = cfg['num_layers']
    num_hidden = cfg['num_hidden']
    assert all(n == num_hidden[0] for n in num_hidden)
    fc = C * p * p
    T1 = cfg['total_length'] - 1
    in_len = cfg['input_length']
    r = ksize // 2
    Hp, Wp = Hn + 2 * r, Wn + 2 * r
    P_pad = B * Hp * Wp

    # ReflectionPad2d([0, pw, 0, ph]) + patchify (mirrors the PyTorch reference,
    # which itself assumes img dims are NOT exact multiples of patch_size).
    pad_h = p - cfg['img_height'] % p
    pad_w = p - cfg['img_width'] % p
    fr = frames.reshape(L * B, C, H, W)
    fr = jnp.pad(fr, ((0, 0), (0, 0), (0, pad_h), (0, pad_w)), mode='reflect')
    a = fr.reshape(L, B, C, Hn, p, Wn, p)
    b = jnp.transpose(a, (1, 0, 2, 4, 6, 3, 5))
    frames_p = b.reshape(B, L, fc, Hn, Wn)

    # frames -> zero-halo NHWC slabs [T1, P_pad, fc]
    f_nhwc = jnp.transpose(frames_p[:, :T1], (1, 0, 3, 4, 2))   # [T1,B,Hn,Wn,fc]
    f_pad = jnp.pad(f_nhwc, ((0, 0), (0, 0), (r, r), (r, r), (0, 0)))
    frames_slab = f_pad.reshape(T1, P_pad, fc)

    # scheduled-sampling mask -> effective mask slab (ones on teacher-forced steps)
    m_nhwc = jnp.transpose(mask_true, (1, 0, 2, 3, 4))          # [Tm,B,Hn,Wn,fc]
    m_pad = jnp.pad(m_nhwc, ((0, 0), (0, 0), (r, r), (r, r), (0, 0)))
    m_slab = m_pad.reshape(-1, P_pad, fc)[:max(T1 - in_len, 0)]
    mask_eff = jnp.concatenate(
        [jnp.ones((min(in_len, T1), P_pad, fc), jnp.float32),
         m_slab.astype(jnp.float32)], axis=0)

    # interior-row mask over the kernel's compute window
    maxoff = r * Wp + r
    P_c = P_pad - 2 * maxoff
    yy = jnp.arange(Hp)
    xx = jnp.arange(Wp)
    m2d = ((yy[:, None] >= r) & (yy[:, None] < r + Hn)
           & (xx[None, :] >= r) & (xx[None, :] < r + Wn)).astype(jnp.float32)
    interior = jnp.tile(m2d.reshape(-1), (B,))[maxoff:P_pad - maxoff]
    interior = interior.reshape(P_c, 1)

    out_slab = _run_recurrence(frames_slab, mask_eff, interior,
                               cell_params, conv_last_w,
                               num_layers, num_hidden, fc, B, Hn, Wn, ksize, T1)

    # strip halo, back to [T1, B, fc, Hn, Wn]
    nf = out_slab.reshape(T1, B, Hp, Wp, fc)[:, :, r:r + Hn, r:r + Wn, :]
    nf = jnp.transpose(nf, (0, 1, 4, 2, 3))

    # reference un-patchify (keeps only the last img channel, output channel 1,
    # exactly as the PyTorch module does)
    a2 = nf.reshape(T1, B, C, p, p, Hn, Wn)[:, :, -1, ...]
    b2 = jnp.transpose(a2, (0, 1, 4, 2, 5, 3))                  # [T1,B,Hn,p,Wn,p]
    out = b2.reshape(T1, B, 1, Hn * p, Wn * p)[:, :, :, :H, :W]
    return out


# --------------------------------------------------------------------------
# Deterministic synthetic parameters (cell_list + conv_last of standard PredRNN),
# gate-fused weight layout: per conv tap, x->7*nh, h->4*nh, m->3*nh columns.
# --------------------------------------------------------------------------
def init_params(key, num_layers, num_hidden, frame_channel, filter_size):
    kk = filter_size * filter_size

    def w(k_, shape, fan_in):
        return (jax.random.normal(k_, shape, jnp.float32)
                / jnp.sqrt(jnp.float32(fan_in)))

    cell_params = []
    for i in range(num_layers):
        in_ch = frame_channel if i == 0 else num_hidden[i - 1]
        nh = num_hidden[i]
        key, k0, k1, k2, k3, k4, k5, k6 = jax.random.split(key, 8)
        cell_params.append(dict(
            wx=w(k0, (kk, in_ch, 7 * nh), in_ch * kk),   # conv_x (7 gate groups fused)
            wh=w(k1, (kk, nh, 4 * nh), nh * kk),         # conv_h (4 gate groups fused)
            wm=w(k2, (kk, nh, 3 * nh), nh * kk),         # conv_m (3 gate groups fused)
            woc=w(k3, (kk, nh, nh), 2 * nh * kk),        # conv_o, c_new half
            wom=w(k4, (kk, nh, nh), 2 * nh * kk),        # conv_o, m_new half
            wlc=w(k5, (nh, nh), 2 * nh),                 # cell conv_last, c half
            wlm=w(k6, (nh, nh), 2 * nh),                 # cell conv_last, m half
        ))
    key, kl = jax.random.split(key)
    conv_last_w = w(kl, (num_hidden[-1], frame_channel), num_hidden[-1])
    return cell_params, conv_last_w


# --------------------------------------------------------------------------
if __name__ == "__main__":
    cfg = dict(
        img_channel=1,
        img_height=15,
        img_width=15,
        patch_size=4,
        total_length=8,
        input_length=5,
        num_layers=2,
        num_hidden=[32, 32],
        filter_size=3,
    )

    key = jax.random.PRNGKey(0)
    k1, k2, k3 = jax.random.split(key, 3)

    L = cfg['total_length']
    B = 2
    Hn = (cfg['img_height'] - 1) // cfg['patch_size'] + 1
    Wn = (cfg['img_width'] - 1) // cfg['patch_size'] + 1
    fc = cfg['img_channel'] * cfg['patch_size'] ** 2

    frames = jax.random.normal(
        k1, (L, B, cfg['img_channel'], cfg['img_height'], cfg['img_width']),
        jnp.float32)
    tmask = cfg['total_length'] - cfg['input_length'] - 1
    mask_true = (jax.random.uniform(k2, (B, tmask, Hn, Wn, fc)) > 0.5
                 ).astype(jnp.float32)

    cell_params, conv_last_w = init_params(
        k3, cfg['num_layers'], cfg['num_hidden'], fc, cfg['filter_size'])

    fwd = jax.jit(functools.partial(predrnn_forward, cfg=cfg))
    out = fwd(frames, mask_true, cell_params, conv_last_w)
    jax.block_until_ready(out)

    expected = (cfg['total_length'] - 1, B, 1,
                cfg['img_height'], cfg['img_width'])
    assert out.shape == expected, (out.shape, expected)
    assert jnp.isfinite(out).all()
    print("KERNEL_OK")
</pallas_src>

<mosaic_0001>
module attributes {stable_mosaic.version = 11 : i64} {
  func.func @kernel(%arg0: i32, %arg1: memref<1x72x16xf32, #tpu.memory_space<vmem>>, %arg2: memref<1x72x16xf32, #tpu.memory_space<vmem>>, %arg3: memref<58x1xf32, #tpu.memory_space<vmem>>, %arg4: memref<9x16x224xf32, #tpu.memory_space<vmem>>, %arg5: memref<9x32x128xf32, #tpu.memory_space<vmem>>, %arg6: memref<9x32x96xf32, #tpu.memory_space<vmem>>, %arg7: memref<9x32x32xf32, #tpu.memory_space<vmem>>, %arg8: memref<9x32x32xf32, #tpu.memory_space<vmem>>, %arg9: memref<32x32xf32, #tpu.memory_space<vmem>>, %arg10: memref<32x32xf32, #tpu.memory_space<vmem>>, %arg11: memref<9x32x224xf32, #tpu.memory_space<vmem>>, %arg12: memref<9x32x128xf32, #tpu.memory_space<vmem>>, %arg13: memref<9x32x96xf32, #tpu.memory_space<vmem>>, %arg14: memref<9x32x32xf32, #tpu.memory_space<vmem>>, %arg15: memref<9x32x32xf32, #tpu.memory_space<vmem>>, %arg16: memref<32x32xf32, #tpu.memory_space<vmem>>, %arg17: memref<32x32xf32, #tpu.memory_space<vmem>>, %arg18: memref<32x16xf32, #tpu.memory_space<vmem>>, %arg19: memref<1x72x16xf32, #tpu.memory_space<vmem>>, %arg20: memref<72x32xf32, #tpu.memory_space<vmem>>, %arg21: memref<72x32xf32, #tpu.memory_space<vmem>>, %arg22: memref<72x32xf32, #tpu.memory_space<vmem>>, %arg23: memref<72x32xf32, #tpu.memory_space<vmem>>, %arg24: memref<72x32xf32, #tpu.memory_space<vmem>>, %arg25: memref<72x16xf32, #tpu.memory_space<vmem>>, %arg26: memref<72x16xf32, #tpu.memory_space<vmem>>) attributes {dimension_semantics = [#tpu.dimension_semantics<arbitrary>], iteration_bounds = array<i64: 7>, scalar_prefetch = 0 : i64, scratch_operands = 7 : i64, tpu.core_type = #tpu.core_type<tc>, window_params = [{transform_indices = @transform_0, window_bounds = array<i64: 1, 72, 16>}, {transform_indices = @transform_1, window_bounds = array<i64: 1, 72, 16>}, {pipeline_mode = #tpu.pipeline_mode<synchronous>, transform_indices = @transform_2, window_bounds = array<i64: 58, 1>}, {pipeline_mode = #tpu.pipeline_mode<synchronous>, transform_indices = @transform_3, window_bounds = array<i64: 9, 16, 224>}, {pipeline_mode = #tpu.pipeline_mode<synchronous>, transform_indices = @transform_4, window_bounds = array<i64: 9, 32, 128>}, {pipeline_mode = #tpu.pipeline_mode<synchronous>, transform_indices = @transform_5, window_bounds = array<i64: 9, 32, 96>}, {pipeline_mode = #tpu.pipeline_mode<synchronous>, transform_indices = @transform_6, window_bounds = array<i64: 9, 32, 32>}, {pipeline_mode = #tpu.pipeline_mode<synchronous>, transform_indices = @transform_7, window_bounds = array<i64: 9, 32, 32>}, {pipeline_mode = #tpu.pipeline_mode<synchronous>, transform_indices = @transform_8, window_bounds = array<i64: 32, 32>}, {pipeline_mode = #tpu.pipeline_mode<synchronous>, transform_indices = @transform_9, window_bounds = array<i64: 32, 32>}, {pipeline_mode = #tpu.pipeline_mode<synchronous>, transform_indices = @transform_10, window_bounds = array<i64: 9, 32, 224>}, {pipeline_mode = #tpu.pipeline_mode<synchronous>, transform_indices = @transform_11, window_bounds = array<i64: 9, 32, 128>}, {pipeline_mode = #tpu.pipeline_mode<synchronous>, transform_indices = @transform_12, window_bounds = array<i64: 9, 32, 96>}, {pipeline_mode = #tpu.pipeline_mode<synchronous>, transform_indices = @transform_13, window_bounds = array<i64: 9, 32, 32>}, {pipeline_mode = #tpu.pipeline_mode<synchronous>, transform_indices = @transform_14, window_bounds = array<i64: 9, 32, 32>}, {pipeline_mode = #tpu.pipeline_mode<synchronous>, transform_indices = @transform_15, window_bounds = array<i64: 32, 32>}, {pipeline_mode = #tpu.pipeline_mode<synchronous>, transform_indices = @transform_16, window_bounds = array<i64: 32, 32>}, {pipeline_mode = #tpu.pipeline_mode<synchronous>, transform_indices = @transform_17, window_bounds = array<i64: 32, 16>}, {transform_indices = @transform_18, window_bounds = array<i64: 1, 72, 16>}]} {
    %c0_i32 = arith.constant 0 : i32
    %0 = arith.cmpi eq, %arg0, %c0_i32 : i32
    %1 = arith.extui %0 : i1 to i32
    %c0_i32_0 = arith.constant 0 : i32
    %2 = arith.cmpi ne, %1, %c0_i32_0 : i32
    scf.if %2 {
      %cst_608 = arith.constant 0.000000e+00 : f32
      %632 = vector.broadcast %cst_608 : f32 to vector<72x32xf32>
      %c0_609 = arith.constant 0 : index
      %c0_610 = arith.constant 0 : index
      %633 = vector.load %arg20[%c0_609, %c0_610] : memref<72x32xf32, #tpu.memory_space<vmem>>, vector<72x32xf32>
      tpu.vector_store %arg20[%c0_609, %c0_610], %632 {strides = array<i32>} : memref<72x32xf32, #tpu.memory_space<vmem>>, vector<72x32xf32>,
      %cst_611 = arith.constant 0.000000e+00 : f32
      %634 = vector.broadcast %cst_611 : f32 to vector<72x32xf32>
      %c0_612 = arith.constant 0 : index
      %c0_613 = arith.constant 0 : index
      %635 = vector.load %arg21[%c0_612, %c0_613] : memref<72x32xf32, #tpu.memory_space<vmem>>, vector<72x32xf32>
      tpu.vector_store %arg21[%c0_612, %c0_613], %634 {strides = array<i32>} : memref<72x32xf32, #tpu.memory_space<vmem>>, vector<72x32xf32>,
      %cst_614 = arith.constant 0.000000e+00 : f32
      %636 = vector.broadcast %cst_614 : f32 to vector<72x32xf32>
      %c0_615 = arith.constant 0 : index
      %c0_616 = arith.constant 0 : index
      %637 = vector.load %arg22[%c0_615, %c0_616] : memref<72x32xf32, #tpu.memory_space<vmem>>, vector<72x32xf32>
      tpu.vector_store %arg22[%c0_615, %c0_616], %636 {strides = array<i32>} : memref<72x32xf32, #tpu.memory_space<vmem>>, vector<72x32xf32>,
      %cst_617 = arith.constant 0.000000e+00 : f32
      %638 = vector.broadcast %cst_617 : f32 to vector<72x32xf32>
      %c0_618 = arith.constant 0 : index
      %c0_619 = arith.constant 0 : index
      %639 = vector.load %arg23[%c0_618, %c0_619] : memref<72x32xf32, #tpu.memory_space<vmem>>, vector<72x32xf32>
      tpu.vector_store %arg23[%c0_618, %c0_619], %638 {strides = array<i32>} : memref<72x32xf32, #tpu.memory_space<vmem>>, vector<72x32xf32>,
      %cst_620 = arith.constant 0.000000e+00 : f32
      %640 = vector.broadcast %cst_620 : f32 to vector<72x32xf32>
      %c0_621 = arith.constant 0 : index
      %c0_622 = arith.constant 0 : index
      %641 = vector.load %arg24[%c0_621, %c0_622] : memref<72x32xf32, #tpu.memory_space<vmem>>, vector<72x32xf32>
      tpu.vector_store %arg24[%c0_621, %c0_622], %640 {strides = array<i32>} : memref<72x32xf32, #tpu.memory_space<vmem>>, vector<72x32xf32>,
      %cst_623 = arith.constant 0.000000e+00 : f32
      %642 = vector.broadcast %cst_623 : f32 to vector<72x16xf32>
      %c0_624 = arith.constant 0 : index
      %c0_625 = arith.constant 0 : index
      %643 = vector.load %arg25[%c0_624, %c0_625] : memref<72x16xf32, #tpu.memory_space<vmem>>, vector<72x16xf32>
      tpu.vector_store %arg25[%c0_624, %c0_625], %642 {strides = array<i32>} : memref<72x16xf32, #tpu.memory_space<vmem>>, vector<72x16xf32>,
    } else {
    }
    %c0 = arith.constant 0 : index
    %c0_1 = arith.constant 0 : index
    %3 = vector.load %arg3[%c0, %c0_1] : memref<58x1xf32, #tpu.memory_space<vmem>>, vector<58x1xf32>
    %c0_2 = arith.constant 0 : index
    %c0_3 = arith.constant 0 : index
    %c0_4 = arith.constant 0 : index
    %4 = vector.load %arg2[%c0_2, %c0_3, %c0_4] : memref<1x72x16xf32, #tpu.memory_space<vmem>>, vector<1x72x16xf32>
    %5 = vector.shape_cast %4 : vector<1x72x16xf32> to vector<72x16xf32>
    %c0_5 = arith.constant 0 : index
    %c0_6 = arith.constant 0 : index
    %c0_7 = arith.constant 0 : index
    %6 = vector.load %arg1[%c0_5, %c0_6, %c0_7] : memref<1x72x16xf32, #tpu.memory_space<vmem>>, vector<1x72x16xf32>
    %7 = vector.shape_cast %6 : vector<1x72x16xf32> to vector<72x16xf32>
    %8 = arith.mulf %5, %7 : vector<72x16xf32>
    %c0_8 = arith.constant 0 : index
    %c0_9 = arith.constant 0 : index
    %c0_10 = arith.constant 0 : index
    %9 = vector.load %arg2[%c0_8, %c0_9, %c0_10] : memref<1x72x16xf32, #tpu.memory_space<vmem>>, vector<1x72x16xf32>
    %10 = vector.shape_cast %9 : vector<1x72x16xf32> to vector<72x16xf32>
    %cst = arith.constant 1.000000e+00 : f32
    %11 = vector.broadcast %cst : f32 to vector<72x16xf32>
    %12 = arith.subf %11, %10 : vector<72x16xf32>
    %c0_11 = arith.constant 0 : index
    %c0_12 = arith.constant 0 : index
    %13 = vector.load %arg25[%c0_11, %c0_12] : memref<72x16xf32, #tpu.memory_space<vmem>>, vector<72x16xf32>
    %14 = arith.mulf %12, %13 : vector<72x16xf32>
    %15 = arith.addf %8, %14 : vector<72x16xf32>
    %c0_13 = arith.constant 0 : index
    %c0_14 = arith.constant 0 : index
    %16 = vector.load %arg26[%c0_13, %c0_14] : memref<72x16xf32, #tpu.memory_space<vmem>>, vector<72x16xf32>
    tpu.vector_store %arg26[%c0_13, %c0_14], %15 {strides = array<i32>} : memref<72x16xf32, #tpu.memory_space<vmem>>, vector<72x16xf32>,
    %cst_15 = arith.constant 0.000000e+00 : f32
    %17 = vector.broadcast %cst_15 : f32 to vector<58x224xf32>
    %cst_16 = arith.constant 0.000000e+00 : f32
    %18 = vector.broadcast %cst_16 : f32 to vector<58x128xf32>
    %cst_17 = arith.constant 0.000000e+00 : f32
    %19 = vector.broadcast %cst_17 : f32 to vector<58x96xf32>
    %c0_18 = arith.constant 0 : index
    %c0_19 = arith.constant 0 : index
    %20 = vector.load %arg26[%c0_18, %c0_19] : memref<72x16xf32, #tpu.memory_space<vmem>>, vector<58x16xf32>
    %c0_20 = arith.constant 0 : index
    %c0_21 = arith.constant 0 : index
    %c0_22 = arith.constant 0 : index
    %21 = vector.load %arg4[%c0_20, %c0_21, %c0_22] : memref<9x16x224xf32, #tpu.memory_space<vmem>>, vector<1x16x224xf32>
    %22 = vector.shape_cast %21 : vector<1x16x224xf32> to vector<16x224xf32>
    %cst_23 = arith.constant dense<0.000000e+00> : vector<58x224xf32>
    %23 = tpu.matmul %20, %22, %cst_23 {dimension_numbers = #tpu.dot_dimension_numbers<[1], [0], [0], [1], [0, 0, 1, 1], [], []>} : vector<58x16xf32>, vector<16x224xf32>, vector<58x224xf32> -> vector<58x224xf32>
    %24 = arith.addf %17, %23 : vector<58x224xf32>
    %c0_24 = arith.constant 0 : index
    %c0_25 = arith.constant 0 : index
    %25 = vector.load %arg20[%c0_24, %c0_25] : memref<72x32xf32, #tpu.memory_space<vmem>>, vector<58x32xf32>
    %c0_26 = arith.constant 0 : index
    %c0_27 = arith.constant 0 : index
    %c0_28 = arith.constant 0 : index
    %26 = vector.load %arg5[%c0_26, %c0_27, %c0_28] : memref<9x32x128xf32, #tpu.memory_space<vmem>>, vector<1x32x128xf32>
    %27 = vector.shape_cast %26 : vector<1x32x128xf32> to vector<32x128xf32>
    %cst_29 = arith.constant dense<0.000000e+00> : vector<58x128xf32>
    %28 = tpu.matmul %25, %27, %cst_29 {dimension_numbers = #tpu.dot_dimension_numbers<[1], [0], [0], [1], [0, 0, 1, 1], [], []>} : vector<58x32xf32>, vector<32x128xf32>, vector<58x128xf32> -> vector<58x128xf32>
    %29 = arith.addf %18, %28 : vector<58x128xf32>
    %c0_30 = arith.constant 0 : index
    %c0_31 = arith.constant 0 : index
    %30 = vector.load %arg24[%c0_30, %c0_31] : memref<72x32xf32, #tpu.memory_space<vmem>>, vector<58x32xf32>
    %c0_32 = arith.constant 0 : index
    %c0_33 = arith.constant 0 : index
    %c0_34 = arith.constant 0 : index
    %31 = vector.load %arg6[%c0_32, %c0_33, %c0_34] : memref<9x32x96xf32, #tpu.memory_space<vmem>>, vector<1x32x96xf32>
    %32 = vector.shape_cast %31 : vector<1x32x96xf32> to vector<32x96xf32>
    %cst_35 = arith.constant dense<0.000000e+00> : vector<58x96xf32>
    %33 = tpu.matmul %30, %32, %cst_35 {dimension_numbers = #tpu.dot_dimension_numbers<[1], [0], [0], [1], [0, 0, 1, 1], [], []>} : vector<58x32xf32>, vector<32x96xf32>, vector<58x96xf32> -> vector<58x96xf32>
    %34 = arith.addf %19, %33 : vector<58x96xf32>
    %c1 = arith.constant 1 : index
    %c0_36 = arith.constant 0 : index
    %35 = vector.load %arg26[%c1, %c0_36] : memref<72x16xf32, #tpu.memory_space<vmem>>, vector<58x16xf32>
    %c1_37 = arith.constant 1 : index
    %c0_38 = arith.constant 0 : index
    %c0_39 = arith.constant 0 : index
    %36 = vector.load %arg4[%c1_37, %c0_38, %c0_39] : memref<9x16x224xf32, #tpu.memory_space<vmem>>, vector<1x16x224xf32>
    %37 = vector.shape_cast %36 : vector<1x16x224xf32> to vector<16x224xf32>
    %cst_40 = arith.constant dense<0.000000e+00> : vector<58x224xf32>
    %38 = tpu.matmul %35, %37, %cst_40 {dimension_numbers = #tpu.dot_dimension_numbers<[1], [0], [0], [1], [0, 0, 1, 1], [], []>} : vector<58x16xf32>, vector<16x224xf32>, vector<58x224xf32> -> vector<58x224xf32>
    %39 = arith.addf %24, %38 : vector<58x224xf32>
    %c1_41 = arith.constant 1 : index
    %c0_42 = arith.constant 0 : index
    %40 = vector.load %arg20[%c1_41, %c0_42] : memref<72x32xf32, #tpu.memory_space<vmem>>, vector<58x32xf32>
    %c1_43 = arith.constant 1 : index
    %c0_44 = arith.constant 0 : index
    %c0_45 = arith.constant 0 : index
    %41 = vector.load %arg5[%c1_43, %c0_44, %c0_45] : memref<9x32x128xf32, #tpu.memory_space<vmem>>, vector<1x32x128xf32>
    %42 = vector.shape_cast %41 : vector<1x32x128xf32> to vector<32x128xf32>
    %cst_46 = arith.constant dense<0.000000e+00> : vector<58x128xf32>
    %43 = tpu.matmul %40, %42, %cst_46 {dimension_numbers = #tpu.dot_dimension_numbers<[1], [0], [0], [1], [0, 0, 1, 1], [], []>} : vector<58x32xf32>, vector<32x128xf32>, vector<58x128xf32> -> vector<58x128xf32>
    %44 = arith.addf %29, %43 : vector<58x128xf32>
    %c1_47 = arith.constant 1 : index
    %c0_48 = arith.constant 0 : index
    %45 = vector.load %arg24[%c1_47, %c0_48] : memref<72x32xf32, #tpu.memory_space<vmem>>, vector<58x32xf32>
    %c1_49 = arith.constant 1 : index
    %c0_50 = arith.constant 0 : index
    %c0_51 = arith.constant 0 : index
    %46 = vector.load %arg6[%c1_49, %c0_50, %c0_51] : memref<9x32x96xf32, #tpu.memory_space<vmem>>, vector<1x32x96xf32>
    %47 = vector.shape_cast %46 : vector<1x32x96xf32> to vector<32x96xf32>
    %cst_52 = arith.constant dense<0.000000e+00> : vector<58x96xf32>
    %48 = tpu.matmul %45, %47, %cst_52 {dimension_numbers = #tpu.dot_dimension_numbers<[1], [0], [0], [1], [0, 0, 1, 1], [], []>} : vector<58x32xf32>, vector<32x96xf32>, vector<58x96xf32> -> vector<58x96xf32>
    %49 = arith.addf %34, %48 : vector<58x96xf32>
    %c2 = arith.constant 2 : index
    %c0_53 = arith.constant 0 : index
    %50 = vector.load %arg26[%c2, %c0_53] : memref<72x16xf32, #tpu.memory_space<vmem>>, vector<58x16xf32>
    %c2_54 = arith.constant 2 : index
    %c0_55 = arith.constant 0 : index
    %c0_56 = arith.constant 0 : index
    %51 = vector.load %arg4[%c2_54, %c0_55, %c0_56] : memref<9x16x224xf32, #tpu.memory_space<vmem>>, vector<1x16x224xf32>
    %52 = vector.shape_cast %51 : vector<1x16x224xf32> to vector<16x224xf32>
    %cst_57 = arith.constant dense<0.000000e+00> : vector<58x224xf32>
    %53 = tpu.matmul %50, %52, %cst_57 {dimension_numbers = #tpu.dot_dimension_numbers<[1], [0], [0], [1], [0, 0, 1, 1], [], []>} : vector<58x16xf32>, vector<16x224xf32>, vector<58x224xf32> -> vector<58x224xf32>
    %54 = arith.addf %39, %53 : vector<58x224xf32>
    %c2_58 = arith.constant 2 : index
    %c0_59 = arith.constant 0 : index
    %55 = vector.load %arg20[%c2_58, %c0_59] : memref<72x32xf32, #tpu.memory_space<vmem>>, vector<58x32xf32>
    %c2_60 = arith.constant 2 : index
    %c0_61 = arith.constant 0 : index
    %c0_62 = arith.constant 0 : index
    %56 = vector.load %arg5[%c2_60, %c0_61, %c0_62] : memref<9x32x128xf32, #tpu.memory_space<vmem>>, vector<1x32x128xf32>
    %57 = vector.shape_cast %56 : vector<1x32x128xf32> to vector<32x128xf32>
    %cst_63 = arith.constant dense<0.000000e+00> : vector<58x128xf32>
    %58 = tpu.matmul %55, %57, %cst_63 {dimension_numbers = #tpu.dot_dimension_numbers<[1], [0], [0], [1], [0, 0, 1, 1], [], []>} : vector<58x32xf32>, vector<32x128xf32>, vector<58x128xf32> -> vector<58x128xf32>
    %59 = arith.addf %44, %58 : vector<58x128xf32>
    %c2_64 = arith.constant 2 : index
    %c0_65 = arith.constant 0 : index
    %60 = vector.load %arg24[%c2_64, %c0_65] : memref<72x32xf32, #tpu.memory_space<vmem>>, vector<58x32xf32>
    %c2_66 = arith.constant 2 : index
    %c0_67 = arith.constant 0 : index
    %c0_68 = arith.constant 0 : index
    %61 = vector.load %arg6[%c2_66, %c0_67, %c0_68] : memref<9x32x96xf32, #tpu.memory_space<vmem>>, vector<1x32x96xf32>
    %62 = vector.shape_cast %61 : vector<1x32x96xf32> to vector<32x96xf32>
    %cst_69 = arith.constant dense<0.000000e+00> : vector<58x96xf32>
    %63 = tpu.matmul %60, %62, %cst_69 {dimension_numbers = #tpu.dot_dimension_numbers<[1], [0], [0], [1], [0, 0, 1, 1], [], []>} : vector<58x32xf32>, vector<32x96xf32>, vector<58x96xf32> -> vector<58x96xf32>
    %64 = arith.addf %49, %63 : vector<58x96xf32>
    %c6 = arith.constant 6 : index
    %c0_70 = arith.constant 0 : index
    %65 = vector.load %arg26[%c6, %c0_70] : memref<72x16xf32, #tpu.memory_space<vmem>>, vector<58x16xf32>
    %c3 = arith.constant 3 : index
    %c0_71 = arith.constant 0 : index
    %c0_72 = arith.constant 0 : index
    %66 = vector.load %arg4[%c3, %c0_71, %c0_72] : memref<9x16x224xf32, #tpu.memory_space<vmem>>, vector<1x16x224xf32>
    %67 = vector.shape_cast %66 : vector<1x16x224xf32> to vector<16x224xf32>
    %cst_73 = arith.constant dense<0.000000e+00> : vector<58x224xf32>
    %68 = tpu.matmul %65, %67, %cst_73 {dimension_numbers = #tpu.dot_dimension_numbers<[1], [0], [0], [1], [0, 0, 1, 1], [], []>} : vector<58x16xf32>, vector<16x224xf32>, vector<58x224xf32> -> vector<58x224xf32>
    %69 = arith.addf %54, %68 : vector<58x224xf32>
    %c6_74 = arith.constant 6 : index
    %c0_75 = arith.constant 0 : index
    %70 = vector.load %arg20[%c6_74, %c0_75] : memref<72x32xf32, #tpu.memory_space<vmem>>, vector<58x32xf32>
    %c3_76 = arith.constant 3 : index
    %c0_77 = arith.constant 0 : index
    %c0_78 = arith.constant 0 : index
    %71 = vector.load %arg5[%c3_76, %c0_77, %c0_78] : memref<9x32x128xf32, #tpu.memory_space<vmem>>, vector<1x32x128xf32>
    %72 = vector.shape_cast %71 : vector<1x32x128xf32> to vector<32x128xf32>
    %cst_79 = arith.constant dense<0.000000e+00> : vector<58x128xf32>
    %73 = tpu.matmul %70, %72, %cst_79 {dimension_numbers = #tpu.dot_dimension_numbers<[1], [0], [0], [1], [0, 0, 1, 1], [], []>} : vector<58x32xf32>, vector<32x128xf32>, vector<58x128xf32> -> vector<58x128xf32>
    %74 = arith.addf %59, %73 : vector<58x128xf32>
    %c6_80 = arith.constant 6 : index
    %c0_81 = arith.constant 0 : index
    %75 = vector.load %arg24[%c6_80, %c0_81] : memref<72x32xf32, #tpu.memory_space<vmem>>, vector<58x32xf32>
    %c3_82 = arith.constant 3 : index
    %c0_83 = arith.constant 0 : index
    %c0_84 = arith.constant 0 : index
    %76 = vector.load %arg6[%c3_82, %c0_83, %c0_84] : memref<9x32x96xf32, #tpu.memory_space<vmem>>, vector<1x32x96xf32>
    %77 = vector.shape_cast %76 : vector<1x32x96xf32> to vector<32x96xf32>
    %cst_85 = arith.constant dense<0.000000e+00> : vector<58x96xf32>
    %78 = tpu.matmul %75, %77, %cst_85 {dimension_numbers = #tpu.dot_dimension_numbers<[1], [0], [0], [1], [0, 0, 1, 1], [], []>} : vector<58x32xf32>, vector<32x96xf32>, vector<58x96xf32> -> vector<58x96xf32>
    %79 = arith.addf %64, %78 : vector<58x96xf32>
    %c7 = arith.constant 7 : index
    %c0_86 = arith.constant 0 : index
    %80 = vector.load %arg26[%c7, %c0_86] : memref<72x16xf32, #tpu.memory_space<vmem>>, vector<58x16xf32>
    %c4 = arith.constant 4 : index
    %c0_87 = arith.constant 0 : index
    %c0_88 = arith.constant 0 : index
    %81 = vector.load %arg4[%c4, %c0_87, %c0_88] : memref<9x16x224xf32, #tpu.memory_space<vmem>>, vector<1x16x224xf32>
    %82 = vector.shape_cast %81 : vector<1x16x224xf32> to vector<16x224xf32>
    %cst_89 = arith.constant dense<0.000000e+00> : vector<58x224xf32>
    %83 = tpu.matmul %80, %82, %cst_89 {dimension_numbers = #tpu.dot_dimension_numbers<[1], [0], [0], [1], [0, 0, 1, 1], [], []>} : vector<58x16xf32>, vector<16x224xf32>, vector<58x224xf32> -> vector<58x224xf32>
    %84 = arith.addf %69, %83 : vector<58x224xf32>
    %c7_90 = arith.constant 7 : index
    %c0_91 = arith.constant 0 : index
    %85 = vector.load %arg20[%c7_90, %c0_91] : memref<72x32xf32, #tpu.memory_space<vmem>>, vector<58x32xf32>
    %c4_92 = arith.constant 4 : index
    %c0_93 = arith.constant 0 : index
    %c0_94 = arith.constant 0 : index
    %86 = vector.load %arg5[%c4_92, %c0_93, %c0_94] : memref<9x32x128xf32, #tpu.memory_space<vmem>>, vector<1x32x128xf32>
    %87 = vector.shape_cast %86 : vector<1x32x128xf32> to vector<32x128xf32>
    %cst_95 = arith.constant dense<0.000000e+00> : vector<58x128xf32>
    %88 = tpu.matmul %85, %87, %cst_95 {dimension_numbers = #tpu.dot_dimension_numbers<[1], [0], [0], [1], [0, 0, 1, 1], [], []>} : vector<58x32xf32>, vector<32x128xf32>, vector<58x128xf32> -> vector<58x128xf32>
    %89 = arith.addf %74, %88 : vector<58x128xf32>
    %c7_96 = arith.constant 7 : index
    %c0_97 = arith.constant 0 : index
    %90 = vector.load %arg24[%c7_96, %c0_97] : memref<72x32xf32, #tpu.memory_space<vmem>>, vector<58x32xf32>
    %c4_98 = arith.constant 4 : index
    %c0_99 = arith.constant 0 : index
    %c0_100 = arith.constant 0 : index
    %91 = vector.load %arg6[%c4_98, %c0_99, %c0_100] : memref<9x32x96xf32, #tpu.memory_space<vmem>>, vector<1x32x96xf32>
    %92 = vector.shape_cast %91 : vector<1x32x96xf32> to vector<32x96xf32>
    %cst_101 = arith.constant dense<0.000000e+00> : vector<58x96xf32>
    %93 = tpu.matmul %90, %92, %cst_101 {dimension_numbers = #tpu.dot_dimension_numbers<[1], [0], [0], [1], [0, 0, 1, 1], [], []>} : vector<58x32xf32>, vector<32x96xf32>, vector<58x96xf32> -> vector<58x96xf32>
    %94 = arith.addf %79, %93 : vector<58x96xf32>
    %c8 = arith.constant 8 : index
    %c0_102 = arith.constant 0 : index
    %95 = vector.load %arg26[%c8, %c0_102] : memref<72x16xf32, #tpu.memory_space<vmem>>, vector<58x16xf32>
    %c5 = arith.constant 5 : index
    %c0_103 = arith.constant 0 : index
    %c0_104 = arith.constant 0 : index
    %96 = vector.load %arg4[%c5, %c0_103, %c0_104] : memref<9x16x224xf32, #tpu.memory_space<vmem>>, vector<1x16x224xf32>
    %97 = vector.shape_cast %96 : vector<1x16x224xf32> to vector<16x224xf32>
    %cst_105 = arith.constant dense<0.000000e+00> : vector<58x224xf32>
    %98 = tpu.matmul %95, %97, %cst_105 {dimension_numbers = #tpu.dot_dimension_numbers<[1], [0], [0], [1], [0, 0, 1, 1], [], []>} : vector<58x16xf32>, vector<16x224xf32>, vector<58x224xf32> -> vector<58x224xf32>
    %99 = arith.addf %84, %98 : vector<58x224xf32>
    %c8_106 = arith.constant 8 : index
    %c0_107 = arith.constant 0 : index
    %100 = vector.load %arg20[%c8_106, %c0_107] : memref<72x32xf32, #tpu.memory_space<vmem>>, vector<58x32xf32>
    %c5_108 = arith.constant 5 : index
    %c0_109 = arith.constant 0 : index
    %c0_110 = arith.constant 0 : index
    %101 = vector.load %arg5[%c5_108, %c0_109, %c0_110] : memref<9x32x128xf32, #tpu.memory_space<vmem>>, vector<1x32x128xf32>
    %102 = vector.shape_cast %101 : vector<1x32x128xf32> to vector<32x128xf32>
    %cst_111 = arith.constant dense<0.000000e+00> : vector<58x128xf32>
    %103 = tpu.matmul %100, %102, %cst_111 {dimension_numbers = #tpu.dot_dimension_numbers<[1], [0], [0], [1], [0, 0, 1, 1], [], []>} : vector<58x32xf32>, vector<32x128xf32>, vector<58x128xf32> -> vector<58x128xf32>
    %104 = arith.addf %89, %103 : vector<58x128xf32>
    %c8_112 = arith.constant 8 : index
    %c0_113 = arith.constant 0 : index
    %105 = vector.load %arg24[%c8_112, %c0_113] : memref<72x32xf32, #tpu.memory_space<vmem>>, vector<58x32xf32>
    %c5_114 = arith.constant 5 : index
    %c0_115 = arith.constant 0 : index
    %c0_116 = arith.constant 0 : index
    %106 = vector.load %arg6[%c5_114, %c0_115, %c0_116] : memref<9x32x96xf32, #tpu.memory_space<vmem>>, vector<1x32x96xf32>
    %107 = vector.shape_cast %106 : vector<1x32x96xf32> to vector<32x96xf32>
    %cst_117 = arith.constant dense<0.000000e+00> : vector<58x96xf32>
    %108 = tpu.matmul %105, %107, %cst_117 {dimension_numbers = #tpu.dot_dimension_numbers<[1], [0], [0], [1], [0, 0, 1, 1], [], []>} : vector<58x32xf32>, vector<32x96xf32>, vector<58x96xf32> -> vector<58x96xf32>
    %109 = arith.addf %94, %108 : vector<58x96xf32>
    %c12 = arith.constant 12 : index
    %c0_118 = arith.constant 0 : index
    %110 = vector.load %arg26[%c12, %c0_118] : memref<72x16xf32, #tpu.memory_space<vmem>>, vector<58x16xf32>
    %c6_119 = arith.constant 6 : index
    %c0_120 = arith.constant 0 : index
    %c0_121 = arith.constant 0 : index
    %111 = vector.load %arg4[%c6_119, %c0_120, %c0_121] : memref<9x16x224xf32, #tpu.memory_space<vmem>>, vector<1x16x224xf32>
    %112 = vector.shape_cast %111 : vector<1x16x224xf32> to vector<16x224xf32>
    %cst_122 = arith.constant dense<0.000000e+00> : vector<58x224xf32>
    %113 = tpu.matmul %110, %112, %cst_122 {dimension_numbers = #tpu.dot_dimension_numbers<[1], [0], [0], [1], [0, 0, 1, 1], [], []>} : vector<58x16xf32>, vector<16x224xf32>, vector<58x224xf32> -> vector<58x224xf32>
    %114 = arith.addf %99, %113 : vector<58x224xf32>
    %c12_123 = arith.constant 12 : index
    %c0_124 = arith.constant 0 : index
    %115 = vector.load %arg20[%c12_123, %c0_124] : memref<72x32xf32, #tpu.memory_space<vmem>>, vector<58x32xf32>
    %c6_125 = arith.constant 6 : index
    %c0_126 = arith.constant 0 : index
    %c0_127 = arith.constant 0 : index
    %116 = vector.load %arg5[%c6_125, %c0_126, %c0_127] : memref<9x32x128xf32, #tpu.memory_space<vmem>>, vector<1x32x128xf32>
    %117 = vector.shape_cast %116 : vector<1x32x128xf32> to vector<32x128xf32>
    %cst_128 = arith.constant dense<0.000000e+00> : vector<58x128xf32>
    %118 = tpu.matmul %115, %117, %cst_128 {dimension_numbers = #tpu.dot_dimension_numbers<[1], [0], [0], [1], [0, 0, 1, 1], [], []>} : vector<58x32xf32>, vector<32x128xf32>, vector<58x128xf32> -> vector<58x128xf32>
    %119 = arith.addf %104, %118 : vector<58x128xf32>
    %c12_129 = arith.constant 12 : index
    %c0_130 = arith.constant 0 : index
    %120 = vector.load %arg24[%c12_129, %c0_130] : memref<72x32xf32, #tpu.memory_space<vmem>>, vector<58x32xf32>
    %c6_131 = arith.constant 6 : index
    %c0_132 = arith.constant 0 : index
    %c0_133 = arith.constant 0 : index
    %121 = vector.load %arg6[%c6_131, %c0_132, %c0_133] : memref<9x32x96xf32, #tpu.memory_space<vmem>>, vector<1x32x96xf32>
    %122 = vector.shape_cast %121 : vector<1x32x96xf32> to vector<32x96xf32>
    %cst_134 = arith.constant dense<0.000000e+00> : vector<58x96xf32>
    %123 = tpu.matmul %120, %122, %cst_134 {dimension_numbers = #tpu.dot_dimension_numbers<[1], [0], [0], [1], [0, 0, 1, 1], [], []>} : vector<58x32xf32>, vector<32x96xf32>, vector<58x96xf32> -> vector<58x96xf32>
    %124 = arith.addf %109, %123 : vector<58x96xf32>
    %c13 = arith.constant 13 : index
    %c0_135 = arith.constant 0 : index
    %125 = vector.load %arg26[%c13, %c0_135] : memref<72x16xf32, #tpu.memory_space<vmem>>, vector<58x16xf32>
    %c7_136 = arith.constant 7 : index
    %c0_137 = arith.constant 0 : index
    %c0_138 = arith.constant 0 : index
    %126 = vector.load %arg4[%c7_136, %c0_137, %c0_138] : memref<9x16x224xf32, #tpu.memory_space<vmem>>, vector<1x16x224xf32>
    %127 = vector.shape_cast %126 : vector<1x16x224xf32> to vector<16x224xf32>
    %cst_139 = arith.constant dense<0.000000e+00> : vector<58x224xf32>
    %128 = tpu.matmul %125, %127, %cst_139 {dimension_numbers = #tpu.dot_dimension_numbers<[1], [0], [0], [1], [0, 0, 1, 1], [], []>} : vector<58x16xf32>, vector<16x224xf32>, vector<58x224xf32> -> vector<58x224xf32>
    %129 = arith.addf %114, %128 : vector<58x224xf32>
    %c13_140 = arith.constant 13 : index
    %c0_141 = arith.constant 0 : index
    %130 = vector.load %arg20[%c13_140, %c0_141] : memref<72x32xf32, #tpu.memory_space<vmem>>, vector<58x32xf32>
    %c7_142 = arith.constant 7 : index
    %c0_143 = arith.constant 0 : index
    %c0_144 = arith.constant 0 : index
    %131 = vector.load %arg5[%c7_142, %c0_143, %c0_144] : memref<9x32x128xf32, #tpu.memory_space<vmem>>, vector<1x32x128xf32>
    %132 = vector.shape_cast %131 : vector<1x32x128xf32> to vector<32x128xf32>
    %cst_145 = arith.constant dense<0.000000e+00> : vector<58x128xf32>
    %133 = tpu.matmul %130, %132, %cst_145 {dimension_numbers = #tpu.dot_dimension_numbers<[1], [0], [0], [1], [0, 0, 1, 1], [], []>} : vector<58x32xf32>, vector<32x128xf32>, vector<58x128xf32> -> vector<58x128xf32>
    %134 = arith.addf %119, %133 : vector<58x128xf32>
    %c13_146 = arith.constant 13 : index
    %c0_147 = arith.constant 0 : index
    %135 = vector.load %arg24[%c13_146, %c0_147] : memref<72x32xf32, #tpu.memory_space<vmem>>, vector<58x32xf32>
    %c7_148 = arith.constant 7 : index
    %c0_149 = arith.constant 0 : index
    %c0_150 = arith.constant 0 : index
    %136 = vector.load %arg6[%c7_148, %c0_149, %c0_150] : memref<9x32x96xf32, #tpu.memory_space<vmem>>, vector<1x32x96xf32>
    %137 = vector.shape_cast %136 : vector<1x32x96xf32> to vector<32x96xf32>
    %cst_151 = arith.constant dense<0.000000e+00> : vector<58x96xf32>
    %138 = tpu.matmul %135, %137, %cst_151 {dimension_numbers = #tpu.dot_dimension_numbers<[1], [0], [0], [1], [0, 0, 1, 1], [], []>} : vector<58x32xf32>, vector<32x96xf32>, vector<58x96xf32> -> vector<58x96xf32>
    %139 = arith.addf %124, %138 : vector<58x96xf32>
    %c14 = arith.constant 14 : index
    %c0_152 = arith.constant 0 : index
    %140 = vector.load %arg26[%c14, %c0_152] : memref<72x16xf32, #tpu.memory_space<vmem>>, vector<58x16xf32>
    %c8_153 = arith.constant 8 : index
    %c0_154 = arith.constant 0 : index
    %c0_155 = arith.constant 0 : index
    %141 = vector.load %arg4[%c8_153, %c0_154, %c0_155] : memref<9x16x224xf32, #tpu.memory_space<vmem>>, vector<1x16x224xf32>
    %142 = vector.shape_cast %141 : vector<1x16x224xf32> to vector<16x224xf32>
    %cst_156 = arith.constant dense<0.000000e+00> : vector<58x224xf32>
    %143 = tpu.matmul %140, %142, %cst_156 {dimension_numbers = #tpu.dot_dimension_numbers<[1], [0], [0], [1], [0, 0, 1, 1], [], []>} : vector<58x16xf32>, vector<16x224xf32>, vector<58x224xf32> -> vector<58x224xf32>
    %144 = arith.addf %129, %143 : vector<58x224xf32>
    %c14_157 = arith.constant 14 : index
    %c0_158 = arith.constant 0 : index
    %145 = vector.load %arg20[%c14_157, %c0_158] : memref<72x32xf32, #tpu.memory_space<vmem>>, vector<58x32xf32>
    %c8_159 = arith.constant 8 : index
    %c0_160 = arith.constant 0 : index
    %c0_161 = arith.constant 0 : index
    %146 = vector.load %arg5[%c8_159, %c0_160, %c0_161] : memref<9x32x128xf32, #tpu.memory_space<vmem>>, vector<1x32x128xf32>
    %147 = vector.shape_cast %146 : vector<1x32x128xf32> to vector<32x128xf32>
    %cst_162 = arith.constant dense<0.000000e+00> : vector<58x128xf32>
    %148 = tpu.matmul %145, %147, %cst_162 {dimension_numbers = #tpu.dot_dimension_numbers<[1], [0], [0], [1], [0, 0, 1, 1], [], []>} : vector<58x32xf32>, vector<32x128xf32>, vector<58x128xf32> -> vector<58x128xf32>
    %149 = arith.addf %134, %148 : vector<58x128xf32>
    %c14_163 = arith.constant 14 : index
    %c0_164 = arith.constant 0 : index
    %150 = vector.load %arg24[%c14_163, %c0_164] : memref<72x32xf32, #tpu.memory_space<vmem>>, vector<58x32xf32>
    %c8_165 = arith.constant 8 : index
    %c0_166 = arith.constant 0 : index
    %c0_167 = arith.constant 0 : index
    %151 = vector.load %arg6[%c8_165, %c0_166, %c0_167] : memref<9x32x96xf32, #tpu.memory_space<vmem>>, vector<1x32x96xf32>
    %152 = vector.shape_cast %151 : vector<1x32x96xf32> to vector<32x96xf32>
    %cst_168 = arith.constant dense<0.000000e+00> : vector<58x96xf32>
    %153 = tpu.matmul %150, %152, %cst_168 {dimension_numbers = #tpu.dot_dimension_numbers<[1], [0], [0], [1], [0, 0, 1, 1], [], []>} : vector<58x32xf32>, vector<32x96xf32>, vector<58x96xf32> -> vector<58x96xf32>
    %154 = arith.addf %139, %153 : vector<58x96xf32>
    %c7_169 = arith.constant 7 : index
    %c0_170 = arith.constant 0 : index
    %155 = vector.load %arg21[%c7_169, %c0_170] : memref<72x32xf32, #tpu.memory_space<vmem>>, vector<58x32xf32>
    %c7_171 = arith.constant 7 : index
    %c0_172 = arith.constant 0 : index
    %156 = vector.load %arg24[%c7_171, %c0_172] : memref<72x32xf32, #tpu.memory_space<vmem>>, vector<58x32xf32>
    %157 = vector.extract_strided_slice %144 {offsets = [0, 0], sizes = [58, 32], strides = [1, 1]} : vector<58x224xf32> to vector<58x32xf32>
    %158 = vector.extract_strided_slice %149 {offsets = [0, 0], sizes = [58, 32], strides = [1, 1]} : vector<58x128xf32> to vector<58x32xf32>
    %159 = arith.addf %157, %158 : vector<58x32xf32>
    %160 = arith.negf %159 : vector<58x32xf32>
    %161 = math.exp %160 : vector<58x32xf32>
    %cst_173 = arith.constant 1.000000e+00 : f32
    %162 = vector.broadcast %cst_173 : f32 to vector<58x32xf32>
    %163 = arith.addf %162, %161 : vector<58x32xf32>
    %164 = arith.divf %162, %163 : vector<58x32xf32>
    %165 = vector.extract_strided_slice %144 {offsets = [0, 32], sizes = [58, 32], strides = [1, 1]} : vector<58x224xf32> to vector<58x32xf32>
    %166 = vector.extract_strided_slice %149 {offsets = [0, 32], sizes = [58, 32], strides = [1, 1]} : vector<58x128xf32> to vector<58x32xf32>
    %167 = arith.addf %165, %166 : vector<58x32xf32>
    %cst_174 = arith.constant 1.000000e+00 : f32
    %168 = vector.broadcast %cst_174 : f32 to vector<58x32xf32>
    %169 = arith.addf %167, %168 : vector<58x32xf32>
    %170 = arith.negf %169 : vector<58x32xf32>
    %171 = math.exp %170 : vector<58x32xf32>
    %cst_175 = arith.constant 1.000000e+00 : f32
    %172 = vector.broadcast %cst_175 : f32 to vector<58x32xf32>
    %173 = arith.addf %172, %171 : vector<58x32xf32>
    %174 = arith.divf %172, %173 : vector<58x32xf32>
    %175 = vector.extract_strided_slice %144 {offsets = [0, 64], sizes = [58, 32], strides = [1, 1]} : vector<58x224xf32> to vector<58x32xf32>
    %176 = vector.extract_strided_slice %149 {offsets = [0, 64], sizes = [58, 32], strides = [1, 1]} : vector<58x128xf32> to vector<58x32xf32>
    %177 = arith.addf %175, %176 : vector<58x32xf32>
    %178 = math.tanh %177 : vector<58x32xf32>
    %179 = arith.mulf %174, %155 : vector<58x32xf32>
    %180 = arith.mulf %164, %178 : vector<58x32xf32>
    %181 = arith.addf %179, %180 : vector<58x32xf32>
    %182 = vector.broadcast %3 : vector<58x1xf32> to vector<58x32xf32>
    %183 = arith.mulf %181, %182 : vector<58x32xf32>
    %184 = vector.extract_strided_slice %144 {offsets = [0, 96], sizes = [58, 32], strides = [1, 1]} : vector<58x224xf32> to vector<58x32xf32>
    %185 = vector.extract_strided_slice %154 {offsets = [0, 0], sizes = [58, 32], strides = [1, 1]} : vector<58x96xf32> to vector<58x32xf32>
    %186 = arith.addf %184, %185 : vector<58x32xf32>
    %187 = arith.negf %186 : vector<58x32xf32>
    %188 = math.exp %187 : vector<58x32xf32>
    %cst_176 = arith.constant 1.000000e+00 : f32
    %189 = vector.broadcast %cst_176 : f32 to vector<58x32xf32>
    %190 = arith.addf %189, %188 : vector<58x32xf32>
    %191 = arith.divf %189, %190 : vector<58x32xf32>
    %192 = vector.extract_strided_slice %144 {offsets = [0, 128], sizes = [58, 32], strides = [1, 1]} : vector<58x224xf32> to vector<58x32xf32>
    %193 = vector.extract_strided_slice %154 {offsets = [0, 32], sizes = [58, 32], strides = [1, 1]} : vector<58x96xf32> to vector<58x32xf32>
    %194 = arith.addf %192, %193 : vector<58x32xf32>
    %cst_177 = arith.constant 1.000000e+00 : f32
    %195 = vector.broadcast %cst_177 : f32 to vector<58x32xf32>
    %196 = arith.addf %194, %195 : vector<58x32xf32>
    %197 = arith.negf %196 : vector<58x32xf32>
    %198 = math.exp %197 : vector<58x32xf32>
    %cst_178 = arith.constant 1.000000e+00 : f32
    %199 = vector.broadcast %cst_178 : f32 to vector<58x32xf32>
    %200 = arith.addf %199, %198 : vector<58x32xf32>
    %201 = arith.divf %199, %200 : vector<58x32xf32>
    %202 = vector.extract_strided_slice %144 {offsets = [0, 160], sizes = [58, 32], strides = [1, 1]} : vector<58x224xf32> to vector<58x32xf32>
    %203 = vector.extract_strided_slice %154 {offsets = [0, 64], sizes = [58, 32], strides = [1, 1]} : vector<58x96xf32> to vector<58x32xf32>
    %204 = arith.addf %202, %203 : vector<58x32xf32>
    %205 = math.tanh %204 : vector<58x32xf32>
    %206 = arith.mulf %201, %156 : vector<58x32xf32>
    %207 = arith.mulf %191, %205 : vector<58x32xf32>
    %208 = arith.addf %206, %207 : vector<58x32xf32>
    %209 = vector.broadcast %3 : vector<58x1xf32> to vector<58x32xf32>
    %210 = arith.mulf %208, %209 : vector<58x32xf32>
    %211 = vector.extract_strided_slice %144 {offsets = [0, 192], sizes = [58, 32], strides = [1, 1]} : vector<58x224xf32> to vector<58x32xf32>
    %212 = vector.extract_strided_slice %149 {offsets = [0, 96], sizes = [58, 32], strides = [1, 1]} : vector<58x128xf32> to vector<58x32xf32>
    %213 = arith.addf %211, %212 : vector<58x32xf32>
    %c7_179 = arith.constant 7 : index
    %c0_180 = arith.constant 0 : index
    %214 = vector.load %arg21[%c7_179, %c0_180] : memref<72x32xf32, #tpu.memory_space<vmem>>, vector<58x32xf32>
    tpu.vector_store %arg21[%c7_179, %c0_180], %183 {strides = array<i32>} : memref<72x32xf32, #tpu.memory_space<vmem>>, vector<58x32xf32>,
    %c7_181 = arith.constant 7 : index
    %c0_182 = arith.constant 0 : index
    %215 = vector.load %arg24[%c7_181, %c0_182] : memref<72x32xf32, #tpu.memory_space<vmem>>, vector<58x32xf32>
    tpu.vector_store %arg24[%c7_181, %c0_182], %210 {strides = array<i32>} : memref<72x32xf32, #tpu.memory_space<vmem>>, vector<58x32xf32>,
    %cst_183 = arith.constant 0.000000e+00 : f32
    %216 = vector.broadcast %cst_183 : f32 to vector<58x32xf32>
    %c0_184 = arith.constant 0 : index
    %c0_185 = arith.constant 0 : index
    %217 = vector.load %arg21[%c0_184, %c0_185] : memref<72x32xf32, #tpu.memory_space<vmem>>, vector<58x32xf32>
    %c0_186 = arith.constant 0 : index
    %c0_187 = arith.constant 0 : index
    %c0_188 = arith.constant 0 : index
    %218 = vector.load %arg7[%c0_186, %c0_187, %c0_188] : memref<9x32x32xf32, #tpu.memory_space<vmem>>, vector<1x32x32xf32>
    %219 = vector.shape_cast %218 : vector<1x32x32xf32> to vector<32x32xf32>
    %cst_189 = arith.constant dense<0.000000e+00> : vector<58x32xf32>
    %220 = tpu.matmul %217, %219, %cst_189 {dimension_numbers = #tpu.dot_dimension_numbers<[1], [0], [0], [1], [0, 0, 1, 1], [], []>} : vector<58x32xf32>, vector<32x32xf32>, vector<58x32xf32> -> vector<58x32xf32>
    %221 = arith.addf %216, %220 : vector<58x32xf32>
    %c0_190 = arith.constant 0 : index
    %c0_191 = arith.constant 0 : index
    %222 = vector.load %arg24[%c0_190, %c0_191] : memref<72x32xf32, #tpu.memory_space<vmem>>, vector<58x32xf32>
    %c0_192 = arith.constant 0 : index
    %c0_193 = arith.constant 0 : index
    %c0_194 = arith.constant 0 : index
    %223 = vector.load %arg8[%c0_192, %c0_193, %c0_194] : memref<9x32x32xf32, #tpu.memory_space<vmem>>, vector<1x32x32xf32>
    %224 = vector.shape_cast %223 : vector<1x32x32xf32> to vector<32x32xf32>
    %cst_195 = arith.constant dense<0.000000e+00> : vector<58x32xf32>
    %225 = tpu.matmul %222, %224, %cst_195 {dimension_numbers = #tpu.dot_dimension_numbers<[1], [0], [0], [1], [0, 0, 1, 1], [], []>} : vector<58x32xf32>, vector<32x32xf32>, vector<58x32xf32> -> vector<58x32xf32>
    %226 = arith.addf %221, %225 : vector<58x32xf32>
    %c1_196 = arith.constant 1 : index
    %c0_197 = arith.constant 0 : index
    %227 = vector.load %arg21[%c1_196, %c0_197] : memref<72x32xf32, #tpu.memory_space<vmem>>, vector<58x32xf32>
    %c1_198 = arith.constant 1 : index
    %c0_199 = arith.constant 0 : index
    %c0_200 = arith.constant 0 : index
    %228 = vector.load %arg7[%c1_198, %c0_199, %c0_200] : memref<9x32x32xf32, #tpu.memory_space<vmem>>, vector<1x32x32xf32>
    %229 = vector.shape_cast %228 : vector<1x32x32xf32> to vector<32x32xf32>
    %cst_201 = arith.constant dense<0.000000e+00> : vector<58x32xf32>
    %230 = tpu.matmul %227, %229, %cst_201 {dimension_numbers = #tpu.dot_dimension_numbers<[1], [0], [0], [1], [0, 0, 1, 1], [], []>} : vector<58x32xf32>, vector<32x32xf32>, vector<58x32xf32> -> vector<58x32xf32>
    %231 = arith.addf %226, %230 : vector<58x32xf32>
    %c1_202 = arith.constant 1 : index
    %c0_203 = arith.constant 0 : index
    %232 = vector.load %arg24[%c1_202, %c0_203] : memref<72x32xf32, #tpu.memory_space<vmem>>, vector<58x32xf32>
    %c1_204 = arith.constant 1 : index
    %c0_205 = arith.constant 0 : index
    %c0_206 = arith.constant 0 : index
    %233 = vector.load %arg8[%c1_204, %c0_205, %c0_206] : memref<9x32x32xf32, #tpu.memory_space<vmem>>, vector<1x32x32xf32>
    %234 = vector.shape_cast %233 : vector<1x32x32xf32> to vector<32x32xf32>
    %cst_207 = arith.constant dense<0.000000e+00> : vector<58x32xf32>
    %235 = tpu.matmul %232, %234, %cst_207 {dimension_numbers = #tpu.dot_dimension_numbers<[1], [0], [0], [1], [0, 0, 1, 1], [], []>} : vector<58x32xf32>, vector<32x32xf32>, vector<58x32xf32> -> vector<58x32xf32>
    %236 = arith.addf %231, %235 : vector<58x32xf32>
    %c2_208 = arith.constant 2 : index
    %c0_209 = arith.constant 0 : index
    %237 = vector.load %arg21[%c2_208, %c0_209] : memref<72x32xf32, #tpu.memory_space<vmem>>, vector<58x32xf32>
    %c2_210 = arith.constant 2 : index
    %c0_211 = arith.constant 0 : index
    %c0_212 = arith.constant 0 : index
    %238 = vector.load %arg7[%c2_210, %c0_211, %c0_212] : memref<9x32x32xf32, #tpu.memory_space<vmem>>, vector<1x32x32xf32>
    %239 = vector.shape_cast %238 : vector<1x32x32xf32> to vector<32x32xf32>
    %cst_213 = arith.constant dense<0.000000e+00> : vector<58x32xf32>
    %240 = tpu.matmul %237, %239, %cst_213 {dimension_numbers = #tpu.dot_dimension_numbers<[1], [0], [0], [1], [0, 0, 1, 1], [], []>} : vector<58x32xf32>, vector<32x32xf32>, vector<58x32xf32> -> vector<58x32xf32>
    %241 = arith.addf %236, %240 : vector<58x32xf32>
    %c2_214 = arith.constant 2 : index
    %c0_215 = arith.constant 0 : index
    %242 = vector.load %arg24[%c2_214, %c0_215] : memref<72x32xf32, #tpu.memory_space<vmem>>, vector<58x32xf32>
    %c2_216 = arith.constant 2 : index
    %c0_217 = arith.constant 0 : index
    %c0_218 = arith.constant 0 : index
    %243 = vector.load %arg8[%c2_216, %c0_217, %c0_218] : memref<9x32x32xf32, #tpu.memory_space<vmem>>, vector<1x32x32xf32>
    %244 = vector.shape_cast %243 : vector<1x32x32xf32> to vector<32x32xf32>
    %cst_219 = arith.constant dense<0.000000e+00> : vector<58x32xf32>
    %245 = tpu.matmul %242, %244, %cst_219 {dimension_numbers = #tpu.dot_dimension_numbers<[1], [0], [0], [1], [0, 0, 1, 1], [], []>} : vector<58x32xf32>, vector<32x32xf32>, vector<58x32xf32> -> vector<58x32xf32>
    %246 = arith.addf %241, %245 : vector<58x32xf32>
    %c6_220 = arith.constant 6 : index
    %c0_221 = arith.constant 0 : index
    %247 = vector.load %arg21[%c6_220, %c0_221] : memref<72x32xf32, #tpu.memory_space<vmem>>, vector<58x32xf32>
    %c3_222 = arith.constant 3 : index
    %c0_223 = arith.constant 0 : index
    %c0_224 = arith.constant 0 : index
    %248 = vector.load %arg7[%c3_222, %c0_223, %c0_224] : memref<9x32x32xf32, #tpu.memory_space<vmem>>, vector<1x32x32xf32>
    %249 = vector.shape_cast %248 : vector<1x32x32xf32> to vector<32x32xf32>
    %cst_225 = arith.constant dense<0.000000e+00> : vector<58x32xf32>
    %250 = tpu.matmul %247, %249, %cst_225 {dimension_numbers = #tpu.dot_dimension_numbers<[1], [0], [0], [1], [0, 0, 1, 1], [], []>} : vector<58x32xf32>, vector<32x32xf32>, vector<58x32xf32> -> vector<58x32xf32>
    %251 = arith.addf %246, %250 : vector<58x32xf32>
    %c6_226 = arith.constant 6 : index
    %c0_227 = arith.constant 0 : index
    %252 = vector.load %arg24[%c6_226, %c0_227] : memref<72x32xf32, #tpu.memory_space<vmem>>, vector<58x32xf32>
    %c3_228 = arith.constant 3 : index
    %c0_229 = arith.constant 0 : index
    %c0_230 = arith.constant 0 : index
    %253 = vector.load %arg8[%c3_228, %c0_229, %c0_230] : memref<9x32x32xf32, #tpu.memory_space<vmem>>, vector<1x32x32xf32>
    %254 = vector.shape_cast %253 : vector<1x32x32xf32> to vector<32x32xf32>
    %cst_231 = arith.constant dense<0.000000e+00> : vector<58x32xf32>
    %255 = tpu.matmul %252, %254, %cst_231 {dimension_numbers = #tpu.dot_dimension_numbers<[1], [0], [0], [1], [0, 0, 1, 1], [], []>} : vector<58x32xf32>, vector<32x32xf32>, vector<58x32xf32> -> vector<58x32xf32>
    %256 = arith.addf %251, %255 : vector<58x32xf32>
    %c7_232 = arith.constant 7 : index
    %c0_233 = arith.constant 0 : index
    %257 = vector.load %arg21[%c7_232, %c0_233] : memref<72x32xf32, #tpu.memory_space<vmem>>, vector<58x32xf32>
    %c4_234 = arith.constant 4 : index
    %c0_235 = arith.constant 0 : index
    %c0_236 = arith.constant 0 : index
    %258 = vector.load %arg7[%c4_234, %c0_235, %c0_236] : memref<9x32x32xf32, #tpu.memory_space<vmem>>, vector<1x32x32xf32>
    %259 = vector.shape_cast %258 : vector<1x32x32xf32> to vector<32x32xf32>
    %cst_237 = arith.constant dense<0.000000e+00> : vector<58x32xf32>
    %260 = tpu.matmul %257, %259, %cst_237 {dimension_numbers = #tpu.dot_dimension_numbers<[1], [0], [0], [1], [0, 0, 1, 1], [], []>} : vector<58x32xf32>, vector<32x32xf32>, vector<58x32xf32> -> vector<58x32xf32>
    %261 = arith.addf %256, %260 : vector<58x32xf32>
    %c7_238 = arith.constant 7 : index
    %c0_239 = arith.constant 0 : index
    %262 = vector.load %arg24[%c7_238, %c0_239] : memref<72x32xf32, #tpu.memory_space<vmem>>, vector<58x32xf32>
    %c4_240 = arith.constant 4 : index
    %c0_241 = arith.constant 0 : index
    %c0_242 = arith.constant 0 : index
    %263 = vector.load %arg8[%c4_240, %c0_241, %c0_242] : memref<9x32x32xf32, #tpu.memory_space<vmem>>, vector<1x32x32xf32>
    %264 = vector.shape_cast %263 : vector<1x32x32xf32> to vector<32x32xf32>
    %cst_243 = arith.constant dense<0.000000e+00> : vector<58x32xf32>
    %265 = tpu.matmul %262, %264, %cst_243 {dimension_numbers = #tpu.dot_dimension_numbers<[1], [0], [0], [1], [0, 0, 1, 1], [], []>} : vector<58x32xf32>, vector<32x32xf32>, vector<58x32xf32> -> vector<58x32xf32>
    %266 = arith.addf %261, %265 : vector<58x32xf32>
    %c8_244 = arith.constant 8 : index
    %c0_245 = arith.constant 0 : index
    %267 = vector.load %arg21[%c8_244, %c0_245] : memref<72x32xf32, #tpu.memory_space<vmem>>, vector<58x32xf32>
    %c5_246 = arith.constant 5 : index
    %c0_247 = arith.constant 0 : index
    %c0_248 = arith.constant 0 : index
    %268 = vector.load %arg7[%c5_246, %c0_247, %c0_248] : memref<9x32x32xf32, #tpu.memory_space<vmem>>, vector<1x32x32xf32>
    %269 = vector.shape_cast %268 : vector<1x32x32xf32> to vector<32x32xf32>
    %cst_249 = arith.constant dense<0.000000e+00> : vector<58x32xf32>
    %270 = tpu.matmul %267, %269, %cst_249 {dimension_numbers = #tpu.dot_dimension_numbers<[1], [0], [0], [1], [0, 0, 1, 1], [], []>} : vector<58x32xf32>, vector<32x32xf32>, vector<58x32xf32> -> vector<58x32xf32>
    %271 = arith.addf %266, %270 : vector<58x32xf32>
    %c8_250 = arith.constant 8 : index
    %c0_251 = arith.constant 0 : index
    %272 = vector.load %arg24[%c8_250, %c0_251] : memref<72x32xf32, #tpu.memory_space<vmem>>, vector<58x32xf32>
    %c5_252 = arith.constant 5 : index
    %c0_253 = arith.constant 0 : index
    %c0_254 = arith.constant 0 : index
    %273 = vector.load %arg8[%c5_252, %c0_253, %c0_254] : memref<9x32x32xf32, #tpu.memory_space<vmem>>, vector<1x32x32xf32>
    %274 = vector.shape_cast %273 : vector<1x32x32xf32> to vector<32x32xf32>
    %cst_255 = arith.constant dense<0.000000e+00> : vector<58x32xf32>
    %275 = tpu.matmul %272, %274, %cst_255 {dimension_numbers = #tpu.dot_dimension_numbers<[1], [0], [0], [1], [0, 0, 1, 1], [], []>} : vector<58x32xf32>, vector<32x32xf32>, vector<58x32xf32> -> vector<58x32xf32>
    %276 = arith.addf %271, %275 : vector<58x32xf32>
    %c12_256 = arith.constant 12 : index
    %c0_257 = arith.constant 0 : index
    %277 = vector.load %arg21[%c12_256, %c0_257] : memref<72x32xf32, #tpu.memory_space<vmem>>, vector<58x32xf32>
    %c6_258 = arith.constant 6 : index
    %c0_259 = arith.constant 0 : index
    %c0_260 = arith.constant 0 : index
    %278 = vector.load %arg7[%c6_258, %c0_259, %c0_260] : memref<9x32x32xf32, #tpu.memory_space<vmem>>, vector<1x32x32xf32>
    %279 = vector.shape_cast %278 : vector<1x32x32xf32> to vector<32x32xf32>
    %cst_261 = arith.constant dense<0.000000e+00> : vector<58x32xf32>
    %280 = tpu.matmul %277, %279, %cst_261 {dimension_numbers = #tpu.dot_dimension_numbers<[1], [0], [0], [1], [0, 0, 1, 1], [], []>} : vector<58x32xf32>, vector<32x32xf32>, vector<58x32xf32> -> vector<58x32xf32>
    %281 = arith.addf %276, %280 : vector<58x32xf32>
    %c12_262 = arith.constant 12 : index
    %c0_263 = arith.constant 0 : index
    %282 = vector.load %arg24[%c12_262, %c0_263] : memref<72x32xf32, #tpu.memory_space<vmem>>, vector<58x32xf32>
    %c6_264 = arith.constant 6 : index
    %c0_265 = arith.constant 0 : index
    %c0_266 = arith.constant 0 : index
    %283 = vector.load %arg8[%c6_264, %c0_265, %c0_266] : memref<9x32x32xf32, #tpu.memory_space<vmem>>, vector<1x32x32xf32>
    %284 = vector.shape_cast %283 : vector<1x32x32xf32> to vector<32x32xf32>
    %cst_267 = arith.constant dense<0.000000e+00> : vector<58x32xf32>
    %285 = tpu.matmul %282, %284, %cst_267 {dimension_numbers = #tpu.dot_dimension_numbers<[1], [0], [0], [1], [0, 0, 1, 1], [], []>} : vector<58x32xf32>, vector<32x32xf32>, vector<58x32xf32> -> vector<58x32xf32>
    %286 = arith.addf %281, %285 : vector<58x32xf32>
    %c13_268 = arith.constant 13 : index
    %c0_269 = arith.constant 0 : index
    %287 = vector.load %arg21[%c13_268, %c0_269] : memref<72x32xf32, #tpu.memory_space<vmem>>, vector<58x32xf32>
    %c7_270 = arith.constant 7 : index
    %c0_271 = arith.constant 0 : index
    %c0_272 = arith.constant 0 : index
    %288 = vector.load %arg7[%c7_270, %c0_271, %c0_272] : memref<9x32x32xf32, #tpu.memory_space<vmem>>, vector<1x32x32xf32>
    %289 = vector.shape_cast %288 : vector<1x32x32xf32> to vector<32x32xf32>
    %cst_273 = arith.constant dense<0.000000e+00> : vector<58x32xf32>
    %290 = tpu.matmul %287, %289, %cst_273 {dimension_numbers = #tpu.dot_dimension_numbers<[1], [0], [0], [1], [0, 0, 1, 1], [], []>} : vector<58x32xf32>, vector<32x32xf32>, vector<58x32xf32> -> vector<58x32xf32>
    %291 = arith.addf %286, %290 : vector<58x32xf32>
    %c13_274 = arith.constant 13 : index
    %c0_275 = arith.constant 0 : index
    %292 = vector.load %arg24[%c13_274, %c0_275] : memref<72x32xf32, #tpu.memory_space<vmem>>, vector<58x32xf32>
    %c7_276 = arith.constant 7 : index
    %c0_277 = arith.constant 0 : index
    %c0_278 = arith.constant 0 : index
    %293 = vector.load %arg8[%c7_276, %c0_277, %c0_278] : memref<9x32x32xf32, #tpu.memory_space<vmem>>, vector<1x32x32xf32>
    %294 = vector.shape_cast %293 : vector<1x32x32xf32> to vector<32x32xf32>
    %cst_279 = arith.constant dense<0.000000e+00> : vector<58x32xf32>
    %295 = tpu.matmul %292, %294, %cst_279 {dimension_numbers = #tpu.dot_dimension_numbers<[1], [0], [0], [1], [0, 0, 1, 1], [], []>} : vector<58x32xf32>, vector<32x32xf32>, vector<58x32xf32> -> vector<58x32xf32>
    %296 = arith.addf %291, %295 : vector<58x32xf32>
    %c14_280 = arith.constant 14 : index
    %c0_281 = arith.constant 0 : index
    %297 = vector.load %arg21[%c14_280, %c0_281] : memref<72x32xf32, #tpu.memory_space<vmem>>, vector<58x32xf32>
    %c8_282 = arith.constant 8 : index
    %c0_283 = arith.constant 0 : index
    %c0_284 = arith.constant 0 : index
    %298 = vector.load %arg7[%c8_282, %c0_283, %c0_284] : memref<9x32x32xf32, #tpu.memory_space<vmem>>, vector<1x32x32xf32>
    %299 = vector.shape_cast %298 : vector<1x32x32xf32> to vector<32x32xf32>
    %cst_285 = arith.constant dense<0.000000e+00> : vector<58x32xf32>
    %300 = tpu.matmul %297, %299, %cst_285 {dimension_numbers = #tpu.dot_dimension_numbers<[1], [0], [0], [1], [0, 0, 1, 1], [], []>} : vector<58x32xf32>, vector<32x32xf32>, vector<58x32xf32> -> vector<58x32xf32>
    %301 = arith.addf %296, %300 : vector<58x32xf32>
    %c14_286 = arith.constant 14 : index
    %c0_287 = arith.constant 0 : index
    %302 = vector.load %arg24[%c14_286, %c0_287] : memref<72x32xf32, #tpu.memory_space<vmem>>, vector<58x32xf32>
    %c8_288 = arith.constant 8 : index
    %c0_289 = arith.constant 0 : index
    %c0_290 = arith.constant 0 : index
    %303 = vector.load %arg8[%c8_288, %c0_289, %c0_290] : memref<9x32x32xf32, #tpu.memory_space<vmem>>, vector<1x32x32xf32>
    %304 = vector.shape_cast %303 : vector<1x32x32xf32> to vector<32x32xf32>
    %cst_291 = arith.constant dense<0.000000e+00> : vector<58x32xf32>
    %305 = tpu.matmul %302, %304, %cst_291 {dimension_numbers = #tpu.dot_dimension_numbers<[1], [0], [0], [1], [0, 0, 1, 1], [], []>} : vector<58x32xf32>, vector<32x32xf32>, vector<58x32xf32> -> vector<58x32xf32>
    %306 = arith.addf %301, %305 : vector<58x32xf32>
    %307 = arith.addf %213, %306 : vector<58x32xf32>
    %308 = arith.negf %307 : vector<58x32xf32>
    %309 = math.exp %308 : vector<58x32xf32>
    %cst_292 = arith.constant 1.000000e+00 : f32
    %310 = vector.broadcast %cst_292 : f32 to vector<58x32xf32>
    %311 = arith.addf %310, %309 : vector<58x32xf32>
    %312 = arith.divf %310, %311 : vector<58x32xf32>
    %c0_293 = arith.constant 0 : index
    %c0_294 = arith.constant 0 : index
    %313 = vector.load %arg9[%c0_293, %c0_294] : memref<32x32xf32, #tpu.memory_space<vmem>>, vector<32x32xf32>
    %cst_295 = arith.constant dense<0.000000e+00> : vector<58x32xf32>
    %314 = tpu.matmul %183, %313, %cst_295 {dimension_numbers = #tpu.dot_dimension_numbers<[1], [0], [0], [1], [0, 0, 1, 1], [], []>} : vector<58x32xf32>, vector<32x32xf32>, vector<58x32xf32> -> vector<58x32xf32>
    %c0_296 = arith.constant 0 : index
    %c0_297 = arith.constant 0 : index
    %315 = vector.load %arg10[%c0_296, %c0_297] : memref<32x32xf32, #tpu.memory_space<vmem>>, vector<32x32xf32>
    %cst_298 = arith.constant dense<0.000000e+00> : vector<58x32xf32>
    %316 = tpu.matmul %210, %315, %cst_298 {dimension_numbers = #tpu.dot_dimension_numbers<[1], [0], [0], [1], [0, 0, 1, 1], [], []>} : vector<58x32xf32>, vector<32x32xf32>, vector<58x32xf32> -> vector<58x32xf32>
    %317 = arith.addf %314, %316 : vector<58x32xf32>
    %318 = math.tanh %317 : vector<58x32xf32>
    %319 = arith.mulf %312, %318 : vector<58x32xf32>
    %c7_299 = arith.constant 7 : index
    %c0_300 = arith.constant 0 : index
    %320 = vector.load %arg20[%c7_299, %c0_300] : memref<72x32xf32, #tpu.memory_space<vmem>>, vector<58x32xf32>
    tpu.vector_store %arg20[%c7_299, %c0_300], %319 {strides = array<i32>} : memref<72x32xf32, #tpu.memory_space<vmem>>, vector<58x32xf32>,
    %cst_301 = arith.constant 0.000000e+00 : f32
    %321 = vector.broadcast %cst_301 : f32 to vector<58x224xf32>
    %cst_302 = arith.constant 0.000000e+00 : f32
    %322 = vector.broadcast %cst_302 : f32 to vector<58x128xf32>
    %cst_303 = arith.constant 0.000000e+00 : f32
    %323 = vector.broadcast %cst_303 : f32 to vector<58x96xf32>
    %c0_304 = arith.constant 0 : index
    %c0_305 = arith.constant 0 : index
    %324 = vector.load %arg20[%c0_304, %c0_305] : memref<72x32xf32, #tpu.memory_space<vmem>>, vector<58x32xf32>
    %c0_306 = arith.constant 0 : index
    %c0_307 = arith.constant 0 : index
    %c0_308 = arith.constant 0 : index
    %325 = vector.load %arg11[%c0_306, %c0_307, %c0_308] : memref<9x32x224xf32, #tpu.memory_space<vmem>>, vector<1x32x224xf32>
    %326 = vector.shape_cast %325 : vector<1x32x224xf32> to vector<32x224xf32>
    %cst_309 = arith.constant dense<0.000000e+00> : vector<58x224xf32>
    %327 = tpu.matmul %324, %326, %cst_309 {dimension_numbers = #tpu.dot_dimension_numbers<[1], [0], [0], [1], [0, 0, 1, 1], [], []>} : vector<58x32xf32>, vector<32x224xf32>, vector<58x224xf32> -> vector<58x224xf32>
    %328 = arith.addf %321, %327 : vector<58x224xf32>
    %c0_310 = arith.constant 0 : index
    %c0_311 = arith.constant 0 : index
    %329 = vector.load %arg22[%c0_310, %c0_311] : memref<72x32xf32, #tpu.memory_space<vmem>>, vector<58x32xf32>
    %c0_312 = arith.constant 0 : index
    %c0_313 = arith.constant 0 : index
    %c0_314 = arith.constant 0 : index
    %330 = vector.load %arg12[%c0_312, %c0_313, %c0_314] : memref<9x32x128xf32, #tpu.memory_space<vmem>>, vector<1x32x128xf32>
    %331 = vector.shape_cast %330 : vector<1x32x128xf32> to vector<32x128xf32>
    %cst_315 = arith.constant dense<0.000000e+00> : vector<58x128xf32>
    %332 = tpu.matmul %329, %331, %cst_315 {dimension_numbers = #tpu.dot_dimension_numbers<[1], [0], [0], [1], [0, 0, 1, 1], [], []>} : vector<58x32xf32>, vector<32x128xf32>, vector<58x128xf32> -> vector<58x128xf32>
    %333 = arith.addf %322, %332 : vector<58x128xf32>
    %c0_316 = arith.constant 0 : index
    %c0_317 = arith.constant 0 : index
    %334 = vector.load %arg24[%c0_316, %c0_317] : memref<72x32xf32, #tpu.memory_space<vmem>>, vector<58x32xf32>
    %c0_318 = arith.constant 0 : index
    %c0_319 = arith.constant 0 : index
    %c0_320 = arith.constant 0 : index
    %335 = vector.load %arg13[%c0_318, %c0_319, %c0_320] : memref<9x32x96xf32, #tpu.memory_space<vmem>>, vector<1x32x96xf32>
    %336 = vector.shape_cast %335 : vector<1x32x96xf32> to vector<32x96xf32>
    %cst_321 = arith.constant dense<0.000000e+00> : vector<58x96xf32>
    %337 = tpu.matmul %334, %336, %cst_321 {dimension_numbers = #tpu.dot_dimension_numbers<[1], [0], [0], [1], [0, 0, 1, 1], [], []>} : vector<58x32xf32>, vector<32x96xf32>, vector<58x96xf32> -> vector<58x96xf32>
    %338 = arith.addf %323, %337 : vector<58x96xf32>
    %c1_322 = arith.constant 1 : index
    %c0_323 = arith.constant 0 : index
    %339 = vector.load %arg20[%c1_322, %c0_323] : memref<72x32xf32, #tpu.memory_space<vmem>>, vector<58x32xf32>
    %c1_324 = arith.constant 1 : index
    %c0_325 = arith.constant 0 : index
    %c0_326 = arith.constant 0 : index
    %340 = vector.load %arg11[%c1_324, %c0_325, %c0_326] : memref<9x32x224xf32, #tpu.memory_space<vmem>>, vector<1x32x224xf32>
    %341 = vector.shape_cast %340 : vector<1x32x224xf32> to vector<32x224xf32>
    %cst_327 = arith.constant dense<0.000000e+00> : vector<58x224xf32>
    %342 = tpu.matmul %339, %341, %cst_327 {dimension_numbers = #tpu.dot_dimension_numbers<[1], [0], [0], [1], [0, 0, 1, 1], [], []>} : vector<58x32xf32>, vector<32x224xf32>, vector<58x224xf32> -> vector<58x224xf32>
    %343 = arith.addf %328, %342 : vector<58x224xf32>
    %c1_328 = arith.constant 1 : index
    %c0_329 = arith.constant 0 : index
    %344 = vector.load %arg22[%c1_328, %c0_329] : memref<72x32xf32, #tpu.memory_space<vmem>>, vector<58x32xf32>
    %c1_330 = arith.constant 1 : index
    %c0_331 = arith.constant 0 : index
    %c0_332 = arith.constant 0 : index
    %345 = vector.load %arg12[%c1_330, %c0_331, %c0_332] : memref<9x32x128xf32, #tpu.memory_space<vmem>>, vector<1x32x128xf32>
    %346 = vector.shape_cast %345 : vector<1x32x128xf32> to vector<32x128xf32>
    %cst_333 = arith.constant dense<0.000000e+00> : vector<58x128xf32>
    %347 = tpu.matmul %344, %346, %cst_333 {dimension_numbers = #tpu.dot_dimension_numbers<[1], [0], [0], [1], [0, 0, 1, 1], [], []>} : vector<58x32xf32>, vector<32x128xf32>, vector<58x128xf32> -> vector<58x128xf32>
    %348 = arith.addf %333, %347 : vector<58x128xf32>
    %c1_334 = arith.constant 1 : index
    %c0_335 = arith.constant 0 : index
    %349 = vector.load %arg24[%c1_334, %c0_335] : memref<72x32xf32, #tpu.memory_space<vmem>>, vector<58x32xf32>
    %c1_336 = arith.constant 1 : index
    %c0_337 = arith.constant 0 : index
    %c0_338 = arith.constant 0 : index
    %350 = vector.load %arg13[%c1_336, %c0_337, %c0_338] : memref<9x32x96xf32, #tpu.memory_space<vmem>>, vector<1x32x96xf32>
    %351 = vector.shape_cast %350 : vector<1x32x96xf32> to vector<32x96xf32>
    %cst_339 = arith.constant dense<0.000000e+00> : vector<58x96xf32>
    %352 = tpu.matmul %349, %351, %cst_339 {dimension_numbers = #tpu.dot_dimension_numbers<[1], [0], [0], [1], [0, 0, 1, 1], [], []>} : vector<58x32xf32>, vector<32x96xf32>, vector<58x96xf32> -> vector<58x96xf32>
    %353 = arith.addf %338, %352 : vector<58x96xf32>
    %c2_340 = arith.constant 2 : index
    %c0_341 = arith.constant 0 : index
    %354 = vector.load %arg20[%c2_340, %c0_341] : memref<72x32xf32, #tpu.memory_space<vmem>>, vector<58x32xf32>
    %c2_342 = arith.constant 2 : index
    %c0_343 = arith.constant 0 : index
    %c0_344 = arith.constant 0 : index
    %355 = vector.load %arg11[%c2_342, %c0_343, %c0_344] : memref<9x32x224xf32, #tpu.memory_space<vmem>>, vector<1x32x224xf32>
    %356 = vector.shape_cast %355 : vector<1x32x224xf32> to vector<32x224xf32>
    %cst_345 = arith.constant dense<0.000000e+00> : vector<58x224xf32>
    %357 = tpu.matmul %354, %356, %cst_345 {dimension_numbers = #tpu.dot_dimension_numbers<[1], [0], [0], [1], [0, 0, 1, 1], [], []>} : vector<58x32xf32>, vector<32x224xf32>, vector<58x224xf32> -> vector<58x224xf32>
    %358 = arith.addf %343, %357 : vector<58x224xf32>
    %c2_346 = arith.constant 2 : index
    %c0_347 = arith.constant 0 : index
    %359 = vector.load %arg22[%c2_346, %c0_347] : memref<72x32xf32, #tpu.memory_space<vmem>>, vector<58x32xf32>
    %c2_348 = arith.constant 2 : index
    %c0_349 = arith.constant 0 : index
    %c0_350 = arith.constant 0 : index
    %360 = vector.load %arg12[%c2_348, %c0_349, %c0_350] : memref<9x32x128xf32, #tpu.memory_space<vmem>>, vector<1x32x128xf32>
    %361 = vector.shape_cast %360 : vector<1x32x128xf32> to vector<32x128xf32>
    %cst_351 = arith.constant dense<0.000000e+00> : vector<58x128xf32>
    %362 = tpu.matmul %359, %361, %cst_351 {dimension_numbers = #tpu.dot_dimension_numbers<[1], [0], [0], [1], [0, 0, 1, 1], [], []>} : vector<58x32xf32>, vector<32x128xf32>, vector<58x128xf32> -> vector<58x128xf32>
    %363 = arith.addf %348, %362 : vector<58x128xf32>
    %c2_352 = arith.constant 2 : index
    %c0_353 = arith.constant 0 : index
    %364 = vector.load %arg24[%c2_352, %c0_353] : memref<72x32xf32, #tpu.memory_space<vmem>>, vector<58x32xf32>
    %c2_354 = arith.constant 2 : index
    %c0_355 = arith.constant 0 : index
    %c0_356 = arith.constant 0 : index
    %365 = vector.load %arg13[%c2_354, %c0_355, %c0_356] : memref<9x32x96xf32, #tpu.memory_space<vmem>>, vector<1x32x96xf32>
    %366 = vector.shape_cast %365 : vector<1x32x96xf32> to vector<32x96xf32>
    %cst_357 = arith.constant dense<0.000000e+00> : vector<58x96xf32>
    %367 = tpu.matmul %364, %366, %cst_357 {dimension_numbers = #tpu.dot_dimension_numbers<[1], [0], [0], [1], [0, 0, 1, 1], [], []>} : vector<58x32xf32>, vector<32x96xf32>, vector<58x96xf32> -> vector<58x96xf32>
    %368 = arith.addf %353, %367 : vector<58x96xf32>
    %c6_358 = arith.constant 6 : index
    %c0_359 = arith.constant 0 : index
    %369 = vector.load %arg20[%c6_358, %c0_359] : memref<72x32xf32, #tpu.memory_space<vmem>>, vector<58x32xf32>
    %c3_360 = arith.constant 3 : index
    %c0_361 = arith.constant 0 : index
    %c0_362 = arith.constant 0 : index
    %370 = vector.load %arg11[%c3_360, %c0_361, %c0_362] : memref<9x32x224xf32, #tpu.memory_space<vmem>>, vector<1x32x224xf32>
    %371 = vector.shape_cast %370 : vector<1x32x224xf32> to vector<32x224xf32>
    %cst_363 = arith.constant dense<0.000000e+00> : vector<58x224xf32>
    %372 = tpu.matmul %369, %371, %cst_363 {dimension_numbers = #tpu.dot_dimension_numbers<[1], [0], [0], [1], [0, 0, 1, 1], [], []>} : vector<58x32xf32>, vector<32x224xf32>, vector<58x224xf32> -> vector<58x224xf32>
    %373 = arith.addf %358, %372 : vector<58x224xf32>
    %c6_364 = arith.constant 6 : index
    %c0_365 = arith.constant 0 : index
    %374 = vector.load %arg22[%c6_364, %c0_365] : memref<72x32xf32, #tpu.memory_space<vmem>>, vector<58x32xf32>
    %c3_366 = arith.constant 3 : index
    %c0_367 = arith.constant 0 : index
    %c0_368 = arith.constant 0 : index
    %375 = vector.load %arg12[%c3_366, %c0_367, %c0_368] : memref<9x32x128xf32, #tpu.memory_space<vmem>>, vector<1x32x128xf32>
    %376 = vector.shape_cast %375 : vector<1x32x128xf32> to vector<32x128xf32>
    %cst_369 = arith.constant dense<0.000000e+00> : vector<58x128xf32>
    %377 = tpu.matmul %374, %376, %cst_369 {dimension_numbers = #tpu.dot_dimension_numbers<[1], [0], [0], [1], [0, 0, 1, 1], [], []>} : vector<58x32xf32>, vector<32x128xf32>, vector<58x128xf32> -> vector<58x128xf32>
    %378 = arith.addf %363, %377 : vector<58x128xf32>
    %c6_370 = arith.constant 6 : index
    %c0_371 = arith.constant 0 : index
    %379 = vector.load %arg24[%c6_370, %c0_371] : memref<72x32xf32, #tpu.memory_space<vmem>>, vector<58x32xf32>
    %c3_372 = arith.constant 3 : index
    %c0_373 = arith.constant 0 : index
    %c0_374 = arith.constant 0 : index
    %380 = vector.load %arg13[%c3_372, %c0_373, %c0_374] : memref<9x32x96xf32, #tpu.memory_space<vmem>>, vector<1x32x96xf32>
    %381 = vector.shape_cast %380 : vector<1x32x96xf32> to vector<32x96xf32>
    %cst_375 = arith.constant dense<0.000000e+00> : vector<58x96xf32>
    %382 = tpu.matmul %379, %381, %cst_375 {dimension_numbers = #tpu.dot_dimension_numbers<[1], [0], [0], [1], [0, 0, 1, 1], [], []>} : vector<58x32xf32>, vector<32x96xf32>, vector<58x96xf32> -> vector<58x96xf32>
    %383 = arith.addf %368, %382 : vector<58x96xf32>
    %c7_376 = arith.constant 7 : index
    %c0_377 = arith.constant 0 : index
    %384 = vector.load %arg20[%c7_376, %c0_377] : memref<72x32xf32, #tpu.memory_space<vmem>>, vector<58x32xf32>
    %c4_378 = arith.constant 4 : index
    %c0_379 = arith.constant 0 : index
    %c0_380 = arith.constant 0 : index
    %385 = vector.load %arg11[%c4_378, %c0_379, %c0_380] : memref<9x32x224xf32, #tpu.memory_space<vmem>>, vector<1x32x224xf32>
    %386 = vector.shape_cast %385 : vector<1x32x224xf32> to vector<32x224xf32>
    %cst_381 = arith.constant dense<0.000000e+00> : vector<58x224xf32>
    %387 = tpu.matmul %384, %386, %cst_381 {dimension_numbers = #tpu.dot_dimension_numbers<[1], [0], [0], [1], [0, 0, 1, 1], [], []>} : vector<58x32xf32>, vector<32x224xf32>, vector<58x224xf32> -> vector<58x224xf32>
    %388 = arith.addf %373, %387 : vector<58x224xf32>
    %c7_382 = arith.constant 7 : index
    %c0_383 = arith.constant 0 : index
    %389 = vector.load %arg22[%c7_382, %c0_383] : memref<72x32xf32, #tpu.memory_space<vmem>>, vector<58x32xf32>
    %c4_384 = arith.constant 4 : index
    %c0_385 = arith.constant 0 : index
    %c0_386 = arith.constant 0 : index
    %390 = vector.load %arg12[%c4_384, %c0_385, %c0_386] : memref<9x32x128xf32, #tpu.memory_space<vmem>>, vector<1x32x128xf32>
    %391 = vector.shape_cast %390 : vector<1x32x128xf32> to vector<32x128xf32>
    %cst_387 = arith.constant dense<0.000000e+00> : vector<58x128xf32>
    %392 = tpu.matmul %389, %391, %cst_387 {dimension_numbers = #tpu.dot_dimension_numbers<[1], [0], [0], [1], [0, 0, 1, 1], [], []>} : vector<58x32xf32>, vector<32x128xf32>, vector<58x128xf32> -> vector<58x128xf32>
    %393 = arith.addf %378, %392 : vector<58x128xf32>
    %c7_388 = arith.constant 7 : index
    %c0_389 = arith.constant 0 : index
    %394 = vector.load %arg24[%c7_388, %c0_389] : memref<72x32xf32, #tpu.memory_space<vmem>>, vector<58x32xf32>
    %c4_390 = arith.constant 4 : index
    %c0_391 = arith.constant 0 : index
    %c0_392 = arith.constant 0 : index
    %395 = vector.load %arg13[%c4_390, %c0_391, %c0_392] : memref<9x32x96xf32, #tpu.memory_space<vmem>>, vector<1x32x96xf32>
    %396 = vector.shape_cast %395 : vector<1x32x96xf32> to vector<32x96xf32>
    %cst_393 = arith.constant dense<0.000000e+00> : vector<58x96xf32>
    %397 = tpu.matmul %394, %396, %cst_393 {dimension_numbers = #tpu.dot_dimension_numbers<[1], [0], [0], [1], [0, 0, 1, 1], [], []>} : vector<58x32xf32>, vector<32x96xf32>, vector<58x96xf32> -> vector<58x96xf32>
    %398 = arith.addf %383, %397 : vector<58x96xf32>
    %c8_394 = arith.constant 8 : index
    %c0_395 = arith.constant 0 : index
    %399 = vector.load %arg20[%c8_394, %c0_395] : memref<72x32xf32, #tpu.memory_space<vmem>>, vector<58x32xf32>
    %c5_396 = arith.constant 5 : index
    %c0_397 = arith.constant 0 : index
    %c0_398 = arith.constant 0 : index
    %400 = vector.load %arg11[%c5_396, %c0_397, %c0_398] : memref<9x32x224xf32, #tpu.memory_space<vmem>>, vector<1x32x224xf32>
    %401 = vector.shape_cast %400 : vector<1x32x224xf32> to vector<32x224xf32>
    %cst_399 = arith.constant dense<0.000000e+00> : vector<58x224xf32>
    %402 = tpu.matmul %399, %401, %cst_399 {dimension_numbers = #tpu.dot_dimension_numbers<[1], [0], [0], [1], [0, 0, 1, 1], [], []>} : vector<58x32xf32>, vector<32x224xf32>, vector<58x224xf32> -> vector<58x224xf32>
    %403 = arith.addf %388, %402 : vector<58x224xf32>
    %c8_400 = arith.constant 8 : index
    %c0_401 = arith.constant 0 : index
    %404 = vector.load %arg22[%c8_400, %c0_401] : memref<72x32xf32, #tpu.memory_space<vmem>>, vector<58x32xf32>
    %c5_402 = arith.constant 5 : index
    %c0_403 = arith.constant 0 : index
    %c0_404 = arith.constant 0 : index
    %405 = vector.load %arg12[%c5_402, %c0_403, %c0_404] : memref<9x32x128xf32, #tpu.memory_space<vmem>>, vector<1x32x128xf32>
    %406 = vector.shape_cast %405 : vector<1x32x128xf32> to vector<32x128xf32>
    %cst_405 = arith.constant dense<0.000000e+00> : vector<58x128xf32>
    %407 = tpu.matmul %404, %406, %cst_405 {dimension_numbers = #tpu.dot_dimension_numbers<[1], [0], [0], [1], [0, 0, 1, 1], [], []>} : vector<58x32xf32>, vector<32x128xf32>, vector<58x128xf32> -> vector<58x128xf32>
    %408 = arith.addf %393, %407 : vector<58x128xf32>
    %c8_406 = arith.constant 8 : index
    %c0_407 = arith.constant 0 : index
    %409 = vector.load %arg24[%c8_406, %c0_407] : memref<72x32xf32, #tpu.memory_space<vmem>>, vector<58x32xf32>
    %c5_408 = arith.constant 5 : index
    %c0_409 = arith.constant 0 : index
    %c0_410 = arith.constant 0 : index
    %410 = vector.load %arg13[%c5_408, %c0_409, %c0_410] : memref<9x32x96xf32, #tpu.memory_space<vmem>>, vector<1x32x96xf32>
    %411 = vector.shape_cast %410 : vector<1x32x96xf32> to vector<32x96xf32>
    %cst_411 = arith.constant dense<0.000000e+00> : vector<58x96xf32>
    %412 = tpu.matmul %409, %411, %cst_411 {dimension_numbers = #tpu.dot_dimension_numbers<[1], [0], [0], [1], [0, 0, 1, 1], [], []>} : vector<58x32xf32>, vector<32x96xf32>, vector<58x96xf32> -> vector<58x96xf32>
    %413 = arith.addf %398, %412 : vector<58x96xf32>
    %c12_412 = arith.constant 12 : index
    %c0_413 = arith.constant 0 : index
    %414 = vector.load %arg20[%c12_412, %c0_413] : memref<72x32xf32, #tpu.memory_space<vmem>>, vector<58x32xf32>
    %c6_414 = arith.constant 6 : index
    %c0_415 = arith.constant 0 : index
    %c0_416 = arith.constant 0 : index
    %415 = vector.load %arg11[%c6_414, %c0_415, %c0_416] : memref<9x32x224xf32, #tpu.memory_space<vmem>>, vector<1x32x224xf32>
    %416 = vector.shape_cast %415 : vector<1x32x224xf32> to vector<32x224xf32>
    %cst_417 = arith.constant dense<0.000000e+00> : vector<58x224xf32>
    %417 = tpu.matmul %414, %416, %cst_417 {dimension_numbers = #tpu.dot_dimension_numbers<[1], [0], [0], [1], [0, 0, 1, 1], [], []>} : vector<58x32xf32>, vector<32x224xf32>, vector<58x224xf32> -> vector<58x224xf32>
    %418 = arith.addf %403, %417 : vector<58x224xf32>
    %c12_418 = arith.constant 12 : index
    %c0_419 = arith.constant 0 : index
    %419 = vector.load %arg22[%c12_418, %c0_419] : memref<72x32xf32, #tpu.memory_space<vmem>>, vector<58x32xf32>
    %c6_420 = arith.constant 6 : index
    %c0_421 = arith.constant 0 : index
    %c0_422 = arith.constant 0 : index
    %420 = vector.load %arg12[%c6_420, %c0_421, %c0_422] : memref<9x32x128xf32, #tpu.memory_space<vmem>>, vector<1x32x128xf32>
    %421 = vector.shape_cast %420 : vector<1x32x128xf32> to vector<32x128xf32>
    %cst_423 = arith.constant dense<0.000000e+00> : vector<58x128xf32>
    %422 = tpu.matmul %419, %421, %cst_423 {dimension_numbers = #tpu.dot_dimension_numbers<[1], [0], [0], [1], [0, 0, 1, 1], [], []>} : vector<58x32xf32>, vector<32x128xf32>, vector<58x128xf32> -> vector<58x128xf32>
    %423 = arith.addf %408, %422 : vector<58x128xf32>
    %c12_424 = arith.constant 12 : index
    %c0_425 = arith.constant 0 : index
    %424 = vector.load %arg24[%c12_424, %c0_425] : memref<72x32xf32, #tpu.memory_space<vmem>>, vector<58x32xf32>
    %c6_426 = arith.constant 6 : index
    %c0_427 = arith.constant 0 : index
    %c0_428 = arith.constant 0 : index
    %425 = vector.load %arg13[%c6_426, %c0_427, %c0_428] : memref<9x32x96xf32, #tpu.memory_space<vmem>>, vector<1x32x96xf32>
    %426 = vector.shape_cast %425 : vector<1x32x96xf32> to vector<32x96xf32>
    %cst_429 = arith.constant dense<0.000000e+00> : vector<58x96xf32>
    %427 = tpu.matmul %424, %426, %cst_429 {dimension_numbers = #tpu.dot_dimension_numbers<[1], [0], [0], [1], [0, 0, 1, 1], [], []>} : vector<58x32xf32>, vector<32x96xf32>, vector<58x96xf32> -> vector<58x96xf32>
    %428 = arith.addf %413, %427 : vector<58x96xf32>
    %c13_430 = arith.constant 13 : index
    %c0_431 = arith.constant 0 : index
    %429 = vector.load %arg20[%c13_430, %c0_431] : memref<72x32xf32, #tpu.memory_space<vmem>>, vector<58x32xf32>
    %c7_432 = arith.constant 7 : index
    %c0_433 = arith.constant 0 : index
    %c0_434 = arith.constant 0 : index
    %430 = vector.load %arg11[%c7_432, %c0_433, %c0_434] : memref<9x32x224xf32, #tpu.memory_space<vmem>>, vector<1x32x224xf32>
    %431 = vector.shape_cast %430 : vector<1x32x224xf32> to vector<32x224xf32>
    %cst_435 = arith.constant dense<0.000000e+00> : vector<58x224xf32>
    %432 = tpu.matmul %429, %431, %cst_435 {dimension_numbers = #tpu.dot_dimension_numbers<[1], [0], [0], [1], [0, 0, 1, 1], [], []>} : vector<58x32xf32>, vector<32x224xf32>, vector<58x224xf32> -> vector<58x224xf32>
    %433 = arith.addf %418, %432 : vector<58x224xf32>
    %c13_436 = arith.constant 13 : index
    %c0_437 = arith.constant 0 : index
    %434 = vector.load %arg22[%c13_436, %c0_437] : memref<72x32xf32, #tpu.memory_space<vmem>>, vector<58x32xf32>
    %c7_438 = arith.constant 7 : index
    %c0_439 = arith.constant 0 : index
    %c0_440 = arith.constant 0 : index
    %435 = vector.load %arg12[%c7_438, %c0_439, %c0_440] : memref<9x32x128xf32, #tpu.memory_space<vmem>>, vector<1x32x128xf32>
    %436 = vector.shape_cast %435 : vector<1x32x128xf32> to vector<32x128xf32>
    %cst_441 = arith.constant dense<0.000000e+00> : vector<58x128xf32>
    %437 = tpu.matmul %434, %436, %cst_441 {dimension_numbers = #tpu.dot_dimension_numbers<[1], [0], [0], [1], [0, 0, 1, 1], [], []>} : vector<58x32xf32>, vector<32x128xf32>, vector<58x128xf32> -> vector<58x128xf32>
    %438 = arith.addf %423, %437 : vector<58x128xf32>
    %c13_442 = arith.constant 13 : index
    %c0_443 = arith.constant 0 : index
    %439 = vector.load %arg24[%c13_442, %c0_443] : memref<72x32xf32, #tpu.memory_space<vmem>>, vector<58x32xf32>
    %c7_444 = arith.constant 7 : index
    %c0_445 = arith.constant 0 : index
    %c0_446 = arith.constant 0 : index
    %440 = vector.load %arg13[%c7_444, %c0_445, %c0_446] : memref<9x32x96xf32, #tpu.memory_space<vmem>>, vector<1x32x96xf32>
    %441 = vector.shape_cast %440 : vector<1x32x96xf32> to vector<32x96xf32>
    %cst_447 = arith.constant dense<0.000000e+00> : vector<58x96xf32>
    %442 = tpu.matmul %439, %441, %cst_447 {dimension_numbers = #tpu.dot_dimension_numbers<[1], [0], [0], [1], [0, 0, 1, 1], [], []>} : vector<58x32xf32>, vector<32x96xf32>, vector<58x96xf32> -> vector<58x96xf32>
    %443 = arith.addf %428, %442 : vector<58x96xf32>
    %c14_448 = arith.constant 14 : index
    %c0_449 = arith.constant 0 : index
    %444 = vector.load %arg20[%c14_448, %c0_449] : memref<72x32xf32, #tpu.memory_space<vmem>>, vector<58x32xf32>
    %c8_450 = arith.constant 8 : index
    %c0_451 = arith.constant 0 : index
    %c0_452 = arith.constant 0 : index
    %445 = vector.load %arg11[%c8_450, %c0_451, %c0_452] : memref<9x32x224xf32, #tpu.memory_space<vmem>>, vector<1x32x224xf32>
    %446 = vector.shape_cast %445 : vector<1x32x224xf32> to vector<32x224xf32>
    %cst_453 = arith.constant dense<0.000000e+00> : vector<58x224xf32>
    %447 = tpu.matmul %444, %446, %cst_453 {dimension_numbers = #tpu.dot_dimension_numbers<[1], [0], [0], [1], [0, 0, 1, 1], [], []>} : vector<58x32xf32>, vector<32x224xf32>, vector<58x224xf32> -> vector<58x224xf32>
    %448 = arith.addf %433, %447 : vector<58x224xf32>
    %c14_454 = arith.constant 14 : index
    %c0_455 = arith.constant 0 : index
    %449 = vector.load %arg22[%c14_454, %c0_455] : memref<72x32xf32, #tpu.memory_space<vmem>>, vector<58x32xf32>
    %c8_456 = arith.constant 8 : index
    %c0_457 = arith.constant 0 : index
    %c0_458 = arith.constant 0 : index
    %450 = vector.load %arg12[%c8_456, %c0_457, %c0_458] : memref<9x32x128xf32, #tpu.memory_space<vmem>>, vector<1x32x128xf32>
    %451 = vector.shape_cast %450 : vector<1x32x128xf32> to vector<32x128xf32>
    %cst_459 = arith.constant dense<0.000000e+00> : vector<58x128xf32>
    %452 = tpu.matmul %449, %451, %cst_459 {dimension_numbers = #tpu.dot_dimension_numbers<[1], [0], [0], [1], [0, 0, 1, 1], [], []>} : vector<58x32xf32>, vector<32x128xf32>, vector<58x128xf32> -> vector<58x128xf32>
    %453 = arith.addf %438, %452 : vector<58x128xf32>
    %c14_460 = arith.constant 14 : index
    %c0_461 = arith.constant 0 : index
    %454 = vector.load %arg24[%c14_460, %c0_461] : memref<72x32xf32, #tpu.memory_space<vmem>>, vector<58x32xf32>
    %c8_462 = arith.constant 8 : index
    %c0_463 = arith.constant 0 : index
    %c0_464 = arith.constant 0 : index
    %455 = vector.load %arg13[%c8_462, %c0_463, %c0_464] : memref<9x32x96xf32, #tpu.memory_space<vmem>>, vector<1x32x96xf32>
    %456 = vector.shape_cast %455 : vector<1x32x96xf32> to vector<32x96xf32>
    %cst_465 = arith.constant dense<0.000000e+00> : vector<58x96xf32>
    %457 = tpu.matmul %454, %456, %cst_465 {dimension_numbers = #tpu.dot_dimension_numbers<[1], [0], [0], [1], [0, 0, 1, 1], [], []>} : vector<58x32xf32>, vector<32x96xf32>, vector<58x96xf32> -> vector<58x96xf32>
    %458 = arith.addf %443, %457 : vector<58x96xf32>
    %c7_466 = arith.constant 7 : index
    %c0_467 = arith.constant 0 : index
    %459 = vector.load %arg23[%c7_466, %c0_467] : memref<72x32xf32, #tpu.memory_space<vmem>>, vector<58x32xf32>
    %c7_468 = arith.constant 7 : index
    %c0_469 = arith.constant 0 : index
    %460 = vector.load %arg24[%c7_468, %c0_469] : memref<72x32xf32, #tpu.memory_space<vmem>>, vector<58x32xf32>
    %461 = vector.extract_strided_slice %448 {offsets = [0, 0], sizes = [58, 32], strides = [1, 1]} : vector<58x224xf32> to vector<58x32xf32>
    %462 = vector.extract_strided_slice %453 {offsets = [0, 0], sizes = [58, 32], strides = [1, 1]} : vector<58x128xf32> to vector<58x32xf32>
    %463 = arith.addf %461, %462 : vector<58x32xf32>
    %464 = arith.negf %463 : vector<58x32xf32>
    %465 = math.exp %464 : vector<58x32xf32>
    %cst_470 = arith.constant 1.000000e+00 : f32
    %466 = vector.broadcast %cst_470 : f32 to vector<58x32xf32>
    %467 = arith.addf %466, %465 : vector<58x32xf32>
    %468 = arith.divf %466, %467 : vector<58x32xf32>
    %469 = vector.extract_strided_slice %448 {offsets = [0, 32], sizes = [58, 32], strides = [1, 1]} : vector<58x224xf32> to vector<58x32xf32>
    %470 = vector.extract_strided_slice %453 {offsets = [0, 32], sizes = [58, 32], strides = [1, 1]} : vector<58x128xf32> to vector<58x32xf32>
    %471 = arith.addf %469, %470 : vector<58x32xf32>
    %cst_471 = arith.constant 1.000000e+00 : f32
    %472 = vector.broadcast %cst_471 : f32 to vector<58x32xf32>
    %473 = arith.addf %471, %472 : vector<58x32xf32>
    %474 = arith.negf %473 : vector<58x32xf32>
    %475 = math.exp %474 : vector<58x32xf32>
    %cst_472 = arith.constant 1.000000e+00 : f32
    %476 = vector.broadcast %cst_472 : f32 to vector<58x32xf32>
    %477 = arith.addf %476, %475 : vector<58x32xf32>
    %478 = arith.divf %476, %477 : vector<58x32xf32>
    %479 = vector.extract_strided_slice %448 {offsets = [0, 64], sizes = [58, 32], strides = [1, 1]} : vector<58x224xf32> to vector<58x32xf32>
    %480 = vector.extract_strided_slice %453 {offsets = [0, 64], sizes = [58, 32], strides = [1, 1]} : vector<58x128xf32> to vector<58x32xf32>
    %481 = arith.addf %479, %480 : vector<58x32xf32>
    %482 = math.tanh %481 : vector<58x32xf32>
    %483 = arith.mulf %478, %459 : vector<58x32xf32>
    %484 = arith.mulf %468, %482 : vector<58x32xf32>
    %485 = arith.addf %483, %484 : vector<58x32xf32>
    %486 = vector.broadcast %3 : vector<58x1xf32> to vector<58x32xf32>
    %487 = arith.mulf %485, %486 : vector<58x32xf32>
    %488 = vector.extract_strided_slice %448 {offsets = [0, 96], sizes = [58, 32], strides = [1, 1]} : vector<58x224xf32> to vector<58x32xf32>
    %489 = vector.extract_strided_slice %458 {offsets = [0, 0], sizes = [58, 32], strides = [1, 1]} : vector<58x96xf32> to vector<58x32xf32>
    %490 = arith.addf %488, %489 : vector<58x32xf32>
    %491 = arith.negf %490 : vector<58x32xf32>
    %492 = math.exp %491 : vector<58x32xf32>
    %cst_473 = arith.constant 1.000000e+00 : f32
    %493 = vector.broadcast %cst_473 : f32 to vector<58x32xf32>
    %494 = arith.addf %493, %492 : vector<58x32xf32>
    %495 = arith.divf %493, %494 : vector<58x32xf32>
    %496 = vector.extract_strided_slice %448 {offsets = [0, 128], sizes = [58, 32], strides = [1, 1]} : vector<58x224xf32> to vector<58x32xf32>
    %497 = vector.extract_strided_slice %458 {offsets = [0, 32], sizes = [58, 32], strides = [1, 1]} : vector<58x96xf32> to vector<58x32xf32>
    %498 = arith.addf %496, %497 : vector<58x32xf32>
    %cst_474 = arith.constant 1.000000e+00 : f32
    %499 = vector.broadcast %cst_474 : f32 to vector<58x32xf32>
    %500 = arith.addf %498, %499 : vector<58x32xf32>
    %501 = arith.negf %500 : vector<58x32xf32>
    %502 = math.exp %501 : vector<58x32xf32>
    %cst_475 = arith.constant 1.000000e+00 : f32
    %503 = vector.broadcast %cst_475 : f32 to vector<58x32xf32>
    %504 = arith.addf %503, %502 : vector<58x32xf32>
    %505 = arith.divf %503, %504 : vector<58x32xf32>
    %506 = vector.extract_strided_slice %448 {offsets = [0, 160], sizes = [58, 32], strides = [1, 1]} : vector<58x224xf32> to vector<58x32xf32>
    %507 = vector.extract_strided_slice %458 {offsets = [0, 64], sizes = [58, 32], strides = [1, 1]} : vector<58x96xf32> to vector<58x32xf32>
    %508 = arith.addf %506, %507 : vector<58x32xf32>
    %509 = math.tanh %508 : vector<58x32xf32>
    %510 = arith.mulf %505, %460 : vector<58x32xf32>
    %511 = arith.mulf %495, %509 : vector<58x32xf32>
    %512 = arith.addf %510, %511 : vector<58x32xf32>
    %513 = vector.broadcast %3 : vector<58x1xf32> to vector<58x32xf32>
    %514 = arith.mulf %512, %513 : vector<58x32xf32>
    %515 = vector.extract_strided_slice %448 {offsets = [0, 192], sizes = [58, 32], strides = [1, 1]} : vector<58x224xf32> to vector<58x32xf32>
    %516 = vector.extract_strided_slice %453 {offsets = [0, 96], sizes = [58, 32], strides = [1, 1]} : vector<58x128xf32> to vector<58x32xf32>
    %517 = arith.addf %515, %516 : vector<58x32xf32>
    %c7_476 = arith.constant 7 : index
    %c0_477 = arith.constant 0 : index
    %518 = vector.load %arg23[%c7_476, %c0_477] : memref<72x32xf32, #tpu.memory_space<vmem>>, vector<58x32xf32>
    tpu.vector_store %arg23[%c7_476, %c0_477], %487 {strides = array<i32>} : memref<72x32xf32, #tpu.memory_space<vmem>>, vector<58x32xf32>,
    %c7_478 = arith.constant 7 : index
    %c0_479 = arith.constant 0 : index
    %519 = vector.load %arg24[%c7_478, %c0_479] : memref<72x32xf32, #tpu.memory_space<vmem>>, vector<58x32xf32>
    tpu.vector_store %arg24[%c7_478, %c0_479], %514 {strides = array<i32>} : memref<72x32xf32, #tpu.memory_space<vmem>>, vector<58x32xf32>,
    %cst_480 = arith.constant 0.000000e+00 : f32
    %520 = vector.broadcast %cst_480 : f32 to vector<58x32xf32>
    %c0_481 = arith.constant 0 : index
    %c0_482 = arith.constant 0 : index
    %521 = vector.load %arg23[%c0_481, %c0_482] : memref<72x32xf32, #tpu.memory_space<vmem>>, vector<58x32xf32>
    %c0_483 = arith.constant 0 : index
    %c0_484 = arith.constant 0 : index
    %c0_485 = arith.constant 0 : index
    %522 = vector.load %arg14[%c0_483, %c0_484, %c0_485] : memref<9x32x32xf32, #tpu.memory_space<vmem>>, vector<1x32x32xf32>
    %523 = vector.shape_cast %522 : vector<1x32x32xf32> to vector<32x32xf32>
    %cst_486 = arith.constant dense<0.000000e+00> : vector<58x32xf32>
    %524 = tpu.matmul %521, %523, %cst_486 {dimension_numbers = #tpu.dot_dimension_numbers<[1], [0], [0], [1], [0, 0, 1, 1], [], []>} : vector<58x32xf32>, vector<32x32xf32>, vector<58x32xf32> -> vector<58x32xf32>
    %525 = arith.addf %520, %524 : vector<58x32xf32>
    %c0_487 = arith.constant 0 : index
    %c0_488 = arith.constant 0 : index
    %526 = vector.load %arg24[%c0_487, %c0_488] : memref<72x32xf32, #tpu.memory_space<vmem>>, vector<58x32xf32>
    %c0_489 = arith.constant 0 : index
    %c0_490 = arith.constant 0 : index
    %c0_491 = arith.constant 0 : index
    %527 = vector.load %arg15[%c0_489, %c0_490, %c0_491] : memref<9x32x32xf32, #tpu.memory_space<vmem>>, vector<1x32x32xf32>
    %528 = vector.shape_cast %527 : vector<1x32x32xf32> to vector<32x32xf32>
    %cst_492 = arith.constant dense<0.000000e+00> : vector<58x32xf32>
    %529 = tpu.matmul %526, %528, %cst_492 {dimension_numbers = #tpu.dot_dimension_numbers<[1], [0], [0], [1], [0, 0, 1, 1], [], []>} : vector<58x32xf32>, vector<32x32xf32>, vector<58x32xf32> -> vector<58x32xf32>
    %530 = arith.addf %525, %529 : vector<58x32xf32>
    %c1_493 = arith.constant 1 : index
    %c0_494 = arith.constant 0 : index
    %531 = vector.load %arg23[%c1_493, %c0_494] : memref<72x32xf32, #tpu.memory_space<vmem>>, vector<58x32xf32>
    %c1_495 = arith.constant 1 : index
    %c0_496 = arith.constant 0 : index
    %c0_497 = arith.constant 0 : index
    %532 = vector.load %arg14[%c1_495, %c0_496, %c0_497] : memref<9x32x32xf32, #tpu.memory_space<vmem>>, vector<1x32x32xf32>
    %533 = vector.shape_cast %532 : vector<1x32x32xf32> to vector<32x32xf32>
    %cst_498 = arith.constant dense<0.000000e+00> : vector<58x32xf32>
    %534 = tpu.matmul %531, %533, %cst_498 {dimension_numbers = #tpu.dot_dimension_numbers<[1], [0], [0], [1], [0, 0, 1, 1], [], []>} : vector<58x32xf32>, vector<32x32xf32>, vector<58x32xf32> -> vector<58x32xf32>
    %535 = arith.addf %530, %534 : vector<58x32xf32>
    %c1_499 = arith.constant 1 : index
    %c0_500 = arith.constant 0 : index
    %536 = vector.load %arg24[%c1_499, %c0_500] : memref<72x32xf32, #tpu.memory_space<vmem>>, vector<58x32xf32>
    %c1_501 = arith.constant 1 : index
    %c0_502 = arith.constant 0 : index
    %c0_503 = arith.constant 0 : index
    %537 = vector.load %arg15[%c1_501, %c0_502, %c0_503] : memref<9x32x32xf32, #tpu.memory_space<vmem>>, vector<1x32x32xf32>
    %538 = vector.shape_cast %537 : vector<1x32x32xf32> to vector<32x32xf32>
    %cst_504 = arith.constant dense<0.000000e+00> : vector<58x32xf32>
    %539 = tpu.matmul %536, %538, %cst_504 {dimension_numbers = #tpu.dot_dimension_numbers<[1], [0], [0], [1], [0, 0, 1, 1], [], []>} : vector<58x32xf32>, vector<32x32xf32>, vector<58x32xf32> -> vector<58x32xf32>
    %540 = arith.addf %535, %539 : vector<58x32xf32>
    %c2_505 = arith.constant 2 : index
    %c0_506 = arith.constant 0 : index
    %541 = vector.load %arg23[%c2_505, %c0_506] : memref<72x32xf32, #tpu.memory_space<vmem>>, vector<58x32xf32>
    %c2_507 = arith.constant 2 : index
    %c0_508 = arith.constant 0 : index
    %c0_509 = arith.constant 0 : index
    %542 = vector.load %arg14[%c2_507, %c0_508, %c0_509] : memref<9x32x32xf32, #tpu.memory_space<vmem>>, vector<1x32x32xf32>
    %543 = vector.shape_cast %542 : vector<1x32x32xf32> to vector<32x32xf32>
    %cst_510 = arith.constant dense<0.000000e+00> : vector<58x32xf32>
    %544 = tpu.matmul %541, %543, %cst_510 {dimension_numbers = #tpu.dot_dimension_numbers<[1], [0], [0], [1], [0, 0, 1, 1], [], []>} : vector<58x32xf32>, vector<32x32xf32>, vector<58x32xf32> -> vector<58x32xf32>
    %545 = arith.addf %540, %544 : vector<58x32xf32>
    %c2_511 = arith.constant 2 : index
    %c0_512 = arith.constant 0 : index
    %546 = vector.load %arg24[%c2_511, %c0_512] : memref<72x32xf32, #tpu.memory_space<vmem>>, vector<58x32xf32>
    %c2_513 = arith.constant 2 : index
    %c0_514 = arith.constant 0 : index
    %c0_515 = arith.constant 0 : index
    %547 = vector.load %arg15[%c2_513, %c0_514, %c0_515] : memref<9x32x32xf32, #tpu.memory_space<vmem>>, vector<1x32x32xf32>
    %548 = vector.shape_cast %547 : vector<1x32x32xf32> to vector<32x32xf32>
    %cst_516 = arith.constant dense<0.000000e+00> : vector<58x32xf32>
    %549 = tpu.matmul %546, %548, %cst_516 {dimension_numbers = #tpu.dot_dimension_numbers<[1], [0], [0], [1], [0, 0, 1, 1], [], []>} : vector<58x32xf32>, vector<32x32xf32>, vector<58x32xf32> -> vector<58x32xf32>
    %550 = arith.addf %545, %549 : vector<58x32xf32>
    %c6_517 = arith.constant 6 : index
    %c0_518 = arith.constant 0 : index
    %551 = vector.load %arg23[%c6_517, %c0_518] : memref<72x32xf32, #tpu.memory_space<vmem>>, vector<58x32xf32>
    %c3_519 = arith.constant 3 : index
    %c0_520 = arith.constant 0 : index
    %c0_521 = arith.constant 0 : index
    %552 = vector.load %arg14[%c3_519, %c0_520, %c0_521] : memref<9x32x32xf32, #tpu.memory_space<vmem>>, vector<1x32x32xf32>
    %553 = vector.shape_cast %552 : vector<1x32x32xf32> to vector<32x32xf32>
    %cst_522 = arith.constant dense<0.000000e+00> : vector<58x32xf32>
    %554 = tpu.matmul %551, %553, %cst_522 {dimension_numbers = #tpu.dot_dimension_numbers<[1], [0], [0], [1], [0, 0, 1, 1], [], []>} : vector<58x32xf32>, vector<32x32xf32>, vector<58x32xf32> -> vector<58x32xf32>
    %555 = arith.addf %550, %554 : vector<58x32xf32>
    %c6_523 = arith.constant 6 : index
    %c0_524 = arith.constant 0 : index
    %556 = vector.load %arg24[%c6_523, %c0_524] : memref<72x32xf32, #tpu.memory_space<vmem>>, vector<58x32xf32>
    %c3_525 = arith.constant 3 : index
    %c0_526 = arith.constant 0 : index
    %c0_527 = arith.constant 0 : index
    %557 = vector.load %arg15[%c3_525, %c0_526, %c0_527] : memref<9x32x32xf32, #tpu.memory_space<vmem>>, vector<1x32x32xf32>
    %558 = vector.shape_cast %557 : vector<1x32x32xf32> to vector<32x32xf32>
    %cst_528 = arith.constant dense<0.000000e+00> : vector<58x32xf32>
    %559 = tpu.matmul %556, %558, %cst_528 {dimension_numbers = #tpu.dot_dimension_numbers<[1], [0], [0], [1], [0, 0, 1, 1], [], []>} : vector<58x32xf32>, vector<32x32xf32>, vector<58x32xf32> -> vector<58x32xf32>
    %560 = arith.addf %555, %559 : vector<58x32xf32>
    %c7_529 = arith.constant 7 : index
    %c0_530 = arith.constant 0 : index
    %561 = vector.load %arg23[%c7_529, %c0_530] : memref<72x32xf32, #tpu.memory_space<vmem>>, vector<58x32xf32>
    %c4_531 = arith.constant 4 : index
    %c0_532 = arith.constant 0 : index
    %c0_533 = arith.constant 0 : index
    %562 = vector.load %arg14[%c4_531, %c0_532, %c0_533] : memref<9x32x32xf32, #tpu.memory_space<vmem>>, vector<1x32x32xf32>
    %563 = vector.shape_cast %562 : vector<1x32x32xf32> to vector<32x32xf32>
    %cst_534 = arith.constant dense<0.000000e+00> : vector<58x32xf32>
    %564 = tpu.matmul %561, %563, %cst_534 {dimension_numbers = #tpu.dot_dimension_numbers<[1], [0], [0], [1], [0, 0, 1, 1], [], []>} : vector<58x32xf32>, vector<32x32xf32>, vector<58x32xf32> -> vector<58x32xf32>
    %565 = arith.addf %560, %564 : vector<58x32xf32>
    %c7_535 = arith.constant 7 : index
    %c0_536 = arith.constant 0 : index
    %566 = vector.load %arg24[%c7_535, %c0_536] : memref<72x32xf32, #tpu.memory_space<vmem>>, vector<58x32xf32>
    %c4_537 = arith.constant 4 : index
    %c0_538 = arith.constant 0 : index
    %c0_539 = arith.constant 0 : index
    %567 = vector.load %arg15[%c4_537, %c0_538, %c0_539] : memref<9x32x32xf32, #tpu.memory_space<vmem>>, vector<1x32x32xf32>
    %568 = vector.shape_cast %567 : vector<1x32x32xf32> to vector<32x32xf32>
    %cst_540 = arith.constant dense<0.000000e+00> : vector<58x32xf32>
    %569 = tpu.matmul %566, %568, %cst_540 {dimension_numbers = #tpu.dot_dimension_numbers<[1], [0], [0], [1], [0, 0, 1, 1], [], []>} : vector<58x32xf32>, vector<32x32xf32>, vector<58x32xf32> -> vector<58x32xf32>
    %570 = arith.addf %565, %569 : vector<58x32xf32>
    %c8_541 = arith.constant 8 : index
    %c0_542 = arith.constant 0 : index
    %571 = vector.load %arg23[%c8_541, %c0_542] : memref<72x32xf32, #tpu.memory_space<vmem>>, vector<58x32xf32>
    %c5_543 = arith.constant 5 : index
    %c0_544 = arith.constant 0 : index
    %c0_545 = arith.constant 0 : index
    %572 = vector.load %arg14[%c5_543, %c0_544, %c0_545] : memref<9x32x32xf32, #tpu.memory_space<vmem>>, vector<1x32x32xf32>
    %573 = vector.shape_cast %572 : vector<1x32x32xf32> to vector<32x32xf32>
    %cst_546 = arith.constant dense<0.000000e+00> : vector<58x32xf32>
    %574 = tpu.matmul %571, %573, %cst_546 {dimension_numbers = #tpu.dot_dimension_numbers<[1], [0], [0], [1], [0, 0, 1, 1], [], []>} : vector<58x32xf32>, vector<32x32xf32>, vector<58x32xf32> -> vector<58x32xf32>
    %575 = arith.addf %570, %574 : vector<58x32xf32>
    %c8_547 = arith.constant 8 : index
    %c0_548 = arith.constant 0 : index
    %576 = vector.load %arg24[%c8_547, %c0_548] : memref<72x32xf32, #tpu.memory_space<vmem>>, vector<58x32xf32>
    %c5_549 = arith.constant 5 : index
    %c0_550 = arith.constant 0 : index
    %c0_551 = arith.constant 0 : index
    %577 = vector.load %arg15[%c5_549, %c0_550, %c0_551] : memref<9x32x32xf32, #tpu.memory_space<vmem>>, vector<1x32x32xf32>
    %578 = vector.shape_cast %577 : vector<1x32x32xf32> to vector<32x32xf32>
    %cst_552 = arith.constant dense<0.000000e+00> : vector<58x32xf32>
    %579 = tpu.matmul %576, %578, %cst_552 {dimension_numbers = #tpu.dot_dimension_numbers<[1], [0], [0], [1], [0, 0, 1, 1], [], []>} : vector<58x32xf32>, vector<32x32xf32>, vector<58x32xf32> -> vector<58x32xf32>
    %580 = arith.addf %575, %579 : vector<58x32xf32>
    %c12_553 = arith.constant 12 : index
    %c0_554 = arith.constant 0 : index
    %581 = vector.load %arg23[%c12_553, %c0_554] : memref<72x32xf32, #tpu.memory_space<vmem>>, vector<58x32xf32>
    %c6_555 = arith.constant 6 : index
    %c0_556 = arith.constant 0 : index
    %c0_557 = arith.constant 0 : index
    %582 = vector.load %arg14[%c6_555, %c0_556, %c0_557] : memref<9x32x32xf32, #tpu.memory_space<vmem>>, vector<1x32x32xf32>
    %583 = vector.shape_cast %582 : vector<1x32x32xf32> to vector<32x32xf32>
    %cst_558 = arith.constant dense<0.000000e+00> : vector<58x32xf32>
    %584 = tpu.matmul %581, %583, %cst_558 {dimension_numbers = #tpu.dot_dimension_numbers<[1], [0], [0], [1], [0, 0, 1, 1], [], []>} : vector<58x32xf32>, vector<32x32xf32>, vector<58x32xf32> -> vector<58x32xf32>
    %585 = arith.addf %580, %584 : vector<58x32xf32>
    %c12_559 = arith.constant 12 : index
    %c0_560 = arith.constant 0 : index
    %586 = vector.load %arg24[%c12_559, %c0_560] : memref<72x32xf32, #tpu.memory_space<vmem>>, vector<58x32xf32>
    %c6_561 = arith.constant 6 : index
    %c0_562 = arith.constant 0 : index
    %c0_563 = arith.constant 0 : index
    %587 = vector.load %arg15[%c6_561, %c0_562, %c0_563] : memref<9x32x32xf32, #tpu.memory_space<vmem>>, vector<1x32x32xf32>
    %588 = vector.shape_cast %587 : vector<1x32x32xf32> to vector<32x32xf32>
    %cst_564 = arith.constant dense<0.000000e+00> : vector<58x32xf32>
    %589 = tpu.matmul %586, %588, %cst_564 {dimension_numbers = #tpu.dot_dimension_numbers<[1], [0], [0], [1], [0, 0, 1, 1], [], []>} : vector<58x32xf32>, vector<32x32xf32>, vector<58x32xf32> -> vector<58x32xf32>
    %590 = arith.addf %585, %589 : vector<58x32xf32>
    %c13_565 = arith.constant 13 : index
    %c0_566 = arith.constant 0 : index
    %591 = vector.load %arg23[%c13_565, %c0_566] : memref<72x32xf32, #tpu.memory_space<vmem>>, vector<58x32xf32>
    %c7_567 = arith.constant 7 : index
    %c0_568 = arith.constant 0 : index
    %c0_569 = arith.constant 0 : index
    %592 = vector.load %arg14[%c7_567, %c0_568, %c0_569] : memref<9x32x32xf32, #tpu.memory_space<vmem>>, vector<1x32x32xf32>
    %593 = vector.shape_cast %592 : vector<1x32x32xf32> to vector<32x32xf32>
    %cst_570 = arith.constant dense<0.000000e+00> : vector<58x32xf32>
    %594 = tpu.matmul %591, %593, %cst_570 {dimension_numbers = #tpu.dot_dimension_numbers<[1], [0], [0], [1], [0, 0, 1, 1], [], []>} : vector<58x32xf32>, vector<32x32xf32>, vector<58x32xf32> -> vector<58x32xf32>
    %595 = arith.addf %590, %594 : vector<58x32xf32>
    %c13_571 = arith.constant 13 : index
    %c0_572 = arith.constant 0 : index
    %596 = vector.load %arg24[%c13_571, %c0_572] : memref<72x32xf32, #tpu.memory_space<vmem>>, vector<58x32xf32>
    %c7_573 = arith.constant 7 : index
    %c0_574 = arith.constant 0 : index
    %c0_575 = arith.constant 0 : index
    %597 = vector.load %arg15[%c7_573, %c0_574, %c0_575] : memref<9x32x32xf32, #tpu.memory_space<vmem>>, vector<1x32x32xf32>
    %598 = vector.shape_cast %597 : vector<1x32x32xf32> to vector<32x32xf32>
    %cst_576 = arith.constant dense<0.000000e+00> : vector<58x32xf32>
    %599 = tpu.matmul %596, %598, %cst_576 {dimension_numbers = #tpu.dot_dimension_numbers<[1], [0], [0], [1], [0, 0, 1, 1], [], []>} : vector<58x32xf32>, vector<32x32xf32>, vector<58x32xf32> -> vector<58x32xf32>
    %600 = arith.addf %595, %599 : vector<58x32xf32>
    %c14_577 = arith.constant 14 : index
    %c0_578 = arith.constant 0 : index
    %601 = vector.load %arg23[%c14_577, %c0_578] : memref<72x32xf32, #tpu.memory_space<vmem>>, vector<58x32xf32>
    %c8_579 = arith.constant 8 : index
    %c0_580 = arith.constant 0 : index
    %c0_581 = arith.constant 0 : index
    %602 = vector.load %arg14[%c8_579, %c0_580, %c0_581] : memref<9x32x32xf32, #tpu.memory_space<vmem>>, vector<1x32x32xf32>
    %603 = vector.shape_cast %602 : vector<1x32x32xf32> to vector<32x32xf32>
    %cst_582 = arith.constant dense<0.000000e+00> : vector<58x32xf32>
    %604 = tpu.matmul %601, %603, %cst_582 {dimension_numbers = #tpu.dot_dimension_numbers<[1], [0], [0], [1], [0, 0, 1, 1], [], []>} : vector<58x32xf32>, vector<32x32xf32>, vector<58x32xf32> -> vector<58x32xf32>
    %605 = arith.addf %600, %604 : vector<58x32xf32>
    %c14_583 = arith.constant 14 : index
    %c0_584 = arith.constant 0 : index
    %606 = vector.load %arg24[%c14_583, %c0_584] : memref<72x32xf32, #tpu.memory_space<vmem>>, vector<58x32xf32>
    %c8_585 = arith.constant 8 : index
    %c0_586 = arith.constant 0 : index
    %c0_587 = arith.constant 0 : index
    %607 = vector.load %arg15[%c8_585, %c0_586, %c0_587] : memref<9x32x32xf32, #tpu.memory_space<vmem>>, vector<1x32x32xf32>
    %608 = vector.shape_cast %607 : vector<1x32x32xf32> to vector<32x32xf32>
    %cst_588 = arith.constant dense<0.000000e+00> : vector<58x32xf32>
    %609 = tpu.matmul %606, %608, %cst_588 {dimension_numbers = #tpu.dot_dimension_numbers<[1], [0], [0], [1], [0, 0, 1, 1], [], []>} : vector<58x32xf32>, vector<32x32xf32>, vector<58x32xf32> -> vector<58x32xf32>
    %610 = arith.addf %605, %609 : vector<58x32xf32>
    %611 = arith.addf %517, %610 : vector<58x32xf32>
    %612 = arith.negf %611 : vector<58x32xf32>
    %613 = math.exp %612 : vector<58x32xf32>
    %cst_589 = arith.constant 1.000000e+00 : f32
    %614 = vector.broadcast %cst_589 : f32 to vector<58x32xf32>
    %615 = arith.addf %614, %613 : vector<58x32xf32>
    %616 = arith.divf %614, %615 : vector<58x32xf32>
    %c0_590 = arith.constant 0 : index
    %c0_591 = arith.constant 0 : index
    %617 = vector.load %arg16[%c0_590, %c0_591] : memref<32x32xf32, #tpu.memory_space<vmem>>, vector<32x32xf32>
    %cst_592 = arith.constant dense<0.000000e+00> : vector<58x32xf32>
    %618 = tpu.matmul %487, %617, %cst_592 {dimension_numbers = #tpu.dot_dimension_numbers<[1], [0], [0], [1], [0, 0, 1, 1], [], []>} : vector<58x32xf32>, vector<32x32xf32>, vector<58x32xf32> -> vector<58x32xf32>
    %c0_593 = arith.constant 0 : index
    %c0_594 = arith.constant 0 : index
    %619 = vector.load %arg17[%c0_593, %c0_594] : memref<32x32xf32, #tpu.memory_space<vmem>>, vector<32x32xf32>
    %cst_595 = arith.constant dense<0.000000e+00> : vector<58x32xf32>
    %620 = tpu.matmul %514, %619, %cst_595 {dimension_numbers = #tpu.dot_dimension_numbers<[1], [0], [0], [1], [0, 0, 1, 1], [], []>} : vector<58x32xf32>, vector<32x32xf32>, vector<58x32xf32> -> vector<58x32xf32>
    %621 = arith.addf %618, %620 : vector<58x32xf32>
    %622 = math.tanh %621 : vector<58x32xf32>
    %623 = arith.mulf %616, %622 : vector<58x32xf32>
    %c7_596 = arith.constant 7 : index
    %c0_597 = arith.constant 0 : index
    %624 = vector.load %arg22[%c7_596, %c0_597] : memref<72x32xf32, #tpu.memory_space<vmem>>, vector<58x32xf32>
    tpu.vector_store %arg22[%c7_596, %c0_597], %623 {strides = array<i32>} : memref<72x32xf32, #tpu.memory_space<vmem>>, vector<58x32xf32>,
    %c0_598 = arith.constant 0 : index
    %c0_599 = arith.constant 0 : index
    %625 = vector.load %arg18[%c0_598, %c0_599] : memref<32x16xf32, #tpu.memory_space<vmem>>, vector<32x16xf32>
    %cst_600 = arith.constant dense<0.000000e+00> : vector<58x16xf32>
    %626 = tpu.matmul %623, %625, %cst_600 {dimension_numbers = #tpu.dot_dimension_numbers<[1], [0], [0], [1], [0, 0, 1, 1], [], []>} : vector<58x32xf32>, vector<32x16xf32>, vector<58x16xf32> -> vector<58x16xf32>
    %c7_601 = arith.constant 7 : index
    %c0_602 = arith.constant 0 : index
    %627 = vector.load %arg25[%c7_601, %c0_602] : memref<72x16xf32, #tpu.memory_space<vmem>>, vector<58x16xf32>
    tpu.vector_store %arg25[%c7_601, %c0_602], %626 {strides = array<i32>} : memref<72x16xf32, #tpu.memory_space<vmem>>, vector<58x16xf32>,
    %c0_603 = arith.constant 0 : index
    %c0_604 = arith.constant 0 : index
    %628 = vector.load %arg25[%c0_603, %c0_604] : memref<72x16xf32, #tpu.memory_space<vmem>>, vector<72x16xf32>
    %c0_605 = arith.constant 0 : index
    %c0_606 = arith.constant 0 : index
    %c0_607 = arith.constant 0 : index
    %629 = vector.load %arg19[%c0_605, %c0_606, %c0_607] : memref<1x72x16xf32, #tpu.memory_space<vmem>>, vector<1x72x16xf32>
    %630 = vector.shape_cast %629 : vector<1x72x16xf32> to vector<72x16xf32>
    %631 = vector.shape_cast %628 : vector<72x16xf32> to vector<1x72x16xf32>
    tpu.vector_store %arg19[%c0_605, %c0_606, %c0_607], %631 {strides = array<i32>} : memref<1x72x16xf32, #tpu.memory_space<vmem>>, vector<1x72x16xf32>,
    return
  }
  func.func @transform_0(%arg0: i32) -> (i32, i32, i32) {
    %c0_i32 = arith.constant 0 : i32
    %c0_i32_0 = arith.constant 0 : i32
    %c0_i32_1 = arith.constant 0 : i32
    return %arg0, %c0_i32, %c0_i32_0 : i32, i32, i32
  }
  func.func @transform_1(%arg0: i32) -> (i32, i32, i32) {
    %c0_i32 = arith.constant 0 : i32
    %c0_i32_0 = arith.constant 0 : i32
    %c0_i32_1 = arith.constant 0 : i32
    return %arg0, %c0_i32, %c0_i32_0 : i32, i32, i32
  }
  func.func @transform_2(%arg0: i32) -> (i32, i32) {
    %c0_i32 = arith.constant 0 : i32
    %c0_i32_0 = arith.constant 0 : i32
    %c0_i32_1 = arith.constant 0 : i32
    return %c0_i32, %c0_i32_0 : i32, i32
  }
  func.func @transform_3(%arg0: i32) -> (i32, i32, i32) {
    %c0_i32 = arith.constant 0 : i32
    %c0_i32_0 = arith.constant 0 : i32
    %c0_i32_1 = arith.constant 0 : i32
    %c0_i32_2 = arith.constant 0 : i32
    return %c0_i32, %c0_i32_0, %c0_i32_1 : i32, i32, i32
  }
  func.func @transform_4(%arg0: i32) -> (i32, i32, i32) {
    %c0_i32 = arith.constant 0 : i32
    %c0_i32_0 = arith.constant 0 : i32
    %c0_i32_1 = arith.constant 0 : i32
    %c0_i32_2 = arith.constant 0 : i32
    return %c0_i32, %c0_i32_0, %c0_i32_1 : i32, i32, i32
  }
  func.func @transform_5(%arg0: i32) -> (i32, i32, i32) {
    %c0_i32 = arith.constant 0 : i32
    %c0_i32_0 = arith.constant 0 : i32
    %c0_i32_1 = arith.constant 0 : i32
    %c0_i32_2 = arith.constant 0 : i32
    return %c0_i32, %c0_i32_0, %c0_i32_1 : i32, i32, i32
  }
  func.func @transform_6(%arg0: i32) -> (i32, i32, i32) {
    %c0_i32 = arith.constant 0 : i32
    %c0_i32_0 = arith.constant 0 : i32
    %c0_i32_1 = arith.constant 0 : i32
    %c0_i32_2 = arith.constant 0 : i32
    return %c0_i32, %c0_i32_0, %c0_i32_1 : i32, i32, i32
  }
  func.func @transform_7(%arg0: i32) -> (i32, i32, i32) {
    %c0_i32 = arith.constant 0 : i32
    %c0_i32_0 = arith.constant 0 : i32
    %c0_i32_1 = arith.constant 0 : i32
    %c0_i32_2 = arith.constant 0 : i32
    return %c0_i32, %c0_i32_0, %c0_i32_1 : i32, i32, i32
  }
  func.func @transform_8(%arg0: i32) -> (i32, i32) {
    %c0_i32 = arith.constant 0 : i32
    %c0_i32_0 = arith.constant 0 : i32
    %c0_i32_1 = arith.constant 0 : i32
    return %c0_i32, %c0_i32_0 : i32, i32
  }
  func.func @transform_9(%arg0: i32) -> (i32, i32) {
    %c0_i32 = arith.constant 0 : i32
    %c0_i32_0 = arith.constant 0 : i32
    %c0_i32_1 = arith.constant 0 : i32
    return %c0_i32, %c0_i32_0 : i32, i32
  }
  func.func @transform_10(%arg0: i32) -> (i32, i32, i32) {
    %c0_i32 = arith.constant 0 : i32
    %c0_i32_0 = arith.constant 0 : i32
    %c0_i32_1 = arith.constant 0 : i32
    %c0_i32_2 = arith.constant 0 : i32
    return %c0_i32, %c0_i32_0, %c0_i32_1 : i32, i32, i32
  }
  func.func @transform_11(%arg0: i32) -> (i32, i32, i32) {
    %c0_i32 = arith.constant 0 : i32
    %c0_i32_0 = arith.constant 0 : i32
    %c0_i32_1 = arith.constant 0 : i32
    %c0_i32_2 = arith.constant 0 : i32
    return %c0_i32, %c0_i32_0, %c0_i32_1 : i32, i32, i32
  }
  func.func @transform_12(%arg0: i32) -> (i32, i32, i32) {
    %c0_i32 = arith.constant 0 : i32
    %c0_i32_0 = arith.constant 0 : i32
    %c0_i32_1 = arith.constant 0 : i32
    %c0_i32_2 = arith.constant 0 : i32
    return %c0_i32, %c0_i32_0, %c0_i32_1 : i32, i32, i32
  }
  func.func @transform_13(%arg0: i32) -> (i32, i32, i32) {
    %c0_i32 = arith.constant 0 : i32
    %c0_i32_0 = arith.constant 0 : i32
    %c0_i32_1 = arith.constant 0 : i32
    %c0_i32_2 = arith.constant 0 : i32
    return %c0_i32, %c0_i32_0, %c0_i32_1 : i32, i32, i32
  }
  func.func @transform_14(%arg0: i32) -> (i32, i32, i32) {
    %c0_i32 = arith.constant 0 : i32
    %c0_i32_0 = arith.constant 0 : i32
    %c0_i32_1 = arith.constant 0 : i32
    %c0_i32_2 = arith.constant 0 : i32
    return %c0_i32, %c0_i32_0, %c0_i32_1 : i32, i32, i32
  }
  func.func @transform_15(%arg0: i32) -> (i32, i32) {
    %c0_i32 = arith.constant 0 : i32
    %c0_i32_0 = arith.constant 0 : i32
    %c0_i32_1 = arith.constant 0 : i32
    return %c0_i32, %c0_i32_0 : i32, i32
  }
  func.func @transform_16(%arg0: i32) -> (i32, i32) {
    %c0_i32 = arith.constant 0 : i32
    %c0_i32_0 = arith.constant 0 : i32
    %c0_i32_1 = arith.constant 0 : i32
    return %c0_i32, %c0_i32_0 : i32, i32
  }
  func.func @transform_17(%arg0: i32) -> (i32, i32) {
    %c0_i32 = arith.constant 0 : i32
    %c0_i32_0 = arith.constant 0 : i32
    %c0_i32_1 = arith.constant 0 : i32
    return %c0_i32, %c0_i32_0 : i32, i32
  }
  func.func @transform_18(%arg0: i32) -> (i32, i32, i32) {
    %c0_i32 = arith.constant 0 : i32
    %c0_i32_0 = arith.constant 0 : i32
    %c0_i32_1 = arith.constant 0 : i32
    return %arg0, %c0_i32, %c0_i32_0 : i32, i32, i32
  }
}

</mosaic_0001>

<bundles_post_ra>
// kernel: tile.6
= control target key start
LH: loop header
LB: loop body
LE: loop exit
PB: predicated region body
PF: predicated region fallthrough
CT: control target
= control target key end

     0   :  { %s22_s0 = inlined_call_operand.vmem [shape: f32[36], index: 0, kind: input, shape index: {}]   ;;  %s23_s1 = inlined_call_operand.vmem [shape: f32[2,36], index: 1, kind: output, shape index: {}]  }
   0x1   :  { %v4_v0 = vld [vmem:[%s22_s0] ss:$0 sm:$0xff] }
   0x2   :  { %5 = vst [vmem:[%s23_s1] sm:$0x3] %v4_v0 }

// kernel: tile.7
= control target key start
LH: loop header
LB: loop body
LE: loop exit
PB: predicated region body
PF: predicated region fallthrough
CT: control target
= control target key end

     0   :  { %vm7_vm0 = vcmask 293888   ;;  %vm13_vm1 = vcmask 589088   ;;  %s39_s0 = inlined_call_operand.vmem [shape: f32[2,36], index: 0, kind: input, shape index: {}]   ;;  %s40_s1 = inlined_call_operand.vmem [shape: f32[72], index: 1, kind: output, shape index: {}]  }
   0x1   :  { %v4_v0 = vld [vmem:[%s39_s0] sm:$0x3]  ;;  %s22_s0 = smov 36  }
   0x2   :  { %5 = vst [vmem:[#allocation1] sm:$0x3] %v4_v0 }
   0x9   :  { %v10_v1 = vld [vmem:[#allocation1 + $0x1] sm:$0x1]   ;;  %v6_v2 = vld [vmem:[#allocation1] sm:$0x1]  }
   0xa   :  { %11 = vrot.lane.b32.xlu0 %v10_v1, %s22_s0  ;;  %8 = vst.msk [vmem:[#allocation0] sm:$0x1] %vm7_vm0, %v6_v2  }
  0x7c   :  { %v12_v3 = vpop.permute.xlu0 %11  }
  0x7d   :  { %14 = vst.msk [vmem:[#allocation0] sm:$0x1] %vm13_vm1, %v12_v3  }
  0x84   :  { %v18_v4 = vld [vmem:[#allocation0] sm:$0x1] }
  0x85   :  { %20 = vst [vmem:[%s40_s1] sm:$0x1] %v18_v4 }

// kernel: predrnn_forward.1
= control target key start
LH: loop header
LB: loop body
LE: loop exit
PB: predicated region body
PF: predicated region fallthrough
CT: control target
= control target key end

     0   :  { %s22471_s27 = smov 0   ;;  %s26073_s0 = inlined_call_operand.vmem [shape: f32[7,72,16], index: 0, kind: input, shape index: {}]   ;;  %s26074_s1 = inlined_call_operand.vmem [shape: f32[7,72,16], index: 1, kind: input, shape index: {}]   ;;  %s26075_s2 = inlined_call_operand.vmem [shape: f32[58,1], index: 2, kind: input, shape index: {}]   ;;  %s26076_s3 = inlined_call_operand.vmem [shape: f32[9,16,224], index: 3, kind: input, shape index: {}]   ;;  %s26077_s4 = inlined_call_operand.vmem [shape: f32[9,32,128], index: 4, kind: input, shape index: {}]   ;;  %s26078_s5 = inlined_call_operand.vmem [shape: f32[9,32,96], index: 5, kind: input, shape index: {}]   ;;  %s26079_s6 = inlined_call_operand.vmem [shape: f32[9,32,32], index: 6, kind: input, shape index: {}]   ;;  %s26080_s7 = inlined_call_operand.vmem [shape: f32[9,32,32], index: 7, kind: input, shape index: {}]   ;;  %s26081_s8 = inlined_call_operand.vmem [shape: f32[32,32], index: 8, kind: input, shape index: {}]   ;;  %s26082_s9 = inlined_call_operand.vmem [shape: f32[32,32], index: 9, kind: input, shape index: {}]   ;;  %s26083_s10 = inlined_call_operand.vmem [shape: f32[9,32,224], index: 10, kind: input, shape index: {}]   ;;  %s26084_s11 = inlined_call_operand.vmem [shape: f32[9,32,128], index: 11, kind: input, shape index: {}]   ;;  %s26085_s12 = inlined_call_operand.vmem [shape: f32[9,32,96], index: 12, kind: input, shape index: {}]   ;;  %s26086_s13 = inlined_call_operand.vmem [shape: f32[9,32,32], index: 13, kind: input, shape index: {}]   ;;  %s26087_s14 = inlined_call_operand.vmem [shape: f32[9,32,32], index: 14, kind: input, shape index: {}]   ;;  %s26088_s15 = inlined_call_operand.vmem [shape: f32[32,32], index: 15, kind: input, shape index: {}]   ;;  %s26089_s16 = inlined_call_operand.vmem [shape: f32[32,32], index: 16, kind: input, shape index: {}]   ;;  %s26090_s17 = inlined_call_operand.vmem [shape: f32[32,16], index: 17, kind: input, shape index: {}]   ;;  %s26091_s18 = inlined_call_operand.vmem [shape: f32[7,72,16], index: 18, kind: output, shape index: {}]  }
   0x1   :  { %26097 = sst [smem:[#allocation9_spill]] %s26073_s0 }
   0x2   :  { %26098 = sst [smem:[#allocation10_spill]] %s26074_s1 }
   0x3   :  { %26099 = sst [smem:[#allocation11_spill]] %s26075_s2 }
   0x4 LB: > { %s16720_s28 = sadd.s32 4294967295, %s22368_s27   ;;  %p16724_p0 = scmp.ge.s32.totalorder %s22368_s27, 1  ;;  %s22368_s27 = sphi %s22471_s27, %s28_s27  }
   0x5   : > { %p522_p1 = scmp.lt.s32.totalorder %s22368_s27, 8 }
   0x7   : > { %p523_p2 = pnand %p16724_p0, %p522_p1 }
   0x8   : > { %p581_p3 = scmp.lt.s32.totalorder (!%p523_p2), %s16720_s28, 6  ;;  %s26100_s1 = sld [smem:[#allocation9_spill]] (!%p523_p2) }
   0x9   : > { %526 = sbr.rel (%p523_p2) target bundleno = 3952 (0xf70), region = 92  ;;  %s26101_s2 = sld [smem:[#allocation10_spill]] (!%p523_p2) }
   0xa   : > { %p16728_p4 = scmp.ne.s32.totalorder (!%p523_p2), %s16720_s28, 0 }
  0x10   : > { %s582_s29 = scalar_select %p581_p3, %s16720_s28, 6 }
  0x11   : > { %599 = sbr.rel (%p16728_p4) target bundleno = 46 (0x2e), region = 96  ;;  %vm600_vm0 = vcmask (!%p16728_p4), 261120   ;;  %vm646_vm1 = vcmask (!%p16728_p4), 130048   ;;  %v22370_v0 = vmov (!%p16728_p4), 0.0  }
  0x12   : > { %s21913_s30 = smul.u32 72, %s582_s29  ;;  %601 = vst.msk [vmem:[#allocation2] sm:$0xff] (!%p16728_p4), %vm600_vm0, %v22370_v0  ;;  %602 = vst.msk [vmem:[#allocation2 + $0x8] sm:$0xff] (!%p16728_p4), %vm600_vm0, %v22370_v0 }
  0x13   : > { %603 = vst.msk [vmem:[#allocation2 + $0x10] sm:$0xff] (!%p16728_p4), %vm600_vm0, %v22370_v0  ;;  %604 = vst.msk [vmem:[#allocation2 + $0x18] sm:$0xff] (!%p16728_p4), %vm600_vm0, %v22370_v0 }
  0x14   : > { %s22482_s20 = scalar_lea.vmem %s26100_s1, %s21913_s30  ;;  %s22487_s23 = scalar_lea.vmem %s26101_s2, %s21913_s30  ;;  %605 = vst.msk [vmem:[#allocation2 + $0x20] sm:$0xff] (!%p16728_p4), %vm600_vm0, %v22370_v0  ;;  %606 = vst.msk [vmem:[#allocation2 + $0x28] sm:$0xff] (!%p16728_p4), %vm600_vm0, %v22370_v0 }
  0x15   : > { %s22492_s26 = scalar_lea.vmem %s26091_s18, %s21913_s30  ;;  %607 = vst.msk [vmem:[#allocation2 + $0x30] sm:$0xff] (!%p16728_p4), %vm600_vm0, %v22370_v0  ;;  %608 = vst.msk [vmem:[#allocation2 + $0x38] sm:$0xff] (!%p16728_p4), %vm600_vm0, %v22370_v0 }
  0x16   : > { %609 = vst.msk [vmem:[#allocation2 + $0x40] sm:$0xff] (!%p16728_p4), %vm600_vm0, %v22370_v0  ;;  %610 = vst.msk [vmem:[#allocation3] sm:$0xff] (!%p16728_p4), %vm600_vm0, %v22370_v0 }
  0x17   : > { %611 = vst.msk [vmem:[#allocation3 + $0x8] sm:$0xff] (!%p16728_p4), %vm600_vm0, %v22370_v0  ;;  %612 = vst.msk [vmem:[#allocation3 + $0x10] sm:$0xff] (!%p16728_p4), %vm600_vm0, %v22370_v0 }
  0x18   : > { %613 = vst.msk [vmem:[#allocation3 + $0x18] sm:$0xff] %vm600_vm0, %v22370_v0  ;;  %614 = vst.msk [vmem:[#allocation3 + $0x20] sm:$0xff] %vm600_vm0, %v22370_v0 }
  0x19   : > { %615 = vst.msk [vmem:[#allocation3 + $0x28] sm:$0xff] %vm600_vm0, %v22370_v0  ;;  %616 = vst.msk [vmem:[#allocation3 + $0x30] sm:$0xff] %vm600_vm0, %v22370_v0 }
  0x1a   : > { %617 = vst.msk [vmem:[#allocation3 + $0x38] sm:$0xff] %vm600_vm0, %v22370_v0  ;;  %618 = vst.msk [vmem:[#allocation3 + $0x40] sm:$0xff] %vm600_vm0, %v22370_v0 }
  0x1b   : > { %619 = vst.msk [vmem:[#allocation4] sm:$0xff] %vm600_vm0, %v22370_v0  ;;  %620 = vst.msk [vmem:[#allocation4 + $0x8] sm:$0xff] %vm600_vm0, %v22370_v0 }
  0x1c   : > { %621 = vst.msk [vmem:[#allocation4 + $0x10] sm:$0xff] %vm600_vm0, %v22370_v0  ;;  %622 = vst.msk [vmem:[#allocation4 + $0x18] sm:$0xff] %vm600_vm0, %v22370_v0 }
  0x1d   : > { %623 = vst.msk [vmem:[#allocation4 + $0x20] sm:$0xff] %vm600_vm0, %v22370_v0  ;;  %624 = vst.msk [vmem:[#allocation4 + $0x28] sm:$0xff] %vm600_vm0, %v22370_v0 }
  0x1e   : > { %625 = vst.msk [vmem:[#allocation4 + $0x30] sm:$0xff] %vm600_vm0, %v22370_v0  ;;  %626 = vst.msk [vmem:[#allocation4 + $0x38] sm:$0xff] %vm600_vm0, %v22370_v0 }
  0x1f   : > { %627 = vst.msk [vmem:[#allocation4 + $0x40] sm:$0xff] %vm600_vm0, %v22370_v0  ;;  %628 = vst.msk [vmem:[#allocation5] sm:$0xff] %vm600_vm0, %v22370_v0 }
  0x20   : > { %629 = vst.msk [vmem:[#allocation5 + $0x8] sm:$0xff] %vm600_vm0, %v22370_v0  ;;  %630 = vst.msk [vmem:[#allocation5 + $0x10] sm:$0xff] %vm600_vm0, %v22370_v0 }
  0x21   : > { %631 = vst.msk [vmem:[#allocation5 + $0x18] sm:$0xff] %vm600_vm0, %v22370_v0  ;;  %632 = vst.msk [vmem:[#allocation5 + $0x20] sm:$0xff] %vm600_vm0, %v22370_v0 }
  0x22   : > { %633 = vst.msk [vmem:[#allocation5 + $0x28] sm:$0xff] %vm600_vm0, %v22370_v0  ;;  %634 = vst.msk [vmem:[#allocation5 + $0x30] sm:$0xff] %vm600_vm0, %v22370_v0 }
  0x23   : > { %635 = vst.msk [vmem:[#allocation5 + $0x38] sm:$0xff] %vm600_vm0, %v22370_v0  ;;  %636 = vst.msk [vmem:[#allocation5 + $0x40] sm:$0xff] %vm600_vm0, %v22370_v0 }
  0x24   : > { %637 = vst.msk [vmem:[#allocation6] sm:$0xff] %vm600_vm0, %v22370_v0  ;;  %638 = vst.msk [vmem:[#allocation6 + $0x8] sm:$0xff] %vm600_vm0, %v22370_v0 }
  0x25   : > { %639 = vst.msk [vmem:[#allocation6 + $0x10] sm:$0xff] %vm600_vm0, %v22370_v0  ;;  %640 = vst.msk [vmem:[#allocation6 + $0x18] sm:$0xff] %vm600_vm0, %v22370_v0 }
  0x26   : > { %641 = vst.msk [vmem:[#allocation6 + $0x20] sm:$0xff] %vm600_vm0, %v22370_v0  ;;  %642 = vst.msk [vmem:[#allocation6 + $0x28] sm:$0xff] %vm600_vm0, %v22370_v0 }
  0x27   : > { %643 = vst.msk [vmem:[#allocation6 + $0x30] sm:$0xff] %vm600_vm0, %v22370_v0  ;;  %644 = vst.msk [vmem:[#allocation6 + $0x38] sm:$0xff] %vm600_vm0, %v22370_v0 }
  0x28   : > { %645 = vst.msk [vmem:[#allocation6 + $0x40] sm:$0xff] %vm600_vm0, %v22370_v0 }
  0x29   : > { %647 = vst.msk [vmem:[#allocation7] sm:$0xff] %vm646_vm1, %v22370_v0  ;;  %648 = vst.msk [vmem:[#allocation7 + $0x8] sm:$0xff] %vm646_vm1, %v22370_v0 }
  0x2a   : > { %649 = vst.msk [vmem:[#allocation7 + $0x10] sm:$0xff] %vm646_vm1, %v22370_v0  ;;  %650 = vst.msk [vmem:[#allocation7 + $0x18] sm:$0xff] %vm646_vm1, %v22370_v0 }
  0x2b   : > { %651 = vst.msk [vmem:[#allocation7 + $0x20] sm:$0xff] %vm646_vm1, %v22370_v0  ;;  %652 = vst.msk [vmem:[#allocation7 + $0x28] sm:$0xff] %vm646_vm1, %v22370_v0 }
  0x2c   : > { %653 = vst.msk [vmem:[#allocation7 + $0x30] sm:$0xff] %vm646_vm1, %v22370_v0  ;;  %654 = vst.msk [vmem:[#allocation7 + $0x38] sm:$0xff] %vm646_vm1, %v22370_v0 }
  0x2d   : > { %655 = vst.msk [vmem:[#allocation7 + $0x40] sm:$0xff] %vm646_vm1, %v22370_v0 }
  0x2e PF: > { %v16730_v1 = vld [vmem:[%s26076_s3 + $0x28] sm:$0xff]  ;;  %v16732_v2 = vld [vmem:[%s26076_s3 + $0x38] sm:$0xff]  ;;  %v16729_v3 = vld [vmem:[%s26076_s3 + $0x20] sm:$0xff]  ;;  %v22371_v6 = vmov 0.0   ;;  %vm727_vm2 = vcmask 130048   ;;  %vm1073_vm3 = vcmask 261120  }
  0x2f   : > { %v20387_v4 = vpack.c.bf16 %v16732_v2, %v16730_v1  ;;  %v16731_v5 = vld [vmem:[%s26076_s3 + $0x30] sm:$0xff]  ;;  %874 = vmatprep.mubr.f32.mxu0 %v22371_v6  ;;  %910 = vmatprep.mubr.f32.mxu1 %v22371_v6  ;;  %v16749_v7 = vld [vmem:[%s26077_s4 + $0x20] sm:$0xff]  ;;  %v16750_v8 = vld [vmem:[%s26077_s4 + $0x28] sm:$0xff]  ;;  %s26095_s1 = smov 96   ;;  %s22374_s21 = smov 64   ;;  %vm5496_vm4 = vcmask 254976  }
  0x30   : > { %v20389_v9 = vpack.c.bf16 %v16731_v5, %v16729_v3  ;;  %v22568_v10 = vpack.c.bf16 %v16750_v8, %v16749_v7  ;;  %v664_v11 = vld [vmem:[%s22487_s23] sm:$0xff]  ;;  %v665_v12 = vld [vmem:[%s22487_s23 + $0x8] sm:$0xff]  ;;  %v701_v19 = vld [vmem:[#allocation7 + $0x8] sm:$0xff]  ;;  %s26093_s0 = smov 32   ;;  %s26103_s25 = smov 96   ;;  %vm16633_vm5 = vcmask 123904  }
  0x31   : > { %v673_v13 = vld [vmem:[%s22482_s20] sm:$0xff]  ;;  %21111 = vmatprep.subr.bf16.mxu1 %v20387_v4  ;;  %20388 = vmatprep.subr.bf16.mxu0 %v20387_v4  ;;  %v674_v14 = vld [vmem:[%s22482_s20 + $0x8] sm:$0xff]  ;;  %v691_v16 = vsub.f32 1.0, %v664_v11  ;;  %v692_v17 = vsub.f32 1.0, %v665_v12  ;;  %v670_v21 = vld [vmem:[%s22487_s23 + $0x30] sm:$0xff]  ;;  %s26104_s2 = smov 32  }
  0x32   : > { %v682_v15 = vmul.f32 %v673_v13, %v664_v11  ;;  %v700_v18 = vld [vmem:[#allocation7] sm:$0xff]  ;;  %21112 = vmatpush1.bf16.msra.mxu1 %v20389_v9  ;;  %20390 = vmatpush1.bf16.msra.mxu0 %v20389_v9  ;;  %v683_v20 = vmul.f32 %v674_v14, %v665_v12  ;;  %v671_v22 = vld [vmem:[%s22487_s23 + $0x38] sm:$0xff]  ;;  %v679_v23 = vld [vmem:[%s22482_s20 + $0x30] sm:$0xff]  ;;  %v697_v28 = vsub.f32 1.0, %v670_v21 }
  0x33   : > { %20396 = vmatprep.subr.bf16.mxu1 %v22568_v10  ;;  %v709_v24 = vmul.f32 %v700_v18, %v691_v16  ;;  %v710_v25 = vmul.f32 %v701_v19, %v692_v17  ;;  %v680_v26 = vld [vmem:[%s22482_s20 + $0x38] sm:$0xff]  ;;  %v688_v27 = vmul.f32 %v679_v23, %v670_v21  ;;  %v707_v30 = vld [vmem:[#allocation7 + $0x38] sm:$0xff]  ;;  %v698_v32 = vsub.f32 1.0, %v671_v22  ;;  %v666_v33 = vld [vmem:[%s22487_s23 + $0x10] sm:$0xff] }
  0x34   : > { %v706_v29 = vld [vmem:[#allocation7 + $0x30] sm:$0xff]  ;;  %v689_v31 = vmul.f32 %v680_v26, %v671_v22  ;;  %v675_v37 = vld [vmem:[%s22482_s20 + $0x10] sm:$0xff]  ;;  %v693_v41 = vsub.f32 1.0, %v666_v33  ;;  %v703_v46 = vld [vmem:[#allocation7 + $0x18] sm:$0xff] }
  0x35   : > { %v718_v34 = vadd.f32 %v709_v24, %v682_v15  ;;  %v719_v35 = vadd.f32 %v710_v25, %v683_v20  ;;  %v715_v36 = vmul.f32 %v706_v29, %v697_v28  ;;  %v702_v38 = vld [vmem:[#allocation7 + $0x10] sm:$0xff]  ;;  %v716_v39 = vmul.f32 %v707_v30, %v698_v32  ;;  %v668_v50 = vld [vmem:[%s22487_s23 + $0x20] sm:$0xff]  ;;  %v704_v55 = vld [vmem:[#allocation7 + $0x20] sm:$0xff] }
  0x36   : > { %v684_v40 = vmul.f32 %v675_v37, %v666_v33  ;;  %v667_v42 = vld [vmem:[%s22487_s23 + $0x18] sm:$0xff]  ;;  %v711_v48 = vmul.f32 %v702_v38, %v693_v41  ;;  %v677_v51 = vld [vmem:[%s22482_s20 + $0x20] sm:$0xff]  ;;  %v695_v54 = vsub.f32 1.0, %v668_v50  ;;  %v669_v57 = vld [vmem:[%s22487_s23 + $0x28] sm:$0xff] }
  0x37   : > { %728 = vst.msk [vmem:[#allocation8] sm:$0xff] %vm727_vm2, %v718_v34  ;;  %729 = vst.msk [vmem:[#allocation8 + $0x8] sm:$0xff] %vm727_vm2, %v719_v35  ;;  %v724_v43 = vadd.f32 %v715_v36, %v688_v27  ;;  %v676_v44 = vld [vmem:[%s22482_s20 + $0x18] sm:$0xff]  ;;  %v694_v45 = vsub.f32 1.0, %v667_v42  ;;  %v725_v47 = vadd.f32 %v716_v39, %v689_v31  ;;  %v686_v53 = vmul.f32 %v677_v51, %v668_v50  ;;  %v678_v60 = vld [vmem:[%s22482_s20 + $0x28] sm:$0xff] }
  0x38   : > { %v685_v49 = vmul.f32 %v676_v44, %v667_v42  ;;  %v720_v56 = vadd.f32 %v711_v48, %v684_v40  ;;  %v713_v59 = vmul.f32 %v704_v55, %v695_v54  ;;  %v696_v61 = vsub.f32 1.0, %v669_v57  ;;  %v705_v62 = vld [vmem:[#allocation7 + $0x28] sm:$0xff]  ;;  %v746_v1 = vld [vmem:[%s26076_s3 + $0x8] sm:$0xff]  ;;  %v748_v2 = vld [vmem:[%s26076_s3 + $0x18] sm:$0xff] }
  0x39   : > { %734 = vst.msk [vmem:[#allocation8 + $0x30] sm:$0xff] %vm727_vm2, %v724_v43  ;;  %v712_v52 = vmul.f32 %v703_v46, %v694_v45  ;;  %735 = vst.msk [vmem:[#allocation8 + $0x38] sm:$0xff] %vm727_vm2, %v725_v47  ;;  %v16751_v63 = vld [vmem:[%s26077_s4 + $0x30] sm:$0xff]  ;;  %v687_v0 = vmul.f32 %v678_v60, %v669_v57  ;;  %v16752_v3 = vld [vmem:[%s26077_s4 + $0x38] sm:$0xff]  ;;  %v20391_v7 = vpack.c.bf16 %v748_v2, %v746_v1 }
  0x3a   : > { %730 = vst.msk [vmem:[#allocation8 + $0x10] sm:$0xff] %vm727_vm2, %v720_v56  ;;  %v722_v4 = vadd.f32 %v713_v59, %v686_v53  ;;  %v714_v5 = vmul.f32 %v705_v62, %v696_v61  ;;  %v745_v8 = vld [vmem:[%s26076_s3] sm:$0xff]  ;;  %v747_v9 = vld [vmem:[%s26076_s3 + $0x10] sm:$0xff]  ;;  %v20399_v14 = vpack.c.bf16 %v16752_v3, %v16751_v63  ;;  %v758_v17 = vld [vmem:[%s26077_s4 + $0x8] sm:$0xff] }
  0x3b   : > { %v721_v58 = vadd.f32 %v712_v52, %v685_v49  ;;  %v20393_v12 = vpack.c.bf16 %v747_v9, %v745_v8  ;;  %20392 = vmatprep.subr.bf16.mxu0 %v20391_v7  ;;  %v757_v16 = vld [vmem:[%s26077_s4] sm:$0xff]  ;;  %v759_v23 = vld [vmem:[%s26077_s4 + $0x10] sm:$0xff]  ;;  %v16770_v29 = vld [vmem:[%s26078_s5 + $0x28] sm:$0xff] }
  0x3c   : > { %732 = vst.msk [vmem:[#allocation8 + $0x20] sm:$0xff] %vm727_vm2, %v722_v4  ;;  %v723_v13 = vadd.f32 %v714_v5, %v687_v0  ;;  %v1060_v20 = vld [vmem:[#allocation2 + $0x1] sm:$0xff]  ;;  %v20403_v21 = vpack.c.bf16 %v758_v17, %v757_v16  ;;  %v1061_v24 = vld [vmem:[#allocation2 + $0x9] sm:$0xff]  ;;  %v1062_v25 = vld [vmem:[#allocation2 + $0x11] sm:$0xff] }
  0x3d   : > { %731 = vst.msk [vmem:[#allocation8 + $0x18] sm:$0xff] %vm727_vm2, %v721_v58  ;;  %v16769_v28 = vld [vmem:[%s26078_s5 + $0x20] sm:$0xff]  ;;  %v16790_v31 = vld [vmem:[%s26076_s3 + $0x48] sm:$0xff]  ;;  %v16792_v32 = vld [vmem:[%s26076_s3 + $0x58] sm:$0xff] }
  0x3e   : > { %v773_v11 = vld [vmem:[#allocation8 + $0x1] sm:$0xff]  ;;  %733 = vst.msk [vmem:[#allocation8 + $0x28] sm:$0xff] %vm727_vm2, %v723_v13  ;;  %v1063_v30 = vld [vmem:[#allocation2 + $0x19] sm:$0xff]  ;;  %v1064_v33 = vld [vmem:[#allocation2 + $0x21] sm:$0xff]  ;;  %v20411_v34 = vpack.c.bf16 %v16770_v29, %v16769_v28  ;;  %v20427_v35 = vpack.c.bf16 %v16792_v32, %v16790_v31 }
  0x3f   : > { %16733 = vmatmul.mubr.msk.f32.vlgmr.msra.gmra.mrb[0].mxu0 %vm727_vm2, %v773_v11  ;;  %v1065_v37 = vld [vmem:[#allocation2 + $0x29] sm:$0xff]  ;;  %v1066_v38 = vld [vmem:[#allocation2 + $0x31] sm:$0xff]  ;;  %v16789_v40 = vld [vmem:[%s26076_s3 + $0x40] sm:$0xff] }
  0x40   : > { %880 = vmatprep.mubr.f32.mxu0 %v22371_v6  ;;  %20394 = vmatpush1.bf16.msra.mxu0 %v20393_v12  ;;  %v779_v15 = vld [vmem:[#allocation8 + $0x31] sm:$0xff]  ;;  %v780_v19 = vld [vmem:[#allocation8 + $0x39] sm:$0x3]  ;;  %v16791_v41 = vld [vmem:[%s26076_s3 + $0x50] sm:$0xff] }
  0x41   : > { %16739 = vmatmul.mubr.msk.f32.vlgmr.msra.gmra.mrb[0].mxu1 %vm727_vm2, %v779_v15  ;;  %v774_v18 = vld [vmem:[#allocation8 + $0x9] sm:$0xff]  ;;  %20428 = vmatprep.subr.bf16.mxu0 %v20427_v35  ;;  %v737_v44 = vld [vmem:[#allocation8] sm:$0xff]  ;;  %v20429_v47 = vpack.c.bf16 %v16791_v41, %v16789_v40  ;;  %v22674_v48 = vld [vmem:[#allocation2 + $0x8] sm:$0xff] }
  0x42   : > { %20398 = vmatpush3.bf16.msra.mxu1 %v22568_v10  ;;  %916 = vmatprep.mubr.f32.mxu1 %v22371_v6  ;;  %v760_v10 = vld [vmem:[%s26077_s4 + $0x18] sm:$0xff]  ;;  %v749_v43 = vld [vmem:[#allocation2] sm:$0xff]  ;;  %v16771_v45 = vld [vmem:[%s26078_s5 + $0x30] sm:$0xff] }
  0x43   : > { %20400 = vmatprep.subr.bf16.mxu1 %v20399_v14  ;;  %16734 = vmatmul.mubr.msk.f32.gmra.mrb[2].mxu0 %vm727_vm2, %v774_v18  ;;  %v20407_v26 = vpack.c.bf16 %v760_v10, %v759_v23  ;;  %v1067_v42 = vld [vmem:[#allocation2 + $0x39] sm:$0x3]  ;;  %v16826_v49 = vld [vmem:[%s26076_s3 + $0x68] sm:$0xff]  ;;  %v22683_v51 = vld [vmem:[#allocation2 + $0x10] sm:$0xff] }
  0x44   : > { %886 = vmatprep.mubr.f32.mxu0 %v22371_v6  ;;  %v775_v22 = vld [vmem:[#allocation8 + $0x11] sm:$0xff]  ;;  %v776_v27 = vld [vmem:[#allocation8 + $0x19] sm:$0xff]  ;;  %v16772_v46 = vld [vmem:[%s26078_s5 + $0x38] sm:$0xff] }
  0x45   : > { %16740 = vmatmul.mubr.msk.f32.gmra.mrb[2].mxu1 %vm727_vm2, %v780_v19  ;;  %v777_v36 = vld [vmem:[#allocation8 + $0x21] sm:$0xff]  ;;  %v778_v39 = vld [vmem:[#allocation8 + $0x29] sm:$0xff]  ;;  %v20415_v52 = vpack.c.bf16 %v16772_v46, %v16771_v45  ;;  %v770_v56 = vld [vmem:[%s26078_s5 + $0x8] sm:$0xff] }
  0x46   : > { %20402 = vmatpush3.bf16.msra.mxu1 %v20399_v14  ;;  %18855 = vmatprep.mubr.msk.f32.mxu1 %vm1073_vm3, %v1060_v20  ;;  %v16828_v50 = vld [vmem:[%s26076_s3 + $0x78] sm:$0xff]  ;;  %v769_v55 = vld [vmem:[%s26078_s5] sm:$0xff]  ;;  %v22711_v61 = vld [vmem:[#allocation2 + $0x28] sm:$0xff] }
  0x47   : > { %20404 = vmatprep.subr.bf16.mxu1 %v20403_v21  ;;  %16735 = vmatmul.mubr.msk.f32.gmra.mrb[4].mxu0 %vm727_vm2, %v775_v22  ;;  %v20447_v53 = vpack.c.bf16 %v16828_v50, %v16826_v49  ;;  %v22686_v54 = vld [vmem:[#allocation8 + $0x8] sm:$0xff]  ;;  %v22702_v58 = vld [vmem:[#allocation2 + $0x20] sm:$0xff]  ;;  %v20419_v59 = vpack.c.bf16 %v770_v56, %v769_v55  ;;  %v22715_v62 = vld [vmem:[#allocation2 + $0x30] sm:$0xff] }
  0x48   : > { %892 = vmatprep.mubr.f32.mxu0 %v22371_v6  ;;  %v22698_v57 = vld [vmem:[#allocation2 + $0x18] sm:$0xff]  ;;  %v22705_v60 = vld [vmem:[#allocation8 + $0x10] sm:$0xff]  ;;  %v22718_v63 = vld [vmem:[#allocation8 + $0x18] sm:$0xff] }
  0x49   : > { %18856 = vmatmul.mubr.msk.f32.vlgmr.msra.gmra.mrb[4].mxu1 %vm1073_vm3, %v1061_v24  ;;  %v756_v0 = vld [vmem:[#allocation2 + $0x38] sm:$0x3]  ;;  %v1332_v1 = vld [vmem:[#allocation6 + $0x1] sm:$0xff]  ;;  %v22727_v2 = vld [vmem:[#allocation8 + $0x20] sm:$0xff] }
  0x4a   : > { %20406 = vmatpush3.bf16.msra.mxu1 %v20403_v21  ;;  %18858 = vmatprep.mubr.msk.f32.mxu1 %vm1073_vm3, %v1062_v25  ;;  %v771_v3 = vld [vmem:[%s26078_s5 + $0x10] sm:$0xff]  ;;  %v772_v4 = vld [vmem:[%s26078_s5 + $0x18] sm:$0xff]  ;;  %v16801_v11 = vld [vmem:[%s26077_s4 + $0x40] sm:$0xff] }
  0x4b   : > { %16736 = vmatmul.mubr.msk.f32.gmra.mrb[6].mxu0 %vm727_vm2, %v776_v27  ;;  %20408 = vmatprep.subr.bf16.mxu1 %v20407_v26  ;;  %v1333_v5 = vld [vmem:[#allocation6 + $0x9] sm:$0xff]  ;;  %v1334_v7 = vld [vmem:[#allocation6 + $0x11] sm:$0xff]  ;;  %v20423_v8 = vpack.c.bf16 %v772_v4, %v771_v3  ;;  %v1335_v13 = vld [vmem:[#allocation6 + $0x19] sm:$0xff] }
  0x4c   : > { %898 = vmatprep.mubr.f32.mxu0 %v22371_v6  ;;  %v22740_v9 = vld [vmem:[#allocation8 + $0x28] sm:$0xff]  ;;  %v16802_v12 = vld [vmem:[%s26077_s4 + $0x48] sm:$0xff]  ;;  %v22753_v16 = vld [vmem:[#allocation8 + $0x30] sm:$0xff] }
  0x4d   : > { %18859 = vmatmul.mubr.msk.f32.gmra.mrb[6].mxu1 %vm1073_vm3, %v1063_v30  ;;  %v1336_v14 = vld [vmem:[#allocation6 + $0x21] sm:$0xff]  ;;  %v20431_v15 = vpack.c.bf16 %v16802_v12, %v16801_v11  ;;  %v1337_v18 = vld [vmem:[#allocation6 + $0x29] sm:$0xff]  ;;  %v1338_v22 = vld [vmem:[#allocation6 + $0x31] sm:$0xff] }
  0x4e   : > { %18861 = vmatprep.mubr.msk.f32.mxu1 %vm1073_vm3, %v1064_v33  ;;  %20410 = vmatpush3.bf16.msra.mxu1 %v20407_v26  ;;  %v672_v17 = vld [vmem:[%s22487_s23 + $0x40] sm:$0xff]  ;;  %v708_v21 = vld [vmem:[#allocation7 + $0x40] sm:$0xff]  ;;  %v16827_v26 = vld [vmem:[%s26076_s3 + $0x70] sm:$0xff]  ;;  %s26102_s23 = sld [smem:[#allocation11_spill]] }
  0x4f   : > { %16737 = vmatmul.mubr.msk.f32.gmra.mrb[8].mxu0 %vm727_vm2, %v777_v36  ;;  %20412 = vmatprep.subr.bf16.mxu1 %v20411_v34  ;;  %v681_v19 = vld [vmem:[%s22482_s20 + $0x40] sm:$0xff]  ;;  %v699_v20 = vsub.f32 1.0, %v672_v17  ;;  %v744_v10 = vld [vmem:[#allocation8 + $0x38] sm:$0x3]  ;;  %v1339_v27 = vld [vmem:[#allocation6 + $0x39] sm:$0x3] }
  0x50   : > { %904 = vmatprep.mubr.f32.mxu0 %v22371_v6  ;;  %v690_v23 = vmul.f32 %v681_v19, %v672_v17  ;;  %v16825_v25 = vld [vmem:[%s26076_s3 + $0x60] sm:$0xff]  ;;  %v16862_v28 = vld [vmem:[%s26076_s3 + $0x88] sm:$0xff]  ;;  %v16864_v29 = vld [vmem:[%s26076_s3 + $0x98] sm:$0xff] }
  0x51   : > { %18862 = vmatmul.mubr.msk.f32.gmra.mrb[8].mxu1 %vm1073_vm3, %v1065_v37  ;;  %v717_v24 = vmul.f32 %v708_v21, %v699_v20  ;;  %v761_v31 = vld [vmem:[#allocation6] sm:$0xff]  ;;  %v1603_v32 = vld [vmem:[#allocation8 + $0x2] sm:$0xff]  ;;  %v20449_v35 = vpack.c.bf16 %v16827_v26, %v16825_v25  ;;  %v20467_v36 = vpack.c.bf16 %v16864_v29, %v16862_v28  ;;  %v22787_v37 = vld [vmem:[#allocation6 + $0x8] sm:$0xff] }
  0x52   : > { %18864 = vmatprep.mubr.msk.f32.mxu1 %vm1073_vm3, %v1066_v38  ;;  %v16803_v33 = vld [vmem:[%s26077_s4 + $0x50] sm:$0xff]  ;;  %v1604_v40 = vld [vmem:[#allocation8 + $0xa] sm:$0xff]  ;;  %v1605_v46 = vld [vmem:[#allocation8 + $0x12] sm:$0xff] }
  0x53   : > { %16738 = vmatmul.mubr.msk.f32.gmra.mrb[10].mxu0 %vm727_vm2, %v778_v39  ;;  %v726_v30 = vadd.f32 %v717_v24, %v690_v23  ;;  %v22790_v38 = vld [vmem:[#allocation6 + $0x10] sm:$0xff]  ;;  %v16813_v41 = vld [vmem:[%s26078_s5 + $0x40] sm:$0xff]  ;;  %v1610_v17 = vld [vmem:[#allocation8 + $0x3a] sm:$0x3] }
  0x54   : > { %1011 = vmatprep.mubr.f32.mxu0 %v22371_v6  ;;  %v22816_v49 = vld [vmem:[#allocation6 + $0x30] sm:$0xff]  ;;  %v1608_v4 = vld [vmem:[#allocation8 + $0x2a] sm:$0xff]  ;;  %v1773_v11 = vld [vmem:[#allocation2 + $0x22] sm:$0xff] }
  0x55   : > { %18865 = vmatmul.mubr.msk.f32.gmra.mrb[10].mxu1 %vm1073_vm3, %v1067_v42  ;;  %736 = vst.msk [vmem:[#allocation8 + $0x40] sm:$0xff] %vm727_vm2, %v726_v30  ;;  %v16814_v42 = vld [vmem:[%s26078_s5 + $0x48] sm:$0xff]  ;;  %v1607_v55 = vld [vmem:[#allocation8 + $0x22] sm:$0xff]  ;;  %v1776_v20 = vld [vmem:[#allocation2 + $0x3a] sm:$0x3] }
  0x56   : > { %18875 = vmatprep.mubr.msk.f32.mxu1 %vm1073_vm3, %v749_v43  ;;  %v22803_v43 = vld [vmem:[#allocation6 + $0x18] sm:$0xff]  ;;  %v20439_v45 = vpack.c.bf16 %v16814_v42, %v16813_v41  ;;  %v1606_v50 = vld [vmem:[#allocation8 + $0x1a] sm:$0xff]  ;;  %v1919_v23 = vld [vmem:[#allocation6 + $0x2] sm:$0xff] }
  0x57   : > { %16741 = vmatmul.mubr.msk.f32.vlgmr.msra.gmra.mrb[0].mxu0 %vm727_vm2, %v737_v44  ;;  %v22806_v44 = vld [vmem:[#allocation6 + $0x20] sm:$0xff]  ;;  %v16815_v56 = vld [vmem:[%s26078_s5 + $0x50] sm:$0xff]  ;;  %v16898_v21 = vld [vmem:[%s26076_s3 + $0xa8] sm:$0xff] }
  0x58   : > { %1017 = vmatprep.mubr.f32.mxu0 %v22371_v6  ;;  %20430 = vmatpush1.bf16.msra.mxu0 %v20429_v47  ;;  %v22813_v47 = vld [vmem:[#allocation6 + $0x28] sm:$0xff]  ;;  %v16863_v19 = vld [vmem:[%s26076_s3 + $0x90] sm:$0xff]  ;;  %v16840_v25 = vld [vmem:[%s26077_s4 + $0x78] sm:$0xff] }
  0x59   : > { %18876 = vmatmul.mubr.msk.f32.vlgmr.msra.gmra.mrb[4].mxu1 %vm1073_vm3, %v22674_v48  ;;  %20448 = vmatprep.subr.bf16.mxu0 %v20447_v53  ;;  %v1769_v53 = vld [vmem:[#allocation2 + $0x2] sm:$0xff]  ;;  %v16839_v24 = vld [vmem:[%s26077_s4 + $0x70] sm:$0xff] }
  0x5a   : > { %20414 = vmatpush3.bf16.msra.mxu1 %v20411_v34  ;;  %18878 = vmatprep.mubr.msk.f32.mxu1 %vm1073_vm3, %v22683_v51  ;;  %v16804_v34 = vld [vmem:[%s26077_s4 + $0x58] sm:$0xff]  ;;  %v1920_v28 = vld [vmem:[#allocation6 + $0xa] sm:$0xff]  ;;  %v20455_v30 = vpack.c.bf16 %v16840_v25, %v16839_v24 }
  0x5b   : > { %16742 = vmatmul.mubr.msk.f32.gmra.mrb[2].mxu0 %vm727_vm2, %v22686_v54  ;;  %20416 = vmatprep.subr.bf16.mxu1 %v20415_v52  ;;  %v20435_v39 = vpack.c.bf16 %v16804_v34, %v16803_v33  ;;  %v1921_v29 = vld [vmem:[#allocation6 + $0x12] sm:$0xff]  ;;  %v16850_v33 = vld [vmem:[%s26078_s5 + $0x68] sm:$0xff]  ;;  %v1922_v34 = vld [vmem:[#allocation6 + $0x1a] sm:$0xff] }
  0x5c   : > { %1023 = vmatprep.mubr.f32.mxu0 %v22371_v6  ;;  %v1925_v41 = vld [vmem:[#allocation6 + $0x32] sm:$0xff] }
  0x5d   : > { %18879 = vmatmul.mubr.msk.f32.gmra.mrb[6].mxu1 %vm1073_vm3, %v22698_v57  ;;  %v22895_v42 = vld [vmem:[#allocation8 + $0x1e] sm:$0xff] }
  0x5e   : > { %18881 = vmatprep.mubr.msk.f32.mxu1 %vm1073_vm3, %v22702_v58  ;;  %20418 = vmatpush3.bf16.msra.mxu1 %v20415_v52  ;;  %v768_v52 = vld [vmem:[#allocation6 + $0x38] sm:$0x3]  ;;  %v22977_v25 = vld [vmem:[#allocation6 + $0xe] sm:$0xff] }
  0x5f   : > { %16743 = vmatmul.mubr.msk.f32.gmra.mrb[4].mxu0 %vm727_vm2, %v22705_v60  ;;  %20420 = vmatprep.subr.bf16.mxu1 %v20419_v59 }
  0x60   : > { %1029 = vmatprep.mubr.f32.mxu0 %v22371_v6 }
  0x61   : > { %18882 = vmatmul.mubr.msk.f32.gmra.mrb[8].mxu1 %vm1073_vm3, %v22711_v61 }
  0x62   : > { %18884 = vmatprep.mubr.msk.f32.mxu1 %vm1073_vm3, %v22715_v62 }
  0x63   : > { %16744 = vmatmul.mubr.msk.f32.gmra.mrb[6].mxu0 %vm727_vm2, %v22718_v63 }
  0x64   : > { %1035 = vmatprep.mubr.f32.mxu0 %v22371_v6 }
  0x65   : > { %18885 = vmatmul.mubr.msk.f32.gmra.mrb[10].mxu1 %vm1073_vm3, %v756_v0  ;;  %v1770_v0 = vld [vmem:[#allocation2 + $0xa] sm:$0xff] }
  0x66   : > { %18895 = vmatprep.mubr.msk.f32.mxu1 %vm1073_vm3, %v1332_v1  ;;  %v1771_v1 = vld [vmem:[#allocation2 + $0x12] sm:$0xff] }
  0x67   : > { %16745 = vmatmul.mubr.msk.f32.gmra.mrb[8].mxu0 %vm727_vm2, %v22727_v2 }
  0x68   : > { %1041 = vmatprep.mubr.f32.mxu0 %v22371_v6 }
  0x69   : > { %18896 = vmatmul.mubr.msk.f32.vlgmr.msra.gmra.mrb[12].mxu1 %vm1073_vm3, %v1333_v5  ;;  %v16837_v5 = vld [vmem:[%s26077_s4 + $0x60] sm:$0xff] }
  0x6a   : > { %20422 = vmatpush3.bf16.msra.mxu1 %v20419_v59  ;;  %18898 = vmatprep.mubr.msk.f32.mxu1 %vm1073_vm3, %v1334_v7  ;;  %v16816_v59 = vld [vmem:[%s26078_s5 + $0x58] sm:$0xff]  ;;  %v16838_v7 = vld [vmem:[%s26077_s4 + $0x68] sm:$0xff] }
  0x6b   : > { %16746 = vmatmul.mubr.msk.f32.gmra.mrb[10].mxu0 %vm727_vm2, %v22740_v9  ;;  %20424 = vmatprep.subr.bf16.mxu1 %v20423_v8  ;;  %v20443_v3 = vpack.c.bf16 %v16816_v59, %v16815_v56  ;;  %v20451_v12 = vpack.c.bf16 %v16838_v7, %v16837_v5  ;;  %v22916_v56 = vld [vmem:[#allocation2 + $0x16] sm:$0xff]  ;;  %v22935_v5 = vld [vmem:[#allocation2 + $0x26] sm:$0xff] }
  0x6c   : > { %1047 = vmatprep.mubr.f32.mxu0 %v22371_v6 }
  0x6d   : > { %18899 = vmatmul.mubr.msk.f32.gmra.mrb[14].mxu1 %vm1073_vm3, %v1335_v13  ;;  %v1609_v13 = vld [vmem:[#allocation8 + $0x32] sm:$0xff] }
  0x6e   : > { %18901 = vmatprep.mubr.msk.f32.mxu1 %vm1073_vm3, %v1336_v14  ;;  %20426 = vmatpush3.bf16.msra.mxu1 %v20423_v8  ;;  %v1772_v8 = vld [vmem:[#allocation2 + $0x1a] sm:$0xff]  ;;  %v1774_v14 = vld [vmem:[#allocation2 + $0x2a] sm:$0xff] }
  0x6f   : > { %16747 = vmatmul.mubr.msk.f32.gmra.mrb[12].mxu0 %vm727_vm2, %v22753_v16  ;;  %20432 = vmatprep.subr.bf16.mxu1 %v20431_v15 }
  0x70   : > { %1053 = vmatprep.mubr.f32.mxu0 %v22371_v6 }
  0x71   : > { %18902 = vmatmul.mubr.msk.f32.gmra.mrb[16].mxu1 %vm1073_vm3, %v1337_v18  ;;  %v16861_v18 = vld [vmem:[%s26076_s3 + $0x80] sm:$0xff] }
  0x72   : > { %18904 = vmatprep.mubr.msk.f32.mxu1 %vm1073_vm3, %v1338_v22  ;;  %v16900_v22 = vld [vmem:[%s26076_s3 + $0xb8] sm:$0xff]  ;;  %v20469_v26 = vpack.c.bf16 %v16863_v19, %v16861_v18  ;;  %v16934_v18 = vld [vmem:[%s26076_s3 + $0xc8] sm:$0xff] }
  0x73   : > { %16748 = vmatmul.mubr.msk.f32.gmra.mrb[14].mxu0 %vm727_vm2, %v744_v10  ;;  %v2069_v10 = vld [vmem:[#allocation8 + $0x6] sm:$0xff] }
  0x74   : > { %1704 = vmatprep.mubr.f32.mxu0 %v22371_v6  ;;  %v16936_v19 = vld [vmem:[%s26076_s3 + $0xd8] sm:$0xff] }
  0x75   : > { %18905 = vmatmul.mubr.msk.f32.gmra.mrb[18].mxu1 %vm1073_vm3, %v1339_v27  ;;  %v20487_v27 = vpack.c.bf16 %v16900_v22, %v16898_v21  ;;  %v2535_v21 = vld [vmem:[#allocation8 + $0x7] sm:$0xff]  ;;  %v20507_v24 = vpack.c.bf16 %v16936_v19, %v16934_v18  ;;  %v2705_v18 = vld [vmem:[#allocation2 + $0x27] sm:$0xff] }
  0x76   : > { %18915 = vmatprep.mubr.msk.f32.mxu1 %vm1073_vm3, %v761_v31  ;;  %v22875_v31 = vld [vmem:[#allocation8 + $0xe] sm:$0xff]  ;;  %v16875_v22 = vld [vmem:[%s26077_s4 + $0x90] sm:$0xff] }
  0x77   : > { %16793 = vmatmul.mubr.msk.f32.vlgmr.msra.gmra.mrb[0].mxu0 %vm727_vm2, %v1603_v32  ;;  %v16849_v32 = vld [vmem:[%s26078_s5 + $0x60] sm:$0xff] }
  0x78   : > { %1710 = vmatprep.mubr.f32.mxu0 %v22371_v6  ;;  %20450 = vmatpush1.bf16.msra.mxu0 %v20449_v35  ;;  %v1923_v35 = vld [vmem:[#allocation6 + $0x22] sm:$0xff] }
  0x79   : > { %18916 = vmatmul.mubr.msk.f32.vlgmr.msra.gmra.mrb[12].mxu1 %vm1073_vm3, %v22787_v37  ;;  %20468 = vmatprep.subr.bf16.mxu0 %v20467_v36  ;;  %v20459_v36 = vpack.c.bf16 %v16850_v33, %v16849_v32  ;;  %v22993_v32 = vld [vmem:[#allocation6 + $0x1e] sm:$0xff]  ;;  %v22996_v33 = vld [vmem:[#allocation6 + $0x26] sm:$0xff] }
  0x7a   : > { %20434 = vmatpush3.bf16.msra.mxu1 %v20431_v15  ;;  %18918 = vmatprep.mubr.msk.f32.mxu1 %vm1073_vm3, %v22790_v38  ;;  %v1775_v15 = vld [vmem:[#allocation2 + $0x32] sm:$0xff] }
  0x7b   : > { %16794 = vmatmul.mubr.msk.f32.gmra.mrb[2].mxu0 %vm727_vm2, %v1604_v40  ;;  %20436 = vmatprep.subr.bf16.mxu1 %v20435_v39  ;;  %v1924_v40 = vld [vmem:[#allocation6 + $0x2a] sm:$0xff] }
  0x7c   : > { %1716 = vmatprep.mubr.f32.mxu0 %v22371_v6 }
  0x7d   : > { %18919 = vmatmul.mubr.msk.f32.gmra.mrb[14].mxu1 %vm1073_vm3, %v22803_v43 }
  0x7e   : > { %18921 = vmatprep.mubr.msk.f32.mxu1 %vm1073_vm3, %v22806_v44  ;;  %20438 = vmatpush3.bf16.msra.mxu1 %v20435_v39  ;;  %v22888_v39 = vld [vmem:[#allocation8 + $0x16] sm:$0xff] }
  0x7f   : > { %16795 = vmatmul.mubr.msk.f32.gmra.mrb[4].mxu0 %vm727_vm2, %v1605_v46  ;;  %20440 = vmatprep.subr.bf16.mxu1 %v20439_v45  ;;  %v2235_v46 = vld [vmem:[#allocation2 + $0x6] sm:$0xff] }
  0x80   : > { %1722 = vmatprep.mubr.f32.mxu0 %v22371_v6 }
  0x81   : > { %18922 = vmatmul.mubr.msk.f32.gmra.mrb[16].mxu1 %vm1073_vm3, %v22813_v47 }
  0x82   : > { %18924 = vmatprep.mubr.msk.f32.mxu1 %vm1073_vm3, %v22816_v49 }
  0x83   : > { %16796 = vmatmul.mubr.msk.f32.gmra.mrb[6].mxu0 %vm727_vm2, %v1606_v50  ;;  %v22902_v50 = vld [vmem:[#allocation8 + $0x26] sm:$0xff] }
  0x84   : > { %1728 = vmatprep.mubr.f32.mxu0 %v22371_v6 }
  0x85   : > { %18925 = vmatmul.mubr.msk.f32.gmra.mrb[18].mxu1 %vm1073_vm3, %v768_v52  ;;  %v16851_v52 = vld [vmem:[%s26078_s5 + $0x70] sm:$0xff] }
  0x86   : > { %18935 = vmatprep.mubr.msk.f32.mxu1 %vm1073_vm3, %v1769_v53  ;;  %v16852_v53 = vld [vmem:[%s26078_s5 + $0x78] sm:$0xff] }
  0x87   : > { %16797 = vmatmul.mubr.msk.f32.gmra.mrb[8].mxu0 %vm727_vm2, %v1607_v55  ;;  %v22912_v55 = vld [vmem:[#allocation2 + $0xe] sm:$0xff]  ;;  %v20463_v59 = vpack.c.bf16 %v16852_v53, %v16851_v52  ;;  %v2539_v52 = vld [vmem:[#allocation8 + $0x27] sm:$0xff] }
  0x88   : > { %1734 = vmatprep.mubr.f32.mxu0 %v22371_v6  ;;  %v16887_v53 = vld [vmem:[%s26078_s5 + $0x90] sm:$0xff] }
  0x89   : > { %18936 = vmatmul.mubr.msk.f32.vlgmr.msra.gmra.mrb[4].mxu1 %vm1073_vm3, %v1770_v0  ;;  %v22919_v0 = vld [vmem:[#allocation8 + $0x2e] sm:$0xff] }
  0x8a   : > { %20442 = vmatpush3.bf16.msra.mxu1 %v20439_v45  ;;  %18938 = vmatprep.mubr.msk.f32.mxu1 %vm1073_vm3, %v1771_v1  ;;  %v1926_v45 = vld [vmem:[#allocation6 + $0x3a] sm:$0x3]  ;;  %v16873_v1 = vld [vmem:[%s26077_s4 + $0x80] sm:$0xff] }
  0x8b   : > { %16798 = vmatmul.mubr.msk.f32.gmra.mrb[10].mxu0 %vm727_vm2, %v1608_v4  ;;  %20444 = vmatprep.subr.bf16.mxu1 %v20443_v3  ;;  %v22931_v4 = vld [vmem:[#allocation2 + $0x1e] sm:$0xff] }
  0x8c   : > { %1740 = vmatprep.mubr.f32.mxu0 %v22371_v6 }
  0x8d   : > { %18939 = vmatmul.mubr.msk.f32.gmra.mrb[6].mxu1 %vm1073_vm3, %v1772_v8  ;;  %v22938_v8 = vld [vmem:[#allocation8 + $0x36] sm:$0xff] }
  0x8e   : > { %18941 = vmatprep.mubr.msk.f32.mxu1 %vm1073_vm3, %v1773_v11  ;;  %20446 = vmatpush3.bf16.msra.mxu1 %v20443_v3  ;;  %v16874_v3 = vld [vmem:[%s26077_s4 + $0x88] sm:$0xff] }
  0x8f   : > { %16799 = vmatmul.mubr.msk.f32.gmra.mrb[12].mxu0 %vm727_vm2, %v1609_v13  ;;  %20452 = vmatprep.subr.bf16.mxu1 %v20451_v12  ;;  %v20471_v7 = vpack.c.bf16 %v16874_v3, %v16873_v1  ;;  %v22944_v11 = vld [vmem:[#allocation2 + $0x2e] sm:$0xff]  ;;  %v2703_v3 = vld [vmem:[#allocation2 + $0x17] sm:$0xff] }
  0x90   : > { %1746 = vmatprep.mubr.f32.mxu0 %v22371_v6  ;;  %v2076_v13 = vld [vmem:[#allocation8 + $0x3e] sm:$0x3] }
  0x91   : > { %18942 = vmatmul.mubr.msk.f32.gmra.mrb[8].mxu1 %vm1073_vm3, %v1774_v14  ;;  %v16897_v14 = vld [vmem:[%s26076_s3 + $0xa0] sm:$0xff]  ;;  %v2702_v1 = vld [vmem:[#allocation2 + $0xf] sm:$0xff] }
  0x92   : > { %18944 = vmatprep.mubr.msk.f32.mxu1 %vm1073_vm3, %v1775_v15  ;;  %v16899_v15 = vld [vmem:[%s26076_s3 + $0xb0] sm:$0xff] }
  0x93   : > { %16800 = vmatmul.mubr.msk.f32.gmra.mrb[14].mxu0 %vm727_vm2, %v1610_v17  ;;  %v2242_v17 = vld [vmem:[#allocation2 + $0x3e] sm:$0x3] }
  0x94   : > { %2170 = vmatprep.mubr.f32.mxu0 %v22371_v6 }
  0x95   : > { %18945 = vmatmul.mubr.msk.f32.gmra.mrb[10].mxu1 %vm1073_vm3, %v1776_v20  ;;  %v2385_v20 = vld [vmem:[#allocation6 + $0x6] sm:$0xff] }
  0x96   : > { %18955 = vmatprep.mubr.msk.f32.mxu1 %vm1073_vm3, %v1919_v23  ;;  %v16876_v23 = vld [vmem:[%s26077_s4 + $0x98] sm:$0xff] }
  0x97   : > { %16829 = vmatmul.mubr.msk.f32.vlgmr.msra.gmra.mrb[0].mxu0 %vm727_vm2, %v2069_v10  ;;  %v20489_v10 = vpack.c.bf16 %v16899_v15, %v16897_v14  ;;  %v16909_v14 = vld [vmem:[%s26077_s4 + $0xa0] sm:$0xff]  ;;  %v16910_v15 = vld [vmem:[%s26077_s4 + $0xa8] sm:$0xff] }
  0x98   : > { %2176 = vmatprep.mubr.f32.mxu0 %v22371_v6  ;;  %20470 = vmatpush1.bf16.msra.mxu0 %v20469_v26  ;;  %v22980_v26 = vld [vmem:[#allocation6 + $0x16] sm:$0xff]  ;;  %v20491_v19 = vpack.c.bf16 %v16910_v15, %v16909_v14 }
  0x99   : > { %18956 = vmatmul.mubr.msk.f32.vlgmr.msra.gmra.mrb[12].mxu1 %vm1073_vm3, %v1920_v28  ;;  %20488 = vmatprep.subr.bf16.mxu0 %v20487_v27  ;;  %v20475_v27 = vpack.c.bf16 %v16876_v23, %v16875_v22  ;;  %v2536_v28 = vld [vmem:[#allocation8 + $0xf] sm:$0xff]  ;;  %v2707_v22 = vld [vmem:[#allocation2 + $0x37] sm:$0xff]  ;;  %v2542_v23 = vld [vmem:[#allocation8 + $0x3f] sm:$0x3] }
  0x9a   : > { %20454 = vmatpush3.bf16.msra.mxu1 %v20451_v12  ;;  %18958 = vmatprep.mubr.msk.f32.mxu1 %vm1073_vm3, %v1921_v29  ;;  %v22948_v12 = vld [vmem:[#allocation2 + $0x36] sm:$0xff]  ;;  %v16885_v29 = vld [vmem:[%s26078_s5 + $0x80] sm:$0xff] }
  0x9b   : > { %16830 = vmatmul.mubr.msk.f32.gmra.mrb[2].mxu0 %vm727_vm2, %v22875_v31  ;;  %20456 = vmatprep.subr.bf16.mxu1 %v20455_v30  ;;  %v2857_v14 = vld [vmem:[#allocation6 + $0x37] sm:$0xff] }
  0x9c   : > { %2182 = vmatprep.mubr.f32.mxu0 %v22371_v6  ;;  %v16923_v15 = vld [vmem:[%s26078_s5 + $0xb0] sm:$0xff] }
  0x9d   : > { %18959 = vmatmul.mubr.msk.f32.gmra.mrb[14].mxu1 %vm1073_vm3, %v1922_v34 }
  0x9e   : > { %18961 = vmatprep.mubr.msk.f32.mxu1 %vm1073_vm3, %v1923_v35  ;;  %20458 = vmatpush3.bf16.msra.mxu1 %v20455_v30  ;;  %v16886_v30 = vld [vmem:[%s26078_s5 + $0x88] sm:$0xff] }
  0x9f   : > { %16831 = vmatmul.mubr.msk.f32.gmra.mrb[4].mxu0 %vm727_vm2, %v22888_v39  ;;  %20460 = vmatprep.subr.bf16.mxu1 %v20459_v36  ;;  %v20479_v34 = vpack.c.bf16 %v16886_v30, %v16885_v29  ;;  %v2537_v35 = vld [vmem:[#allocation8 + $0x17] sm:$0xff]  ;;  %v16972_v29 = vld [vmem:[%s26076_s3 + $0xf8] sm:$0xff] }
  0xa0   : > { %2188 = vmatprep.mubr.f32.mxu0 %v22371_v6  ;;  %v2851_v30 = vld [vmem:[#allocation6 + $0x7] sm:$0xff] }
  0xa1   : > { %18962 = vmatmul.mubr.msk.f32.gmra.mrb[16].mxu1 %vm1073_vm3, %v1924_v40  ;;  %v23006_v40 = vld [vmem:[#allocation6 + $0x36] sm:$0xff] }
  0xa2   : > { %18964 = vmatprep.mubr.msk.f32.mxu1 %vm1073_vm3, %v1925_v41  ;;  %v2538_v41 = vld [vmem:[#allocation8 + $0x1f] sm:$0xff] }
  0xa3   : > { %16832 = vmatmul.mubr.msk.f32.gmra.mrb[6].mxu0 %vm727_vm2, %v22895_v42 }
  0xa4   : > { %2194 = vmatprep.mubr.f32.mxu0 %v22371_v6 }
  0xa5   : > { %18965 = vmatmul.mubr.msk.f32.gmra.mrb[18].mxu1 %vm1073_vm3, %v1926_v45  ;;  %v2392_v45 = vld [vmem:[#allocation6 + $0x3e] sm:$0x3] }
  0xa6   : > { %18975 = vmatprep.mubr.msk.f32.mxu1 %vm1073_vm3, %v2235_v46  ;;  %v2701_v46 = vld [vmem:[#allocation2 + $0x7] sm:$0xff] }
  0xa7   : > { %16833 = vmatmul.mubr.msk.f32.gmra.mrb[8].mxu0 %vm727_vm2, %v22902_v50 }
  0xa8   : > { %2200 = vmatprep.mubr.f32.mxu0 %v22371_v6 }
  0xa9   : > { %18976 = vmatmul.mubr.msk.f32.vlgmr.msra.gmra.mrb[4].mxu1 %vm1073_vm3, %v22912_v55 }
  0xaa   : > { %20462 = vmatpush3.bf16.msra.mxu1 %v20459_v36  ;;  %18978 = vmatprep.mubr.msk.f32.mxu1 %vm1073_vm3, %v22916_v56  ;;  %v23003_v36 = vld [vmem:[#allocation6 + $0x2e] sm:$0xff] }
  0xab   : > { %16834 = vmatmul.mubr.msk.f32.gmra.mrb[10].mxu0 %vm727_vm2, %v22919_v0  ;;  %20464 = vmatprep.subr.bf16.mxu1 %v20463_v59 }
  0xac   : > { %2206 = vmatprep.mubr.f32.mxu0 %v22371_v6 }
  0xad   : > { %18979 = vmatmul.mubr.msk.f32.gmra.mrb[6].mxu1 %vm1073_vm3, %v22931_v4 }
  0xae   : > { %18981 = vmatprep.mubr.msk.f32.mxu1 %vm1073_vm3, %v22935_v5  ;;  %20466 = vmatpush3.bf16.msra.mxu1 %v20463_v59  ;;  %v16888_v59 = vld [vmem:[%s26078_s5 + $0x98] sm:$0xff] }
  0xaf   : > { %16835 = vmatmul.mubr.msk.f32.gmra.mrb[12].mxu0 %vm727_vm2, %v22938_v8  ;;  %20472 = vmatprep.subr.bf16.mxu1 %v20471_v7 }
  0xb0   : > { %2212 = vmatprep.mubr.f32.mxu0 %v22371_v6 }
  0xb1   : > { %18982 = vmatmul.mubr.msk.f32.gmra.mrb[8].mxu1 %vm1073_vm3, %v22944_v11 }
  0xb2   : > { %18984 = vmatprep.mubr.msk.f32.mxu1 %vm1073_vm3, %v22948_v12 }
  0xb3   : > { %16836 = vmatmul.mubr.msk.f32.gmra.mrb[14].mxu0 %vm727_vm2, %v2076_v13  ;;  %v2540_v13 = vld [vmem:[#allocation8 + $0x2f] sm:$0xff] }
  0xb4   : > { %2636 = vmatprep.mubr.f32.mxu0 %v22371_v6 }
  0xb5   : > { %18985 = vmatmul.mubr.msk.f32.gmra.mrb[10].mxu1 %vm1073_vm3, %v2242_v17  ;;  %v2704_v17 = vld [vmem:[#allocation2 + $0x1f] sm:$0xff] }
  0xb6   : > { %18995 = vmatprep.mubr.msk.f32.mxu1 %vm1073_vm3, %v2385_v20  ;;  %v2541_v20 = vld [vmem:[#allocation8 + $0x37] sm:$0xff] }
  0xb7   : > { %16865 = vmatmul.mubr.msk.f32.vlgmr.msra.gmra.mrb[0].mxu0 %vm727_vm2, %v2535_v21  ;;  %v2706_v21 = vld [vmem:[#allocation2 + $0x2f] sm:$0xff] }
  0xb8   : > { %2642 = vmatprep.mubr.f32.mxu0 %v22371_v6  ;;  %20490 = vmatpush1.bf16.msra.mxu0 %v20489_v10  ;;  %v16933_v10 = vld [vmem:[%s26076_s3 + $0xc0] sm:$0xff] }
  0xb9   : > { %18996 = vmatmul.mubr.msk.f32.vlgmr.msra.gmra.mrb[12].mxu1 %vm1073_vm3, %v22977_v25  ;;  %20508 = vmatprep.subr.bf16.mxu0 %v20507_v24  ;;  %v16935_v24 = vld [vmem:[%s26076_s3 + $0xd0] sm:$0xff] }
  0xba   : > { %20474 = vmatpush3.bf16.msra.mxu1 %v20471_v7  ;;  %18998 = vmatprep.mubr.msk.f32.mxu1 %vm1073_vm3, %v22980_v26  ;;  %v20483_v7 = vpack.c.bf16 %v16888_v59, %v16887_v53  ;;  %v16921_v59 = vld [vmem:[%s26078_s5 + $0xa0] sm:$0xff] }
  0xbb   : > { %16866 = vmatmul.mubr.msk.f32.gmra.mrb[2].mxu0 %vm727_vm2, %v2536_v28  ;;  %20476 = vmatprep.subr.bf16.mxu1 %v20475_v27  ;;  %v16970_v28 = vld [vmem:[%s26076_s3 + $0xe8] sm:$0xff] }
  0xbc   : > { %2648 = vmatprep.mubr.f32.mxu0 %v22371_v6 }
  0xbd   : > { %18999 = vmatmul.mubr.msk.f32.gmra.mrb[14].mxu1 %vm1073_vm3, %v22993_v32 }
  0xbe   : > { %19001 = vmatprep.mubr.msk.f32.mxu1 %vm1073_vm3, %v22996_v33  ;;  %20478 = vmatpush3.bf16.msra.mxu1 %v20475_v27  ;;  %v2708_v27 = vld [vmem:[#allocation2 + $0x3f] sm:$0x3] }
  0xbf   : > { %16867 = vmatmul.mubr.msk.f32.gmra.mrb[4].mxu0 %vm727_vm2, %v2537_v35  ;;  %20480 = vmatprep.subr.bf16.mxu1 %v20479_v34  ;;  %v16912_v35 = vld [vmem:[%s26077_s4 + $0xb8] sm:$0xff] }
  0xc0   : > { %2654 = vmatprep.mubr.f32.mxu0 %v22371_v6 }
  0xc1   : > { %19002 = vmatmul.mubr.msk.f32.gmra.mrb[16].mxu1 %vm1073_vm3, %v23003_v36 }
  0xc2   : > { %19004 = vmatprep.mubr.msk.f32.mxu1 %vm1073_vm3, %v23006_v40 }
  0xc3   : > { %16868 = vmatmul.mubr.msk.f32.gmra.mrb[6].mxu0 %vm727_vm2, %v2538_v41  ;;  %v20509_v41 = vpack.c.bf16 %v16935_v24, %v16933_v10 }
  0xc4   : > { %2660 = vmatprep.mubr.f32.mxu0 %v22371_v6 }
  0xc5   : > { %19005 = vmatmul.mubr.msk.f32.gmra.mrb[18].mxu1 %vm1073_vm3, %v2392_v45  ;;  %v20527_v45 = vpack.c.bf16 %v16972_v29, %v16970_v28  ;;  %v16957_v28 = vld [vmem:[%s26078_s5 + $0xc0] sm:$0xff]  ;;  %v16958_v29 = vld [vmem:[%s26078_s5 + $0xc8] sm:$0xff] }
  0xc6   : > { %19015 = vmatprep.mubr.msk.f32.mxu1 %vm1073_vm3, %v2701_v46  ;;  %v2852_v46 = vld [vmem:[#allocation6 + $0xf] sm:$0xff] }
  0xc7   : > { %16869 = vmatmul.mubr.msk.f32.gmra.mrb[8].mxu0 %vm727_vm2, %v2539_v52  ;;  %v2853_v52 = vld [vmem:[#allocation6 + $0x17] sm:$0xff] }
  0xc8   : > { %2666 = vmatprep.mubr.f32.mxu0 %v22371_v6 }
  0xc9   : > { %19016 = vmatmul.mubr.msk.f32.vlgmr.msra.gmra.mrb[4].mxu1 %vm1073_vm3, %v2702_v1  ;;  %v16922_v1 = vld [vmem:[%s26078_s5 + $0xa8] sm:$0xff] }
  0xca   : > { %20482 = vmatpush3.bf16.msra.mxu1 %v20479_v34  ;;  %19018 = vmatprep.mubr.msk.f32.mxu1 %vm1073_vm3, %v2703_v3  ;;  %v16911_v34 = vld [vmem:[%s26077_s4 + $0xb0] sm:$0xff]  ;;  %v2855_v3 = vld [vmem:[#allocation6 + $0x27] sm:$0xff] }
  0xcb   : > { %16870 = vmatmul.mubr.msk.f32.gmra.mrb[10].mxu0 %vm727_vm2, %v2540_v13  ;;  %20484 = vmatprep.subr.bf16.mxu1 %v20483_v7  ;;  %v20495_v53 = vpack.c.bf16 %v16912_v35, %v16911_v34  ;;  %v2856_v13 = vld [vmem:[#allocation6 + $0x2f] sm:$0xff]  ;;  %v3324_v34 = vld [vmem:[#allocation6 + $0x40] sm:$0x3] }
  0xcc   : > { %2672 = vmatprep.mubr.f32.mxu0 %v22371_v6  ;;  %v16959_v35 = vld [vmem:[%s26078_s5 + $0xd0] sm:$0xff] }
  0xcd   : > { %19019 = vmatmul.mubr.msk.f32.gmra.mrb[6].mxu1 %vm1073_vm3, %v2704_v17 }
  0xce   : > { %19021 = vmatprep.mubr.msk.f32.mxu1 %vm1073_vm3, %v2705_v18  ;;  %20486 = vmatpush3.bf16.msra.mxu1 %v20483_v7  ;;  %v20499_v7 = vpack.c.bf16 %v16922_v1, %v16921_v59  ;;  %v16946_v18 = vld [vmem:[%s26077_s4 + $0xc8] sm:$0xff] }
  0xcf   : > { %16871 = vmatmul.mubr.msk.f32.gmra.mrb[12].mxu0 %vm727_vm2, %v2541_v20  ;;  %20492 = vmatprep.subr.bf16.mxu1 %v20491_v19  ;;  %v17008_v20 = vld [vmem:[%s26076_s3 + $0x118] sm:$0xff]  ;;  %v16982_v59 = vld [vmem:[%s26077_s4 + $0xe8] sm:$0xff] }
  0xd0   : > { %2678 = vmatprep.mubr.f32.mxu0 %v22371_v6  ;;  %v3636_v1 = vld [vmem:[#allocation2 + $0x24] sm:$0xff] }
  0xd1   : > { %19022 = vmatmul.mubr.msk.f32.gmra.mrb[8].mxu1 %vm1073_vm3, %v2706_v21  ;;  %v16947_v21 = vld [vmem:[%s26077_s4 + $0xd0] sm:$0xff] }
  0xd2   : > { %19024 = vmatprep.mubr.msk.f32.mxu1 %vm1073_vm3, %v2707_v22  ;;  %v16948_v22 = vld [vmem:[%s26077_s4 + $0xd8] sm:$0xff] }
  0xd3   : > { %16872 = vmatmul.mubr.msk.f32.gmra.mrb[14].mxu0 %vm727_vm2, %v2542_v23  ;;  %v20515_v24 = vpack.c.bf16 %v16948_v22, %v16947_v21  ;;  %v16993_v21 = vld [vmem:[%s26078_s5 + $0xe0] sm:$0xff]  ;;  %v16994_v22 = vld [vmem:[%s26078_s5 + $0xe8] sm:$0xff] }
  0xd4   : > { %3102 = vmatprep.mubr.f32.mxu0 %v22371_v6 }
  0xd5   : > { %19025 = vmatmul.mubr.msk.f32.gmra.mrb[10].mxu1 %vm1073_vm3, %v2708_v27  ;;  %v3468_v27 = vld [vmem:[#allocation8 + $0x14] sm:$0xff] }
  0xd6   : > { %19035 = vmatprep.mubr.msk.f32.mxu1 %vm1073_vm3, %v2851_v30  ;;  %v3469_v30 = vld [vmem:[#allocation8 + $0x1c] sm:$0xff] }
  0xd7   : > { %16901 = vmatmul.mubr.msk.f32.vlgmr.msra.gmra.mrb[0].mxu0 %vm727_vm2, %v22686_v54  ;;  %v2854_v54 = vld [vmem:[#allocation6 + $0x1f] sm:$0xff] }
  0xd8   : > { %3108 = vmatprep.mubr.f32.mxu0 %v22371_v6  ;;  %20510 = vmatpush1.bf16.msra.mxu0 %v20509_v41  ;;  %v16960_v41 = vld [vmem:[%s26078_s5 + $0xd8] sm:$0xff] }
  0xd9   : > { %19036 = vmatmul.mubr.msk.f32.vlgmr.msra.gmra.mrb[12].mxu1 %vm1073_vm3, %v2852_v46  ;;  %20528 = vmatprep.subr.bf16.mxu0 %v20527_v45  ;;  %v3635_v45 = vld [vmem:[#allocation2 + $0x1c] sm:$0xff]  ;;  %v20523_v46 = vpack.c.bf16 %v16960_v41, %v16959_v35 }
  0xda   : > { %20494 = vmatpush3.bf16.msra.mxu1 %v20491_v19  ;;  %19038 = vmatprep.mubr.msk.f32.mxu1 %vm1073_vm3, %v2853_v52  ;;  %v17006_v19 = vld [vmem:[%s26076_s3 + $0x108] sm:$0xff]  ;;  %v4100_v35 = vld [vmem:[#allocation2 + $0x15] sm:$0xff]  ;;  %v4101_v41 = vld [vmem:[#allocation2 + $0x1d] sm:$0xff] }
  0xdb   : > { %16902 = vmatmul.mubr.msk.f32.gmra.mrb[2].mxu0 %vm727_vm2, %v22705_v60  ;;  %20496 = vmatprep.subr.bf16.mxu1 %v20495_v53  ;;  %v2858_v60 = vld [vmem:[#allocation6 + $0x3f] sm:$0x3]  ;;  %v20547_v10 = vpack.c.bf16 %v17008_v20, %v17006_v19  ;;  %v3472_v52 = vld [vmem:[#allocation8 + $0x34] sm:$0xff] }
  0xdc   : > { %3114 = vmatprep.mubr.f32.mxu0 %v22371_v6 }
  0xdd   : > { %19039 = vmatmul.mubr.msk.f32.gmra.mrb[14].mxu1 %vm1073_vm3, %v2854_v54  ;;  %v3637_v54 = vld [vmem:[#allocation2 + $0x2c] sm:$0xff] }
  0xde   : > { %19041 = vmatprep.mubr.msk.f32.mxu1 %vm1073_vm3, %v2855_v3  ;;  %20498 = vmatpush3.bf16.msra.mxu1 %v20495_v53  ;;  %v16981_v53 = vld [vmem:[%s26077_s4 + $0xe0] sm:$0xff] }
  0xdf   : > { %16903 = vmatmul.mubr.msk.f32.gmra.mrb[4].mxu0 %vm727_vm2, %v22718_v63  ;;  %20500 = vmatprep.subr.bf16.mxu1 %v20499_v7  ;;  %v16924_v63 = vld [vmem:[%s26078_s5 + $0xb8] sm:$0xff]  ;;  %v20531_v3 = vpack.c.bf16 %v16982_v59, %v16981_v53  ;;  %v4102_v53 = vld [vmem:[#allocation2 + $0x25] sm:$0xff]  ;;  %v4103_v59 = vld [vmem:[#allocation2 + $0x2d] sm:$0xff] }
  0xe0   : > { %3120 = vmatprep.mubr.f32.mxu0 %v22371_v6  ;;  %v20503_v17 = vpack.c.bf16 %v16924_v63, %v16923_v15  ;;  %v17005_v15 = vld [vmem:[%s26076_s3 + $0x100] sm:$0xff]  ;;  %v17007_v63 = vld [vmem:[%s26076_s3 + $0x110] sm:$0xff] }
  0xe1   : > { %19042 = vmatmul.mubr.msk.f32.gmra.mrb[16].mxu1 %vm1073_vm3, %v2856_v13  ;;  %v3638_v13 = vld [vmem:[#allocation2 + $0x34] sm:$0xff] }
  0xe2   : > { %19044 = vmatprep.mubr.msk.f32.mxu1 %vm1073_vm3, %v2857_v14  ;;  %v3639_v14 = vld [vmem:[#allocation2 + $0x3c] sm:$0xff] }
  0xe3   : > { %16904 = vmatmul.mubr.msk.f32.gmra.mrb[6].mxu0 %vm727_vm2, %v22727_v2  ;;  %v16945_v2 = vld [vmem:[%s26077_s4 + $0xc0] sm:$0xff] }
  0xe4   : > { %3126 = vmatprep.mubr.f32.mxu0 %v22371_v6 }
  0xe5   : > { %19045 = vmatmul.mubr.msk.f32.gmra.mrb[18].mxu1 %vm1073_vm3, %v2858_v60  ;;  %v3474_v60 = vld [vmem:[#allocation8 + $0x44] sm:$0x3] }
  0xe6   : > { %19055 = vmatprep.mubr.msk.f32.mxu1 %vm1073_vm3, %v22674_v48  ;;  %v20511_v48 = vpack.c.bf16 %v16946_v18, %v16945_v2  ;;  %v3783_v2 = vld [vmem:[#allocation6 + $0xc] sm:$0xff] }
  0xe7   : > { %16905 = vmatmul.mubr.msk.f32.gmra.mrb[8].mxu0 %vm727_vm2, %v22740_v9  ;;  %v3007_v9 = vld [vmem:[#allocation8 + $0x38] sm:$0xff] }
  0xe8   : > { %3132 = vmatprep.mubr.f32.mxu0 %v22371_v6 }
  0xe9   : > { %19056 = vmatmul.mubr.msk.f32.vlgmr.msra.gmra.mrb[4].mxu1 %vm1073_vm3, %v22683_v51  ;;  %v3173_v51 = vld [vmem:[#allocation2 + $0x38] sm:$0xff] }
  0xea   : > { %20502 = vmatpush3.bf16.msra.mxu1 %v20499_v7  ;;  %19058 = vmatprep.mubr.msk.f32.mxu1 %vm1073_vm3, %v22698_v57  ;;  %v3008_v57 = vld [vmem:[#allocation8 + $0x40] sm:$0x3] }
  0xeb   : > { %16906 = vmatmul.mubr.msk.f32.gmra.mrb[10].mxu0 %vm727_vm2, %v22753_v16  ;;  %20504 = vmatprep.subr.bf16.mxu1 %v20503_v17  ;;  %v16969_v16 = vld [vmem:[%s26076_s3 + $0xe0] sm:$0xff]  ;;  %v3473_v7 = vld [vmem:[#allocation8 + $0x3c] sm:$0xff] }
  0xec   : > { %3138 = vmatprep.mubr.f32.mxu0 %v22371_v6 }
  0xed   : > { %19059 = vmatmul.mubr.msk.f32.gmra.mrb[6].mxu1 %vm1073_vm3, %v22702_v58  ;;  %v16971_v58 = vld [vmem:[%s26076_s3 + $0xf0] sm:$0xff] }
  0xee   : > { %19061 = vmatprep.mubr.msk.f32.mxu1 %vm1073_vm3, %v22711_v61  ;;  %20506 = vmatpush3.bf16.msra.mxu1 %v20503_v17  ;;  %v3174_v61 = vld [vmem:[#allocation2 + $0x40] sm:$0x3]  ;;  %v20529_v23 = vpack.c.bf16 %v16971_v58, %v16969_v16  ;;  %v3640_v17 = vld [vmem:[#allocation2 + $0x44] sm:$0x3]  ;;  %v3784_v58 = vld [vmem:[#allocation6 + $0x14] sm:$0xff] }
  0xef   : > { %16907 = vmatmul.mubr.msk.f32.gmra.mrb[12].mxu0 %vm727_vm2, %v3007_v9  ;;  %20512 = vmatprep.subr.bf16.mxu1 %v20511_v48  ;;  %v16983_v9 = vld [vmem:[%s26077_s4 + $0xf0] sm:$0xff] }
  0xf0   : > { %3144 = vmatprep.mubr.f32.mxu0 %v22371_v6 }
  0xf1   : > { %19062 = vmatmul.mubr.msk.f32.gmra.mrb[8].mxu1 %vm1073_vm3, %v22715_v62  ;;  %v3467_v62 = vld [vmem:[#allocation8 + $0xc] sm:$0xff] }
  0xf2   : > { %19064 = vmatprep.mubr.msk.f32.mxu1 %vm1073_vm3, %v3173_v51  ;;  %v16984_v51 = vld [vmem:[%s26077_s4 + $0xf8] sm:$0xff] }
  0xf3   : > { %16908 = vmatmul.mubr.msk.f32.gmra.mrb[14].mxu0 %vm727_vm2, %v3008_v57  ;;  %v20549_v57 = vpack.c.bf16 %v17007_v63, %v17005_v15  ;;  %v20535_v19 = vpack.c.bf16 %v16984_v51, %v16983_v9  ;;  %v17019_v15 = vld [vmem:[%s26077_s4 + $0x110] sm:$0xff]  ;;  %v17020_v63 = vld [vmem:[%s26077_s4 + $0x118] sm:$0xff]  ;;  %v17029_v9 = vld [vmem:[%s26078_s5 + $0x100] sm:$0xff] }
  0xf4   : > { %3568 = vmatprep.mubr.f32.mxu0 %v22371_v6  ;;  %v17030_v51 = vld [vmem:[%s26078_s5 + $0x108] sm:$0xff] }
  0xf5   : > { %19065 = vmatmul.mubr.msk.f32.gmra.mrb[10].mxu1 %vm1073_vm3, %v3174_v61  ;;  %v3785_v61 = vld [vmem:[#allocation6 + $0x1c] sm:$0xff] }
  0xf6   : > { %19075 = vmatprep.mubr.msk.f32.mxu1 %vm1073_vm3, %v22787_v37  ;;  %v20519_v37 = vpack.c.bf16 %v16958_v29, %v16957_v28  ;;  %v3935_v28 = vld [vmem:[#allocation8 + $0x1d] sm:$0xff] }
  0xf7   : > { %16937 = vmatmul.mubr.msk.f32.vlgmr.msra.gmra.mrb[0].mxu0 %vm727_vm2, %v3467_v62  ;;  %v3934_v62 = vld [vmem:[#allocation8 + $0x15] sm:$0xff]  ;;  %v3788_v29 = vld [vmem:[#allocation6 + $0x34] sm:$0xff] }
  0xf8   : > { %3574 = vmatprep.mubr.f32.mxu0 %v22371_v6  ;;  %20530 = vmatpush1.bf16.msra.mxu0 %v20529_v23 }
  0xf9   : > { %19076 = vmatmul.mubr.msk.f32.vlgmr.msra.gmra.mrb[12].mxu1 %vm1073_vm3, %v22790_v38  ;;  %20548 = vmatprep.subr.bf16.mxu0 %v20547_v10  ;;  %v3323_v38 = vld [vmem:[#allocation6 + $0x38] sm:$0xff]  ;;  %v3786_v10 = vld [vmem:[#allocation6 + $0x24] sm:$0xff] }
  0xfa   : > { %20514 = vmatpush3.bf16.msra.mxu1 %v20511_v48  ;;  %19078 = vmatprep.mubr.msk.f32.mxu1 %vm1073_vm3, %v22803_v43  ;;  %v3470_v43 = vld [vmem:[#allocation8 + $0x24] sm:$0xff]  ;;  %v3933_v48 = vld [vmem:[#allocation8 + $0xd] sm:$0xff] }
  0xfb   : > { %16938 = vmatmul.mubr.msk.f32.gmra.mrb[2].mxu0 %vm727_vm2, %v3468_v27  ;;  %20516 = vmatprep.subr.bf16.mxu1 %v20515_v24  ;;  %v20539_v27 = vpack.c.bf16 %v16994_v22, %v16993_v21 }
  0xfc   : > { %3580 = vmatprep.mubr.f32.mxu0 %v22371_v6 }
  0xfd   : > { %19079 = vmatmul.mubr.msk.f32.gmra.mrb[14].mxu1 %vm1073_vm3, %v22806_v44  ;;  %v3633_v44 = vld [vmem:[#allocation2 + $0xc] sm:$0xff] }
  0xfe   : > { %19081 = vmatprep.mubr.msk.f32.mxu1 %vm1073_vm3, %v22813_v47  ;;  %20518 = vmatpush3.bf16.msra.mxu1 %v20515_v24  ;;  %v3471_v47 = vld [vmem:[#allocation8 + $0x2c] sm:$0xff]  ;;  %v3787_v24 = vld [vmem:[#allocation6 + $0x2c] sm:$0xff] }
  0xff   : > { %16939 = vmatmul.mubr.msk.f32.gmra.mrb[4].mxu0 %vm727_vm2, %v3469_v30  ;;  %20520 = vmatprep.subr.bf16.mxu1 %v20519_v37  ;;  %v3936_v30 = vld [vmem:[#allocation8 + $0x25] sm:$0xff] }
 0x100   : > { %3586 = vmatprep.mubr.f32.mxu0 %v22371_v6 }
 0x101   : > { %19082 = vmatmul.mubr.msk.f32.gmra.mrb[16].mxu1 %vm1073_vm3, %v22816_v49  ;;  %v3634_v49 = vld [vmem:[#allocation2 + $0x14] sm:$0xff] }
 0x102   : > { %19084 = vmatprep.mubr.msk.f32.mxu1 %vm1073_vm3, %v3323_v38  ;;  %v3790_v38 = vld [vmem:[#allocation6 + $0x44] sm:$0x3] }
 0x103   : > { %16940 = vmatmul.mubr.msk.f32.gmra.mrb[6].mxu0 %vm727_vm2, %v3470_v43  ;;  %v4099_v43 = vld [vmem:[#allocation2 + $0xd] sm:$0xff] }
 0x104   : > { %3592 = vmatprep.mubr.f32.mxu0 %v22371_v6 }
 0x105   : > { %19085 = vmatmul.mubr.msk.f32.gmra.mrb[18].mxu1 %vm1073_vm3, %v3324_v34  ;;  %v3937_v34 = vld [vmem:[#allocation8 + $0x2d] sm:$0xff] }
 0x106   : > { %19095 = vmatprep.mubr.msk.f32.mxu1 %vm1073_vm3, %v3633_v44  ;;  %v16995_v44 = vld [vmem:[%s26078_s5 + $0xf0] sm:$0xff] }
 0x107   : > { %16941 = vmatmul.mubr.msk.f32.gmra.mrb[8].mxu0 %vm727_vm2, %v3471_v47  ;;  %v16996_v47 = vld [vmem:[%s26078_s5 + $0xf8] sm:$0xff] }
 0x108   : > { %3598 = vmatprep.mubr.f32.mxu0 %v22371_v6 }
 0x109   : > { %19096 = vmatmul.mubr.msk.f32.vlgmr.msra.gmra.mrb[4].mxu1 %vm1073_vm3, %v3634_v49  ;;  %v20543_v49 = vpack.c.bf16 %v16996_v47, %v16995_v44 }
 0x10a   : > { %20522 = vmatpush3.bf16.msra.mxu1 %v20519_v37  ;;  %19098 = vmatprep.mubr.msk.f32.mxu1 %vm1073_vm3, %v3635_v45  ;;  %v3789_v37 = vld [vmem:[#allocation6 + $0x3c] sm:$0xff]  ;;  %v3938_v45 = vld [vmem:[#allocation8 + $0x35] sm:$0xff] }
 0x10b   : > { %16942 = vmatmul.mubr.msk.f32.gmra.mrb[10].mxu0 %vm727_vm2, %v3472_v52  ;;  %20524 = vmatprep.subr.bf16.mxu1 %v20523_v46  ;;  %v17018_v52 = vld [vmem:[%s26077_s4 + $0x108] sm:$0xff] }
 0x10c   : > { %3604 = vmatprep.mubr.f32.mxu0 %v22371_v6 }
 0x10d   : > { %19099 = vmatmul.mubr.msk.f32.gmra.mrb[6].mxu1 %vm1073_vm3, %v3636_v1 }
 0x10e   : > { %19101 = vmatprep.mubr.msk.f32.mxu1 %vm1073_vm3, %v3637_v54  ;;  %20526 = vmatpush3.bf16.msra.mxu1 %v20523_v46  ;;  %v17017_v46 = vld [vmem:[%s26077_s4 + $0x100] sm:$0xff]  ;;  %v3939_v54 = vld [vmem:[#allocation8 + $0x3d] sm:$0xff] }
 0x10f   : > { %16943 = vmatmul.mubr.msk.f32.gmra.mrb[12].mxu0 %vm727_vm2, %v3473_v7  ;;  %20532 = vmatprep.subr.bf16.mxu1 %v20531_v3  ;;  %v20551_v1 = vpack.c.bf16 %v17018_v52, %v17017_v46  ;;  %v4105_v7 = vld [vmem:[#allocation2 + $0x3d] sm:$0xff] }
 0x110   : > { %3610 = vmatprep.mubr.f32.mxu0 %v22371_v6 }
 0x111   : > { %19102 = vmatmul.mubr.msk.f32.gmra.mrb[8].mxu1 %vm1073_vm3, %v3638_v13  ;;  %v3940_v13 = vld [vmem:[#allocation8 + $0x45] sm:$0x3] }
 0x112   : > { %19104 = vmatprep.mubr.msk.f32.mxu1 %vm1073_vm3, %v3639_v14  ;;  %v4106_v14 = vld [vmem:[#allocation2 + $0x45] sm:$0x3] }
 0x113   : > { %16944 = vmatmul.mubr.msk.f32.gmra.mrb[14].mxu0 %vm727_vm2, %v3474_v60  ;;  %v4249_v60 = vld [vmem:[#allocation6 + $0xd] sm:$0xff] }
 0x114   : > { %v23202_v18 = vpop.f32.mrb[0].mxu1  ;;  %4034 = vmatprep.mubr.f32.mxu0 %v22371_v6 }
 0x115   : > { %v23211_v16 = vpop.f32.mrb[1].mxu1  ;;  %19105 = vmatmul.mubr.msk.f32.gmra.mrb[10].mxu1 %vm1073_vm3, %v3640_v17  ;;  %v4250_v17 = vld [vmem:[#allocation6 + $0x15] sm:$0xff] }
 0x116   : > { %19115 = vmatprep.mubr.msk.f32.mxu1 %vm1073_vm3, %v3783_v2  ;;  %v4251_v2 = vld [vmem:[#allocation6 + $0x1d] sm:$0xff] }
 0x117   : > { %16973 = vmatmul.mubr.msk.f32.vlgmr.msra.gmra.mrb[0].mxu0 %vm727_vm2, %v3933_v48  ;;  %v20555_v48 = vpack.c.bf16 %v17020_v63, %v17019_v15 }
 0x118   : > { %v23216_v20 = vpop.f32.mrb[2].mxu1  ;;  %4040 = vmatprep.mubr.f32.mxu0 %v22371_v6  ;;  %20550 = vmatpush1.bf16.msra.mxu0 %v20549_v57  ;;  %v4252_v57 = vld [vmem:[#allocation6 + $0x25] sm:$0xff] }
 0x119   : > { %v23225_v23 = vpop.f32.mrb[3].mxu1  ;;  %19116 = vmatmul.mubr.msk.f32.vlgmr.msra.gmra.mrb[12].mxu1 %vm1073_vm3, %v3784_v58  ;;  %v20559_v58 = vpack.c.bf16 %v17030_v51, %v17029_v9 }
 0x11a   : > { %20534 = vmatpush3.bf16.msra.mxu1 %v20531_v3  ;;  %19118 = vmatprep.mubr.msk.f32.mxu1 %vm1073_vm3, %v3785_v61  ;;  %v4104_v3 = vld [vmem:[#allocation2 + $0x35] sm:$0xff] }
 0x11b   : > { %16974 = vmatmul.mubr.msk.f32.gmra.mrb[2].mxu0 %vm727_vm2, %v3934_v62  ;;  %20536 = vmatprep.subr.bf16.mxu1 %v20535_v19  ;;  %v4254_v61 = vld [vmem:[#allocation6 + $0x35] sm:$0xff] }
 0x11c   : > { %4046 = vmatprep.mubr.f32.mxu0 %v22371_v6  ;;  %v17031_v62 = vld [vmem:[%s26078_s5 + $0x110] sm:$0xff] }
 0x11d   : > { %19119 = vmatmul.mubr.msk.f32.gmra.mrb[14].mxu1 %vm1073_vm3, %v3786_v10 }
 0x11e   : > { %19121 = vmatprep.mubr.msk.f32.mxu1 %vm1073_vm3, %v3787_v24  ;;  %20538 = vmatpush3.bf16.msra.mxu1 %v20535_v19  ;;  %v4255_v19 = vld [vmem:[#allocation6 + $0x3d] sm:$0xff] }
 0x11f   : > { %16975 = vmatmul.mubr.msk.f32.gmra.mrb[4].mxu0 %vm727_vm2, %v3935_v28  ;;  %20540 = vmatprep.subr.bf16.mxu1 %v20539_v27 }
 0x120   : > { %4052 = vmatprep.mubr.f32.mxu0 %v22371_v6 }
 0x121   : > { %19122 = vmatmul.mubr.msk.f32.gmra.mrb[16].mxu1 %vm1073_vm3, %v3788_v29 }
 0x122   : > { %19124 = vmatprep.mubr.msk.f32.mxu1 %vm1073_vm3, %v3789_v37 }
 0x123   : > { %16976 = vmatmul.mubr.msk.f32.gmra.mrb[6].mxu0 %vm727_vm2, %v3936_v30 }
 0x124   : > { %4058 = vmatprep.mubr.f32.mxu0 %v22371_v6 }
 0x125   : > { %19125 = vmatmul.mubr.msk.f32.gmra.mrb[18].mxu1 %vm1073_vm3, %v3790_v38 }
 0x126   : > { %19135 = vmatprep.mubr.msk.f32.mxu1 %vm1073_vm3, %v4099_v43 }
 0x127   : > { %16977 = vmatmul.mubr.msk.f32.gmra.mrb[8].mxu0 %vm727_vm2, %v3937_v34 }
 0x128   : > { %4064 = vmatprep.mubr.f32.mxu0 %v22371_v6 }
 0x129   : > { %19136 = vmatmul.mubr.msk.f32.vlgmr.msra.gmra.mrb[4].mxu1 %vm1073_vm3, %v4100_v35 }
 0x12a   : > { %20542 = vmatpush3.bf16.msra.mxu1 %v20539_v27  ;;  %19138 = vmatprep.mubr.msk.f32.mxu1 %vm1073_vm3, %v4101_v41 }
 0x12b   : > { %16978 = vmatmul.mubr.msk.f32.gmra.mrb[10].mxu0 %vm727_vm2, %v3938_v45  ;;  %20544 = vmatprep.subr.bf16.mxu1 %v20543_v49 }
 0x12c   : > { %4070 = vmatprep.mubr.f32.mxu0 %v22371_v6 }
 0x12d   : > { %19139 = vmatmul.mubr.msk.f32.gmra.mrb[6].mxu1 %vm1073_vm3, %v4102_v53 }
 0x12e   : > { %19141 = vmatprep.mubr.msk.f32.mxu1 %vm1073_vm3, %v4103_v59  ;;  %20546 = vmatpush3.bf16.msra.mxu1 %v20543_v49 }
 0x12f   : > { %16979 = vmatmul.mubr.msk.f32.gmra.mrb[12].mxu0 %vm727_vm2, %v3939_v54  ;;  %20552 = vmatprep.subr.bf16.mxu1 %v20551_v1 }
 0x130   : > { %4076 = vmatprep.mubr.f32.mxu0 %v22371_v6 }
 0x131   : > { %19142 = vmatmul.mubr.msk.f32.gmra.mrb[8].mxu1 %vm1073_vm3, %v4104_v3 }
 0x132   : > { %19144 = vmatprep.mubr.msk.f32.mxu1 %vm1073_vm3, %v4105_v7 }
 0x133   : > { %16980 = vmatmul.mubr.msk.f32.gmra.mrb[14].mxu0 %vm727_vm2, %v3940_v13 }
 0x134   : > { %4500 = vmatprep.mubr.f32.mxu0 %v22371_v6 }
 0x135   : > { %19145 = vmatmul.mubr.msk.f32.gmra.mrb[10].mxu1 %vm1073_vm3, %v4106_v14 }
 0x136   : > { %19155 = vmatprep.mubr.msk.f32.mxu1 %vm1073_vm3, %v4249_v60 }
 0x137   : > { %17009 = vmatmul.mubr.msk.f32.vlgmr.msra.gmra.mrb[0].mxu0 %vm727_vm2, %v22875_v31  ;;  %v4253_v31 = vld [vmem:[#allocation6 + $0x2d] sm:$0xff] }
 0x138   : > { %4506 = vmatprep.mubr.f32.mxu0 %v22371_v6 }
 0x139   : > { %19156 = vmatmul.mubr.msk.f32.vlgmr.msra.gmra.mrb[12].mxu1 %vm1073_vm3, %v4250_v17 }
 0x13a   : > { %20554 = vmatpush3.bf16.msra.mxu1 %v20551_v1  ;;  %19158 = vmatprep.mubr.msk.f32.mxu1 %vm1073_vm3, %v4251_v2 }
 0x13b   : > { %17010 = vmatmul.mubr.msk.f32.gmra.mrb[2].mxu0 %vm727_vm2, %v22888_v39  ;;  %20556 = vmatprep.subr.bf16.mxu1 %v20555_v48  ;;  %v4256_v39 = vld [vmem:[#allocation6 + $0x45] sm:$0x3] }
 0x13c   : > { %4512 = vmatprep.mubr.f32.mxu0 %v22371_v6 }
 0x13d   : > { %19159 = vmatmul.mubr.msk.f32.gmra.mrb[14].mxu1 %vm1073_vm3, %v4252_v57 }
 0x13e   : > { %19161 = vmatprep.mubr.msk.f32.mxu1 %vm1073_vm3, %v4253_v31  ;;  %20558 = vmatpush3.bf16.msra.mxu1 %v20555_v48 }
 0x13f   : > { %17011 = vmatmul.mubr.msk.f32.gmra.mrb[4].mxu0 %vm727_vm2, %v22895_v42  ;;  %20560 = vmatprep.subr.bf16.mxu1 %v20559_v58  ;;  %v17032_v42 = vld [vmem:[%s26078_s5 + $0x118] sm:$0xff] }
 0x140   : > { %4518 = vmatprep.mubr.f32.mxu0 %v22371_v6  ;;  %v20563_v21 = vpack.c.bf16 %v17032_v42, %v17031_v62  ;;  %v659_v62 = vld [vmem:[%s26102_s23 + $0x18] sm:$0xff]  ;;  %v4865_v42 = vld [vmem:[#allocation3 + $0x7] sm:$0xff] }
 0x141   : > { %19162 = vmatmul.mubr.msk.f32.gmra.mrb[16].mxu1 %vm1073_vm3, %v4254_v61 }
 0x142   : > { %19164 = vmatprep.mubr.msk.f32.mxu1 %vm1073_vm3, %v4255_v19  ;;  %v658_v19 = vld [vmem:[%s26102_s23 + $0x10] sm:$0xff] }
 0x143   : > { %17012 = vmatmul.mubr.msk.f32.gmra.mrb[6].mxu0 %vm727_vm2, %v22902_v50  ;;  %v4405_v50 = vld [vmem:[#allocation8 + $0x3e] sm:$0xff] }
 0x144   : > { %4524 = vmatprep.mubr.f32.mxu0 %v22371_v6 }
 0x145   : > { %19165 = vmatmul.mubr.msk.f32.gmra.mrb[18].mxu1 %vm1073_vm3, %v4256_v39  ;;  %v656_v39 = vld [vmem:[%s26102_s23] sm:$0xff] }
 0x146   : > { %19175 = vmatprep.mubr.msk.f32.mxu1 %vm1073_vm3, %v22912_v55  ;;  %v4571_v55 = vld [vmem:[#allocation2 + $0x3e] sm:$0xff] }
 0x147   : > { %17013 = vmatmul.mubr.msk.f32.gmra.mrb[8].mxu0 %vm727_vm2, %v22919_v0  ;;  %v4572_v0 = vld [vmem:[#allocation2 + $0x46] sm:$0x3] }
 0x148   : > { %4530 = vmatprep.mubr.f32.mxu0 %v22371_v6 }
 0x149   : > { %19176 = vmatmul.mubr.msk.f32.vlgmr.msra.gmra.mrb[4].mxu1 %vm1073_vm3, %v22916_v56  ;;  %v4406_v56 = vld [vmem:[#allocation8 + $0x46] sm:$0x3] }
 0x14a   : > { %20562 = vmatpush3.bf16.msra.mxu1 %v20559_v58  ;;  %19178 = vmatprep.mubr.msk.f32.mxu1 %vm1073_vm3, %v22931_v4  ;;  %v4721_v4 = vld [vmem:[#allocation6 + $0x3e] sm:$0xff]  ;;  %v657_v58 = vld [vmem:[%s26102_s23 + $0x8] sm:$0xff] }
 0x14b   : > { %17014 = vmatmul.mubr.msk.f32.gmra.mrb[10].mxu0 %vm727_vm2, %v22938_v8  ;;  %20564 = vmatprep.subr.bf16.mxu1 %v20563_v21  ;;  %v22372_v8 = vmov 0  }
 0x14c   : > { %4536 = vmatprep.mubr.f32.mxu0 %v22371_v6  ;;  %21929 = vset.pattern.permute.xlu0 %v22372_v8 }
 0x14d   : > { %19179 = vmatmul.mubr.msk.f32.gmra.mrb[6].mxu1 %vm1073_vm3, %v22935_v5  ;;  %v4722_v5 = vld [vmem:[#allocation6 + $0x46] sm:$0x3]  ;;  %21928 = vset.pattern.permute.xlu1 %v22372_v8 }
 0x14e   : > { %19181 = vmatprep.mubr.msk.f32.mxu1 %vm1073_vm3, %v22944_v11  ;;  %20566 = vmatpush3.bf16.msra.mxu1 %v20563_v21  ;;  %v4867_v21 = vld [vmem:[#allocation3 + $0x17] sm:$0xff] }
 0x14f   : > { %17015 = vmatmul.mubr.msk.f32.gmra.mrb[12].mxu0 %vm727_vm2, %v4405_v50  ;;  %v4866_v50 = vld [vmem:[#allocation3 + $0xf] sm:$0xff] }
 0x150   : > { %4542 = vmatprep.mubr.f32.mxu0 %v22371_v6 }
 0x151   : > { %19182 = vmatmul.mubr.msk.f32.gmra.mrb[8].mxu1 %vm1073_vm3, %v22948_v12 }
 0x152   : > { %19184 = vmatprep.mubr.msk.f32.mxu1 %vm1073_vm3, %v4571_v55  ;;  %v660_v55 = vld [vmem:[%s26102_s23 + $0x20] sm:$0xff] }
 0x153   : > { %17016 = vmatmul.mubr.msk.f32.gmra.mrb[14].mxu0 %vm727_vm2, %v4406_v56  ;;  %v4868_v56 = vld [vmem:[#allocation3 + $0x1f] sm:$0xff] }
 0x155   : > { %19185 = vmatmul.mubr.msk.f32.gmra.mrb[10].mxu1 %vm1073_vm3, %v4572_v0 }
 0x156   : > { %19195 = vmatprep.mubr.msk.f32.mxu1 %vm1073_vm3, %v22977_v25 }
 0x159   : > { %19196 = vmatmul.mubr.msk.f32.vlgmr.msra.gmra.mrb[12].mxu1 %vm1073_vm3, %v22980_v26 }
 0x15a   : > { %19198 = vmatprep.mubr.msk.f32.mxu1 %vm1073_vm3, %v22993_v32 }
 0x15d   : > { %19199 = vmatmul.mubr.msk.f32.gmra.mrb[14].mxu1 %vm1073_vm3, %v22996_v33 }
 0x15e   : > { %19201 = vmatprep.mubr.msk.f32.mxu1 %vm1073_vm3, %v23003_v36 }
 0x161   : > { %19202 = vmatmul.mubr.msk.f32.gmra.mrb[16].mxu1 %vm1073_vm3, %v23006_v40 }
 0x162   : > { %19204 = vmatprep.mubr.msk.f32.mxu1 %vm1073_vm3, %v4721_v4 }
 0x165   : > { %19205 = vmatmul.mubr.msk.f32.gmra.mrb[18].mxu1 %vm1073_vm3, %v4722_v5 }
 0x20a   : > { %v23343_v11 = vpop.f32.mrb[0].mxu0 }
 0x20b   : > { %v23345_v12 = vpop.f32.mrb[1].mxu0 }
 0x20e   : > { %v23347_v25 = vpop.f32.mrb[2].mxu0 }
 0x20f   : > { %v23349_v26 = vpop.f32.mrb[3].mxu0 }
 0x212   : > { %v23351_v32 = vpop.f32.mrb[4].mxu0 }
 0x213   : > { %v23353_v33 = vpop.f32.mrb[5].mxu0 }
 0x216   : > { %v23355_v36 = vpop.f32.mrb[6].mxu0 }
 0x217   : > { %v23357_v40 = vpop.f32.mrb[7].mxu0 }
 0x21a   : > { %v23359_v22 = vpop.f32.mrb[8].mxu0 }
 0x21b   : > { %v23361_v10 = vpop.f32.mrb[9].mxu0 }
 0x21c   : > { %v23363_v24 = vpop.f32.mrb[4].mxu1 }
 0x21d   : > { %v23367_v27 = vadd.f32 %v23363_v24, %v23347_v25  ;;  %v23369_v28 = vpop.f32.mrb[5].mxu1 }
 0x21e   : > { %v23373_v29 = vadd.f32 %v23369_v28, %v23343_v11  ;;  %v23375_v37 = vpop.f32.mrb[10].mxu0 }
 0x21f   : > { %v23377_v30 = vpop.f32.mrb[11].mxu0  ;;  %21930 = vtanh.f32 %v23367_v27  ;;  %v17042_v0 = vmul.f32 -1.442695, %v23367_v27 }
 0x220   : > { %v23379_v38 = vpop.f32.mrb[6].mxu1  ;;  %21932 = vtanh.f32 %v23373_v29  ;;  %v17041_v4 = vmul.f32 -1.442695, %v23373_v29 }
 0x221   : > { %v23383_v43 = vadd.f32 %v23379_v38, %v23355_v36  ;;  %v23385_v34 = vpop.f32.mrb[7].mxu1 }
 0x222   : > { %v23389_v44 = vadd.f32 %v23385_v34, %v23351_v32  ;;  %v4538_v47 = vpop.f32.mrb[12].mxu0 }
 0x223   : > { %v23392_v35 = vadd.f32 %v4538_v47, %v23202_v18  ;;  %v4540_v41 = vpop.f32.mrb[13].mxu0  ;;  %21934 = vtanh.f32 %v23383_v43 }
 0x224   : > { %v23394_v49 = vpop.f32.mrb[8].mxu1  ;;  %v23397_v45 = vadd.f32 %v4540_v41, %v23211_v16  ;;  %21936 = vtanh.f32 %v23389_v44 }
 0x225   : > { %v23401_v46 = vadd.f32 %v23394_v49, %v23375_v37  ;;  %v23403_v52 = vpop.f32.mrb[9].mxu1 }
 0x226   : > { %v23407_v53 = vadd.f32 %v23403_v52, %v23359_v22  ;;  %v4544_v59 = vpop.f32.mrb[14].mxu0 }
 0x227   : > { %v23410_v18 = vadd.f32 %v4544_v59, %v23216_v20  ;;  %v4546_v1 = vpop.f32.mrb[15].mxu0  ;;  %21938 = vtanh.f32 %v23401_v46 }
 0x228   : > { %v23412_v54 = vpop.f32.mrb[10].mxu1  ;;  %v23415_v16 = vadd.f32 %v4546_v1, %v23225_v23  ;;  %21940 = vtanh.f32 %v23407_v53 }
 0x229   : > { %v23417_v3 = vpop.f32.mrb[11].mxu1  ;;  %v21931_v17 = vpop.eup %21930 }
 0x22a   : > { %v21933_v2 = vpop.eup %21932  ;;  %v23436_v48 = vadd.f32 %v23392_v35, %v23417_v3 }
 0x22c   : > { %v19197_v7 = vpop.f32.mrb[12].mxu1  ;;  %21942 = vtanh.f32 %v23436_v48 }
 0x22d   : > { %v4818_v13 = vpop.f32.mrb[13].mxu1  ;;  %v21935_v9 = vpop.eup %21934  ;;  %21944 = vpow2.f32 %v17042_v0  ;;  %v661_v0 = vld [vmem:[%s26102_s23 + $0x28] sm:$0xff] }
 0x22e   : > { %5169 = vrot.lane.b32.xlu0 %v4818_v13, %s26095_s1  ;;  %v21937_v51 = vpop.eup %21936  ;;  %21946 = vpow2.f32 %v17041_v4 }
 0x230   : > { %v19200_v14 = vpop.f32.mrb[14].mxu1 }
 0x231   : > { %v4828_v60 = vpop.f32.mrb[15].mxu1  ;;  %v21939_v57 = vpop.eup %21938 }
 0x232   : > { %5171 = vrot.lane.b32.xlu0 %v19197_v7, %s26095_s1  ;;  %5173 = vrot.lane.b32.xlu1 %v4828_v60, %s26095_s1  ;;  %v21941_v31 = vpop.eup %21940 }
 0x234   : > { %v19203_v20 = vpop.f32.mrb[16].mxu1 }
 0x235   : > { %v4838_v23 = vpop.f32.mrb[17].mxu1 }
 0x236   : > { %5175 = vrot.lane.b32.xlu1 %v19200_v14, %s26095_s1  ;;  %5177 = vrot.lane.b32.xlu0 %v4838_v23, %s26095_s1  ;;  %v21943_v61 = vpop.eup %21942  ;;  %v17043_v23 = vmul.f32 -1.442695, %v23389_v44 }
 0x237   : > { %v21945_v5 = vpop.eup %21944 }
 0x238   : > { %v23428_v15 = vpop.f32.mrb[18].mxu1  ;;  %v4906_v41 = vadd.f32 1.0, %v21945_v5  ;;  %v21947_v59 = vpop.eup %21946 }
 0x239   : > { %v4848_v63 = vpop.f32.mrb[19].mxu1  ;;  %v4905_v13 = vadd.f32 1.0, %v21947_v59 }
 0x23a   : > { %5179 = vrot.lane.b32.xlu1 %v19203_v20, %s26095_s1  ;;  %5181 = vrot.lane.b32.xlu0 %v4848_v63, %s26095_s1 }
 0x23e   : > { %5041 = vrot.lane.b32.xlu1 %v21933_v2, %s22374_s21  ;;  %5043 = vrot.lane.b32.xlu0 %v21931_v17, %s22374_s21 }
 0x242   : > { %5045 = vrot.lane.b32.xlu1 %v21937_v51, %s22374_s21  ;;  %5047 = vrot.lane.b32.xlu0 %v21935_v9, %s22374_s21  ;;  %v17044_v51 = vmul.f32 -1.442695, %v23383_v43 }
 0x246   : > { %5049 = vrot.lane.b32.xlu1 %v21941_v31, %s22374_s21  ;;  %5051 = vrot.lane.b32.xlu0 %v21939_v57, %s22374_s21 }
 0x24a   : > { %5120 = vperm.xlu0 %21929, %v657_v58   ;;  %5053 = vrot.lane.b32.xlu1 %v21943_v61, %s22374_s21 }
 0x24e   : > { %5125 = vperm.xlu0 %21929, %v658_v19   ;;  %5115 = vperm.xlu1 %21928, %v656_v39  }
 0x252   : > { %5130 = vperm.xlu0 %21929, %v659_v62   ;;  %5001 = vrot.lane.b32.xlu1 %v4865_v42, %s26093_s0 }
 0x256   : > { %5005 = vrot.lane.b32.xlu0 %v4867_v21, %s26093_s0  ;;  %5003 = vrot.lane.b32.xlu1 %v4866_v50, %s26093_s0  ;;  %v17046_v50 = vmul.f32 -1.442695, %v23401_v46 }
 0x25a   : > { %5135 = vperm.xlu0 %21929, %v660_v55   ;;  %5007 = vrot.lane.b32.xlu1 %v4868_v56, %s26093_s0  ;;  %v17045_v55 = vmul.f32 -1.442695, %v23407_v53 }
 0x2a0   : > { %v23467_v8 = vpop.permute.xlu0 %5169 }
 0x2a1   : > { %v23471_v47 = vadd.f32 %v23467_v8, %v23345_v12 }
 0x2a3   : > { %21948 = vtanh.f32 %v23471_v47 }
 0x2a4   : > { %v23474_v1 = vpop.permute.xlu0 %5171  ;;  %v23476_v7 = vpop.permute.xlu1 %5173  ;;  %21950 = vrcp.f32 %v4906_v41  ;;  %v17047_v41 = vmul.f32 -1.442695, %v23436_v48 }
 0x2a5   : > { %v23484_v20 = vadd.f32 %v23476_v7, %v23353_v33  ;;  %21952 = vrcp.f32 %v4905_v13  ;;  %v23489_v63 = vadd.f32 %v23474_v1, %v23349_v26 }
 0x2a7   : > { %21954 = vtanh.f32 %v23484_v20 }
 0x2a8   : > { %v23478_v14 = vpop.permute.xlu1 %5175  ;;  %v23480_v60 = vpop.permute.xlu0 %5177  ;;  %21956 = vpow2.f32 %v17043_v23 }
 0x2a9   : > { %21958 = vtanh.f32 %v23489_v63  ;;  %v23501_v31 = vadd.f32 %v23478_v14, %v23357_v40  ;;  %v23505_v61 = vadd.f32 %v23480_v60, %v23361_v10 }
 0x2aa   : > { %21960 = vpow2.f32 %v17044_v51 }
 0x2ab   : > { %21962 = vtanh.f32 %v23501_v31 }
 0x2ac   : > { %v23491_v17 = vpop.permute.xlu1 %5179  ;;  %v23493_v2 = vpop.permute.xlu0 %5181  ;;  %21964 = vtanh.f32 %v23505_v61 }
 0x2ad   : > { %v21949_v9 = vpop.eup %21948  ;;  %21966 = vpow2.f32 %v17046_v50  ;;  %v23519_v5 = vadd.f32 %v23491_v17, %v23377_v30  ;;  %v23526_v51 = vadd.f32 %v23397_v45, %v23493_v2 }
 0x2ae   : > { %5337 = vrot.lane.b32.xlu0 %v21949_v9, %s22374_s21  ;;  %v21951_v57 = vpop.eup %21950  ;;  %21968 = vpow2.f32 %v17045_v55 }
 0x2af   : > { %v21953_v62 = vpop.eup %21952  ;;  %21970 = vtanh.f32 %v23519_v5 }
 0x2b0   : > { %v5044_v58 = vpop.permute.xlu0 %5043  ;;  %v5042_v39 = vpop.permute.xlu1 %5041  ;;  %21972 = vpow2.f32 %v17047_v41 }
 0x2b1   : > { %v5066_v19 = vmul.f32 %v21951_v57, %v5044_v58  ;;  %v5065_v42 = vmul.f32 %v21953_v62, %v5042_v39  ;;  %v21955_v21 = vpop.eup %21954 }
 0x2b2   : > { %5341 = vrot.lane.b32.xlu0 %v21955_v21, %s22374_s21  ;;  %v21957_v56 = vpop.eup %21956 }
 0x2b3   : > { %5083 = vrot.lane.b32.xlu1 %v5066_v19, %s26093_s0  ;;  %v21959_v4 = vpop.eup %21958  ;;  %v4907_v13 = vadd.f32 1.0, %v21957_v56 }
 0x2b4   : > { %v21961_v59 = vpop.eup %21960  ;;  %v5046_v21 = vpop.permute.xlu1 %5045 }
 0x2b5   : > { %v21963_v23 = vpop.eup %21962  ;;  %v4908_v57 = vadd.f32 1.0, %v21961_v59  ;;  %21974 = vrcp.f32 %v4907_v13  ;;  %v5048_v41 = vpop.permute.xlu0 %5047  ;;  %v4869_v13 = vld [vmem:[#allocation3 + $0x27] sm:$0xff] }
 0x2b6   : > { %5140 = vperm.xlu0 %21929, %v661_v0   ;;  %v21965_v9 = vpop.eup %21964  ;;  %21976 = vtanh.f32 %v23526_v51 }
 0x2b7   : > { %5081 = vrot.lane.b32.xlu1 %v5065_v42, %s26093_s0  ;;  %v21967_v58 = vpop.eup %21966  ;;  %21978 = vrcp.f32 %v4908_v57 }
 0x2b8   : > { %v21969_v19 = vpop.eup %21968  ;;  %v4910_v39 = vadd.f32 1.0, %v21967_v58  ;;  %v5050_v57 = vpop.permute.xlu1 %5049  ;;  %v662_v58 = vld [vmem:[%s26102_s23 + $0x30] sm:$0xff] }
 0x2b9   : > { %v21971_v62 = vpop.eup %21970  ;;  %v4909_v42 = vadd.f32 1.0, %v21969_v19  ;;  %v4870_v19 = vld [vmem:[#allocation3 + $0x2f] sm:$0xff] }
 0x2ba   : > { %5345 = vrot.lane.b32.xlu0 %v21965_v9, %s22374_s21  ;;  %v21973_v50 = vpop.eup %21972  ;;  %21980 = vrcp.f32 %v4910_v39  ;;  %v23538_v9 = vadd.f32 %v23410_v18, %v23412_v54  ;;  %v5052_v39 = vpop.permute.xlu0 %5051 }
 0x2bb   : > { %5339 = vrot.lane.b32.xlu1 %v21959_v4, %s22374_s21  ;;  %21982 = vrcp.f32 %v4909_v42  ;;  %v4911_v4 = vadd.f32 1.0, %v21973_v50 }
 0x2bd   : > { %21984 = vrcp.f32 %v4911_v4 }
 0x2be   : > { %21986 = vtanh.f32 %v23538_v9 }
 0x2bf   : > { %5343 = vrot.lane.b32.xlu1 %v21963_v23, %s22374_s21  ;;  %v21975_v55 = vpop.eup %21974 }
 0x2c0   : > { %v5067_v56 = vmul.f32 %v21975_v55, %v5046_v21  ;;  %v21977_v0 = vpop.eup %21976  ;;  %v5054_v55 = vpop.permute.xlu1 %5053 }
 0x2c1   : > { %5349 = vrot.lane.b32.xlu0 %v21977_v0, %s22374_s21  ;;  %v21979_v59 = vpop.eup %21978  ;;  %v4871_v0 = vld [vmem:[#allocation3 + $0x37] sm:$0xff] }
 0x2c2   : > { %v5068_v23 = vmul.f32 %v21979_v59, %v5048_v41  ;;  %v5193_v59 = vadd.f32 %v23467_v8, %v23343_v11 }
 0x2c3   : > { %5347 = vrot.lane.b32.xlu1 %v21971_v62, %s22374_s21 }
 0x2c4   : > { %v21981_v62 = vpop.eup %21980 }
 0x2c5   : > { %5009 = vrot.lane.b32.xlu0 %v4869_v13, %s26093_s0  ;;  %v21983_v42 = vpop.eup %21982  ;;  %v5070_v50 = vmul.f32 %v21981_v62, %v5052_v39  ;;  %v17057_v13 = vmul.f32 -1.442695, %v5193_v59 }
 0x2c6   : > { %v5069_v21 = vmul.f32 %v21983_v42, %v5050_v57  ;;  %v5195_v57 = vadd.f32 %v23476_v7, %v23351_v32 }
 0x2c7   : > { %5085 = vrot.lane.b32.xlu1 %v5067_v56, %s26093_s0  ;;  %v21985_v56 = vpop.eup %21984  ;;  %21988 = vpow2.f32 %v17057_v13 }
 0x2c8   : > { %v5071_v4 = vmul.f32 %v21985_v56, %v5054_v55  ;;  %v21987_v41 = vpop.eup %21986 }
 0x2c9   : > { %5145 = vperm.xlu0 %21929, %v662_v58   ;;  %v5194_v58 = vadd.f32 %v23474_v1, %v23347_v25  ;;  %v4929_v25 = vadd.f32 1.0, %v23373_v29  ;;  %v4930_v29 = vadd.f32 1.0, %v23367_v27 }
 0x2cb   : > { %5087 = vrot.lane.b32.xlu1 %v5068_v23, %s26093_s0  ;;  %v23554_v23 = vpop.permute.xlu0 %5120  ;;  %v17058_v62 = vmul.f32 -1.442695, %v5194_v58  ;;  %v17049_v55 = vmul.f32 -1.442695, %v4929_v25 }
 0x2cd   : > { %5091 = vrot.lane.b32.xlu0 %v5070_v50, %s26093_s0  ;;  %v23564_v11 = vpop.permute.xlu1 %5115 }
 0x2cf   : > { %5011 = vrot.lane.b32.xlu1 %v4870_v19, %s26093_s0  ;;  %v17059_v19 = vmul.f32 -1.442695, %v5195_v57  ;;  %v23560_v39 = vpop.permute.xlu0 %5125 }
 0x2d1   : > { %5093 = vrot.lane.b32.xlu0 %v5071_v4, %s26093_s0  ;;  %v21989_v42 = vpop.eup %21988  ;;  %21990 = vpow2.f32 %v17059_v19  ;;  %v23568_v32 = vpop.permute.xlu1 %5001 }
 0x2d2   : > { %21992 = vpow2.f32 %v17058_v62 }
 0x2d3   : > { %5089 = vrot.lane.b32.xlu1 %v5069_v21, %s26093_s0  ;;  %v5225_v21 = vadd.f32 1.0, %v21989_v42  ;;  %v23566_v50 = vpop.permute.xlu0 %5130  ;;  %v4932_v42 = vadd.f32 1.0, %v23383_v43 }
 0x2d5   : > { %5183 = vrot.lane.b32.xlu0 %v23428_v15, %s26095_s1  ;;  %v5196_v15 = vadd.f32 %v23478_v14, %v23355_v36  ;;  %v5198_v36 = vadd.f32 %v23491_v17, %v23375_v37  ;;  %v4931_v14 = vadd.f32 1.0, %v23389_v44  ;;  %v23576_v56 = vpop.permute.xlu1 %5003  ;;  %v5199_v17 = vadd.f32 %v23392_v35, %v23493_v2  ;;  %v8281_v35 = vld [vmem:[%s26082_s9 + $0x8] sm:$0xff] }
 0x2d6   : > { %v17052_v43 = vmul.f32 -1.442695, %v4932_v42 }
 0x2d7   : > { %5013 = vrot.lane.b32.xlu1 %v4871_v0, %s26093_s0  ;;  %v17060_v8 = vmul.f32 -1.442695, %v5196_v15  ;;  %v23571_v1 = vpop.permute.xlu0 %5005  ;;  %v17062_v13 = vmul.f32 -1.442695, %v5198_v36  ;;  %v17051_v57 = vmul.f32 -1.442695, %v4931_v14 }
 0x2d8   : > { %v8282_v36 = vld [vmem:[%s26082_s9 + $0x10] sm:$0xff]  ;;  %v8283_v14 = vld [vmem:[%s26082_s9 + $0x18] sm:$0xff] }
 0x2d9   : > { %21994 = vpow2.f32 %v17060_v8  ;;  %v23585_v62 = vpop.permute.xlu1 %5007  ;;  %v17063_v8 = vmul.f32 -1.442695, %v5199_v17 }
 0x2da   : > { %21996 = vrcp.f32 %v5225_v21  ;;  %v8280_v21 = vld [vmem:[%s26082_s9] sm:$0xff] }
 0x2db   : > { %5055 = vrot.lane.b32.xlu1 %v21987_v41, %s22374_s21  ;;  %v21991_v7 = vpop.eup %21990  ;;  %v5197_v41 = vadd.f32 %v23480_v60, %v23359_v22  ;;  %v23580_v59 = vpop.permute.xlu0 %5135  ;;  %21998 = vpow2.f32 %v17049_v55  ;;  %v17050_v60 = vmul.f32 -1.442695, %v4930_v29  ;;  %v20711_v25 = vpack.c.bf16 %v8281_v35, %v8280_v21 }
 0x2dc   : > { %v21993_v0 = vpop.eup %21992  ;;  %v5227_v4 = vadd.f32 1.0, %v21991_v7  ;;  %v4933_v7 = vadd.f32 1.0, %v23407_v53  ;;  %v20715_v55 = vpack.c.bf16 %v8283_v14, %v8282_v36 }
 0x2dd   : > { %v5226_v19 = vadd.f32 1.0, %v21993_v0  ;;  %v17061_v44 = vmul.f32 -1.442695, %v5197_v41  ;;  %20712 = vmatprep.subr.bf16.mxu1 %v20711_v25 }
 0x2de   : > { %22000 = vrcp.f32 %v5227_v4  ;;  %20714 = vmatpush3.bf16.msra.mxu1 %v20711_v25  ;;  %v17053_v29 = vmul.f32 -1.442695, %v4933_v7 }
 0x2df   : > { %22002 = vpow2.f32 %v17062_v13  ;;  %20716 = vmatprep.subr.bf16.mxu1 %v20715_v55 }
 0x2e0   : > { %22004 = vpow2.f32 %v17051_v57 }
 0x2e1   : > { %22006 = vrcp.f32 %v5226_v19  ;;  %v5527_v19 = vld [vmem:[%s26080_s7 + $0x8] sm:$0xff] }
 0x2e2   : > { %22008 = vpow2.f32 %v17061_v44  ;;  %20718 = vmatpush3.bf16.msra.mxu1 %v20715_v55 }
 0x2e3   : > { %v21995_v58 = vpop.eup %21994  ;;  %22010 = vpow2.f32 %v17050_v60 }
 0x2e4   : > { %v21997_v37 = vpop.eup %21996  ;;  %v5228_v27 = vadd.f32 1.0, %v21995_v58  ;;  %v5526_v58 = vld [vmem:[%s26080_s7] sm:$0xff] }
 0x2e5   : > { %v21999_v0 = vpop.eup %21998  ;;  %v20567_v17 = vpack.c.bf16 %v5527_v19, %v5526_v58 }
 0x2e6   : > { %22012 = vrcp.f32 %v5228_v27  ;;  %v4961_v44 = vadd.f32 1.0, %v21999_v0  ;;  %v4934_v0 = vadd.f32 1.0, %v23401_v46 }
 0x2e7   : > { %22014 = vpow2.f32 %v17063_v8  ;;  %20568 = vmatprep.subr.bf16.mxu0 %v20567_v17 }
 0x2e8   : > { %v22001_v41 = vpop.eup %22000  ;;  %22016 = vpow2.f32 %v17052_v43  ;;  %20570 = vmatpush3.bf16.msra.mxu0 %v20567_v17  ;;  %v17054_v19 = vmul.f32 -1.442695, %v4934_v0 }
 0x2e9   : > { %v22003_v53 = vpop.eup %22002  ;;  %22018 = vpow2.f32 %v17053_v29 }
 0x2ea   : > { %v5230_v42 = vadd.f32 1.0, %v22003_v53  ;;  %22020 = vrcp.f32 %v4961_v44  ;;  %v5529_v53 = vld [vmem:[%s26080_s7 + $0x18] sm:$0xff] }
 0x2ec   : > { %22022 = vrcp.f32 %v5230_v42 }
 0x320   : > { %v5338_v15 = vpop.permute.xlu0 %5337 }
 0x321   : > { %v5361_v22 = vmul.f32 %v21997_v37, %v5338_v15  ;;  %v22005_v37 = vpop.eup %22004 }
 0x322   : > { %v22007_v15 = vpop.eup %22006  ;;  %v4963_v21 = vadd.f32 1.0, %v22005_v37 }
 0x323   : > { %5377 = vrot.lane.b32.xlu1 %v5361_v22, %s26093_s0  ;;  %v22009_v60 = vpop.eup %22008 }
 0x324   : > { %v5342_v13 = vpop.permute.xlu0 %5341  ;;  %v22011_v8 = vpop.eup %22010  ;;  %v5229_v25 = vadd.f32 1.0, %v22009_v60  ;;  %22024 = vrcp.f32 %v4963_v21 }
 0x325   : > { %v23595_v2 = vpop.permute.xlu1 %5083  ;;  %v5363_v57 = vmul.f32 %v22001_v41, %v5342_v13  ;;  %v22013_v35 = vpop.eup %22012  ;;  %v4962_v14 = vadd.f32 1.0, %v22011_v8  ;;  %v5528_v13 = vld [vmem:[%s26080_s7 + $0x10] sm:$0xff] }
 0x326   : > { %v22015_v7 = vpop.eup %22014  ;;  %22026 = vrcp.f32 %v5229_v25  ;;  %v20571_v58 = vpack.c.bf16 %v5529_v53, %v5528_v13  ;;  %v17048_v53 = vmul.f32 -1.442695, %v23538_v9 }
 0x327   : > { %5381 = vrot.lane.b32.xlu1 %v5363_v57, %s26093_s0  ;;  %v22017_v55 = vpop.eup %22016  ;;  %v5231_v41 = vadd.f32 1.0, %v22015_v7  ;;  %22028 = vrcp.f32 %v4962_v14  ;;  %v4935_v57 = vadd.f32 1.0, %v23436_v48 }
 0x328   : > { %v4964_v29 = vadd.f32 1.0, %v22017_v55  ;;  %v22019_v37 = vpop.eup %22018  ;;  %20572 = vmatprep.subr.bf16.mxu0 %v20571_v58  ;;  %v5515_v55 = vld [vmem:[%s26079_s6 + $0x8] sm:$0xff] }
 0x329   : > { %v5082_v4 = vpop.permute.xlu1 %5081  ;;  %22030 = vrcp.f32 %v5231_v41  ;;  %v22021_v46 = vpop.eup %22020  ;;  %20574 = vmatpush3.bf16.msra.mxu0 %v20571_v58  ;;  %v17055_v44 = vmul.f32 -1.442695, %v4935_v57  ;;  %v4965_v60 = vadd.f32 1.0, %v22019_v37 }
 0x32a   : > { %22032 = vrcp.f32 %v4964_v29  ;;  %v5025_v17 = vmul.f32 %v22021_v46, %v23568_v32 }
 0x32b   : > { %22034 = vpow2.f32 %v17054_v19 }
 0x32c   : > { %22036 = vpow2.f32 %v17055_v44 }
 0x32d   : > { %v5340_v22 = vpop.permute.xlu1 %5339  ;;  %22038 = vrcp.f32 %v4965_v60 }
 0x32e   : > { %v5362_v27 = vmul.f32 %v22007_v15, %v5340_v22  ;;  %v22023_v22 = vpop.eup %22022  ;;  %22040 = vpow2.f32 %v17048_v53 }
 0x32f   : > { %v22025_v48 = vpop.eup %22024 }
 0x330   : > { %5379 = vrot.lane.b32.xlu0 %v5362_v27, %s26093_s0  ;;  %v5105_v27 = vadd.f32 %v5082_v4, %v5025_v17  ;;  %v22027_v21 = vpop.eup %22026  ;;  %v5514_v4 = vld [vmem:[%s26079_s6] sm:$0xff] }
 0x331   : > { %v5344_v43 = vpop.permute.xlu1 %5343  ;;  %v22029_v32 = vpop.eup %22028  ;;  %v23635_v0 = vpack.c.bf16 %v5515_v55, %v5514_v4 }
 0x332   : > { %v5364_v36 = vmul.f32 %v22013_v35, %v5344_v43  ;;  %v5027_v35 = vmul.f32 %v22025_v48, %v23571_v1  ;;  %v5026_v1 = vmul.f32 %v22029_v32, %v23576_v56 }
 0x333   : > { %v22031_v41 = vpop.eup %22030  ;;  %20576 = vmatprep.subr.bf16.mxu0 %v23635_v0 }
 0x334   : > { %5383 = vrot.lane.b32.xlu0 %v5364_v36, %s26093_s0  ;;  %v5153_v36 = vmul.f32 %v23564_v11, %v5105_v27  ;;  %v5106_v29 = vadd.f32 %v23595_v2, %v5026_v1  ;;  %v22033_v19 = vpop.eup %22032 }
 0x335   : > { %v23622_v15 = vpop.permute.xlu0 %5140  ;;  %v5348_v42 = vpop.permute.xlu1 %5347  ;;  %v5028_v46 = vmul.f32 %v22033_v19, %v23585_v62 }
 0x336   : > { %v5366_v8 = vmul.f32 %v22023_v22, %v5348_v42  ;;  %v22035_v56 = vpop.eup %22034  ;;  %v5154_v44 = vmul.f32 %v23554_v23, %v5106_v29 }
 0x337   : > { %v22037_v60 = vpop.eup %22036  ;;  %v4966_v42 = vadd.f32 1.0, %v22035_v56 }
 0x338   : > { %5387 = vrot.lane.b32.xlu0 %v5366_v8, %s26093_s0  ;;  %v22039_v27 = vpop.eup %22038  ;;  %v4967_v62 = vadd.f32 1.0, %v22037_v60  ;;  %v5257_v60 = vadd.f32 1.0, %v23471_v47 }
 0x339   : > { %v5346_v25 = vpop.permute.xlu0 %5345  ;;  %v5086_v7 = vpop.permute.xlu1 %5085  ;;  %22042 = vrcp.f32 %v4966_v42 }
 0x33a   : > { %v5365_v43 = vmul.f32 %v22027_v21, %v5346_v25  ;;  %v5107_v14 = vadd.f32 %v5086_v7, %v5027_v35  ;;  %22044 = vrcp.f32 %v4967_v62  ;;  %v17065_v42 = vmul.f32 -1.442695, %v5257_v60 }
 0x33c   : > { %5385 = vrot.lane.b32.xlu1 %v5365_v43, %s26093_s0  ;;  %5465 = vrot.lane.b32.xlu0 %v5153_v36, %s26095_s1  ;;  %v5155_v37 = vmul.f32 %v23560_v39, %v5107_v14  ;;  %v22041_v43 = vpop.eup %22040 }
 0x33d   : > { %v5350_v13 = vpop.permute.xlu0 %5349  ;;  %v5088_v58 = vpop.permute.xlu1 %5087  ;;  %v4912_v7 = vadd.f32 1.0, %v22041_v43 }
 0x33e   : > { %v5367_v57 = vmul.f32 %v22031_v41, %v5350_v13  ;;  %v5108_v17 = vadd.f32 %v5088_v58, %v5028_v46  ;;  %v663_v58 = vld [vmem:[%s26102_s23 + $0x38] sm:$0x3] }
 0x33f   : > { %22046 = vrcp.f32 %v4912_v7  ;;  %v5262_v7 = vadd.f32 1.0, %v23519_v5 }
 0x340   : > { %5389 = vrot.lane.b32.xlu1 %v5367_v57, %s26093_s0  ;;  %5469 = vrot.lane.b32.xlu0 %v5155_v37, %s26095_s1  ;;  %v5156_v48 = vmul.f32 %v23566_v50, %v5108_v17  ;;  %v4872_v17 = vld [vmem:[#allocation3 + $0x3f] sm:$0x3] }
 0x341   : > { %v5010_v22 = vpop.permute.xlu0 %5009  ;;  %v5012_v2 = vpop.permute.xlu1 %5011 }
 0x342   : > { %v5029_v8 = vmul.f32 %v22039_v27, %v5010_v22  ;;  %v5259_v27 = vadd.f32 1.0, %v23484_v20  ;;  %v5261_v20 = vadd.f32 1.0, %v23505_v61 }
 0x343   : > { %v22043_v36 = vpop.eup %22042 }
 0x344   : > { %5467 = vrot.lane.b32.xlu1 %v5154_v44, %s26095_s1  ;;  %v5030_v14 = vmul.f32 %v22043_v36, %v5012_v2  ;;  %v22045_v41 = vpop.eup %22044 }
 0x345   : > { %v5090_v21 = vpop.permute.xlu1 %5089 }
 0x346   : > { %v5109_v35 = vadd.f32 %v5090_v21, %v5029_v8  ;;  %v5258_v8 = vadd.f32 1.0, %v23489_v63  ;;  %v5260_v21 = vadd.f32 1.0, %v23501_v31  ;;  %v17069_v31 = vmul.f32 -1.442695, %v5261_v20 }
 0x348   : > { %5471 = vrot.lane.b32.xlu1 %v5156_v48, %s26095_s1  ;;  %v5157_v25 = vmul.f32 %v23580_v59, %v5109_v35  ;;  %v23651_v32 = vpop.permute.xlu0 %5145  ;;  %v17067_v48 = vmul.f32 -1.442695, %v5259_v27  ;;  %v17066_v62 = vmul.f32 -1.442695, %v5258_v8  ;;  %v22348_v27 = vld [vmem:[#allocation6 + $0xf] sm:$0xff] }
 0x349   : > { %v5014_v55 = vpop.permute.xlu1 %5013  ;;  %v22047_v44 = vpop.eup %22046 }
 0x34a   : > { %5473 = vrot.lane.b32.xlu0 %v5157_v25, %s26095_s1  ;;  %v5031_v53 = vmul.f32 %v22045_v41, %v5014_v55  ;;  %v17068_v25 = vmul.f32 -1.442695, %v5260_v21  ;;  %v5263_v41 = vadd.f32 1.0, %v23526_v51 }
 0x34c   : > { %v5092_v4 = vpop.permute.xlu0 %5091 }
 0x34d   : > { %v5110_v1 = vadd.f32 %v5092_v4, %v5030_v14  ;;  %v5056_v37 = vpop.permute.xlu1 %5055  ;;  %v17070_v4 = vmul.f32 -1.442695, %v5262_v7 }
 0x34e   : > { %v5072_v22 = vmul.f32 %v22047_v44, %v5056_v37  ;;  %v22347_v44 = vld [vmem:[#allocation6 + $0x17] sm:$0xff] }
 0x34f   : > { %v5158_v13 = vmul.f32 %v23622_v15, %v5110_v1 }
 0x350   : > { %v5094_v29 = vpop.permute.xlu0 %5093 }
 0x351   : > { %v5111_v57 = vadd.f32 %v5094_v29, %v5031_v53  ;;  %5475 = vrot.lane.b32.xlu1 %v5158_v13, %s26095_s1  ;;  %v22346_v53 = vld [vmem:[#allocation6 + $0x7] sm:$0xff] }
 0x353   : > { %v5159_v19 = vmul.f32 %v23651_v32, %v5111_v57  ;;  %v17071_v57 = vmul.f32 -1.442695, %v5263_v41 }
 0x354   : > { %v23659_v56 = vpop.permute.xlu0 %5183 }
 0x355   : > { %v23663_v46 = vadd.f32 %v23415_v16, %v23659_v56  ;;  %5150 = vperm.xlu1 %21928, %v663_v58   ;;  %5477 = vrot.lane.b32.xlu0 %v5159_v19, %s26095_s1 }
 0x357   : > { %22048 = vtanh.f32 %v23663_v46 }
 0x358   : > { %22050 = vpow2.f32 %v17065_v42 }
 0x359   : > { %5015 = vrot.lane.b32.xlu0 %v4872_v17, %s26093_s0  ;;  %5095 = vrot.lane.b32.xlu1 %v5072_v22, %s26093_s0  ;;  %22052 = vpow2.f32 %v17067_v48 }
 0x35a   : > { %22054 = vpow2.f32 %v17066_v62 }
 0x35b   : > { %22056 = vpow2.f32 %v17068_v25 }
 0x361   : > { %v22049_v2 = vpop.eup %22048 }
 0x362   : > { %5351 = vrot.lane.b32.xlu0 %v22049_v2, %s22374_s21  ;;  %v22051_v35 = vpop.eup %22050 }
 0x363   : > { %v5289_v43 = vadd.f32 1.0, %v22051_v35  ;;  %v22053_v47 = vpop.eup %22052 }
 0x364   : > { %v22055_v36 = vpop.eup %22054  ;;  %v5291_v14 = vadd.f32 1.0, %v22053_v47 }
 0x365   : > { %22058 = vrcp.f32 %v5289_v43  ;;  %v22057_v63 = vpop.eup %22056  ;;  %v5290_v55 = vadd.f32 1.0, %v22055_v36  ;;  %v22349_v36 = vld [vmem:[#allocation6 + $0x1f] sm:$0xff] }
 0x366   : > { %22060 = vrcp.f32 %v5291_v14  ;;  %v5292_v13 = vadd.f32 1.0, %v22057_v63 }
 0x367   : > { %22062 = vpow2.f32 %v17070_v4 }
 0x368   : > { %22064 = vrcp.f32 %v5290_v55 }
 0x369   : > { %22066 = vpow2.f32 %v17069_v31  ;;  %v5517_v31 = vld [vmem:[%s26079_s6 + $0x18] sm:$0xff] }
 0x36a   : > { %22068 = vrcp.f32 %v5292_v13 }
 0x36b   : > { %22070 = vpow2.f32 %v17071_v57 }
 0x36f   : > { %v22059_v1 = vpop.eup %22058 }
 0x370   : > { %v5321_v29 = vmul.f32 %v22346_v53, %v22059_v1  ;;  %v22061_v19 = vpop.eup %22060  ;;  %v5516_v1 = vld [vmem:[%s26079_s6 + $0x10] sm:$0xff]  ;;  %v17089_v53 = vld [vmem:[%s26079_s6 + $0x20] sm:$0xff] }
 0x371   : > { %v22063_v37 = vpop.eup %22062  ;;  %v5323_v17 = vmul.f32 %v22347_v44, %v22061_v19  ;;  %v20579_v13 = vpack.c.bf16 %v5517_v31, %v5516_v1  ;;  %v17091_v31 = vld [vmem:[%s26079_s6 + $0x30] sm:$0xff] }
 0x372   : > { %v22065_v51 = vpop.eup %22064  ;;  %v5294_v2 = vadd.f32 1.0, %v22063_v37 }
 0x373   : > { %v22067_v22 = vpop.eup %22066  ;;  %v5322_v8 = vmul.f32 %v22348_v27, %v22065_v51 }
 0x374   : > { %v22069_v21 = vpop.eup %22068  ;;  %v5293_v62 = vadd.f32 1.0, %v22067_v22  ;;  %22072 = vrcp.f32 %v5294_v2  ;;  %v22351_v22 = vld [vmem:[#allocation6 + $0x27] sm:$0xff] }
 0x375   : > { %v22071_v43 = vpop.eup %22070  ;;  %v5324_v14 = vmul.f32 %v22349_v36, %v22069_v21  ;;  %v22352_v21 = vld [vmem:[#allocation6 + $0x37] sm:$0xff]  ;;  %v5200_v36 = vadd.f32 %v23410_v18, %v23659_v56 }
 0x376   : > { %22074 = vrcp.f32 %v5293_v62  ;;  %v5295_v20 = vadd.f32 1.0, %v22071_v43 }
 0x378   : > { %22076 = vrcp.f32 %v5295_v20 }
 0x37e   : > { %v22073_v41 = vpop.eup %22072 }
 0x395   : > { %v5378_v5 = vpop.permute.xlu1 %5377 }
 0x396   : > { %v5401_v58 = vadd.f32 %v5378_v5, %v5321_v29  ;;  %v17090_v5 = vld [vmem:[%s26079_s6 + $0x28] sm:$0xff] }
 0x397   : > { %v20583_v51 = vpack.c.bf16 %v17090_v5, %v17089_v53 }
 0x398   : > { %v5409_v61 = vmul.f32 %v5401_v58, %v23564_v11  ;;  %v22075_v58 = vpop.eup %22074 }
 0x399   : > { %v5382_v60 = vpop.permute.xlu1 %5381  ;;  %v5325_v2 = vmul.f32 %v22351_v22, %v22075_v58  ;;  %v17101_v58 = vld [vmem:[%s26080_s7 + $0x20] sm:$0xff] }
 0x39a   : > { %5498 = vst.msk [vmem:[#allocation6 + $0x7] sm:$0xff] %vm1073_vm3, %v5409_v61  ;;  %19575 = vmatprep.mubr.msk.f32.mxu1 %vm1073_vm3, %v5409_v61  ;;  %v5403_v42 = vadd.f32 %v5382_v60, %v5323_v17  ;;  %v22350_v61 = vld [vmem:[#allocation6 + $0x2f] sm:$0xff]  ;;  %v22077_v60 = vpop.eup %22076 }
 0x39b   : > { %v5326_v19 = vmul.f32 %v22350_v61, %v22073_v41  ;;  %v5327_v62 = vmul.f32 %v22352_v21, %v22077_v60  ;;  %v17092_v41 = vld [vmem:[%s26079_s6 + $0x38] sm:$0xff]  ;;  %v17102_v61 = vld [vmem:[%s26080_s7 + $0x28] sm:$0xff]  ;;  %v8276_v21 = vld [vmem:[%s26081_s8] sm:$0xff] }
 0x39c   : > { %v5411_v35 = vmul.f32 %v5403_v42, %v23560_v39  ;;  %v20587_v53 = vpack.c.bf16 %v17092_v41, %v17091_v31  ;;  %v17104_v31 = vld [vmem:[%s26080_s7 + $0x38] sm:$0xff] }
 0x39e   : > { %5500 = vst.msk [vmem:[#allocation6 + $0x17] sm:$0xff] %vm1073_vm3, %v5411_v35 }
 0x3a1   : > { %v5518_v48 = vld [vmem:[#allocation6] sm:$0xff] }
 0x3a2   : > { %v5380_v25 = vpop.permute.xlu0 %5379  ;;  %19215 = vmatprep.mubr.msk.f32.mxu0 %vm1073_vm3, %v5518_v48 }
 0x3a3   : > { %v5402_v47 = vadd.f32 %v5380_v25, %v5322_v8 }
 0x3a5   : > { %v5410_v7 = vmul.f32 %v5402_v47, %v23554_v23 }
 0x3a6   : > { %v5384_v4 = vpop.permute.xlu0 %5383 }
 0x3a7   : > { %5499 = vst.msk [vmem:[#allocation6 + $0xf] sm:$0xff] %vm1073_vm3, %v5410_v7  ;;  %v5404_v63 = vadd.f32 %v5384_v4, %v5324_v14  ;;  %19576 = vmatmul.mubr.msk.f32.vlgmr.msra.gmra.mrb[20].mxu1 %vm1073_vm3, %v5410_v7  ;;  %v4936_v14 = vadd.f32 1.0, %v23538_v9 }
 0x3a8   : > { %19578 = vmatprep.mubr.msk.f32.mxu1 %vm1073_vm3, %v5411_v35 }
 0x3a9   : > { %v5412_v55 = vmul.f32 %v5404_v63, %v23566_v50  ;;  %v17056_v18 = vmul.f32 -1.442695, %v4936_v14 }
 0x3aa   : > { %v5388_v37 = vpop.permute.xlu0 %5387 }
 0x3ab   : > { %5501 = vst.msk [vmem:[#allocation6 + $0x1f] sm:$0xff] %vm1073_vm3, %v5412_v55  ;;  %19579 = vmatmul.mubr.msk.f32.gmra.mrb[22].mxu1 %vm1073_vm3, %v5412_v55  ;;  %v5406_v44 = vadd.f32 %v5388_v37, %v5326_v19  ;;  %v17064_v55 = vmul.f32 -1.442695, %v5200_v36  ;;  %v20591_v37 = vpack.c.bf16 %v17102_v61, %v17101_v58 }
 0x3ad   : > { %v5414_v42 = vmul.f32 %v5406_v44, %v23622_v15  ;;  %22078 = vpow2.f32 %v17064_v55 }
 0x3ae   : > { %v23699_v29 = vld [vmem:[#allocation6 + $0x8] sm:$0xff]  ;;  %v23701_v57 = vld [vmem:[#allocation6 + $0x10] sm:$0xff]  ;;  %v5386_v27 = vpop.permute.xlu1 %5385  ;;  %v23716_v8 = vpop.permute.xlu0 %5465  ;;  %22080 = vpow2.f32 %v17056_v18 }
 0x3af   : > { %19216 = vmatmul.mubr.msk.f32.vlgmr.msra.gmra.mrb[16].mxu0 %vm1073_vm3, %v23699_v29  ;;  %v5405_v48 = vadd.f32 %v5386_v27, %v5325_v2  ;;  %5503 = vst.msk [vmem:[#allocation6 + $0x2f] sm:$0xff] %vm1073_vm3, %v5414_v42  ;;  %5489 = vst.msk [vmem:[#allocation3 + $0x7] sm:$0xff] %vm1073_vm3, %v23716_v8 }
 0x3b0   : > { %19218 = vmatprep.mubr.msk.f32.mxu0 %vm1073_vm3, %v23701_v57  ;;  %20578 = vmatpush3.bf16.msra.mxu0 %v23635_v0 }
 0x3b1   : > { %20580 = vmatprep.subr.bf16.mxu0 %v20579_v13  ;;  %v5413_v0 = vmul.f32 %v5405_v48, %v23580_v59 }
 0x3b2   : > { %v23711_v17 = vld [vmem:[#allocation6 + $0x18] sm:$0xff]  ;;  %v5390_v35 = vpop.permute.xlu1 %5389  ;;  %v23723_v25 = vpop.permute.xlu0 %5469 }
 0x3b3   : > { %19219 = vmatmul.mubr.msk.f32.gmra.mrb[18].mxu0 %vm1073_vm3, %v23711_v17  ;;  %5502 = vst.msk [vmem:[#allocation6 + $0x27] sm:$0xff] %vm1073_vm3, %v5413_v0  ;;  %v5407_v43 = vadd.f32 %v5390_v35, %v5327_v62  ;;  %19581 = vmatprep.mubr.msk.f32.mxu1 %vm1073_vm3, %v5413_v0  ;;  %5491 = vst.msk [vmem:[#allocation3 + $0x17] sm:$0xff] %vm1073_vm3, %v23723_v25  ;;  %v8277_v62 = vld [vmem:[%s26081_s8 + $0x8] sm:$0xff] }
 0x3b4   : > { %20582 = vmatpush3.bf16.msra.mxu0 %v20579_v13  ;;  %19582 = vmatmul.mubr.msk.f32.gmra.mrb[24].mxu1 %vm1073_vm3, %v5414_v42  ;;  %v20719_v35 = vpack.c.bf16 %v8277_v62, %v8276_v21 }
 0x3b5   : > { %20584 = vmatprep.subr.bf16.mxu0 %v20583_v51  ;;  %v5415_v47 = vmul.f32 %v5407_v43, %v23651_v32  ;;  %v8278_v43 = vld [vmem:[%s26081_s8 + $0x10] sm:$0xff] }
 0x3b6   : > { %v23730_v7 = vpop.permute.xlu1 %5467  ;;  %v5506_v13 = vld [vmem:[#allocation3] sm:$0xff]  ;;  %20720 = vmatprep.subr.bf16.mxu1 %v20719_v35 }
 0x3b7   : > { %5504 = vst.msk [vmem:[#allocation6 + $0x37] sm:$0xff] %vm1073_vm3, %v5415_v47  ;;  %5490 = vst.msk [vmem:[#allocation3 + $0xf] sm:$0xff] %vm1073_vm3, %v23730_v7  ;;  %19584 = vmatprep.mubr.msk.f32.mxu1 %vm1073_vm3, %v5415_v47  ;;  %v22079_v2 = vpop.eup %22078  ;;  %v8279_v47 = vld [vmem:[%s26081_s8 + $0x18] sm:$0xff]  ;;  %20722 = vmatpush3.bf16.msra.mxu1 %v20719_v35  ;;  %v5788_v41 = vld [vmem:[#allocation3 + $0x1] sm:$0xff] }
 0x3b8   : > { %v5232_v42 = vadd.f32 1.0, %v22079_v2  ;;  %v20723_v14 = vpack.c.bf16 %v8279_v47, %v8278_v43 }
 0x3ba   : > { %v23739_v20 = vpop.permute.xlu1 %5471  ;;  %v23741_v4 = vld [vmem:[#allocation6 + $0x20] sm:$0xff]  ;;  %v23743_v63 = vld [vmem:[#allocation6 + $0x28] sm:$0xff]  ;;  %22082 = vrcp.f32 %v5232_v42  ;;  %20724 = vmatprep.subr.bf16.mxu1 %v20723_v14 }
 0x3bb   : > { %5492 = vst.msk [vmem:[#allocation3 + $0x1f] sm:$0xff] %vm1073_vm3, %v23739_v20  ;;  %19221 = vmatprep.mubr.msk.f32.mxu0 %vm1073_vm3, %v23741_v4  ;;  %v17114_v42 = vld [vmem:[%s26079_s6 + $0x48] sm:$0xff]  ;;  %20726 = vmatpush3.bf16.msra.mxu1 %v20723_v14 }
 0x3bc   : > { %19222 = vmatmul.mubr.msk.f32.gmra.mrb[20].mxu0 %vm1073_vm3, %v23743_v63  ;;  %v23751_v1 = vpop.permute.xlu0 %5473 }
 0x3bd   : > { %5493 = vst.msk [vmem:[#allocation3 + $0x27] sm:$0xff] %vm1073_vm3, %v23751_v1 }
 0x3be   : > { %v23755_v9 = vld [vmem:[#allocation6 + $0x30] sm:$0xff]  ;;  %v5525_v56 = vld [vmem:[#allocation6 + $0x38] sm:$0x3] }
 0x3bf   : > { %19224 = vmatprep.mubr.msk.f32.mxu0 %vm1073_vm3, %v23755_v9  ;;  %v23767_v5 = vld [vmem:[#allocation3 + $0x8] sm:$0xff]  ;;  %v23777_v19 = vld [vmem:[#allocation3 + $0x10] sm:$0xff] }
 0x3c0   : > { %19225 = vmatmul.mubr.msk.f32.gmra.mrb[22].mxu0 %vm1073_vm3, %v5525_v56  ;;  %v17103_v56 = vld [vmem:[%s26080_s7 + $0x30] sm:$0xff]  ;;  %v5790_v21 = vld [vmem:[#allocation3 + $0x11] sm:$0xff] }
 0x3c1   : > { %19235 = vmatprep.mubr.msk.f32.mxu0 %vm1073_vm3, %v5506_v13  ;;  %v20595_v13 = vpack.c.bf16 %v17104_v31, %v17103_v56  ;;  %v5789_v2 = vld [vmem:[#allocation3 + $0x9] sm:$0xff] }
 0x3c2   : > { %v23781_v44 = vld [vmem:[#allocation3 + $0x18] sm:$0xff] }
 0x3c3   : > { %v23789_v60 = vpop.permute.xlu1 %5475 }
 0x3c4   : > { %19236 = vmatmul.mubr.msk.f32.vlgmr.msra.gmra.mrb[16].mxu0 %vm1073_vm3, %v23767_v5  ;;  %v23785_v22 = vld [vmem:[#allocation3 + $0x20] sm:$0xff]  ;;  %5494 = vst.msk [vmem:[#allocation3 + $0x2f] sm:$0xff] %vm1073_vm3, %v23789_v60 }
 0x3c5   : > { %19238 = vmatprep.mubr.msk.f32.mxu0 %vm1073_vm3, %v23777_v19  ;;  %20586 = vmatpush3.bf16.msra.mxu0 %v20583_v51  ;;  %v22081_v51 = vpop.eup %22080  ;;  %v5792_v31 = vld [vmem:[#allocation3 + $0x21] sm:$0xff] }
 0x3c6   : > { %20588 = vmatprep.subr.bf16.mxu0 %v20587_v53  ;;  %v4968_v48 = vadd.f32 1.0, %v22081_v51  ;;  %v17113_v51 = vld [vmem:[%s26079_s6 + $0x40] sm:$0xff] }
 0x3c7   : > { %v23793_v27 = vpop.permute.xlu0 %5477  ;;  %v20599_v43 = vpack.c.bf16 %v17114_v42, %v17113_v51  ;;  %v5939_v51 = vld [vmem:[#allocation6 + $0x9] sm:$0xff]  ;;  %v17125_v42 = vld [vmem:[%s26080_s7 + $0x40] sm:$0xff] }
 0x3c8   : > { %19239 = vmatmul.mubr.msk.f32.gmra.mrb[18].mxu0 %vm1073_vm3, %v23781_v44  ;;  %5495 = vst.msk [vmem:[#allocation3 + $0x37] sm:$0xff] %vm1073_vm3, %v23793_v27  ;;  %22084 = vrcp.f32 %v4968_v48 }
 0x3c9   : > { %19241 = vmatprep.mubr.msk.f32.mxu0 %vm1073_vm3, %v23785_v22  ;;  %20590 = vmatpush3.bf16.msra.mxu0 %v20587_v53  ;;  %v22083_v53 = vpop.eup %22082 }
 0x3ca   : > { %20592 = vmatprep.subr.bf16.mxu0 %v20591_v37 }
 0x3cb   : > { %v23797_v0 = vld [vmem:[#allocation3 + $0x28] sm:$0xff]  ;;  %v5016_v55 = vpop.permute.xlu0 %5015 }
 0x3cc   : > { %19242 = vmatmul.mubr.msk.f32.gmra.mrb[20].mxu0 %vm1073_vm3, %v23797_v0 }
 0x3cf   : > { %v23813_v36 = vld [vmem:[#allocation3 + $0x30] sm:$0xff]  ;;  %v5513_v18 = vld [vmem:[#allocation3 + $0x38] sm:$0x3] }
 0x3d0   : > { %19244 = vmatprep.mubr.msk.f32.mxu0 %vm1073_vm3, %v23813_v36 }
 0x3d1   : > { %19245 = vmatmul.mubr.msk.f32.gmra.mrb[22].mxu0 %vm1073_vm3, %v5513_v18  ;;  %v5791_v18 = vld [vmem:[#allocation3 + $0x19] sm:$0xff] }
 0x3d2   : > { %19255 = vmatprep.mubr.msk.f32.mxu0 %vm1073_vm3, %v5788_v41  ;;  %v22085_v62 = vpop.eup %22084  ;;  %v5793_v41 = vld [vmem:[#allocation3 + $0x29] sm:$0xff] }
 0x3d3   : > { %v5032_v35 = vmul.f32 %v22085_v62, %v5016_v55  ;;  %v5795_v55 = vld [vmem:[#allocation3 + $0x39] sm:$0x3]  ;;  %v5941_v62 = vld [vmem:[#allocation6 + $0x19] sm:$0xff] }
 0x3d4   : > { %v5352_v58 = vpop.permute.xlu0 %5351  ;;  %v23825_v61 = vpop.permute.xlu1 %5150 }
 0x3d5   : > { %v5368_v48 = vmul.f32 %v22083_v53, %v5352_v58  ;;  %19256 = vmatmul.mubr.msk.f32.vlgmr.msra.gmra.mrb[16].mxu0 %vm1073_vm3, %v5789_v2  ;;  %v17115_v53 = vld [vmem:[%s26079_s6 + $0x50] sm:$0xff]  ;;  %v5938_v58 = vld [vmem:[#allocation6 + $0x1] sm:$0xff] }
 0x3d6   : > { %19258 = vmatprep.mubr.msk.f32.mxu0 %vm1073_vm3, %v5790_v21  ;;  %20594 = vmatpush3.bf16.msra.mxu0 %v20591_v37  ;;  %v5794_v37 = vld [vmem:[#allocation3 + $0x31] sm:$0xff] }
 0x3d7   : > { %5391 = vrot.lane.b32.xlu0 %v5368_v48, %s26093_s0  ;;  %20596 = vmatprep.subr.bf16.mxu0 %v20595_v13  ;;  %v17126_v48 = vld [vmem:[%s26080_s7 + $0x48] sm:$0xff] }
 0x3d8   : > { %v5096_v47 = vpop.permute.xlu1 %5095  ;;  %v20607_v21 = vpack.c.bf16 %v17126_v48, %v17125_v42  ;;  %v6239_v48 = vld [vmem:[#allocation6 + $0xa] sm:$0xff] }
 0x3d9   : > { %v5112_v56 = vadd.f32 %v5096_v47, %v5032_v35  ;;  %19259 = vmatmul.mubr.msk.f32.gmra.mrb[18].mxu0 %vm1073_vm3, %v5791_v18  ;;  %v5942_v35 = vld [vmem:[#allocation6 + $0x21] sm:$0xff]  ;;  %v5945_v47 = vld [vmem:[#allocation6 + $0x39] sm:$0x3] }
 0x3da   : > { %19261 = vmatprep.mubr.msk.f32.mxu0 %vm1073_vm3, %v5792_v31  ;;  %20598 = vmatpush3.bf16.msra.mxu0 %v20595_v13  ;;  %v17116_v13 = vld [vmem:[%s26079_s6 + $0x58] sm:$0xff] }
 0x3db   : > { %v5160_v14 = vmul.f32 %v23825_v61, %v5112_v56  ;;  %20600 = vmatprep.subr.bf16.mxu0 %v20599_v43  ;;  %v20603_v2 = vpack.c.bf16 %v17116_v13, %v17115_v53  ;;  %v17128_v18 = vld [vmem:[%s26080_s7 + $0x58] sm:$0xff]  ;;  %v6092_v53 = vld [vmem:[#allocation3 + $0x22] sm:$0xff] }
 0x3dc   : > { %v6089_v31 = vld [vmem:[#allocation3 + $0xa] sm:$0xff]  ;;  %v6094_v13 = vld [vmem:[#allocation3 + $0x32] sm:$0xff] }
 0x3dd   : > { %5479 = vrot.lane.b32.xlu1 %v5160_v14, %s26095_s1  ;;  %19262 = vmatmul.mubr.msk.f32.gmra.mrb[20].mxu0 %vm1073_vm3, %v5793_v41  ;;  %v17137_v14 = vld [vmem:[%s26079_s6 + $0x60] sm:$0xff]  ;;  %v17138_v41 = vld [vmem:[%s26079_s6 + $0x68] sm:$0xff] }
 0x3de   : > { %19264 = vmatprep.mubr.msk.f32.mxu0 %vm1073_vm3, %v5794_v37  ;;  %v20615_v37 = vpack.c.bf16 %v17138_v41, %v17137_v14  ;;  %v23924_v41 = vld [vmem:[#allocation3 + $0xe] sm:$0xff] }
 0x3e1   : > { %5425 = vrot.lane.b32.xlu1 %v23369_v28, %s26095_s1  ;;  %19265 = vmatmul.mubr.msk.f32.gmra.mrb[22].mxu0 %vm1073_vm3, %v5795_v55  ;;  %v5940_v28 = vld [vmem:[#allocation6 + $0x11] sm:$0xff]  ;;  %v6091_v55 = vld [vmem:[#allocation3 + $0x1a] sm:$0xff] }
 0x3e2   : > { %19275 = vmatprep.mubr.msk.f32.mxu0 %vm1073_vm3, %v5938_v58  ;;  %v6095_v58 = vld [vmem:[#allocation3 + $0x3a] sm:$0x3] }
 0x3e5   : > { %5427 = vrot.lane.b32.xlu1 %v23363_v24, %s26095_s1  ;;  %19276 = vmatmul.mubr.msk.f32.vlgmr.msra.gmra.mrb[16].mxu0 %vm1073_vm3, %v5939_v51  ;;  %v5943_v24 = vld [vmem:[#allocation6 + $0x29] sm:$0xff] }
 0x3e6   : > { %19278 = vmatprep.mubr.msk.f32.mxu0 %vm1073_vm3, %v5940_v28  ;;  %20602 = vmatpush3.bf16.msra.mxu0 %v20599_v43  ;;  %v5944_v43 = vld [vmem:[#allocation6 + $0x31] sm:$0xff]  ;;  %v6238_v51 = vld [vmem:[#allocation6 + $0x2] sm:$0xff] }
 0x3e7   : > { %20604 = vmatprep.subr.bf16.mxu0 %v20603_v2  ;;  %v17149_v28 = vld [vmem:[%s26080_s7 + $0x60] sm:$0xff] }
 0x3e9   : > { %5429 = vrot.lane.b32.xlu1 %v23385_v34, %s26095_s1  ;;  %19279 = vmatmul.mubr.msk.f32.gmra.mrb[18].mxu0 %vm1073_vm3, %v5941_v62  ;;  %v17127_v34 = vld [vmem:[%s26080_s7 + $0x50] sm:$0xff] }
 0x3ea   : > { %19281 = vmatprep.mubr.msk.f32.mxu0 %vm1073_vm3, %v5942_v35  ;;  %20606 = vmatpush3.bf16.msra.mxu0 %v20603_v2  ;;  %v20611_v56 = vpack.c.bf16 %v17128_v18, %v17127_v34  ;;  %v17139_v2 = vld [vmem:[%s26079_s6 + $0x70] sm:$0xff]  ;;  %v6245_v18 = vld [vmem:[#allocation6 + $0x3a] sm:$0x3] }
 0x3eb   : > { %20608 = vmatprep.subr.bf16.mxu0 %v20607_v21  ;;  %v6240_v62 = vld [vmem:[#allocation6 + $0x12] sm:$0xff] }
 0x3ec   : > { %v6244_v34 = vld [vmem:[#allocation6 + $0x32] sm:$0xff] }
 0x3ed   : > { %5431 = vrot.lane.b32.xlu1 %v23379_v38, %s26095_s1  ;;  %19282 = vmatmul.mubr.msk.f32.gmra.mrb[20].mxu0 %vm1073_vm3, %v5943_v24  ;;  %v6088_v38 = vld [vmem:[#allocation3 + $0x2] sm:$0xff]  ;;  %v6241_v24 = vld [vmem:[#allocation6 + $0x1a] sm:$0xff] }
 0x3ee   : > { %19284 = vmatprep.mubr.msk.f32.mxu0 %vm1073_vm3, %v5944_v43  ;;  %v6242_v43 = vld [vmem:[#allocation6 + $0x22] sm:$0xff] }
 0x3f1   : > { %5433 = vrot.lane.b32.xlu1 %v23403_v52, %s26095_s1  ;;  %19285 = vmatmul.mubr.msk.f32.gmra.mrb[22].mxu0 %vm1073_vm3, %v5945_v47  ;;  %v6090_v52 = vld [vmem:[#allocation3 + $0x12] sm:$0xff]  ;;  %v6243_v47 = vld [vmem:[#allocation6 + $0x2a] sm:$0xff] }
 0x3f2   : > { %19295 = vmatprep.mubr.msk.f32.mxu0 %vm1073_vm3, %v6088_v38  ;;  %v17151_v38 = vld [vmem:[%s26080_s7 + $0x70] sm:$0xff] }
 0x3f5   : > { %5435 = vrot.lane.b32.xlu1 %v23394_v49, %s26095_s1  ;;  %19296 = vmatmul.mubr.msk.f32.vlgmr.msra.gmra.mrb[16].mxu0 %vm1073_vm3, %v6089_v31  ;;  %v6093_v49 = vld [vmem:[#allocation3 + $0x2a] sm:$0xff] }
 0x3f6   : > { %19298 = vmatprep.mubr.msk.f32.mxu0 %vm1073_vm3, %v6090_v52  ;;  %20610 = vmatpush3.bf16.msra.mxu0 %v20607_v21  ;;  %v17150_v21 = vld [vmem:[%s26080_s7 + $0x68] sm:$0xff]  ;;  %v17161_v52 = vld [vmem:[%s26079_s6 + $0x80] sm:$0xff] }
 0x3f7   : > { %20612 = vmatprep.subr.bf16.mxu0 %v20611_v56  ;;  %v20623_v35 = vpack.c.bf16 %v17150_v21, %v17149_v28  ;;  %v6388_v31 = vld [vmem:[#allocation3 + $0x6] sm:$0xff]  ;;  %v22353_v21 = vld [vmem:[#allocation6 + $0x3f] sm:$0x3] }
 0x3f9   : > { %5437 = vrot.lane.b32.xlu1 %v23417_v3, %s26095_s1  ;;  %19299 = vmatmul.mubr.msk.f32.gmra.mrb[18].mxu0 %vm1073_vm3, %v6091_v55  ;;  %v17140_v3 = vld [vmem:[%s26079_s6 + $0x78] sm:$0xff] }
 0x3fa   : > { %19301 = vmatprep.mubr.msk.f32.mxu0 %vm1073_vm3, %v6092_v53  ;;  %20614 = vmatpush3.bf16.msra.mxu0 %v20611_v56  ;;  %v20619_v42 = vpack.c.bf16 %v17140_v3, %v17139_v2  ;;  %v17152_v56 = vld [vmem:[%s26080_s7 + $0x78] sm:$0xff]  ;;  %v5264_v3 = vadd.f32 1.0, %v23663_v46 }
 0x3fb   : > { %20616 = vmatprep.subr.bf16.mxu0 %v20615_v37  ;;  %v20627_v14 = vpack.c.bf16 %v17152_v56, %v17151_v38  ;;  %v23934_v55 = vld [vmem:[#allocation3 + $0x16] sm:$0xff]  ;;  %v23991_v38 = vld [vmem:[#allocation6 + $0x16] sm:$0xff]  ;;  %v24001_v56 = vld [vmem:[#allocation6 + $0x26] sm:$0xff] }
 0x3fc   : > { %v23950_v2 = vld [vmem:[#allocation3 + $0x36] sm:$0xff] }
 0x3fd   : > { %19302 = vmatmul.mubr.msk.f32.gmra.mrb[20].mxu0 %vm1073_vm3, %v6093_v49  ;;  %v23938_v49 = vld [vmem:[#allocation3 + $0x1e] sm:$0xff] }
 0x3fe   : > { %19304 = vmatprep.mubr.msk.f32.mxu0 %vm1073_vm3, %v6094_v13  ;;  %v23942_v13 = vld [vmem:[#allocation3 + $0x26] sm:$0xff] }
 0x401   : > { %19305 = vmatmul.mubr.msk.f32.gmra.mrb[22].mxu0 %vm1073_vm3, %v6095_v58  ;;  %v23946_v58 = vld [vmem:[#allocation3 + $0x2e] sm:$0xff] }
 0x402   : > { %19315 = vmatprep.mubr.msk.f32.mxu0 %vm1073_vm3, %v6238_v51  ;;  %v17072_v51 = vmul.f32 -1.442695, %v5264_v3  ;;  %v6688_v3 = vld [vmem:[#allocation3 + $0x7] sm:$0xff] }
 0x404   : > { %22086 = vpow2.f32 %v17072_v51 }
 0x405   : > { %19316 = vmatmul.mubr.msk.f32.vlgmr.msra.gmra.mrb[16].mxu0 %vm1073_vm3, %v6239_v48 }
 0x406   : > { %19318 = vmatprep.mubr.msk.f32.mxu0 %vm1073_vm3, %v6240_v62  ;;  %20618 = vmatpush3.bf16.msra.mxu0 %v20615_v37  ;;  %v17162_v37 = vld [vmem:[%s26079_s6 + $0x88] sm:$0xff] }
 0x407   : > { %20620 = vmatprep.subr.bf16.mxu0 %v20619_v42  ;;  %v20631_v53 = vpack.c.bf16 %v17162_v37, %v17161_v52  ;;  %v17175_v37 = vld [vmem:[%s26080_s7 + $0x90] sm:$0xff] }
 0x409   : > { %19319 = vmatmul.mubr.msk.f32.gmra.mrb[18].mxu0 %vm1073_vm3, %v6241_v24 }
 0x40a   : > { %19321 = vmatprep.mubr.msk.f32.mxu0 %vm1073_vm3, %v6242_v43  ;;  %20622 = vmatpush3.bf16.msra.mxu0 %v20619_v42 }
 0x40b   : > { %20624 = vmatprep.subr.bf16.mxu0 %v20623_v35 }
 0x40d   : > { %19322 = vmatmul.mubr.msk.f32.gmra.mrb[20].mxu0 %vm1073_vm3, %v6243_v47 }
 0x40e   : > { %19324 = vmatprep.mubr.msk.f32.mxu0 %vm1073_vm3, %v6244_v34  ;;  %v22087_v42 = vpop.eup %22086  ;;  %v17164_v34 = vld [vmem:[%s26079_s6 + $0x98] sm:$0xff] }
 0x40f   : > { %v5296_v48 = vadd.f32 1.0, %v22087_v42  ;;  %v6689_v42 = vld [vmem:[#allocation3 + $0xf] sm:$0xff] }
 0x411   : > { %19325 = vmatmul.mubr.msk.f32.gmra.mrb[22].mxu0 %vm1073_vm3, %v6245_v18  ;;  %22088 = vrcp.f32 %v5296_v48  ;;  %v17174_v18 = vld [vmem:[%s26080_s7 + $0x88] sm:$0xff]  ;;  %v17185_v48 = vld [vmem:[%s26079_s6 + $0xa0] sm:$0xff] }
 0x412   : > { %19335 = vmatprep.mubr.msk.f32.mxu0 %vm1073_vm3, %v6388_v31  ;;  %v24005_v31 = vld [vmem:[#allocation6 + $0x2e] sm:$0xff] }
 0x415   : > { %19336 = vmatmul.mubr.msk.f32.vlgmr.msra.gmra.mrb[16].mxu0 %vm1073_vm3, %v23924_v41 }
 0x416   : > { %19338 = vmatprep.mubr.msk.f32.mxu0 %vm1073_vm3, %v23934_v55  ;;  %20626 = vmatpush3.bf16.msra.mxu0 %v20623_v35 }
 0x417   : > { %20628 = vmatprep.subr.bf16.mxu0 %v20627_v14 }
 0x419   : > { %19339 = vmatmul.mubr.msk.f32.gmra.mrb[18].mxu0 %vm1073_vm3, %v23938_v49 }
 0x41a   : > { %19341 = vmatprep.mubr.msk.f32.mxu0 %vm1073_vm3, %v23942_v13  ;;  %20630 = vmatpush3.bf16.msra.mxu0 %v20627_v14  ;;  %v24009_v14 = vld [vmem:[#allocation6 + $0x36] sm:$0xff] }
 0x41b   : > { %20632 = vmatprep.subr.bf16.mxu0 %v20631_v53  ;;  %v22089_v28 = vpop.eup %22088 }
 0x41c   : > { %v5328_v62 = vmul.f32 %v22353_v21, %v22089_v28  ;;  %v17186_v28 = vld [vmem:[%s26079_s6 + $0xa8] sm:$0xff]  ;;  %v6690_v21 = vld [vmem:[#allocation3 + $0x17] sm:$0xff] }
 0x41d   : > { %19342 = vmatmul.mubr.msk.f32.gmra.mrb[20].mxu0 %vm1073_vm3, %v23946_v58 }
 0x41e   : > { %19344 = vmatprep.mubr.msk.f32.mxu0 %vm1073_vm3, %v23950_v2 }
 0x449   : > { %v5392_v35 = vpop.permute.xlu0 %5391 }
 0x44a   : > { %v5408_v24 = vadd.f32 %v5392_v35, %v5328_v62  ;;  %v20647_v62 = vpack.c.bf16 %v17186_v28, %v17185_v48  ;;  %v6691_v35 = vld [vmem:[#allocation3 + $0x1f] sm:$0xff]  ;;  %v17199_v28 = vld [vmem:[%s26080_s7 + $0xb0] sm:$0xff] }
 0x44c   : > { %v5416_v43 = vmul.f32 %v5408_v24, %v23825_v61  ;;  %v6692_v24 = vld [vmem:[#allocation3 + $0x27] sm:$0xff] }
 0x44e   : > { %19585 = vmatmul.mubr.msk.f32.gmra.mrb[26].mxu1 %vm1073_vm3, %v5416_v43  ;;  %5505 = vst.msk [vmem:[#allocation6 + $0x3f] sm:$0x3] %vm5496_vm4, %v5416_v43  ;;  %v6693_v43 = vld [vmem:[#allocation3 + $0x2f] sm:$0xff] }
 0x44f   : > { %19595 = vmatprep.mubr.msk.f32.mxu1 %vm1073_vm3, %v23716_v8  ;;  %v5480_v46 = vpop.permute.xlu1 %5479  ;;  %v17163_v8 = vld [vmem:[%s26079_s6 + $0x90] sm:$0xff] }
 0x450   : > { %5497 = vst.msk [vmem:[#allocation3 + $0x3f] sm:$0x3] %vm5496_vm4, %v5480_v46 }
 0x452   : > { %19596 = vmatmul.mubr.msk.f32.vlgmr.msra.gmra.mrb[20].mxu1 %vm1073_vm3, %v23730_v7  ;;  %v6538_v7 = vld [vmem:[#allocation6 + $0x6] sm:$0xff] }
 0x453   : > { %19598 = vmatprep.mubr.msk.f32.mxu1 %vm1073_vm3, %v23723_v25  ;;  %v20635_v25 = vpack.c.bf16 %v17164_v34, %v17163_v8  ;;  %v17187_v8 = vld [vmem:[%s26079_s6 + $0xb0] sm:$0xff]  ;;  %v17188_v34 = vld [vmem:[%s26079_s6 + $0xb8] sm:$0xff] }
 0x455   : > { %v6545_v52 = vld [vmem:[#allocation6 + $0x3e] sm:$0x3] }
 0x456   : > { %19599 = vmatmul.mubr.msk.f32.gmra.mrb[22].mxu1 %vm1073_vm3, %v23739_v20  ;;  %v23981_v20 = vld [vmem:[#allocation6 + $0xe] sm:$0xff]  ;;  %v6845_v48 = vld [vmem:[#allocation6 + $0x3f] sm:$0x3] }
 0x457   : > { %19601 = vmatprep.mubr.msk.f32.mxu1 %vm1073_vm3, %v23751_v1  ;;  %v6395_v47 = vld [vmem:[#allocation3 + $0x3e] sm:$0x3] }
 0x458   : > { %19345 = vmatmul.mubr.msk.f32.gmra.mrb[22].mxu0 %vm1073_vm3, %v6395_v47  ;;  %v17173_v1 = vld [vmem:[%s26080_s7 + $0x80] sm:$0xff] }
 0x459   : > { %19355 = vmatprep.mubr.msk.f32.mxu0 %vm1073_vm3, %v6538_v7  ;;  %v6695_v47 = vld [vmem:[#allocation3 + $0x3f] sm:$0x3] }
 0x45a   : > { %19602 = vmatmul.mubr.msk.f32.gmra.mrb[24].mxu1 %vm1073_vm3, %v23789_v60  ;;  %v20639_v60 = vpack.c.bf16 %v17174_v18, %v17173_v1  ;;  %v6838_v7 = vld [vmem:[#allocation6 + $0x7] sm:$0xff]  ;;  %v6839_v1 = vld [vmem:[#allocation6 + $0xf] sm:$0xff] }
 0x45b   : > { %19604 = vmatprep.mubr.msk.f32.mxu1 %vm1073_vm3, %v23793_v27  ;;  %v23996_v27 = vld [vmem:[#allocation6 + $0x1e] sm:$0xff] }
 0x45c   : > { %19356 = vmatmul.mubr.msk.f32.vlgmr.msra.gmra.mrb[16].mxu0 %vm1073_vm3, %v23981_v20  ;;  %v17197_v18 = vld [vmem:[%s26080_s7 + $0xa0] sm:$0xff] }
 0x45d   : > { %20634 = vmatpush3.bf16.msra.mxu0 %v20631_v53  ;;  %19358 = vmatprep.mubr.msk.f32.mxu0 %vm1073_vm3, %v23991_v38  ;;  %v17176_v53 = vld [vmem:[%s26080_s7 + $0x98] sm:$0xff] }
 0x45e   : > { %19605 = vmatmul.mubr.msk.f32.gmra.mrb[26].mxu1 %vm1073_vm3, %v5480_v46  ;;  %20636 = vmatprep.subr.bf16.mxu0 %v20635_v25  ;;  %v20643_v51 = vpack.c.bf16 %v17176_v53, %v17175_v37  ;;  %v6694_v46 = vld [vmem:[#allocation3 + $0x37] sm:$0xff] }
 0x45f   : > { %8767 = vmatprep.mubr.f32.mxu1 %v22371_v6  ;;  %v6841_v53 = vld [vmem:[#allocation6 + $0x1f] sm:$0xff] }
 0x460   : > { %19359 = vmatmul.mubr.msk.f32.gmra.mrb[18].mxu0 %vm1073_vm3, %v23996_v27 }
 0x461   : > { %19361 = vmatprep.mubr.msk.f32.mxu0 %vm1073_vm3, %v24001_v56  ;;  %20638 = vmatpush3.bf16.msra.mxu0 %v20635_v25  ;;  %v20651_v25 = vpack.c.bf16 %v17188_v34, %v17187_v8  ;;  %v7289_v34 = vld [vmem:[#allocation3 + $0x14] sm:$0xff] }
 0x462   : > { %20640 = vmatprep.subr.bf16.mxu0 %v20639_v60 }
 0x464   : > { %19362 = vmatmul.mubr.msk.f32.gmra.mrb[20].mxu0 %vm1073_vm3, %v24005_v31 }
 0x465   : > { %19364 = vmatprep.mubr.msk.f32.mxu0 %vm1073_vm3, %v24009_v14 }
 0x468   : > { %19365 = vmatmul.mubr.msk.f32.gmra.mrb[22].mxu0 %vm1073_vm3, %v6545_v52  ;;  %v6840_v52 = vld [vmem:[#allocation6 + $0x17] sm:$0xff] }
 0x469   : > { %19375 = vmatprep.mubr.msk.f32.mxu0 %vm1073_vm3, %v6688_v3  ;;  %v6842_v3 = vld [vmem:[#allocation6 + $0x27] sm:$0xff] }
 0x46c   : > { %19376 = vmatmul.mubr.msk.f32.vlgmr.msra.gmra.mrb[16].mxu0 %vm1073_vm3, %v6689_v42  ;;  %v6844_v42 = vld [vmem:[#allocation6 + $0x37] sm:$0xff] }
 0x46d   : > { %20642 = vmatpush3.bf16.msra.mxu0 %v20639_v60  ;;  %19378 = vmatprep.mubr.msk.f32.mxu0 %vm1073_vm3, %v6690_v21  ;;  %v17198_v60 = vld [vmem:[%s26080_s7 + $0xa8] sm:$0xff]  ;;  %v17200_v21 = vld [vmem:[%s26080_s7 + $0xb8] sm:$0xff] }
 0x46e   : > { %20644 = vmatprep.subr.bf16.mxu0 %v20643_v51  ;;  %v20655_v37 = vpack.c.bf16 %v17198_v60, %v17197_v18  ;;  %v7291_v18 = vld [vmem:[#allocation3 + $0x24] sm:$0xff]  ;;  %v7292_v60 = vld [vmem:[#allocation3 + $0x2c] sm:$0xff] }
 0x470   : > { %19379 = vmatmul.mubr.msk.f32.gmra.mrb[18].mxu0 %vm1073_vm3, %v6691_v35  ;;  %v17209_v35 = vld [vmem:[%s26079_s6 + $0xc0] sm:$0xff] }
 0x471   : > { %19381 = vmatprep.mubr.msk.f32.mxu0 %vm1073_vm3, %v6692_v24  ;;  %20646 = vmatpush3.bf16.msra.mxu0 %v20643_v51  ;;  %v6843_v51 = vld [vmem:[#allocation6 + $0x2f] sm:$0xff] }
 0x472   : > { %20648 = vmatprep.subr.bf16.mxu0 %v20647_v62  ;;  %v17210_v24 = vld [vmem:[%s26079_s6 + $0xc8] sm:$0xff] }
 0x474   : > { %19382 = vmatmul.mubr.msk.f32.gmra.mrb[20].mxu0 %vm1073_vm3, %v6693_v43  ;;  %v20663_v43 = vpack.c.bf16 %v17210_v24, %v17209_v35  ;;  %v7440_v35 = vld [vmem:[#allocation6 + $0x1c] sm:$0xff] }
 0x475   : > { %19384 = vmatprep.mubr.msk.f32.mxu0 %vm1073_vm3, %v6694_v46  ;;  %v17222_v46 = vld [vmem:[%s26080_s7 + $0xc8] sm:$0xff] }
 0x478   : > { %19385 = vmatmul.mubr.msk.f32.gmra.mrb[22].mxu0 %vm1073_vm3, %v6695_v47 }
 0x479   : > { %19395 = vmatprep.mubr.msk.f32.mxu0 %vm1073_vm3, %v6838_v7  ;;  %v17234_v7 = vld [vmem:[%s26079_s6 + $0xe8] sm:$0xff] }
 0x47c   : > { %19396 = vmatmul.mubr.msk.f32.vlgmr.msra.gmra.mrb[16].mxu0 %vm1073_vm3, %v6839_v1 }
 0x47d   : > { %20650 = vmatpush3.bf16.msra.mxu0 %v20647_v62  ;;  %19398 = vmatprep.mubr.msk.f32.mxu0 %vm1073_vm3, %v6840_v52  ;;  %v20659_v62 = vpack.c.bf16 %v17200_v21, %v17199_v28  ;;  %v7293_v52 = vld [vmem:[#allocation3 + $0x34] sm:$0xff]  ;;  %v7439_v28 = vld [vmem:[#allocation6 + $0x14] sm:$0xff] }
 0x47e   : > { %20652 = vmatprep.subr.bf16.mxu0 %v20651_v25  ;;  %v17245_v21 = vld [vmem:[%s26080_s7 + $0xe0] sm:$0xff] }
 0x480   : > { %19399 = vmatmul.mubr.msk.f32.gmra.mrb[18].mxu0 %vm1073_vm3, %v6841_v53  ;;  %v7295_v53 = vld [vmem:[#allocation3 + $0x44] sm:$0x3] }
 0x481   : > { %19401 = vmatprep.mubr.msk.f32.mxu0 %vm1073_vm3, %v6842_v3  ;;  %20654 = vmatpush3.bf16.msra.mxu0 %v20651_v25  ;;  %v7290_v25 = vld [vmem:[#allocation3 + $0x1c] sm:$0xff]  ;;  %v17235_v3 = vld [vmem:[%s26079_s6 + $0xf0] sm:$0xff] }
 0x482   : > { %20656 = vmatprep.subr.bf16.mxu0 %v20655_v37 }
 0x484   : > { %19402 = vmatmul.mubr.msk.f32.gmra.mrb[20].mxu0 %vm1073_vm3, %v6843_v51  ;;  %v17236_v51 = vld [vmem:[%s26079_s6 + $0xf8] sm:$0xff] }
 0x485   : > { %19404 = vmatprep.mubr.msk.f32.mxu0 %vm1073_vm3, %v6844_v42  ;;  %v7438_v42 = vld [vmem:[#allocation6 + $0xc] sm:$0xff] }
 0x488   : > { %19405 = vmatmul.mubr.msk.f32.gmra.mrb[22].mxu0 %vm1073_vm3, %v6845_v48  ;;  %v20683_v48 = vpack.c.bf16 %v17236_v51, %v17235_v3  ;;  %v17270_v3 = vld [vmem:[%s26080_s7 + $0x108] sm:$0xff]  ;;  %v7740_v51 = vld [vmem:[#allocation6 + $0x1d] sm:$0xff] }
 0x489   : > { %19415 = vmatprep.mubr.msk.f32.mxu0 %vm1073_vm3, %v23767_v5  ;;  %v6994_v5 = vld [vmem:[#allocation3 + $0x38] sm:$0xff] }
 0x48c   : > { %19416 = vmatmul.mubr.msk.f32.vlgmr.msra.gmra.mrb[16].mxu0 %vm1073_vm3, %v23777_v19  ;;  %v6995_v19 = vld [vmem:[#allocation3 + $0x40] sm:$0x3] }
 0x48d   : > { %20658 = vmatpush3.bf16.msra.mxu0 %v20655_v37  ;;  %19418 = vmatprep.mubr.msk.f32.mxu0 %vm1073_vm3, %v23781_v44  ;;  %v17211_v44 = vld [vmem:[%s26079_s6 + $0xd0] sm:$0xff]  ;;  %v7294_v37 = vld [vmem:[#allocation3 + $0x3c] sm:$0xff] }
 0x48e   : > { %20660 = vmatprep.subr.bf16.mxu0 %v20659_v62 }
 0x490   : > { %19419 = vmatmul.mubr.msk.f32.gmra.mrb[18].mxu0 %vm1073_vm3, %v23785_v22  ;;  %v17212_v22 = vld [vmem:[%s26079_s6 + $0xd8] sm:$0xff] }
 0x491   : > { %19421 = vmatprep.mubr.msk.f32.mxu0 %vm1073_vm3, %v23797_v0  ;;  %20662 = vmatpush3.bf16.msra.mxu0 %v20659_v62  ;;  %v20667_v0 = vpack.c.bf16 %v17212_v22, %v17211_v44  ;;  %v17246_v62 = vld [vmem:[%s26080_s7 + $0xe8] sm:$0xff]  ;;  %v7444_v44 = vld [vmem:[#allocation6 + $0x3c] sm:$0xff]  ;;  %v7445_v22 = vld [vmem:[#allocation6 + $0x44] sm:$0x3] }
 0x492   : > { %20664 = vmatprep.subr.bf16.mxu0 %v20663_v43  ;;  %v20687_v24 = vpack.c.bf16 %v17246_v62, %v17245_v21  ;;  %v7743_v21 = vld [vmem:[#allocation6 + $0x35] sm:$0xff]  ;;  %v7744_v62 = vld [vmem:[#allocation6 + $0x3d] sm:$0xff] }
 0x494   : > { %19422 = vmatmul.mubr.msk.f32.gmra.mrb[20].mxu0 %vm1073_vm3, %v23813_v36  ;;  %v17221_v36 = vld [vmem:[%s26080_s7 + $0xc0] sm:$0xff] }
 0x495   : > { %19424 = vmatprep.mubr.msk.f32.mxu0 %vm1073_vm3, %v6994_v5  ;;  %v20671_v47 = vpack.c.bf16 %v17222_v46, %v17221_v36  ;;  %v7442_v5 = vld [vmem:[#allocation6 + $0x2c] sm:$0xff]  ;;  %v17248_v36 = vld [vmem:[%s26080_s7 + $0xf8] sm:$0xff] }
 0x496   : > { %v7588_v46 = vld [vmem:[#allocation3 + $0xd] sm:$0xff] }
 0x498   : > { %19425 = vmatmul.mubr.msk.f32.gmra.mrb[22].mxu0 %vm1073_vm3, %v6995_v19  ;;  %v7443_v19 = vld [vmem:[#allocation6 + $0x34] sm:$0xff] }
 0x499   : > { %19435 = vmatprep.mubr.msk.f32.mxu0 %vm1073_vm3, %v23699_v29  ;;  %v7144_v29 = vld [vmem:[#allocation6 + $0x38] sm:$0xff] }
 0x49c   : > { %19436 = vmatmul.mubr.msk.f32.vlgmr.msra.gmra.mrb[16].mxu0 %vm1073_vm3, %v23701_v57  ;;  %v7145_v57 = vld [vmem:[#allocation6 + $0x40] sm:$0x3] }
 0x49d   : > { %20666 = vmatpush3.bf16.msra.mxu0 %v20663_v43  ;;  %19438 = vmatprep.mubr.msk.f32.mxu0 %vm1073_vm3, %v23711_v17  ;;  %v17223_v17 = vld [vmem:[%s26080_s7 + $0xd0] sm:$0xff]  ;;  %v7441_v43 = vld [vmem:[#allocation6 + $0x24] sm:$0xff] }
 0x49e   : > { %20668 = vmatprep.subr.bf16.mxu0 %v20667_v0 }
 0x4a0   : > { %19439 = vmatmul.mubr.msk.f32.gmra.mrb[18].mxu0 %vm1073_vm3, %v23741_v4  ;;  %v17224_v4 = vld [vmem:[%s26080_s7 + $0xd8] sm:$0xff] }
 0x4a1   : > { %19441 = vmatprep.mubr.msk.f32.mxu0 %vm1073_vm3, %v23743_v63  ;;  %20670 = vmatpush3.bf16.msra.mxu0 %v20667_v0  ;;  %v7288_v63 = vld [vmem:[#allocation3 + $0xc] sm:$0xff]  ;;  %v20675_v8 = vpack.c.bf16 %v17224_v4, %v17223_v17  ;;  %v17258_v17 = vld [vmem:[%s26079_s6 + $0x108] sm:$0xff] }
 0x4a2   : > { %20672 = vmatprep.subr.bf16.mxu0 %v20671_v47  ;;  %v17247_v0 = vld [vmem:[%s26080_s7 + $0xf0] sm:$0xff]  ;;  %v7590_v4 = vld [vmem:[#allocation3 + $0x1d] sm:$0xff] }
 0x4a4   : > { %19442 = vmatmul.mubr.msk.f32.gmra.mrb[20].mxu0 %vm1073_vm3, %v23755_v9  ;;  %v17233_v9 = vld [vmem:[%s26079_s6 + $0xe0] sm:$0xff] }
 0x4a5   : > { %19444 = vmatprep.mubr.msk.f32.mxu0 %vm1073_vm3, %v7144_v29  ;;  %v20679_v1 = vpack.c.bf16 %v17234_v7, %v17233_v9  ;;  %v7589_v29 = vld [vmem:[#allocation3 + $0x15] sm:$0xff]  ;;  %v7594_v7 = vld [vmem:[#allocation3 + $0x3d] sm:$0xff] }
 0x4a6   : > { %v7593_v9 = vld [vmem:[#allocation3 + $0x35] sm:$0xff] }
 0x4a8   : > { %19445 = vmatmul.mubr.msk.f32.gmra.mrb[22].mxu0 %vm1073_vm3, %v7145_v57  ;;  %v17257_v57 = vld [vmem:[%s26079_s6 + $0x100] sm:$0xff] }
 0x4a9   : > { %19455 = vmatprep.mubr.msk.f32.mxu0 %vm1073_vm3, %v7288_v63  ;;  %v20695_v63 = vpack.c.bf16 %v17258_v17, %v17257_v57 }
 0x4ac   : > { %19456 = vmatmul.mubr.msk.f32.vlgmr.msra.gmra.mrb[16].mxu0 %vm1073_vm3, %v7289_v34  ;;  %v7592_v34 = vld [vmem:[#allocation3 + $0x2d] sm:$0xff] }
 0x4ad   : > { %20674 = vmatpush3.bf16.msra.mxu0 %v20671_v47  ;;  %19458 = vmatprep.mubr.msk.f32.mxu0 %vm1073_vm3, %v7290_v25  ;;  %v20691_v47 = vpack.c.bf16 %v17248_v36, %v17247_v0  ;;  %v7595_v25 = vld [vmem:[#allocation3 + $0x45] sm:$0x3] }
 0x4ae   : > { %20676 = vmatprep.subr.bf16.mxu0 %v20675_v8 }
 0x4b0   : > { %19459 = vmatmul.mubr.msk.f32.gmra.mrb[18].mxu0 %vm1073_vm3, %v7291_v18  ;;  %v17260_v18 = vld [vmem:[%s26079_s6 + $0x118] sm:$0xff] }
 0x4b1   : > { %19461 = vmatprep.mubr.msk.f32.mxu0 %vm1073_vm3, %v7292_v60  ;;  %20678 = vmatpush3.bf16.msra.mxu0 %v20675_v8  ;;  %v7591_v8 = vld [vmem:[#allocation3 + $0x25] sm:$0xff] }
 0x4b2   : > { %20680 = vmatprep.subr.bf16.mxu0 %v20679_v1  ;;  %v7738_v60 = vld [vmem:[#allocation6 + $0xd] sm:$0xff] }
 0x4b4   : > { %19462 = vmatmul.mubr.msk.f32.gmra.mrb[20].mxu0 %vm1073_vm3, %v7293_v52 }
 0x4b5   : > { %19464 = vmatprep.mubr.msk.f32.mxu0 %vm1073_vm3, %v7294_v37  ;;  %v7739_v37 = vld [vmem:[#allocation6 + $0x15] sm:$0xff] }
 0x4b8   : > { %19465 = vmatmul.mubr.msk.f32.gmra.mrb[22].mxu0 %vm1073_vm3, %v7295_v53  ;;  %v17269_v53 = vld [vmem:[%s26080_s7 + $0x100] sm:$0xff] }
 0x4b9   : > { %19475 = vmatprep.mubr.msk.f32.mxu0 %vm1073_vm3, %v7438_v42  ;;  %v20703_v42 = vpack.c.bf16 %v17270_v3, %v17269_v53 }
 0x4bc   : > { %19476 = vmatmul.mubr.msk.f32.vlgmr.msra.gmra.mrb[16].mxu0 %vm1073_vm3, %v7439_v28  ;;  %v7742_v28 = vld [vmem:[#allocation6 + $0x2d] sm:$0xff] }
 0x4bd   : > { %20682 = vmatpush3.bf16.msra.mxu0 %v20679_v1  ;;  %19478 = vmatprep.mubr.msk.f32.mxu0 %vm1073_vm3, %v7440_v35  ;;  %v17259_v1 = vld [vmem:[%s26079_s6 + $0x110] sm:$0xff]  ;;  %v7745_v35 = vld [vmem:[#allocation6 + $0x45] sm:$0x3] }
 0x4be   : > { %20684 = vmatprep.subr.bf16.mxu0 %v20683_v48  ;;  %v20699_v52 = vpack.c.bf16 %v17260_v18, %v17259_v1  ;;  %v17305_v1 = vld [vmem:[%s26083_s10 + $0x40] sm:$0xff] }
 0x4c0   : > { %19479 = vmatmul.mubr.msk.f32.gmra.mrb[18].mxu0 %vm1073_vm3, %v7441_v43  ;;  %v17272_v43 = vld [vmem:[%s26080_s7 + $0x118] sm:$0xff] }
 0x4c1   : > { %19481 = vmatprep.mubr.msk.f32.mxu0 %vm1073_vm3, %v7442_v5  ;;  %20686 = vmatpush3.bf16.msra.mxu0 %v20683_v48  ;;  %v7741_v48 = vld [vmem:[#allocation6 + $0x25] sm:$0xff] }
 0x4c2   : > { %20688 = vmatprep.subr.bf16.mxu0 %v20687_v24 }
 0x4c4   : > { %19482 = vmatmul.mubr.msk.f32.gmra.mrb[20].mxu0 %vm1073_vm3, %v7443_v19  ;;  %v7895_v19 = vld [vmem:[#allocation3 + $0x46] sm:$0x3] }
 0x4c5   : > { %19484 = vmatprep.mubr.msk.f32.mxu0 %vm1073_vm3, %v7444_v44 }
 0x4c8   : > { %19485 = vmatmul.mubr.msk.f32.gmra.mrb[22].mxu0 %vm1073_vm3, %v7445_v22 }
 0x4c9   : > { %19495 = vmatprep.mubr.msk.f32.mxu0 %vm1073_vm3, %v7588_v46 }
 0x4cc   : > { %19496 = vmatmul.mubr.msk.f32.vlgmr.msra.gmra.mrb[16].mxu0 %vm1073_vm3, %v7589_v29 }
 0x4cd   : > { %20690 = vmatpush3.bf16.msra.mxu0 %v20687_v24  ;;  %19498 = vmatprep.mubr.msk.f32.mxu0 %vm1073_vm3, %v7590_v4  ;;  %v17271_v24 = vld [vmem:[%s26080_s7 + $0x110] sm:$0xff] }
 0x4ce   : > { %20692 = vmatprep.subr.bf16.mxu0 %v20691_v47  ;;  %v20707_v5 = vpack.c.bf16 %v17272_v43, %v17271_v24 }
 0x4d0   : > { %19499 = vmatmul.mubr.msk.f32.gmra.mrb[18].mxu0 %vm1073_vm3, %v7591_v8 }
 0x4d1   : > { %19501 = vmatprep.mubr.msk.f32.mxu0 %vm1073_vm3, %v7592_v34  ;;  %20694 = vmatpush3.bf16.msra.mxu0 %v20691_v47 }
 0x4d2   : > { %20696 = vmatprep.subr.bf16.mxu0 %v20695_v63 }
 0x4d4   : > { %19502 = vmatmul.mubr.msk.f32.gmra.mrb[20].mxu0 %vm1073_vm3, %v7593_v9 }
 0x4d5   : > { %19504 = vmatprep.mubr.msk.f32.mxu0 %vm1073_vm3, %v7594_v7  ;;  %v17306_v7 = vld [vmem:[%s26083_s10 + $0x48] sm:$0xff] }
 0x4d8   : > { %19505 = vmatmul.mubr.msk.f32.gmra.mrb[22].mxu0 %vm1073_vm3, %v7595_v25  ;;  %v17308_v25 = vld [vmem:[%s26083_s10 + $0x58] sm:$0xff] }
 0x4d9   : > { %19515 = vmatprep.mubr.msk.f32.mxu0 %vm1073_vm3, %v7738_v60  ;;  %v20727_v18 = vpack.c.bf16 %v17308_v25, %v17306_v7  ;;  %v17307_v60 = vld [vmem:[%s26083_s10 + $0x50] sm:$0xff] }
 0x4da   : > { %v20729_v53 = vpack.c.bf16 %v17307_v60, %v17305_v1 }
 0x4db   : > { %20728 = vmatprep.subr.bf16.mxu1 %v20727_v18 }
 0x4dc   : > { %19516 = vmatmul.mubr.msk.f32.vlgmr.msra.gmra.mrb[16].mxu0 %vm1073_vm3, %v7739_v37  ;;  %v17312_v37 = vld [vmem:[%s26083_s10 + $0x78] sm:$0xff]  ;;  %20730 = vmatpush1.bf16.msra.mxu1 %v20729_v53 }
 0x4dd   : > { %20698 = vmatpush3.bf16.msra.mxu0 %v20695_v63  ;;  %19518 = vmatprep.mubr.msk.f32.mxu0 %vm1073_vm3, %v7740_v51  ;;  %v5426_v51 = vpop.permute.xlu1 %5425 }
 0x4de   : > { %20700 = vmatprep.subr.bf16.mxu0 %v20699_v52 }
 0x4e0   : > { %19519 = vmatmul.mubr.msk.f32.gmra.mrb[18].mxu0 %vm1073_vm3, %v7741_v48 }
 0x4e1   : > { %19521 = vmatprep.mubr.msk.f32.mxu0 %vm1073_vm3, %v7742_v28  ;;  %20702 = vmatpush3.bf16.msra.mxu0 %v20699_v52  ;;  %v17310_v52 = vld [vmem:[%s26083_s10 + $0x68] sm:$0xff]  ;;  %v5449_v28 = vadd.f32 %v5426_v51, %v23345_v12 }
 0x4e2   : > { %20704 = vmatprep.subr.bf16.mxu0 %v20703_v42  ;;  %v20731_v3 = vpack.c.bf16 %v17312_v37, %v17310_v52 }
 0x4e4   : > { %19522 = vmatmul.mubr.msk.f32.gmra.mrb[20].mxu0 %vm1073_vm3, %v7743_v21  ;;  %20732 = vmatprep.subr.bf16.mxu1 %v20731_v3 }
 0x4e5   : > { %19524 = vmatprep.mubr.msk.f32.mxu0 %vm1073_vm3, %v7744_v62 }
 0x4e8   : > { %19525 = vmatmul.mubr.msk.f32.gmra.mrb[22].mxu0 %vm1073_vm3, %v7745_v35 }
 0x4e9   : > { %19535 = vmatprep.mubr.msk.f32.mxu0 %vm1073_vm3, %v23924_v41  ;;  %v7894_v41 = vld [vmem:[#allocation3 + $0x3e] sm:$0xff] }
 0x4ec   : > { %19536 = vmatmul.mubr.msk.f32.vlgmr.msra.gmra.mrb[16].mxu0 %vm1073_vm3, %v23934_v55  ;;  %v8044_v55 = vld [vmem:[#allocation6 + $0x3e] sm:$0xff] }
 0x4ed   : > { %20706 = vmatpush3.bf16.msra.mxu0 %v20703_v42  ;;  %19538 = vmatprep.mubr.msk.f32.mxu0 %vm1073_vm3, %v23938_v49  ;;  %v8045_v49 = vld [vmem:[#allocation6 + $0x46] sm:$0x3]  ;;  %v5428_v42 = vpop.permute.xlu1 %5427 }
 0x4ee   : > { %20708 = vmatprep.subr.bf16.mxu0 %v20707_v5  ;;  %v5450_v24 = vadd.f32 %v5428_v42, %v23349_v26 }
 0x4f0   : > { %19539 = vmatmul.mubr.msk.f32.gmra.mrb[18].mxu0 %vm1073_vm3, %v23942_v13 }
 0x4f1   : > { %19541 = vmatprep.mubr.msk.f32.mxu0 %vm1073_vm3, %v23946_v58  ;;  %20710 = vmatpush3.bf16.msra.mxu0 %v20707_v5  ;;  %v5430_v48 = vpop.permute.xlu1 %5429 }
 0x4f4   : > { %19542 = vmatmul.mubr.msk.f32.gmra.mrb[20].mxu0 %vm1073_vm3, %v23950_v2 }
 0x4f5   : > { %19544 = vmatprep.mubr.msk.f32.mxu0 %vm1073_vm3, %v7894_v41  ;;  %v5432_v35 = vpop.permute.xlu1 %5431 }
 0x4f8   : > { %19545 = vmatmul.mubr.msk.f32.gmra.mrb[22].mxu0 %vm1073_vm3, %v7895_v19  ;;  %v5451_v19 = vadd.f32 %v5430_v48, %v23353_v33 }
 0x4f9   : > { %19555 = vmatprep.mubr.msk.f32.mxu0 %vm1073_vm3, %v23981_v20 }
 0x4fc   : > { %19556 = vmatmul.mubr.msk.f32.vlgmr.msra.gmra.mrb[16].mxu0 %vm1073_vm3, %v23991_v38 }
 0x4fd   : > { %19558 = vmatprep.mubr.msk.f32.mxu0 %vm1073_vm3, %v23996_v27 }
 0x500   : > { %19559 = vmatmul.mubr.msk.f32.gmra.mrb[18].mxu0 %vm1073_vm3, %v24001_v56 }
 0x501   : > { %19561 = vmatprep.mubr.msk.f32.mxu0 %vm1073_vm3, %v24005_v31 }
 0x504   : > { %19562 = vmatmul.mubr.msk.f32.gmra.mrb[20].mxu0 %vm1073_vm3, %v24009_v14 }
 0x505   : > { %19564 = vmatprep.mubr.msk.f32.mxu0 %vm1073_vm3, %v8044_v55 }
 0x508   : > { %19565 = vmatmul.mubr.msk.f32.gmra.mrb[22].mxu0 %vm1073_vm3, %v8045_v49  ;;  %v5434_v49 = vpop.permute.xlu1 %5433 }
 0x509   : > { %v5453_v26 = vadd.f32 %v5434_v49, %v23361_v10 }
 0x525   : > { %v19597_v13 = vpop.f32.mrb[20].mxu1 }
 0x526   : > { %v8495_v58 = vpop.f32.mrb[21].mxu1 }
 0x527   : > { %22090 = vtanh.f32 %v8495_v58 }
 0x529   : > { %v19600_v2 = vpop.f32.mrb[22].mxu1 }
 0x52a   : > { %v8505_v20 = vpop.f32.mrb[23].mxu1 }
 0x52b   : > { %22092 = vtanh.f32 %v8505_v20 }
 0x52d   : > { %v19603_v38 = vpop.f32.mrb[24].mxu1 }
 0x52e   : > { %v8515_v27 = vpop.f32.mrb[25].mxu1 }
 0x52f   : > { %22094 = vtanh.f32 %v8515_v27  ;;  %v5436_v27 = vpop.permute.xlu1 %5435 }
 0x531   : > { %v22091_v56 = vpop.eup %22090  ;;  %v24220_v31 = vpop.f32.mrb[26].mxu1 }
 0x532   : > { %8550 = vrot.lane.b32.xlu1 %v22091_v56, %s22374_s21  ;;  %v8525_v14 = vpop.f32.mrb[27].mxu1 }
 0x533   : > { %22096 = vtanh.f32 %v8525_v14  ;;  %v5438_v10 = vpop.permute.xlu1 %5437 }
 0x534   : > { %22098 = vtanh.f32 %v19597_v13 }
 0x535   : > { %v22093_v44 = vpop.eup %22092  ;;  %22100 = vtanh.f32 %v19600_v2  ;;  %v5452_v2 = vadd.f32 %v5432_v35, %v23357_v40  ;;  %v17311_v40 = vld [vmem:[%s26083_s10 + $0x70] sm:$0xff] }
 0x536   : > { %8554 = vrot.lane.b32.xlu1 %v22093_v44, %s22374_s21  ;;  %22102 = vtanh.f32 %v19603_v38 }
 0x539   : > { %v22095_v22 = vpop.eup %22094 }
 0x53a   : > { %8558 = vrot.lane.b32.xlu1 %v22095_v22, %s22374_s21 }
 0x53d   : > { %v22097_v0 = vpop.eup %22096 }
 0x53e   : > { %8562 = vrot.lane.b32.xlu1 %v22097_v0, %s22374_s21  ;;  %v22099_v8 = vpop.eup %22098  ;;  %v17309_v0 = vld [vmem:[%s26083_s10 + $0x60] sm:$0xff] }
 0x53f   : > { %v22101_v34 = vpop.eup %22100 }
 0x540   : > { %v22103_v9 = vpop.eup %22102 }
 0x5a4   : > { %v8551_v3 = vpop.permute.xlu1 %8550 }
 0x5cf   : > { %v19557_v36 = vpop.f32.mrb[16].mxu0 }
 0x5d0   : > { %v8141_v46 = vpop.f32.mrb[17].mxu0 }
 0x5d1   : > { %8196 = vrot.lane.b32.xlu0 %v8141_v46, %s22374_s21  ;;  %v5454_v46 = vadd.f32 %v5436_v27, %v23377_v30  ;;  %v5455_v30 = vadd.f32 %v23397_v45, %v5438_v10 }
 0x5d3   : > { %v19560_v47 = vpop.f32.mrb[18].mxu0 }
 0x5d4   : > { %v8151_v29 = vpop.f32.mrb[19].mxu0 }
 0x5d5   : > { %8198 = vrot.lane.b32.xlu0 %v19557_v36, %s22374_s21 }
 0x5d7   : > { %v19563_v57 = vpop.f32.mrb[20].mxu0 }
 0x5d8   : > { %v8161_v17 = vpop.f32.mrb[21].mxu0 }
 0x5d9   : > { %8200 = vrot.lane.b32.xlu0 %v8151_v29, %s22374_s21  ;;  %v20733_v29 = vpack.c.bf16 %v17311_v40, %v17309_v0  ;;  %v8632_v0 = vld [vmem:[%s26083_s10 + $0x10] sm:$0xff]  ;;  %v8635_v40 = vld [vmem:[%s26083_s10 + $0x28] sm:$0xff] }
 0x5db   : > { %v24229_v4 = vpop.f32.mrb[22].mxu0  ;;  %20734 = vmatpush1.bf16.msra.mxu1 %v20733_v29  ;;  %v8636_v29 = vld [vmem:[%s26083_s10 + $0x30] sm:$0xff] }
 0x5dc   : > { %v8171_v63 = vpop.f32.mrb[23].mxu0 }
 0x5dd   : > { %8202 = vrot.lane.b32.xlu0 %v19560_v47, %s22374_s21 }
 0x5e1   : > { %8204 = vrot.lane.b32.xlu0 %v8161_v17, %s22374_s21 }
 0x5e5   : > { %8206 = vrot.lane.b32.xlu0 %v19563_v57, %s22374_s21 }
 0x5e9   : > { %8208 = vrot.lane.b32.xlu0 %v8171_v63, %s22374_s21 }
 0x5ed   : > { %8552 = vrot.lane.b32.xlu0 %v22099_v8, %s22374_s21  ;;  %v8631_v8 = vld [vmem:[%s26083_s10 + $0x8] sm:$0xff] }
 0x5f1   : > { %8556 = vrot.lane.b32.xlu0 %v22101_v34, %s22374_s21  ;;  %v8633_v34 = vld [vmem:[%s26083_s10 + $0x18] sm:$0xff] }
 0x5f2   : > { %v20735_v25 = vpack.c.bf16 %v8633_v34, %v8631_v8 }
 0x5f4   : > { %20736 = vmatprep.subr.bf16.mxu1 %v20735_v25 }
 0x5f5   : > { %8560 = vrot.lane.b32.xlu0 %v22103_v9, %s22374_s21 }
 0x643   : > { %v8197_v21 = vpop.permute.xlu0 %8196 }
 0x644   : > { %v8220_v62 = vadd.f32 %v8197_v21, %v5449_v28 }
 0x646   : > { %v17281_v43 = vmul.f32 -1.442695, %v8220_v62 }
 0x647   : > { %v8199_v5 = vpop.permute.xlu0 %8198 }
 0x648   : > { %22104 = vpow2.f32 %v17281_v43  ;;  %v8221_v41 = vadd.f32 %v8199_v5, %v5450_v24  ;;  %v8555_v43 = vpop.permute.xlu1 %8554 }
 0x64a   : > { %v17282_v55 = vmul.f32 -1.442695, %v8221_v41 }
 0x64b   : > { %v8201_v13 = vpop.permute.xlu0 %8200 }
 0x64c   : > { %22106 = vpow2.f32 %v17282_v55  ;;  %v8222_v58 = vadd.f32 %v8201_v13, %v5451_v19 }
 0x64e   : > { %v17283_v20 = vmul.f32 -1.442695, %v8222_v58 }
 0x64f   : > { %v8203_v12 = vpop.permute.xlu0 %8202 }
 0x650   : > { %22108 = vpow2.f32 %v17283_v20  ;;  %v8223_v38 = vadd.f32 %v8203_v12, %v5452_v2  ;;  %v8559_v20 = vpop.permute.xlu1 %8558 }
 0x652   : > { %v22105_v56 = vpop.eup %22104  ;;  %v17284_v14 = vmul.f32 -1.442695, %v8223_v38 }
 0x653   : > { %v8252_v44 = vadd.f32 1.0, %v22105_v56  ;;  %v8205_v22 = vpop.permute.xlu0 %8204 }
 0x654   : > { %22110 = vpow2.f32 %v17284_v14  ;;  %v8224_v33 = vadd.f32 %v8205_v22, %v5453_v26  ;;  %v8563_v14 = vpop.permute.xlu1 %8562 }
 0x655   : > { %22112 = vrcp.f32 %v8252_v44 }
 0x656   : > { %v22107_v36 = vpop.eup %22106  ;;  %v17285_v47 = vmul.f32 -1.442695, %v8224_v33 }
 0x657   : > { %v8253_v57 = vadd.f32 1.0, %v22107_v36  ;;  %v8207_v17 = vpop.permute.xlu0 %8206 }
 0x658   : > { %22114 = vpow2.f32 %v17285_v47  ;;  %v8225_v63 = vadd.f32 %v8207_v17, %v5454_v46  ;;  %v8634_v47 = vld [vmem:[%s26083_s10 + $0x20] sm:$0xff] }
 0x659   : > { %22116 = vrcp.f32 %v8253_v57  ;;  %v17329_v17 = vld [vmem:[%s26084_s11 + $0x20] sm:$0xff]  ;;  %v20741_v8 = vpack.c.bf16 %v8636_v29, %v8634_v47  ;;  %v8960_v29 = vld [vmem:[#allocation4 + $0x39] sm:$0x3] }
 0x65a   : > { %v22109_v9 = vpop.eup %22108  ;;  %v17286_v7 = vmul.f32 -1.442695, %v8225_v63  ;;  %v17330_v63 = vld [vmem:[%s26084_s11 + $0x28] sm:$0xff] }
 0x65b   : > { %v8254_v1 = vadd.f32 1.0, %v22109_v9  ;;  %v8209_v18 = vpop.permute.xlu0 %8208  ;;  %v20743_v34 = vpack.c.bf16 %v17330_v63, %v17329_v17  ;;  %v8959_v47 = vld [vmem:[#allocation4 + $0x31] sm:$0xff]  ;;  %v17352_v17 = vld [vmem:[%s26085_s12 + $0x38] sm:$0xff] }
 0x65c   : > { %22118 = vpow2.f32 %v17286_v7  ;;  %v8226_v60 = vadd.f32 %v8209_v18, %v5455_v30  ;;  %v24409_v63 = vld [vmem:[#allocation4 + $0x8] sm:$0xff] }
 0x65d   : > { %22120 = vrcp.f32 %v8254_v1 }
 0x65e   : > { %v22111_v52 = vpop.eup %22110  ;;  %v17287_v37 = vmul.f32 -1.442695, %v8226_v60 }
 0x65f   : > { %v22113_v53 = vpop.eup %22112  ;;  %v8255_v51 = vadd.f32 1.0, %v22111_v52  ;;  %v8553_v21 = vpop.permute.xlu0 %8552 }
 0x660   : > { %22122 = vpow2.f32 %v17287_v37  ;;  %v8574_v42 = vmul.f32 %v22113_v53, %v8551_v3 }
 0x661   : > { %22124 = vrcp.f32 %v8255_v51 }
 0x662   : > { %v22115_v48 = vpop.eup %22114  ;;  %8590 = vrot.lane.b32.xlu0 %v8574_v42, %s22374_s21 }
 0x663   : > { %v22117_v45 = vpop.eup %22116  ;;  %v8256_v28 = vadd.f32 1.0, %v22115_v48  ;;  %v8557_v13 = vpop.permute.xlu0 %8556 }
 0x664   : > { %v8575_v62 = vmul.f32 %v22117_v45, %v8553_v21  ;;  %v17331_v21 = vld [vmem:[%s26084_s11 + $0x30] sm:$0xff] }
 0x665   : > { %22126 = vrcp.f32 %v8256_v28 }
 0x666   : > { %v22119_v35 = vpop.eup %22118  ;;  %8592 = vrot.lane.b32.xlu1 %v8575_v62, %s22374_s21 }
 0x667   : > { %v22121_v24 = vpop.eup %22120  ;;  %v8257_v5 = vadd.f32 1.0, %v22119_v35  ;;  %v8561_v27 = vpop.permute.xlu0 %8560 }
 0x668   : > { %v8576_v41 = vmul.f32 %v22121_v24, %v8555_v43  ;;  %v8646_v24 = vld [vmem:[%s26084_s11] sm:$0xff]  ;;  %v8647_v43 = vld [vmem:[%s26084_s11 + $0x8] sm:$0xff] }
 0x669   : > { %22128 = vrcp.f32 %v8257_v5 }
 0x66a   : > { %v22123_v19 = vpop.eup %22122  ;;  %8594 = vrot.lane.b32.xlu0 %v8576_v41, %s22374_s21  ;;  %v20751_v41 = vpack.c.bf16 %v8647_v43, %v8646_v24  ;;  %v9230_v24 = vld [vmem:[#allocation6 + $0x31] sm:$0xff]  ;;  %v17369_v43 = vld [vmem:[%s26083_s10 + $0x80] sm:$0xff] }
 0x66b   : > { %v22125_v55 = vpop.eup %22124  ;;  %v8258_v49 = vadd.f32 1.0, %v22123_v19 }
 0x66c   : > { %v8577_v58 = vmul.f32 %v22125_v55, %v8557_v13 }
 0x66d   : > { %22130 = vrcp.f32 %v8258_v49 }
 0x66e   : > { %8596 = vrot.lane.b32.xlu1 %v8577_v58, %s22374_s21  ;;  %22132 = vtanh.f32 %v24220_v31  ;;  %v8630_v31 = vld [vmem:[%s26083_s10] sm:$0xff] }
 0x66f   : > { %v22127_v2 = vpop.eup %22126  ;;  %v20737_v36 = vpack.c.bf16 %v8632_v0, %v8630_v31  ;;  %v17349_v0 = vld [vmem:[%s26085_s12 + $0x20] sm:$0xff] }
 0x670   : > { %v8578_v12 = vmul.f32 %v22127_v2, %v8559_v20 }
 0x672   : > { %8598 = vrot.lane.b32.xlu0 %v8578_v12, %s22374_s21 }
 0x673   : > { %v22129_v38 = vpop.eup %22128 }
 0x674   : > { %v8579_v56 = vmul.f32 %v22129_v38, %v8561_v27 }
 0x676   : > { %8600 = vrot.lane.b32.xlu1 %v8579_v56, %s22374_s21  ;;  %v8953_v56 = vld [vmem:[#allocation4 + $0x1] sm:$0xff] }
 0x677   : > { %v22131_v26 = vpop.eup %22130 }
 0x678   : > { %v8580_v44 = vmul.f32 %v22131_v26, %v8563_v14  ;;  %v22133_v22 = vpop.eup %22132  ;;  %v8648_v14 = vld [vmem:[%s26084_s11 + $0x10] sm:$0xff] }
 0x67a   : > { %5439 = vrot.lane.b32.xlu1 %v23412_v54, %s26103_s25  ;;  %8602 = vrot.lane.b32.xlu0 %v8580_v44, %s22374_s21  ;;  %v8649_v44 = vld [vmem:[%s26084_s11 + $0x18] sm:$0xff] }
 0x67b   : > { %v20755_v31 = vpack.c.bf16 %v8649_v44, %v8648_v14  ;;  %v17375_v14 = vld [vmem:[%s26083_s10 + $0xb0] sm:$0xff]  ;;  %v24479_v44 = vld [vmem:[#allocation6 + $0x8] sm:$0xff] }
 0x67e   : > { %8564 = vrot.lane.b32.xlu1 %v22133_v22, %s22374_s21  ;;  %8210 = vrot.lane.b32.xlu0 %v24229_v4, %s22374_s21  ;;  %v8637_v4 = vld [vmem:[%s26083_s10 + $0x38] sm:$0xff] }
 0x67f   : > { %v20739_v46 = vpack.c.bf16 %v8637_v4, %v8635_v40  ;;  %v8954_v22 = vld [vmem:[#allocation4 + $0x9] sm:$0xff]  ;;  %v8956_v40 = vld [vmem:[#allocation4 + $0x19] sm:$0xff]  ;;  %v8957_v4 = vld [vmem:[#allocation4 + $0x21] sm:$0xff] }
 0x6d4   : > { %v8591_v33 = vpop.permute.xlu0 %8590 }
 0x6d5   : > { %8614 = vst.msk [vmem:[#allocation2 + $0x7] sm:$0xff] %vm1073_vm3, %v8591_v33  ;;  %v8955_v33 = vld [vmem:[#allocation4 + $0x11] sm:$0xff] }
 0x6d8   : > { %v8593_v54 = vpop.permute.xlu1 %8592 }
 0x6d9   : > { %8615 = vst.msk [vmem:[#allocation2 + $0xf] sm:$0xff] %vm1073_vm3, %v8593_v54  ;;  %v17350_v54 = vld [vmem:[%s26085_s12 + $0x28] sm:$0xff] }
 0x6dc   : > { %v8595_v10 = vpop.permute.xlu0 %8594  ;;  %v8662_v57 = vld [vmem:[#allocation2 + $0x1] sm:$0xff] }
 0x6dd   : > { %8616 = vst.msk [vmem:[#allocation2 + $0x17] sm:$0xff] %vm1073_vm3, %v8595_v10  ;;  %17313 = vmatmul.mubr.msk.f32.vlgmr.msra.gmra.mrb[28].mxu1 %vm1073_vm3, %v8662_v57  ;;  %v8622_v35 = vld [vmem:[#allocation2] sm:$0xff]  ;;  %v8638_v10 = vld [vmem:[#allocation4] sm:$0xff] }
 0x6de   : > { %20738 = vmatpush1.bf16.msra.mxu1 %v20737_v36  ;;  %8773 = vmatprep.mubr.f32.mxu1 %v22371_v6  ;;  %v20759_v36 = vpack.c.bf16 %v17350_v54, %v17349_v0  ;;  %v17351_v57 = vld [vmem:[%s26085_s12 + $0x30] sm:$0xff] }
 0x6df   : > { %20740 = vmatprep.subr.bf16.mxu1 %v20739_v46  ;;  %v8958_v46 = vld [vmem:[#allocation4 + $0x29] sm:$0xff] }
 0x6e0   : > { %v8597_v9 = vpop.permute.xlu1 %8596  ;;  %v8663_v30 = vld [vmem:[#allocation2 + $0x9] sm:$0xff] }
 0x6e1   : > { %8617 = vst.msk [vmem:[#allocation2 + $0x1f] sm:$0xff] %vm1073_vm3, %v8597_v9  ;;  %17314 = vmatmul.mubr.msk.f32.gmra.mrb[30].mxu1 %vm1073_vm3, %v8663_v30  ;;  %v24350_v55 = vld [vmem:[#allocation2 + $0x8] sm:$0xff]  ;;  %v8658_v9 = vld [vmem:[%s26085_s12] sm:$0xff] }
 0x6e2   : > { %8779 = vmatprep.mubr.f32.mxu1 %v22371_v6  ;;  %20742 = vmatpush1.bf16.msra.mxu1 %v20741_v8  ;;  %v24411_v8 = vld [vmem:[#allocation4 + $0x10] sm:$0xff]  ;;  %v8659_v30 = vld [vmem:[%s26085_s12 + $0x8] sm:$0xff] }
 0x6e3   : > { %20744 = vmatprep.subr.bf16.mxu1 %v20743_v34 }
 0x6e4   : > { %v8599_v7 = vpop.permute.xlu0 %8598  ;;  %v8664_v25 = vld [vmem:[#allocation2 + $0x11] sm:$0xff] }
 0x6e5   : > { %8618 = vst.msk [vmem:[#allocation2 + $0x27] sm:$0xff] %vm1073_vm3, %v8599_v7  ;;  %17315 = vmatmul.mubr.msk.f32.gmra.mrb[32].mxu1 %vm1073_vm3, %v8664_v25  ;;  %v24355_v49 = vld [vmem:[#allocation2 + $0x10] sm:$0xff]  ;;  %v24423_v7 = vld [vmem:[#allocation4 + $0x18] sm:$0xff] }
 0x6e6   : > { %8785 = vmatprep.mubr.f32.mxu1 %v22371_v6  ;;  %v24425_v25 = vld [vmem:[#allocation4 + $0x20] sm:$0xff] }
 0x6e8   : > { %v8601_v1 = vpop.permute.xlu1 %8600  ;;  %v8665_v18 = vld [vmem:[#allocation2 + $0x19] sm:$0xff] }
 0x6e9   : > { %8619 = vst.msk [vmem:[#allocation2 + $0x2f] sm:$0xff] %vm1073_vm3, %v8601_v1  ;;  %17316 = vmatmul.mubr.msk.f32.gmra.mrb[34].mxu1 %vm1073_vm3, %v8665_v18  ;;  %v24360_v13 = vld [vmem:[#allocation2 + $0x18] sm:$0xff]  ;;  %v20767_v1 = vpack.c.bf16 %v8659_v30, %v8658_v9  ;;  %v17398_v9 = vld [vmem:[%s26085_s12 + $0x48] sm:$0xff] }
 0x6ea   : > { %8791 = vmatprep.mubr.f32.mxu1 %v22371_v6  ;;  %v24431_v18 = vld [vmem:[#allocation4 + $0x28] sm:$0xff] }
 0x6ec   : > { %v8603_v60 = vpop.permute.xlu0 %8602  ;;  %v5440_v52 = vpop.permute.xlu1 %5439  ;;  %v8666_v37 = vld [vmem:[#allocation2 + $0x21] sm:$0xff] }
 0x6ed   : > { %8620 = vst.msk [vmem:[#allocation2 + $0x37] sm:$0xff] %vm1073_vm3, %v8603_v60  ;;  %17317 = vmatmul.mubr.msk.f32.gmra.mrb[36].mxu1 %vm1073_vm3, %v8666_v37  ;;  %v5456_v53 = vadd.f32 %v23415_v16, %v5440_v52  ;;  %v17332_v16 = vld [vmem:[%s26084_s11 + $0x38] sm:$0xff]  ;;  %v24365_v20 = vld [vmem:[#allocation2 + $0x20] sm:$0xff]  ;;  %v8645_v52 = vld [vmem:[#allocation4 + $0x38] sm:$0x3] }
 0x6ee   : > { %8797 = vmatprep.mubr.f32.mxu1 %v22371_v6  ;;  %v20747_v62 = vpack.c.bf16 %v17332_v16, %v17331_v21  ;;  %v24433_v60 = vld [vmem:[#allocation4 + $0x30] sm:$0xff]  ;;  %v8660_v37 = vld [vmem:[%s26085_s12 + $0x10] sm:$0xff] }
 0x6ef   : > { %v9227_v16 = vld [vmem:[#allocation6 + $0x19] sm:$0xff] }
 0x6f0   : > { %v8211_v3 = vpop.permute.xlu0 %8210  ;;  %v8667_v51 = vld [vmem:[#allocation2 + $0x29] sm:$0xff]  ;;  %v8565_v2 = vpop.permute.xlu1 %8564 }
 0x6f1   : > { %v8227_v42 = vadd.f32 %v8211_v3, %v5456_v53  ;;  %17318 = vmatmul.mubr.msk.f32.gmra.mrb[38].mxu1 %vm1073_vm3, %v8667_v51  ;;  %v24371_v38 = vld [vmem:[#allocation2 + $0x28] sm:$0xff]  ;;  %v8661_v53 = vld [vmem:[%s26085_s12 + $0x18] sm:$0xff] }
 0x6f2   : > { %8803 = vmatprep.mubr.f32.mxu1 %v22371_v6  ;;  %v9224_v3 = vld [vmem:[#allocation6 + $0x1] sm:$0xff]  ;;  %v20771_v51 = vpack.c.bf16 %v8661_v53, %v8660_v37 }
 0x6f3   : > { %v17288_v48 = vmul.f32 -1.442695, %v8227_v42  ;;  %v9225_v42 = vld [vmem:[#allocation6 + $0x9] sm:$0xff]  ;;  %v9498_v37 = vld [vmem:[#allocation2 + $0x1a] sm:$0xff] }
 0x6f4   : > { %v8668_v45 = vld [vmem:[#allocation2 + $0x31] sm:$0xff]  ;;  %v8669_v28 = vld [vmem:[#allocation2 + $0x39] sm:$0x3]  ;;  %v9499_v53 = vld [vmem:[#allocation2 + $0x22] sm:$0xff] }
 0x6f5   : > { %22134 = vpow2.f32 %v17288_v48  ;;  %17319 = vmatmul.mubr.msk.f32.gmra.mrb[40].mxu1 %vm1073_vm3, %v8668_v45  ;;  %v24376_v27 = vld [vmem:[#allocation2 + $0x30] sm:$0xff]  ;;  %v8629_v26 = vld [vmem:[#allocation2 + $0x38] sm:$0x3]  ;;  %v17370_v48 = vld [vmem:[%s26083_s10 + $0x88] sm:$0xff] }
 0x6f6   : > { %8809 = vmatprep.mubr.f32.mxu1 %v22371_v6  ;;  %v17372_v45 = vld [vmem:[%s26083_s10 + $0x98] sm:$0xff] }
 0x6f7   : > { %v20775_v21 = vpack.c.bf16 %v17372_v45, %v17370_v48  ;;  %v9502_v48 = vld [vmem:[#allocation2 + $0x3a] sm:$0x3]  ;;  %v17399_v45 = vld [vmem:[%s26085_s12 + $0x50] sm:$0xff] }
 0x6f9   : > { %17320 = vmatmul.mubr.msk.f32.gmra.mrb[42].mxu1 %vm1073_vm3, %v8669_v28  ;;  %v9226_v28 = vld [vmem:[#allocation6 + $0x11] sm:$0xff] }
 0x6fa   : > { %8904 = vmatprep.mubr.f32.mxu1 %v22371_v6 }
 0x6fd   : > { %17321 = vmatmul.mubr.msk.f32.vlgmr.msra.gmra.mrb[28].mxu1 %vm1073_vm3, %v8622_v35  ;;  %v9229_v35 = vld [vmem:[#allocation6 + $0x29] sm:$0xff] }
 0x6fe   : > { %20746 = vmatpush3.bf16.msra.mxu1 %v20743_v34  ;;  %8910 = vmatprep.mubr.f32.mxu1 %v22371_v6  ;;  %v20763_v34 = vpack.c.bf16 %v17352_v17, %v17351_v57  ;;  %v9495_v17 = vld [vmem:[#allocation2 + $0x2] sm:$0xff] }
 0x6ff   : > { %v22135_v5 = vpop.eup %22134  ;;  %20748 = vmatprep.subr.bf16.mxu1 %v20747_v62 }
 0x700   : > { %v8259_v19 = vadd.f32 1.0, %v22135_v5  ;;  %v17371_v5 = vld [vmem:[%s26083_s10 + $0x90] sm:$0xff] }
 0x701   : > { %17322 = vmatmul.mubr.msk.f32.gmra.mrb[30].mxu1 %vm1073_vm3, %v24350_v55 }
 0x702   : > { %22136 = vrcp.f32 %v8259_v19  ;;  %8916 = vmatprep.mubr.f32.mxu1 %v22371_v6  ;;  %20750 = vmatpush3.bf16.msra.mxu1 %v20747_v62  ;;  %v9228_v62 = vld [vmem:[#allocation6 + $0x21] sm:$0xff] }
 0x703   : > { %20752 = vmatprep.subr.bf16.mxu1 %v20751_v41  ;;  %v17374_v19 = vld [vmem:[%s26083_s10 + $0xa8] sm:$0xff] }
 0x705   : > { %17323 = vmatmul.mubr.msk.f32.gmra.mrb[32].mxu1 %vm1073_vm3, %v24355_v49 }
 0x706   : > { %8922 = vmatprep.mubr.f32.mxu1 %v22371_v6 }
 0x709   : > { %17324 = vmatmul.mubr.msk.f32.gmra.mrb[34].mxu1 %vm1073_vm3, %v24360_v13 }
 0x70a   : > { %8928 = vmatprep.mubr.f32.mxu1 %v22371_v6 }
 0x70c   : > { %v22137_v58 = vpop.eup %22136 }
 0x70d   : > { %v8581_v12 = vmul.f32 %v22137_v58, %v8565_v2  ;;  %17325 = vmatmul.mubr.msk.f32.gmra.mrb[36].mxu1 %vm1073_vm3, %v24365_v20  ;;  %v17376_v58 = vld [vmem:[%s26083_s10 + $0xb8] sm:$0xff]  ;;  %v8650_v2 = vld [vmem:[#allocation6] sm:$0xff] }
 0x70e   : > { %8934 = vmatprep.mubr.f32.mxu1 %v22371_v6 }
 0x70f   : > { %8604 = vrot.lane.b32.xlu0 %v8581_v12, %s22374_s21  ;;  %v20777_v12 = vpack.c.bf16 %v17371_v5, %v17369_v43  ;;  %v9668_v43 = vld [vmem:[#allocation4 + $0x1a] sm:$0xff]  ;;  %v9669_v5 = vld [vmem:[#allocation4 + $0x22] sm:$0xff] }
 0x711   : > { %17326 = vmatmul.mubr.msk.f32.gmra.mrb[38].mxu1 %vm1073_vm3, %v24371_v38 }
 0x712   : > { %8940 = vmatprep.mubr.f32.mxu1 %v22371_v6 }
 0x715   : > { %17327 = vmatmul.mubr.msk.f32.gmra.mrb[40].mxu1 %vm1073_vm3, %v24376_v27 }
 0x716   : > { %8946 = vmatprep.mubr.f32.mxu1 %v22371_v6 }
 0x719   : > { %17328 = vmatmul.mubr.msk.f32.gmra.mrb[42].mxu1 %vm1073_vm3, %v8629_v26  ;;  %v17373_v26 = vld [vmem:[%s26083_s10 + $0xa0] sm:$0xff] }
 0x71a   : > { %19615 = vmatprep.mubr.msk.f32.mxu1 %vm1073_vm3, %v8953_v56  ;;  %v20779_v56 = vpack.c.bf16 %v17376_v58, %v17374_v19  ;;  %v20781_v0 = vpack.c.bf16 %v17375_v14, %v17373_v26  ;;  %v9670_v58 = vld [vmem:[#allocation4 + $0x2a] sm:$0xff]  ;;  %v17411_v26 = vld [vmem:[%s26083_s10 + $0xd0] sm:$0xff]  ;;  %v17414_v14 = vld [vmem:[%s26083_s10 + $0xe8] sm:$0xff] }
 0x71d   : > { %19616 = vmatmul.mubr.msk.f32.vlgmr.msra.gmra.mrb[44].mxu1 %vm1073_vm3, %v8954_v22  ;;  %v17385_v22 = vld [vmem:[%s26084_s11 + $0x40] sm:$0xff] }
 0x71e   : > { %20754 = vmatpush3.bf16.msra.mxu1 %v20751_v41  ;;  %19618 = vmatprep.mubr.msk.f32.mxu1 %vm1073_vm3, %v8955_v33  ;;  %v9231_v41 = vld [vmem:[#allocation6 + $0x39] sm:$0x3]  ;;  %v17386_v33 = vld [vmem:[%s26084_s11 + $0x48] sm:$0xff] }
 0x71f   : > { %20756 = vmatprep.subr.bf16.mxu1 %v20755_v31  ;;  %v20783_v54 = vpack.c.bf16 %v17386_v33, %v17385_v22  ;;  %v17416_v22 = vld [vmem:[%s26083_s10 + $0xf8] sm:$0xff]  ;;  %v9815_v33 = vld [vmem:[#allocation6 + $0x2] sm:$0xff] }
 0x721   : > { %19619 = vmatmul.mubr.msk.f32.gmra.mrb[46].mxu1 %vm1073_vm3, %v8956_v40  ;;  %v24493_v40 = vld [vmem:[#allocation6 + $0x18] sm:$0xff] }
 0x722   : > { %19621 = vmatprep.mubr.msk.f32.mxu1 %vm1073_vm3, %v8957_v4  ;;  %20758 = vmatpush3.bf16.msra.mxu1 %v20755_v31  ;;  %v24489_v31 = vld [vmem:[#allocation6 + $0x10] sm:$0xff]  ;;  %v24497_v4 = vld [vmem:[#allocation6 + $0x20] sm:$0xff] }
 0x723   : > { %20760 = vmatprep.subr.bf16.mxu1 %v20759_v36 }
 0x725   : > { %19622 = vmatmul.mubr.msk.f32.gmra.mrb[48].mxu1 %vm1073_vm3, %v8958_v46  ;;  %v24505_v46 = vld [vmem:[#allocation6 + $0x30] sm:$0xff] }
 0x726   : > { %19624 = vmatprep.mubr.msk.f32.mxu1 %vm1073_vm3, %v8959_v47  ;;  %v8657_v47 = vld [vmem:[#allocation6 + $0x38] sm:$0x3] }
 0x729   : > { %19625 = vmatmul.mubr.msk.f32.gmra.mrb[50].mxu1 %vm1073_vm3, %v8960_v29  ;;  %v17387_v29 = vld [vmem:[%s26084_s11 + $0x50] sm:$0xff] }
 0x72a   : > { %19635 = vmatprep.mubr.msk.f32.mxu1 %vm1073_vm3, %v8638_v10  ;;  %v17388_v10 = vld [vmem:[%s26084_s11 + $0x58] sm:$0xff] }
 0x72b   : > { %v20787_v57 = vpack.c.bf16 %v17388_v10, %v17387_v29  ;;  %v17415_v29 = vld [vmem:[%s26083_s10 + $0xf0] sm:$0xff] }
 0x72c   : > { %v9816_v10 = vld [vmem:[#allocation6 + $0xa] sm:$0xff] }
 0x72d   : > { %19636 = vmatmul.mubr.msk.f32.vlgmr.msra.gmra.mrb[44].mxu1 %vm1073_vm3, %v24409_v63 }
 0x72e   : > { %20762 = vmatpush3.bf16.msra.mxu1 %v20759_v36  ;;  %19638 = vmatprep.mubr.msk.f32.mxu1 %vm1073_vm3, %v24411_v8  ;;  %v24501_v36 = vld [vmem:[#allocation6 + $0x28] sm:$0xff] }
 0x72f   : > { %20764 = vmatprep.subr.bf16.mxu1 %v20763_v34 }
 0x731   : > { %19639 = vmatmul.mubr.msk.f32.gmra.mrb[46].mxu1 %vm1073_vm3, %v24423_v7 }
 0x732   : > { %19641 = vmatprep.mubr.msk.f32.mxu1 %vm1073_vm3, %v24425_v25  ;;  %20766 = vmatpush3.bf16.msra.mxu1 %v20763_v34  ;;  %v17397_v34 = vld [vmem:[%s26085_s12 + $0x40] sm:$0xff] }
 0x733   : > { %20768 = vmatprep.subr.bf16.mxu1 %v20767_v1  ;;  %v20791_v30 = vpack.c.bf16 %v17398_v9, %v17397_v34  ;;  %v9817_v34 = vld [vmem:[#allocation6 + $0x12] sm:$0xff] }
 0x735   : > { %19642 = vmatmul.mubr.msk.f32.gmra.mrb[48].mxu1 %vm1073_vm3, %v24431_v18 }
 0x736   : > { %19644 = vmatprep.mubr.msk.f32.mxu1 %vm1073_vm3, %v24433_v60 }
 0x739   : > { %19645 = vmatmul.mubr.msk.f32.gmra.mrb[50].mxu1 %vm1073_vm3, %v8645_v52  ;;  %v9497_v52 = vld [vmem:[#allocation2 + $0x12] sm:$0xff] }
 0x73a   : > { %19655 = vmatprep.mubr.msk.f32.mxu1 %vm1073_vm3, %v9224_v3  ;;  %v9500_v3 = vld [vmem:[#allocation2 + $0x2a] sm:$0xff] }
 0x73d   : > { %19656 = vmatmul.mubr.msk.f32.vlgmr.msra.gmra.mrb[52].mxu1 %vm1073_vm3, %v9225_v42  ;;  %v9665_v42 = vld [vmem:[#allocation4 + $0x2] sm:$0xff] }
 0x73e   : > { %20770 = vmatpush3.bf16.msra.mxu1 %v20767_v1  ;;  %19658 = vmatprep.mubr.msk.f32.mxu1 %vm1073_vm3, %v9226_v28  ;;  %v9496_v1 = vld [vmem:[#allocation2 + $0xa] sm:$0xff]  ;;  %v17400_v28 = vld [vmem:[%s26085_s12 + $0x58] sm:$0xff] }
 0x73f   : > { %20772 = vmatprep.subr.bf16.mxu1 %v20771_v51 }
 0x741   : > { %19659 = vmatmul.mubr.msk.f32.gmra.mrb[54].mxu1 %vm1073_vm3, %v9227_v16  ;;  %v9667_v16 = vld [vmem:[#allocation4 + $0x12] sm:$0xff] }
 0x742   : > { %19661 = vmatprep.mubr.msk.f32.mxu1 %vm1073_vm3, %v9228_v62  ;;  %20774 = vmatpush3.bf16.msra.mxu1 %v20771_v51  ;;  %v9501_v51 = vld [vmem:[#allocation2 + $0x32] sm:$0xff]  ;;  %v20795_v62 = vpack.c.bf16 %v17400_v28, %v17399_v45  ;;  %v9965_v45 = vld [vmem:[#allocation2 + $0x6] sm:$0xff] }
 0x743   : > { %20776 = vmatprep.subr.bf16.mxu1 %v20775_v21  ;;  %v9666_v21 = vld [vmem:[#allocation4 + $0xa] sm:$0xff] }
 0x744   : > { %v17437_v28 = vld [vmem:[%s26085_s12 + $0x60] sm:$0xff] }
 0x745   : > { %19662 = vmatmul.mubr.msk.f32.gmra.mrb[56].mxu1 %vm1073_vm3, %v9229_v35  ;;  %v17410_v35 = vld [vmem:[%s26083_s10 + $0xc8] sm:$0xff] }
 0x746   : > { %19664 = vmatprep.mubr.msk.f32.mxu1 %vm1073_vm3, %v9230_v24  ;;  %v17412_v24 = vld [vmem:[%s26083_s10 + $0xd8] sm:$0xff] }
 0x749   : > { %19665 = vmatmul.mubr.msk.f32.gmra.mrb[58].mxu1 %vm1073_vm3, %v9231_v41  ;;  %v20799_v41 = vpack.c.bf16 %v17412_v24, %v17410_v35  ;;  %v24611_v35 = vld [vmem:[#allocation2 + $0x16] sm:$0xff]  ;;  %v24616_v24 = vld [vmem:[#allocation2 + $0x1e] sm:$0xff] }
 0x74a   : > { %19675 = vmatprep.mubr.msk.f32.mxu1 %vm1073_vm3, %v8650_v2  ;;  %v9671_v2 = vld [vmem:[#allocation4 + $0x32] sm:$0xff] }
 0x74d   : > { %19676 = vmatmul.mubr.msk.f32.vlgmr.msra.gmra.mrb[52].mxu1 %vm1073_vm3, %v24479_v44 }
 0x74e   : > { %20778 = vmatpush1.bf16.msra.mxu1 %v20777_v12  ;;  %19678 = vmatprep.mubr.msk.f32.mxu1 %vm1073_vm3, %v24489_v31  ;;  %v9672_v12 = vld [vmem:[#allocation4 + $0x3a] sm:$0x3] }
 0x74f   : > { %20780 = vmatprep.subr.bf16.mxu1 %v20779_v56  ;;  %v17409_v56 = vld [vmem:[%s26083_s10 + $0xc0] sm:$0xff] }
 0x751   : > { %19679 = vmatmul.mubr.msk.f32.gmra.mrb[54].mxu1 %vm1073_vm3, %v24493_v40 }
 0x752   : > { %19681 = vmatprep.mubr.msk.f32.mxu1 %vm1073_vm3, %v24497_v4  ;;  %20782 = vmatpush1.bf16.msra.mxu1 %v20781_v0  ;;  %v20801_v0 = vpack.c.bf16 %v17411_v26, %v17409_v56  ;;  %v24644_v56 = vld [vmem:[#allocation4 + $0xe] sm:$0xff]  ;;  %v24646_v26 = vld [vmem:[#allocation4 + $0x16] sm:$0xff] }
 0x753   : > { %20784 = vmatprep.subr.bf16.mxu1 %v20783_v54 }
 0x755   : > { %19682 = vmatmul.mubr.msk.f32.gmra.mrb[56].mxu1 %vm1073_vm3, %v24501_v36 }
 0x756   : > { %19684 = vmatprep.mubr.msk.f32.mxu1 %vm1073_vm3, %v24505_v46 }
 0x759   : > { %19685 = vmatmul.mubr.msk.f32.gmra.mrb[58].mxu1 %vm1073_vm3, %v8657_v47  ;;  %v17413_v47 = vld [vmem:[%s26083_s10 + $0xe0] sm:$0xff] }
 0x75a   : > { %9600 = vmatprep.mubr.f32.mxu1 %v22371_v6  ;;  %v20805_v9 = vpack.c.bf16 %v17415_v29, %v17413_v47  ;;  %v24666_v29 = vld [vmem:[#allocation4 + $0x2e] sm:$0xff] }
 0x75d   : > { %17377 = vmatmul.mubr.msk.f32.vlgmr.msra.gmra.mrb[28].mxu1 %vm1073_vm3, %v9495_v17  ;;  %v17426_v17 = vld [vmem:[%s26084_s11 + $0x68] sm:$0xff] }
 0x75e   : > { %20786 = vmatpush3.bf16.msra.mxu1 %v20783_v54  ;;  %9606 = vmatprep.mubr.f32.mxu1 %v22371_v6  ;;  %v20803_v54 = vpack.c.bf16 %v17416_v22, %v17414_v14  ;;  %v17450_v22 = vld [vmem:[%s26083_s10 + $0x108] sm:$0xff] }
 0x75f   : > { %20788 = vmatprep.subr.bf16.mxu1 %v20787_v57 }
 0x761   : > { %17378 = vmatmul.mubr.msk.f32.gmra.mrb[30].mxu1 %vm1073_vm3, %v9496_v1  ;;  %v9818_v1 = vld [vmem:[#allocation6 + $0x1a] sm:$0xff] }
 0x762   : > { %9612 = vmatprep.mubr.f32.mxu1 %v22371_v6  ;;  %20790 = vmatpush3.bf16.msra.mxu1 %v20787_v57  ;;  %v17425_v57 = vld [vmem:[%s26084_s11 + $0x60] sm:$0xff] }
 0x763   : > { %20792 = vmatprep.subr.bf16.mxu1 %v20791_v30 }
 0x765   : > { %17379 = vmatmul.mubr.msk.f32.gmra.mrb[32].mxu1 %vm1073_vm3, %v9497_v52  ;;  %v9819_v52 = vld [vmem:[#allocation6 + $0x22] sm:$0xff] }
 0x766   : > { %9618 = vmatprep.mubr.f32.mxu1 %v22371_v6 }
 0x769   : > { %17380 = vmatmul.mubr.msk.f32.gmra.mrb[34].mxu1 %vm1073_vm3, %v9498_v37  ;;  %v9820_v37 = vld [vmem:[#allocation6 + $0x2a] sm:$0xff] }
 0x76a   : > { %9624 = vmatprep.mubr.f32.mxu1 %v22371_v6 }
 0x76d   : > { %17381 = vmatmul.mubr.msk.f32.gmra.mrb[36].mxu1 %vm1073_vm3, %v9499_v53  ;;  %v9821_v53 = vld [vmem:[#allocation6 + $0x32] sm:$0xff] }
 0x76e   : > { %9630 = vmatprep.mubr.f32.mxu1 %v22371_v6 }
 0x771   : > { %17382 = vmatmul.mubr.msk.f32.gmra.mrb[38].mxu1 %vm1073_vm3, %v9500_v3  ;;  %v9822_v3 = vld [vmem:[#allocation6 + $0x3a] sm:$0x3] }
 0x772   : > { %9636 = vmatprep.mubr.f32.mxu1 %v22371_v6 }
 0x775   : > { %17383 = vmatmul.mubr.msk.f32.gmra.mrb[40].mxu1 %vm1073_vm3, %v9501_v51  ;;  %v17427_v51 = vld [vmem:[%s26084_s11 + $0x70] sm:$0xff] }
 0x776   : > { %9642 = vmatprep.mubr.f32.mxu1 %v22371_v6 }
 0x779   : > { %17384 = vmatmul.mubr.msk.f32.gmra.mrb[42].mxu1 %vm1073_vm3, %v9502_v48 }
 0x77a   : > { %19695 = vmatprep.mubr.msk.f32.mxu1 %vm1073_vm3, %v9665_v42  ;;  %v17428_v42 = vld [vmem:[%s26084_s11 + $0x78] sm:$0xff] }
 0x77b   : > { %v20811_v48 = vpack.c.bf16 %v17428_v42, %v17427_v51  ;;  %v24694_v51 = vld [vmem:[#allocation6 + $0xe] sm:$0xff]  ;;  %v17465_v42 = vld [vmem:[%s26084_s11 + $0x80] sm:$0xff] }
 0x77d   : > { %19696 = vmatmul.mubr.msk.f32.vlgmr.msra.gmra.mrb[44].mxu1 %vm1073_vm3, %v9666_v21  ;;  %v17438_v21 = vld [vmem:[%s26085_s12 + $0x68] sm:$0xff] }
 0x77e   : > { %20794 = vmatpush3.bf16.msra.mxu1 %v20791_v30  ;;  %19698 = vmatprep.mubr.msk.f32.mxu1 %vm1073_vm3, %v9667_v16  ;;  %v20807_v30 = vpack.c.bf16 %v17426_v17, %v17425_v57  ;;  %v20815_v16 = vpack.c.bf16 %v17438_v21, %v17437_v28  ;;  %v10142_v57 = vld [vmem:[#allocation4 + $0x3e] sm:$0x3]  ;;  %v17449_v17 = vld [vmem:[%s26083_s10 + $0x100] sm:$0xff] }
 0x77f   : > { %20796 = vmatprep.subr.bf16.mxu1 %v20795_v62 }
 0x781   : > { %19699 = vmatmul.mubr.msk.f32.gmra.mrb[46].mxu1 %vm1073_vm3, %v9668_v43  ;;  %v8605_v19 = vpop.permute.xlu0 %8604  ;;  %v24621_v43 = vld [vmem:[#allocation2 + $0x26] sm:$0xff] }
 0x782   : > { %8621 = vst.msk [vmem:[#allocation2 + $0x3f] sm:$0x3] %vm5496_vm4, %v8605_v19  ;;  %19701 = vmatprep.mubr.msk.f32.mxu1 %vm1073_vm3, %v9669_v5  ;;  %20798 = vmatpush3.bf16.msra.mxu1 %v20795_v62  ;;  %v24606_v62 = vld [vmem:[#allocation2 + $0xe] sm:$0xff]  ;;  %v10135_v19 = vld [vmem:[#allocation4 + $0x6] sm:$0xff] }
 0x783   : > { %20800 = vmatprep.subr.bf16.mxu1 %v20799_v41  ;;  %v24626_v5 = vld [vmem:[#allocation2 + $0x2e] sm:$0xff]  ;;  %v24631_v41 = vld [vmem:[#allocation2 + $0x36] sm:$0xff] }
 0x785   : > { %19702 = vmatmul.mubr.msk.f32.gmra.mrb[48].mxu1 %vm1073_vm3, %v9670_v58 }
 0x786   : > { %19704 = vmatprep.mubr.msk.f32.mxu1 %vm1073_vm3, %v9671_v2  ;;  %v17439_v2 = vld [vmem:[%s26085_s12 + $0x70] sm:$0xff] }
 0x789   : > { %19705 = vmatmul.mubr.msk.f32.gmra.mrb[50].mxu1 %vm1073_vm3, %v9672_v12  ;;  %v9972_v58 = vld [vmem:[#allocation2 + $0x3e] sm:$0x3] }
 0x78a   : > { %19715 = vmatprep.mubr.msk.f32.mxu1 %vm1073_vm3, %v9815_v33  ;;  %v17440_v12 = vld [vmem:[%s26085_s12 + $0x78] sm:$0xff] }
 0x78b   : > { %v20819_v14 = vpack.c.bf16 %v17440_v12, %v17439_v2  ;;  %v17452_v33 = vld [vmem:[%s26083_s10 + $0x118] sm:$0xff] }
 0x78c   : > { %v20823_v47 = vpack.c.bf16 %v17452_v33, %v17450_v22  ;;  %v24720_v2 = vld [vmem:[#allocation6 + $0x36] sm:$0xff]  ;;  %v10292_v12 = vld [vmem:[#allocation6 + $0x3e] sm:$0x3] }
 0x78d   : > { %19716 = vmatmul.mubr.msk.f32.vlgmr.msra.gmra.mrb[52].mxu1 %vm1073_vm3, %v9816_v10  ;;  %v24668_v10 = vld [vmem:[#allocation4 + $0x36] sm:$0xff]  ;;  %v17468_v22 = vld [vmem:[%s26084_s11 + $0x98] sm:$0xff] }
 0x78e   : > { %20802 = vmatpush1.bf16.msra.mxu1 %v20801_v0  ;;  %19718 = vmatprep.mubr.msk.f32.mxu1 %vm1073_vm3, %v9817_v34  ;;  %v24658_v0 = vld [vmem:[#allocation4 + $0x1e] sm:$0xff] }
 0x78f   : > { %20804 = vmatprep.subr.bf16.mxu1 %v20803_v54  ;;  %v24660_v54 = vld [vmem:[#allocation4 + $0x26] sm:$0xff] }
 0x790   : > { %v17451_v34 = vld [vmem:[%s26083_s10 + $0x110] sm:$0xff] }
 0x791   : > { %19719 = vmatmul.mubr.msk.f32.gmra.mrb[54].mxu1 %vm1073_vm3, %v9818_v1  ;;  %v10285_v1 = vld [vmem:[#allocation6 + $0x6] sm:$0xff] }
 0x792   : > { %19721 = vmatprep.mubr.msk.f32.mxu1 %vm1073_vm3, %v9819_v52  ;;  %20806 = vmatpush1.bf16.msra.mxu1 %v20805_v9  ;;  %v17454_v9 = vld [vmem:[%s26083_s10 + $0x128] sm:$0xff]  ;;  %v20825_v52 = vpack.c.bf16 %v17451_v34, %v17449_v17 }
 0x793   : > { %20808 = vmatprep.subr.bf16.mxu1 %v20807_v30  ;;  %v17478_v17 = vld [vmem:[%s26085_s12 + $0x88] sm:$0xff] }
 0x795   : > { %19722 = vmatmul.mubr.msk.f32.gmra.mrb[56].mxu1 %vm1073_vm3, %v9820_v37 }
 0x796   : > { %19724 = vmatprep.mubr.msk.f32.mxu1 %vm1073_vm3, %v9821_v53  ;;  %v17453_v53 = vld [vmem:[%s26083_s10 + $0x120] sm:$0xff] }
 0x799   : > { %19725 = vmatmul.mubr.msk.f32.gmra.mrb[58].mxu1 %vm1073_vm3, %v9822_v3  ;;  %v17455_v3 = vld [vmem:[%s26083_s10 + $0x130] sm:$0xff] }
 0x79a   : > { %10070 = vmatprep.mubr.f32.mxu1 %v22371_v6  ;;  %v20829_v28 = vpack.c.bf16 %v17455_v3, %v17453_v53  ;;  %v10441_v53 = vld [vmem:[#allocation2 + $0x37] sm:$0xff] }
 0x79b   : > { %v10605_v3 = vld [vmem:[#allocation4 + $0x7] sm:$0xff] }
 0x79d   : > { %17417 = vmatmul.mubr.msk.f32.vlgmr.msra.gmra.mrb[28].mxu1 %vm1073_vm3, %v9965_v45  ;;  %v24704_v45 = vld [vmem:[#allocation6 + $0x16] sm:$0xff] }
 0x79e   : > { %20810 = vmatpush3.bf16.msra.mxu1 %v20807_v30  ;;  %10076 = vmatprep.mubr.f32.mxu1 %v22371_v6  ;;  %v17456_v30 = vld [vmem:[%s26083_s10 + $0x138] sm:$0xff] }
 0x79f   : > { %20812 = vmatprep.subr.bf16.mxu1 %v20811_v48  ;;  %v20827_v37 = vpack.c.bf16 %v17456_v30, %v17454_v9  ;;  %v10436_v9 = vld [vmem:[#allocation2 + $0xf] sm:$0xff]  ;;  %v10437_v30 = vld [vmem:[#allocation2 + $0x17] sm:$0xff] }
 0x7a1   : > { %17418 = vmatmul.mubr.msk.f32.gmra.mrb[30].mxu1 %vm1073_vm3, %v24606_v62 }
 0x7a2   : > { %10082 = vmatprep.mubr.f32.mxu1 %v22371_v6  ;;  %20814 = vmatpush3.bf16.msra.mxu1 %v20811_v48  ;;  %v17466_v48 = vld [vmem:[%s26084_s11 + $0x88] sm:$0xff] }
 0x7a3   : > { %20816 = vmatprep.subr.bf16.mxu1 %v20815_v16  ;;  %v20831_v21 = vpack.c.bf16 %v17466_v48, %v17465_v42  ;;  %v10442_v42 = vld [vmem:[#allocation2 + $0x3f] sm:$0x3]  ;;  %v17479_v48 = vld [vmem:[%s26085_s12 + $0x90] sm:$0xff] }
 0x7a5   : > { %17419 = vmatmul.mubr.msk.f32.gmra.mrb[32].mxu1 %vm1073_vm3, %v24611_v35 }
 0x7a6   : > { %10088 = vmatprep.mubr.f32.mxu1 %v22371_v6 }
 0x7a9   : > { %17420 = vmatmul.mubr.msk.f32.gmra.mrb[34].mxu1 %vm1073_vm3, %v24616_v24 }
 0x7aa   : > { %10094 = vmatprep.mubr.f32.mxu1 %v22371_v6 }
 0x7ad   : > { %17421 = vmatmul.mubr.msk.f32.gmra.mrb[36].mxu1 %vm1073_vm3, %v24621_v43 }
 0x7ae   : > { %10100 = vmatprep.mubr.f32.mxu1 %v22371_v6 }
 0x7b1   : > { %17422 = vmatmul.mubr.msk.f32.gmra.mrb[38].mxu1 %vm1073_vm3, %v24626_v5 }
 0x7b2   : > { %10106 = vmatprep.mubr.f32.mxu1 %v22371_v6 }
 0x7b5   : > { %17423 = vmatmul.mubr.msk.f32.gmra.mrb[40].mxu1 %vm1073_vm3, %v24631_v41 }
 0x7b6   : > { %10112 = vmatprep.mubr.f32.mxu1 %v22371_v6 }
 0x7b9   : > { %17424 = vmatmul.mubr.msk.f32.gmra.mrb[42].mxu1 %vm1073_vm3, %v9972_v58  ;;  %v24716_v58 = vld [vmem:[#allocation6 + $0x2e] sm:$0xff] }
 0x7ba   : > { %19735 = vmatprep.mubr.msk.f32.mxu1 %vm1073_vm3, %v10135_v19  ;;  %v24712_v19 = vld [vmem:[#allocation6 + $0x26] sm:$0xff] }
 0x7bd   : > { %19736 = vmatmul.mubr.msk.f32.vlgmr.msra.gmra.mrb[44].mxu1 %vm1073_vm3, %v24644_v56 }
 0x7be   : > { %20818 = vmatpush3.bf16.msra.mxu1 %v20815_v16  ;;  %19738 = vmatprep.mubr.msk.f32.mxu1 %vm1073_vm3, %v24646_v26  ;;  %v24708_v16 = vld [vmem:[#allocation6 + $0x1e] sm:$0xff] }
 0x7bf   : > { %20820 = vmatprep.subr.bf16.mxu1 %v20819_v14 }
 0x7c1   : > { %19739 = vmatmul.mubr.msk.f32.gmra.mrb[46].mxu1 %vm1073_vm3, %v24658_v0 }
 0x7c2   : > { %19741 = vmatprep.mubr.msk.f32.mxu1 %vm1073_vm3, %v24660_v54  ;;  %20822 = vmatpush3.bf16.msra.mxu1 %v20819_v14  ;;  %v17467_v14 = vld [vmem:[%s26084_s11 + $0x90] sm:$0xff] }
 0x7c3   : > { %20824 = vmatprep.subr.bf16.mxu1 %v20823_v47  ;;  %v20835_v33 = vpack.c.bf16 %v17468_v22, %v17467_v14  ;;  %v10435_v47 = vld [vmem:[#allocation2 + $0x7] sm:$0xff] }
 0x7c4   : > { %v17490_v22 = vld [vmem:[%s26083_s10 + $0x148] sm:$0xff] }
 0x7c5   : > { %19742 = vmatmul.mubr.msk.f32.gmra.mrb[48].mxu1 %vm1073_vm3, %v24666_v29 }
 0x7c6   : > { %19744 = vmatprep.mubr.msk.f32.mxu1 %vm1073_vm3, %v24668_v10 }
 0x7c9   : > { %19745 = vmatmul.mubr.msk.f32.gmra.mrb[50].mxu1 %vm1073_vm3, %v10142_v57  ;;  %v17477_v57 = vld [vmem:[%s26085_s12 + $0x80] sm:$0xff] }
 0x7ca   : > { %19755 = vmatprep.mubr.msk.f32.mxu1 %vm1073_vm3, %v10285_v1  ;;  %v20839_v34 = vpack.c.bf16 %v17478_v17, %v17477_v57  ;;  %v10438_v1 = vld [vmem:[#allocation2 + $0x1f] sm:$0xff]  ;;  %v10609_v57 = vld [vmem:[#allocation4 + $0x27] sm:$0xff] }
 0x7cd   : > { %19756 = vmatmul.mubr.msk.f32.vlgmr.msra.gmra.mrb[52].mxu1 %vm1073_vm3, %v24694_v51 }
 0x7ce   : > { %20826 = vmatpush1.bf16.msra.mxu1 %v20825_v52  ;;  %19758 = vmatprep.mubr.msk.f32.mxu1 %vm1073_vm3, %v24704_v45  ;;  %v10439_v52 = vld [vmem:[#allocation2 + $0x27] sm:$0xff] }
 0x7cf   : > { %20828 = vmatprep.subr.bf16.mxu1 %v20827_v37  ;;  %v10440_v37 = vld [vmem:[#allocation2 + $0x2f] sm:$0xff] }
 0x7d1   : > { %19759 = vmatmul.mubr.msk.f32.gmra.mrb[54].mxu1 %vm1073_vm3, %v24708_v16 }
 0x7d2   : > { %19761 = vmatprep.mubr.msk.f32.mxu1 %vm1073_vm3, %v24712_v19  ;;  %20830 = vmatpush1.bf16.msra.mxu1 %v20829_v28  ;;  %v17480_v28 = vld [vmem:[%s26085_s12 + $0x98] sm:$0xff] }
 0x7d3   : > { %20832 = vmatprep.subr.bf16.mxu1 %v20831_v21  ;;  %v20843_v14 = vpack.c.bf16 %v17480_v28, %v17479_v48  ;;  %v17493_v28 = vld [vmem:[%s26083_s10 + $0x160] sm:$0xff] }
 0x7d5   : > { %19762 = vmatmul.mubr.msk.f32.gmra.mrb[56].mxu1 %vm1073_vm3, %v24716_v58 }
 0x7d6   : > { %19764 = vmatprep.mubr.msk.f32.mxu1 %vm1073_vm3, %v24720_v2 }
 0x7d9   : > { %19765 = vmatmul.mubr.msk.f32.gmra.mrb[58].mxu1 %vm1073_vm3, %v10292_v12  ;;  %v10607_v12 = vld [vmem:[#allocation4 + $0x17] sm:$0xff] }
 0x7da   : > { %10540 = vmatprep.mubr.f32.mxu1 %v22371_v6 }
 0x7dd   : > { %17457 = vmatmul.mubr.msk.f32.vlgmr.msra.gmra.mrb[28].mxu1 %vm1073_vm3, %v10435_v47  ;;  %v10608_v47 = vld [vmem:[#allocation4 + $0x1f] sm:$0xff] }
 0x7de   : > { %20834 = vmatpush3.bf16.msra.mxu1 %v20831_v21  ;;  %10546 = vmatprep.mubr.f32.mxu1 %v22371_v6  ;;  %v10606_v21 = vld [vmem:[#allocation4 + $0xf] sm:$0xff] }
 0x7df   : > { %20836 = vmatprep.subr.bf16.mxu1 %v20835_v33 }
 0x7e1   : > { %17458 = vmatmul.mubr.msk.f32.gmra.mrb[30].mxu1 %vm1073_vm3, %v10436_v9  ;;  %v10610_v9 = vld [vmem:[#allocation4 + $0x2f] sm:$0xff] }
 0x7e2   : > { %10552 = vmatprep.mubr.f32.mxu1 %v22371_v6  ;;  %20838 = vmatpush3.bf16.msra.mxu1 %v20835_v33  ;;  %v17492_v33 = vld [vmem:[%s26083_s10 + $0x158] sm:$0xff] }
 0x7e3   : > { %20840 = vmatprep.subr.bf16.mxu1 %v20839_v34  ;;  %v20847_v17 = vpack.c.bf16 %v17492_v33, %v17490_v22  ;;  %v17506_v22 = vld [vmem:[%s26084_s11 + $0xa8] sm:$0xff]  ;;  %v10757_v33 = vld [vmem:[#allocation6 + $0x17] sm:$0xff] }
 0x7e5   : > { %17459 = vmatmul.mubr.msk.f32.gmra.mrb[32].mxu1 %vm1073_vm3, %v10437_v30  ;;  %v10611_v30 = vld [vmem:[#allocation4 + $0x37] sm:$0xff] }
 0x7e6   : > { %10558 = vmatprep.mubr.f32.mxu1 %v22371_v6 }
 0x7e9   : > { %17460 = vmatmul.mubr.msk.f32.gmra.mrb[34].mxu1 %vm1073_vm3, %v10438_v1  ;;  %v10612_v1 = vld [vmem:[#allocation4 + $0x3f] sm:$0x3] }
 0x7ea   : > { %10564 = vmatprep.mubr.f32.mxu1 %v22371_v6 }
 0x7ed   : > { %17461 = vmatmul.mubr.msk.f32.gmra.mrb[36].mxu1 %vm1073_vm3, %v10439_v52  ;;  %v17491_v52 = vld [vmem:[%s26083_s10 + $0x150] sm:$0xff] }
 0x7ee   : > { %10570 = vmatprep.mubr.f32.mxu1 %v22371_v6 }
 0x7f1   : > { %17462 = vmatmul.mubr.msk.f32.gmra.mrb[38].mxu1 %vm1073_vm3, %v10440_v37  ;;  %v17494_v37 = vld [vmem:[%s26083_s10 + $0x168] sm:$0xff] }
 0x7f2   : > { %10576 = vmatprep.mubr.f32.mxu1 %v22371_v6 }
 0x7f5   : > { %17463 = vmatmul.mubr.msk.f32.gmra.mrb[40].mxu1 %vm1073_vm3, %v10441_v53  ;;  %v17496_v53 = vld [vmem:[%s26083_s10 + $0x178] sm:$0xff] }
 0x7f6   : > { %10582 = vmatprep.mubr.f32.mxu1 %v22371_v6  ;;  %v20851_v48 = vpack.c.bf16 %v17496_v53, %v17494_v37  ;;  %v17508_v37 = vld [vmem:[%s26084_s11 + $0xb8] sm:$0xff] }
 0x7f9   : > { %17464 = vmatmul.mubr.msk.f32.gmra.mrb[42].mxu1 %vm1073_vm3, %v10442_v42 }
 0x7fa   : > { %19775 = vmatprep.mubr.msk.f32.mxu1 %vm1073_vm3, %v10605_v3  ;;  %v10755_v3 = vld [vmem:[#allocation6 + $0x7] sm:$0xff] }
 0x7fd   : > { %19776 = vmatmul.mubr.msk.f32.vlgmr.msra.gmra.mrb[44].mxu1 %vm1073_vm3, %v10606_v21  ;;  %v17495_v21 = vld [vmem:[%s26083_s10 + $0x170] sm:$0xff] }
 0x7fe   : > { %20842 = vmatpush3.bf16.msra.mxu1 %v20839_v34  ;;  %19778 = vmatprep.mubr.msk.f32.mxu1 %vm1073_vm3, %v10607_v12  ;;  %v17489_v34 = vld [vmem:[%s26083_s10 + $0x140] sm:$0xff]  ;;  %v10756_v12 = vld [vmem:[#allocation6 + $0xf] sm:$0xff] }
 0x7ff   : > { %20844 = vmatprep.subr.bf16.mxu1 %v20843_v14  ;;  %v20849_v42 = vpack.c.bf16 %v17491_v52, %v17489_v34  ;;  %v10762_v34 = vld [vmem:[#allocation6 + $0x3f] sm:$0x3]  ;;  %v17507_v52 = vld [vmem:[%s26084_s11 + $0xb0] sm:$0xff] }
 0x800   : > { %v20859_v53 = vpack.c.bf16 %v17508_v37, %v17507_v52  ;;  %v11376_v52 = vld [vmem:[#allocation2 + $0x14] sm:$0xff]  ;;  %v11377_v37 = vld [vmem:[#allocation2 + $0x1c] sm:$0xff] }
 0x801   : > { %19779 = vmatmul.mubr.msk.f32.gmra.mrb[46].mxu1 %vm1073_vm3, %v10608_v47  ;;  %v20853_v47 = vpack.c.bf16 %v17495_v21, %v17493_v28  ;;  %v17532_v28 = vld [vmem:[%s26083_s10 + $0x198] sm:$0xff] }
 0x802   : > { %19781 = vmatprep.mubr.msk.f32.mxu1 %vm1073_vm3, %v10609_v57  ;;  %20846 = vmatpush3.bf16.msra.mxu1 %v20843_v14  ;;  %v17505_v14 = vld [vmem:[%s26084_s11 + $0xa0] sm:$0xff] }
 0x803   : > { %20848 = vmatprep.subr.bf16.mxu1 %v20847_v17  ;;  %v20855_v57 = vpack.c.bf16 %v17506_v22, %v17505_v14  ;;  %v10758_v17 = vld [vmem:[#allocation6 + $0x1f] sm:$0xff] }
 0x804   : > { %v17533_v22 = vld [vmem:[%s26083_s10 + $0x1a0] sm:$0xff] }
 0x805   : > { %19782 = vmatmul.mubr.msk.f32.gmra.mrb[48].mxu1 %vm1073_vm3, %v10610_v9  ;;  %v10759_v9 = vld [vmem:[#allocation6 + $0x27] sm:$0xff] }
 0x806   : > { %19784 = vmatprep.mubr.msk.f32.mxu1 %vm1073_vm3, %v10611_v30  ;;  %v10760_v30 = vld [vmem:[#allocation6 + $0x2f] sm:$0xff] }
 0x809   : > { %19785 = vmatmul.mubr.msk.f32.gmra.mrb[50].mxu1 %vm1073_vm3, %v10612_v1  ;;  %v10761_v1 = vld [vmem:[#allocation6 + $0x37] sm:$0xff] }
 0x80a   : > { %19795 = vmatprep.mubr.msk.f32.mxu1 %vm1073_vm3, %v10755_v3  ;;  %v17517_v3 = vld [vmem:[%s26085_s12 + $0xa0] sm:$0xff] }
 0x80d   : > { %19796 = vmatmul.mubr.msk.f32.vlgmr.msra.gmra.mrb[52].mxu1 %vm1073_vm3, %v10756_v12  ;;  %v17536_v12 = vld [vmem:[%s26083_s10 + $0x1b8] sm:$0xff] }
 0x80e   : > { %20850 = vmatpush1.bf16.msra.mxu1 %v20849_v42  ;;  %19798 = vmatprep.mubr.msk.f32.mxu1 %vm1073_vm3, %v10757_v33  ;;  %v17518_v42 = vld [vmem:[%s26085_s12 + $0xa8] sm:$0xff]  ;;  %v17535_v33 = vld [vmem:[%s26083_s10 + $0x1b0] sm:$0xff] }
 0x80f   : > { %20852 = vmatprep.subr.bf16.mxu1 %v20851_v48  ;;  %v20863_v48 = vpack.c.bf16 %v17518_v42, %v17517_v3  ;;  %v11379_v3 = vld [vmem:[#allocation2 + $0x2c] sm:$0xff]  ;;  %v11380_v42 = vld [vmem:[#allocation2 + $0x34] sm:$0xff] }
 0x811   : > { %19799 = vmatmul.mubr.msk.f32.gmra.mrb[54].mxu1 %vm1073_vm3, %v10758_v17 }
 0x812   : > { %19801 = vmatprep.mubr.msk.f32.mxu1 %vm1073_vm3, %v10759_v9  ;;  %20854 = vmatpush1.bf16.msra.mxu1 %v20853_v47  ;;  %v17545_v47 = vld [vmem:[%s26084_s11 + $0xc0] sm:$0xff]  ;;  %v11231_v9 = vld [vmem:[#allocation6 + $0x38] sm:$0xff] }
 0x813   : > { %20856 = vmatprep.subr.bf16.mxu1 %v20855_v57 }
 0x815   : > { %19802 = vmatmul.mubr.msk.f32.gmra.mrb[56].mxu1 %vm1073_vm3, %v10760_v30  ;;  %v11375_v30 = vld [vmem:[#allocation2 + $0xc] sm:$0xff] }
 0x816   : > { %19804 = vmatprep.mubr.msk.f32.mxu1 %vm1073_vm3, %v10761_v1  ;;  %v17558_v1 = vld [vmem:[%s26085_s12 + $0xc8] sm:$0xff] }
 0x819   : > { %19805 = vmatmul.mubr.msk.f32.gmra.mrb[58].mxu1 %vm1073_vm3, %v10762_v34 }
 0x81a   : > { %11010 = vmatprep.mubr.f32.mxu1 %v22371_v6 }
 0x81d   : > { %17497 = vmatmul.mubr.msk.f32.vlgmr.msra.gmra.mrb[28].mxu1 %vm1073_vm3, %v24350_v55  ;;  %v10911_v55 = vld [vmem:[#allocation2 + $0x38] sm:$0xff] }
 0x81e   : > { %20858 = vmatpush3.bf16.msra.mxu1 %v20855_v57  ;;  %11016 = vmatprep.mubr.f32.mxu1 %v22371_v6  ;;  %v17546_v57 = vld [vmem:[%s26084_s11 + $0xc8] sm:$0xff] }
 0x81f   : > { %20860 = vmatprep.subr.bf16.mxu1 %v20859_v53  ;;  %v20879_v17 = vpack.c.bf16 %v17546_v57, %v17545_v47  ;;  %v17576_v47 = vld [vmem:[%s26083_s10 + $0x1f8] sm:$0xff]  ;;  %v11695_v57 = vld [vmem:[#allocation6 + $0xc] sm:$0xff] }
 0x821   : > { %17498 = vmatmul.mubr.msk.f32.gmra.mrb[30].mxu1 %vm1073_vm3, %v24355_v49  ;;  %v10912_v49 = vld [vmem:[#allocation2 + $0x40] sm:$0x3] }
 0x822   : > { %11022 = vmatprep.mubr.f32.mxu1 %v22371_v6  ;;  %20862 = vmatpush3.bf16.msra.mxu1 %v20859_v53  ;;  %v11378_v53 = vld [vmem:[#allocation2 + $0x24] sm:$0xff] }
 0x823   : > { %20864 = vmatprep.subr.bf16.mxu1 %v20863_v48 }
 0x825   : > { %17499 = vmatmul.mubr.msk.f32.gmra.mrb[32].mxu1 %vm1073_vm3, %v24360_v13  ;;  %v17519_v13 = vld [vmem:[%s26085_s12 + $0xb0] sm:$0xff] }
 0x826   : > { %11028 = vmatprep.mubr.f32.mxu1 %v22371_v6 }
 0x829   : > { %17500 = vmatmul.mubr.msk.f32.gmra.mrb[34].mxu1 %vm1073_vm3, %v24365_v20  ;;  %v17520_v20 = vld [vmem:[%s26085_s12 + $0xb8] sm:$0xff] }
 0x82a   : > { %11034 = vmatprep.mubr.f32.mxu1 %v22371_v6 }
 0x82d   : > { %17501 = vmatmul.mubr.msk.f32.gmra.mrb[36].mxu1 %vm1073_vm3, %v24371_v38  ;;  %v20867_v38 = vpack.c.bf16 %v17520_v20, %v17519_v13  ;;  %v17559_v13 = vld [vmem:[%s26085_s12 + $0xd0] sm:$0xff]  ;;  %v17560_v20 = vld [vmem:[%s26085_s12 + $0xd8] sm:$0xff] }
 0x82e   : > { %11040 = vmatprep.mubr.f32.mxu1 %v22371_v6 }
 0x831   : > { %17502 = vmatmul.mubr.msk.f32.gmra.mrb[38].mxu1 %vm1073_vm3, %v24376_v27  ;;  %v17530_v27 = vld [vmem:[%s26083_s10 + $0x188] sm:$0xff] }
 0x832   : > { %11046 = vmatprep.mubr.f32.mxu1 %v22371_v6  ;;  %v20871_v21 = vpack.c.bf16 %v17532_v28, %v17530_v27  ;;  %v11547_v27 = vld [vmem:[#allocation4 + $0x1c] sm:$0xff]  ;;  %v20891_v28 = vpack.c.bf16 %v17560_v20, %v17559_v13  ;;  %v17597_v13 = vld [vmem:[%s26085_s12 + $0xe0] sm:$0xff] }
 0x833   : > { %v17598_v20 = vld [vmem:[%s26085_s12 + $0xe8] sm:$0xff] }
 0x835   : > { %17503 = vmatmul.mubr.msk.f32.gmra.mrb[40].mxu1 %vm1073_vm3, %v10911_v55  ;;  %v11382_v55 = vld [vmem:[#allocation2 + $0x44] sm:$0x3] }
 0x836   : > { %11052 = vmatprep.mubr.f32.mxu1 %v22371_v6 }
 0x839   : > { %17504 = vmatmul.mubr.msk.f32.gmra.mrb[42].mxu1 %vm1073_vm3, %v10912_v49  ;;  %v11545_v49 = vld [vmem:[#allocation4 + $0xc] sm:$0xff] }
 0x83a   : > { %19815 = vmatprep.mubr.msk.f32.mxu1 %vm1073_vm3, %v24409_v63  ;;  %v11081_v63 = vld [vmem:[#allocation4 + $0x38] sm:$0xff] }
 0x83d   : > { %19816 = vmatmul.mubr.msk.f32.vlgmr.msra.gmra.mrb[44].mxu1 %vm1073_vm3, %v24411_v8  ;;  %v11082_v8 = vld [vmem:[#allocation4 + $0x40] sm:$0x3] }
 0x83e   : > { %20866 = vmatpush3.bf16.msra.mxu1 %v20863_v48  ;;  %19818 = vmatprep.mubr.msk.f32.mxu1 %vm1073_vm3, %v24423_v7  ;;  %v17529_v7 = vld [vmem:[%s26083_s10 + $0x180] sm:$0xff] }
 0x83f   : > { %20868 = vmatprep.subr.bf16.mxu1 %v20867_v38  ;;  %v11381_v48 = vld [vmem:[#allocation2 + $0x3c] sm:$0xff] }
 0x841   : > { %19819 = vmatmul.mubr.msk.f32.gmra.mrb[46].mxu1 %vm1073_vm3, %v24425_v25  ;;  %v17531_v25 = vld [vmem:[%s26083_s10 + $0x190] sm:$0xff] }
 0x842   : > { %19821 = vmatprep.mubr.msk.f32.mxu1 %vm1073_vm3, %v24431_v18  ;;  %20870 = vmatpush3.bf16.msra.mxu1 %v20867_v38  ;;  %v17534_v18 = vld [vmem:[%s26083_s10 + $0x1a8] sm:$0xff] }
 0x843   : > { %20872 = vmatprep.subr.bf16.mxu1 %v20871_v21  ;;  %v20875_v14 = vpack.c.bf16 %v17536_v12, %v17534_v18  ;;  %v11546_v38 = vld [vmem:[#allocation4 + $0x14] sm:$0xff]  ;;  %v11551_v12 = vld [vmem:[#allocation4 + $0x3c] sm:$0xff] }
 0x844   : > { %v17570_v21 = vld [vmem:[%s26083_s10 + $0x1c8] sm:$0xff] }
 0x845   : > { %19822 = vmatmul.mubr.msk.f32.gmra.mrb[48].mxu1 %vm1073_vm3, %v24433_v60  ;;  %v20873_v60 = vpack.c.bf16 %v17531_v25, %v17529_v7  ;;  %v11549_v7 = vld [vmem:[#allocation4 + $0x2c] sm:$0xff]  ;;  %v11550_v18 = vld [vmem:[#allocation4 + $0x34] sm:$0xff] }
 0x846   : > { %19824 = vmatprep.mubr.msk.f32.mxu1 %vm1073_vm3, %v11081_v63  ;;  %v17572_v63 = vld [vmem:[%s26083_s10 + $0x1d8] sm:$0xff] }
 0x847   : > { %v20895_v25 = vpack.c.bf16 %v17572_v63, %v17570_v21  ;;  %v11848_v21 = vld [vmem:[#allocation2 + $0x25] sm:$0xff]  ;;  %v11849_v63 = vld [vmem:[#allocation2 + $0x2d] sm:$0xff] }
 0x849   : > { %19825 = vmatmul.mubr.msk.f32.gmra.mrb[50].mxu1 %vm1073_vm3, %v11082_v8  ;;  %v11548_v8 = vld [vmem:[#allocation4 + $0x24] sm:$0xff] }
 0x84a   : > { %19835 = vmatprep.mubr.msk.f32.mxu1 %vm1073_vm3, %v24479_v44  ;;  %v20877_v44 = vpack.c.bf16 %v17535_v33, %v17533_v22  ;;  %v17571_v22 = vld [vmem:[%s26083_s10 + $0x1d0] sm:$0xff]  ;;  %v17574_v33 = vld [vmem:[%s26083_s10 + $0x1e8] sm:$0xff] }
 0x84d   : > { %19836 = vmatmul.mubr.msk.f32.vlgmr.msra.gmra.mrb[52].mxu1 %vm1073_vm3, %v24489_v31  ;;  %v11232_v31 = vld [vmem:[#allocation6 + $0x40] sm:$0x3] }
 0x84e   : > { %20874 = vmatpush1.bf16.msra.mxu1 %v20873_v60  ;;  %19838 = vmatprep.mubr.msk.f32.mxu1 %vm1073_vm3, %v24493_v40  ;;  %v17547_v40 = vld [vmem:[%s26084_s11 + $0xd0] sm:$0xff] }
 0x84f   : > { %20876 = vmatprep.subr.bf16.mxu1 %v20875_v14  ;;  %v11552_v60 = vld [vmem:[#allocation4 + $0x44] sm:$0x3]  ;;  %v17569_v14 = vld [vmem:[%s26083_s10 + $0x1c0] sm:$0xff] }
 0x851   : > { %19839 = vmatmul.mubr.msk.f32.gmra.mrb[54].mxu1 %vm1073_vm3, %v24497_v4  ;;  %v17548_v4 = vld [vmem:[%s26084_s11 + $0xd8] sm:$0xff] }
 0x852   : > { %19841 = vmatprep.mubr.msk.f32.mxu1 %vm1073_vm3, %v24501_v36  ;;  %20878 = vmatpush1.bf16.msra.mxu1 %v20877_v44  ;;  %v20883_v36 = vpack.c.bf16 %v17548_v4, %v17547_v40  ;;  %v20897_v44 = vpack.c.bf16 %v17571_v22, %v17569_v14  ;;  %v11696_v40 = vld [vmem:[#allocation6 + $0x14] sm:$0xff]  ;;  %v17585_v4 = vld [vmem:[%s26084_s11 + $0xe0] sm:$0xff] }
 0x853   : > { %20880 = vmatprep.subr.bf16.mxu1 %v20879_v17  ;;  %v12016_v14 = vld [vmem:[#allocation4 + $0x15] sm:$0xff]  ;;  %v12017_v22 = vld [vmem:[#allocation4 + $0x1d] sm:$0xff] }
 0x855   : > { %19842 = vmatmul.mubr.msk.f32.gmra.mrb[56].mxu1 %vm1073_vm3, %v24505_v46  ;;  %v17557_v46 = vld [vmem:[%s26085_s12 + $0xc0] sm:$0xff] }
 0x856   : > { %19844 = vmatprep.mubr.msk.f32.mxu1 %vm1073_vm3, %v11231_v9  ;;  %v20887_v34 = vpack.c.bf16 %v17558_v1, %v17557_v46  ;;  %v17573_v9 = vld [vmem:[%s26083_s10 + $0x1e0] sm:$0xff] }
 0x859   : > { %19845 = vmatmul.mubr.msk.f32.gmra.mrb[58].mxu1 %vm1073_vm3, %v11232_v31  ;;  %v17575_v31 = vld [vmem:[%s26083_s10 + $0x1f0] sm:$0xff] }
 0x85a   : > { %11480 = vmatprep.mubr.f32.mxu1 %v22371_v6  ;;  %v20901_v46 = vpack.c.bf16 %v17575_v31, %v17573_v9  ;;  %v12020_v31 = vld [vmem:[#allocation4 + $0x35] sm:$0xff] }
 0x85d   : > { %17537 = vmatmul.mubr.msk.f32.vlgmr.msra.gmra.mrb[28].mxu1 %vm1073_vm3, %v11375_v30  ;;  %v11697_v30 = vld [vmem:[#allocation6 + $0x1c] sm:$0xff] }
 0x85e   : > { %20882 = vmatpush3.bf16.msra.mxu1 %v20879_v17  ;;  %11486 = vmatprep.mubr.f32.mxu1 %v22371_v6  ;;  %v20899_v17 = vpack.c.bf16 %v17576_v47, %v17574_v33  ;;  %v17610_v47 = vld [vmem:[%s26083_s10 + $0x208] sm:$0xff] }
 0x85f   : > { %20884 = vmatprep.subr.bf16.mxu1 %v20883_v36 }
 0x861   : > { %17538 = vmatmul.mubr.msk.f32.gmra.mrb[30].mxu1 %vm1073_vm3, %v11376_v52  ;;  %v11699_v52 = vld [vmem:[#allocation6 + $0x2c] sm:$0xff] }
 0x862   : > { %11492 = vmatprep.mubr.f32.mxu1 %v22371_v6  ;;  %20886 = vmatpush3.bf16.msra.mxu1 %v20883_v36  ;;  %v17586_v36 = vld [vmem:[%s26084_s11 + $0xe8] sm:$0xff] }
 0x863   : > { %20888 = vmatprep.subr.bf16.mxu1 %v20887_v34  ;;  %v20903_v1 = vpack.c.bf16 %v17586_v36, %v17585_v4  ;;  %v12022_v4 = vld [vmem:[#allocation4 + $0x45] sm:$0x3]  ;;  %v17609_v36 = vld [vmem:[%s26083_s10 + $0x200] sm:$0xff] }
 0x865   : > { %17539 = vmatmul.mubr.msk.f32.gmra.mrb[32].mxu1 %vm1073_vm3, %v11377_v37  ;;  %v11700_v37 = vld [vmem:[#allocation6 + $0x34] sm:$0xff] }
 0x866   : > { %11498 = vmatprep.mubr.f32.mxu1 %v22371_v6 }
 0x869   : > { %17540 = vmatmul.mubr.msk.f32.gmra.mrb[34].mxu1 %vm1073_vm3, %v11378_v53  ;;  %v11701_v53 = vld [vmem:[#allocation6 + $0x3c] sm:$0xff] }
 0x86a   : > { %11504 = vmatprep.mubr.f32.mxu1 %v22371_v6 }
 0x86d   : > { %17541 = vmatmul.mubr.msk.f32.gmra.mrb[36].mxu1 %vm1073_vm3, %v11379_v3  ;;  %v11702_v3 = vld [vmem:[#allocation6 + $0x44] sm:$0x3] }
 0x86e   : > { %11510 = vmatprep.mubr.f32.mxu1 %v22371_v6 }
 0x871   : > { %17542 = vmatmul.mubr.msk.f32.gmra.mrb[38].mxu1 %vm1073_vm3, %v11380_v42  ;;  %v17587_v42 = vld [vmem:[%s26084_s11 + $0xf0] sm:$0xff] }
 0x872   : > { %11516 = vmatprep.mubr.f32.mxu1 %v22371_v6 }
 0x875   : > { %17543 = vmatmul.mubr.msk.f32.gmra.mrb[40].mxu1 %vm1073_vm3, %v11381_v48  ;;  %v17588_v48 = vld [vmem:[%s26084_s11 + $0xf8] sm:$0xff] }
 0x876   : > { %11522 = vmatprep.mubr.f32.mxu1 %v22371_v6 }
 0x879   : > { %17544 = vmatmul.mubr.msk.f32.gmra.mrb[42].mxu1 %vm1073_vm3, %v11382_v55  ;;  %v20907_v55 = vpack.c.bf16 %v17588_v48, %v17587_v42  ;;  %v12166_v42 = vld [vmem:[#allocation6 + $0x15] sm:$0xff]  ;;  %v17625_v48 = vld [vmem:[%s26084_s11 + $0x100] sm:$0xff] }
 0x87a   : > { %19855 = vmatprep.mubr.msk.f32.mxu1 %vm1073_vm3, %v11545_v49  ;;  %v11845_v49 = vld [vmem:[#allocation2 + $0xd] sm:$0xff] }
 0x87d   : > { %19856 = vmatmul.mubr.msk.f32.vlgmr.msra.gmra.mrb[44].mxu1 %vm1073_vm3, %v11546_v38  ;;  %v20911_v38 = vpack.c.bf16 %v17598_v20, %v17597_v13 }
 0x87e   : > { %20890 = vmatpush3.bf16.msra.mxu1 %v20887_v34  ;;  %19858 = vmatprep.mubr.msk.f32.mxu1 %vm1073_vm3, %v11547_v27  ;;  %v11698_v34 = vld [vmem:[#allocation6 + $0x24] sm:$0xff]  ;;  %v11846_v27 = vld [vmem:[#allocation2 + $0x15] sm:$0xff] }
 0x87f   : > { %20892 = vmatprep.subr.bf16.mxu1 %v20891_v28 }
 0x881   : > { %19859 = vmatmul.mubr.msk.f32.gmra.mrb[46].mxu1 %vm1073_vm3, %v11548_v8  ;;  %v11850_v8 = vld [vmem:[#allocation2 + $0x35] sm:$0xff] }
 0x882   : > { %19861 = vmatprep.mubr.msk.f32.mxu1 %vm1073_vm3, %v11549_v7  ;;  %20894 = vmatpush3.bf16.msra.mxu1 %v20891_v28  ;;  %v11847_v28 = vld [vmem:[#allocation2 + $0x1d] sm:$0xff] }
 0x883   : > { %20896 = vmatprep.subr.bf16.mxu1 %v20895_v25  ;;  %v11851_v7 = vld [vmem:[#allocation2 + $0x3d] sm:$0xff]  ;;  %v11852_v25 = vld [vmem:[#allocation2 + $0x45] sm:$0x3] }
 0x885   : > { %19862 = vmatmul.mubr.msk.f32.gmra.mrb[48].mxu1 %vm1073_vm3, %v11550_v18  ;;  %v12015_v18 = vld [vmem:[#allocation4 + $0xd] sm:$0xff] }
 0x886   : > { %19864 = vmatprep.mubr.msk.f32.mxu1 %vm1073_vm3, %v11551_v12  ;;  %v17599_v12 = vld [vmem:[%s26085_s12 + $0xf0] sm:$0xff] }
 0x889   : > { %19865 = vmatmul.mubr.msk.f32.gmra.mrb[50].mxu1 %vm1073_vm3, %v11552_v60  ;;  %v17600_v60 = vld [vmem:[%s26085_s12 + $0xf8] sm:$0xff] }
 0x88a   : > { %19875 = vmatprep.mubr.msk.f32.mxu1 %vm1073_vm3, %v11695_v57  ;;  %v20915_v33 = vpack.c.bf16 %v17600_v60, %v17599_v12  ;;  %v17612_v57 = vld [vmem:[%s26083_s10 + $0x218] sm:$0xff]  ;;  %v17638_v12 = vld [vmem:[%s26085_s12 + $0x108] sm:$0xff] }
 0x88b   : > { %v20919_v9 = vpack.c.bf16 %v17612_v57, %v17610_v47 }
 0x88d   : > { %19876 = vmatmul.mubr.msk.f32.vlgmr.msra.gmra.mrb[52].mxu1 %vm1073_vm3, %v11696_v40  ;;  %v12021_v40 = vld [vmem:[#allocation4 + $0x3d] sm:$0xff] }
 0x88e   : > { %20898 = vmatpush1.bf16.msra.mxu1 %v20897_v44  ;;  %19878 = vmatprep.mubr.msk.f32.mxu1 %vm1073_vm3, %v11697_v30  ;;  %v12018_v44 = vld [vmem:[#allocation4 + $0x25] sm:$0xff] }
 0x88f   : > { %20900 = vmatprep.subr.bf16.mxu1 %v20899_v17  ;;  %v12019_v17 = vld [vmem:[#allocation4 + $0x2d] sm:$0xff]  ;;  %v17611_v30 = vld [vmem:[%s26083_s10 + $0x210] sm:$0xff] }
 0x891   : > { %19879 = vmatmul.mubr.msk.f32.gmra.mrb[54].mxu1 %vm1073_vm3, %v11698_v34  ;;  %v12165_v34 = vld [vmem:[#allocation6 + $0xd] sm:$0xff] }
 0x892   : > { %19881 = vmatprep.mubr.msk.f32.mxu1 %vm1073_vm3, %v11699_v52  ;;  %20902 = vmatpush1.bf16.msra.mxu1 %v20901_v46  ;;  %v17614_v46 = vld [vmem:[%s26083_s10 + $0x228] sm:$0xff]  ;;  %v20921_v52 = vpack.c.bf16 %v17611_v30, %v17609_v36 }
 0x893   : > { %20904 = vmatprep.subr.bf16.mxu1 %v20903_v1 }
 0x895   : > { %19882 = vmatmul.mubr.msk.f32.gmra.mrb[56].mxu1 %vm1073_vm3, %v11700_v37 }
 0x896   : > { %19884 = vmatprep.mubr.msk.f32.mxu1 %vm1073_vm3, %v11701_v53  ;;  %v17613_v53 = vld [vmem:[%s26083_s10 + $0x220] sm:$0xff] }
 0x899   : > { %19885 = vmatmul.mubr.msk.f32.gmra.mrb[58].mxu1 %vm1073_vm3, %v11702_v3  ;;  %v17615_v3 = vld [vmem:[%s26083_s10 + $0x230] sm:$0xff] }
 0x89a   : > { %11950 = vmatprep.mubr.f32.mxu1 %v22371_v6  ;;  %v20925_v13 = vpack.c.bf16 %v17615_v3, %v17613_v53 }
 0x89d   : > { %17577 = vmatmul.mubr.msk.f32.vlgmr.msra.gmra.mrb[28].mxu1 %vm1073_vm3, %v11845_v49  ;;  %v12167_v49 = vld [vmem:[#allocation6 + $0x1d] sm:$0xff] }
 0x89e   : > { %20906 = vmatpush3.bf16.msra.mxu1 %v20903_v1  ;;  %11956 = vmatprep.mubr.f32.mxu1 %v22371_v6  ;;  %v17616_v1 = vld [vmem:[%s26083_s10 + $0x238] sm:$0xff] }
 0x89f   : > { %20908 = vmatprep.subr.bf16.mxu1 %v20907_v55  ;;  %v20923_v37 = vpack.c.bf16 %v17616_v1, %v17614_v46 }
 0x8a1   : > { %17578 = vmatmul.mubr.msk.f32.gmra.mrb[30].mxu1 %vm1073_vm3, %v11846_v27  ;;  %v12169_v27 = vld [vmem:[#allocation6 + $0x2d] sm:$0xff] }
 0x8a2   : > { %11962 = vmatprep.mubr.f32.mxu1 %v22371_v6  ;;  %20910 = vmatpush3.bf16.msra.mxu1 %v20907_v55  ;;  %v17626_v55 = vld [vmem:[%s26084_s11 + $0x108] sm:$0xff] }
 0x8a3   : > { %20912 = vmatprep.subr.bf16.mxu1 %v20911_v38  ;;  %v20927_v20 = vpack.c.bf16 %v17626_v55, %v17625_v48 }
 0x8a5   : > { %17579 = vmatmul.mubr.msk.f32.gmra.mrb[32].mxu1 %vm1073_vm3, %v11847_v28  ;;  %v12170_v28 = vld [vmem:[#allocation6 + $0x35] sm:$0xff] }
 0x8a6   : > { %11968 = vmatprep.mubr.f32.mxu1 %v22371_v6 }
 0x8a9   : > { %17580 = vmatmul.mubr.msk.f32.gmra.mrb[34].mxu1 %vm1073_vm3, %v11848_v21  ;;  %v12171_v21 = vld [vmem:[#allocation6 + $0x3d] sm:$0xff] }
 0x8aa   : > { %11974 = vmatprep.mubr.f32.mxu1 %v22371_v6 }
 0x8ad   : > { %17581 = vmatmul.mubr.msk.f32.gmra.mrb[36].mxu1 %vm1073_vm3, %v11849_v63  ;;  %v12172_v63 = vld [vmem:[#allocation6 + $0x45] sm:$0x3] }
 0x8ae   : > { %11980 = vmatprep.mubr.f32.mxu1 %v22371_v6 }
 0x8b1   : > { %17582 = vmatmul.mubr.msk.f32.gmra.mrb[38].mxu1 %vm1073_vm3, %v11850_v8  ;;  %v17627_v8 = vld [vmem:[%s26084_s11 + $0x110] sm:$0xff] }
 0x8b2   : > { %11986 = vmatprep.mubr.f32.mxu1 %v22371_v6 }
 0x8b5   : > { %17583 = vmatmul.mubr.msk.f32.gmra.mrb[40].mxu1 %vm1073_vm3, %v11851_v7  ;;  %v17628_v7 = vld [vmem:[%s26084_s11 + $0x118] sm:$0xff] }
 0x8b6   : > { %11992 = vmatprep.mubr.f32.mxu1 %v22371_v6 }
 0x8b9   : > { %17584 = vmatmul.mubr.msk.f32.gmra.mrb[42].mxu1 %vm1073_vm3, %v11852_v25  ;;  %v20931_v25 = vpack.c.bf16 %v17628_v7, %v17627_v8 }
 0x8ba   : > { %19895 = vmatprep.mubr.msk.f32.mxu1 %vm1073_vm3, %v12015_v18  ;;  %v17637_v18 = vld [vmem:[%s26085_s12 + $0x100] sm:$0xff] }
 0x8bb   : > { %v20935_v60 = vpack.c.bf16 %v17638_v12, %v17637_v18 }
 0x8bd   : > { %19896 = vmatmul.mubr.msk.f32.vlgmr.msra.gmra.mrb[44].mxu1 %vm1073_vm3, %v12016_v14 }
 0x8be   : > { %20914 = vmatpush3.bf16.msra.mxu1 %v20911_v38  ;;  %19898 = vmatprep.mubr.msk.f32.mxu1 %vm1073_vm3, %v12017_v22  ;;  %v12168_v38 = vld [vmem:[#allocation6 + $0x25] sm:$0xff] }
 0x8bf   : > { %20916 = vmatprep.subr.bf16.mxu1 %v20915_v33 }
 0x8c1   : > { %19899 = vmatmul.mubr.msk.f32.gmra.mrb[46].mxu1 %vm1073_vm3, %v12018_v44 }
 0x8c2   : > { %19901 = vmatprep.mubr.msk.f32.mxu1 %vm1073_vm3, %v12019_v17  ;;  %20918 = vmatpush3.bf16.msra.mxu1 %v20915_v33 }
 0x8c3   : > { %20920 = vmatprep.subr.bf16.mxu1 %v20919_v9 }
 0x8c5   : > { %19902 = vmatmul.mubr.msk.f32.gmra.mrb[48].mxu1 %vm1073_vm3, %v12020_v31 }
 0x8c6   : > { %19904 = vmatprep.mubr.msk.f32.mxu1 %vm1073_vm3, %v12021_v40 }
 0x8c9   : > { %19905 = vmatmul.mubr.msk.f32.gmra.mrb[50].mxu1 %vm1073_vm3, %v12022_v4 }
 0x8ca   : > { %19915 = vmatprep.mubr.msk.f32.mxu1 %vm1073_vm3, %v12165_v34 }
 0x8cd   : > { %19916 = vmatmul.mubr.msk.f32.vlgmr.msra.gmra.mrb[52].mxu1 %vm1073_vm3, %v12166_v42 }
 0x8ce   : > { %20922 = vmatpush1.bf16.msra.mxu1 %v20921_v52  ;;  %19918 = vmatprep.mubr.msk.f32.mxu1 %vm1073_vm3, %v12167_v49 }
 0x8cf   : > { %20924 = vmatprep.subr.bf16.mxu1 %v20923_v37 }
 0x8d1   : > { %19919 = vmatmul.mubr.msk.f32.gmra.mrb[54].mxu1 %vm1073_vm3, %v12168_v38 }
 0x8d2   : > { %19921 = vmatprep.mubr.msk.f32.mxu1 %vm1073_vm3, %v12169_v27  ;;  %20926 = vmatpush1.bf16.msra.mxu1 %v20925_v13 }
 0x8d3   : > { %20928 = vmatprep.subr.bf16.mxu1 %v20927_v20 }
 0x8d5   : > { %19922 = vmatmul.mubr.msk.f32.gmra.mrb[56].mxu1 %vm1073_vm3, %v12170_v28 }
 0x8d6   : > { %19924 = vmatprep.mubr.msk.f32.mxu1 %vm1073_vm3, %v12171_v21 }
 0x8d9   : > { %19925 = vmatmul.mubr.msk.f32.gmra.mrb[58].mxu1 %vm1073_vm3, %v12172_v63 }
 0x8da   : > { %12420 = vmatprep.mubr.f32.mxu1 %v22371_v6 }
 0x8dd   : > { %17617 = vmatmul.mubr.msk.f32.vlgmr.msra.gmra.mrb[28].mxu1 %vm1073_vm3, %v24606_v62  ;;  %v12321_v62 = vld [vmem:[#allocation2 + $0x3e] sm:$0xff] }
 0x8de   : > { %20930 = vmatpush3.bf16.msra.mxu1 %v20927_v20  ;;  %12426 = vmatprep.mubr.f32.mxu1 %v22371_v6 }
 0x8df   : > { %20932 = vmatprep.subr.bf16.mxu1 %v20931_v25 }
 0x8e1   : > { %17618 = vmatmul.mubr.msk.f32.gmra.mrb[30].mxu1 %vm1073_vm3, %v24611_v35  ;;  %v12322_v35 = vld [vmem:[#allocation2 + $0x46] sm:$0x3] }
 0x8e2   : > { %12432 = vmatprep.mubr.f32.mxu1 %v22371_v6  ;;  %20934 = vmatpush3.bf16.msra.mxu1 %v20931_v25 }
 0x8e3   : > { %20936 = vmatprep.subr.bf16.mxu1 %v20935_v60 }
 0x8e5   : > { %17619 = vmatmul.mubr.msk.f32.gmra.mrb[32].mxu1 %vm1073_vm3, %v24616_v24  ;;  %v17639_v24 = vld [vmem:[%s26085_s12 + $0x110] sm:$0xff] }
 0x8e6   : > { %12438 = vmatprep.mubr.f32.mxu1 %v22371_v6 }
 0x8e9   : > { %17620 = vmatmul.mubr.msk.f32.gmra.mrb[34].mxu1 %vm1073_vm3, %v24621_v43  ;;  %v17640_v43 = vld [vmem:[%s26085_s12 + $0x118] sm:$0xff] }
 0x8ea   : > { %12444 = vmatprep.mubr.f32.mxu1 %v22371_v6 }
 0x8ed   : > { %17621 = vmatmul.mubr.msk.f32.gmra.mrb[36].mxu1 %vm1073_vm3, %v24626_v5  ;;  %v20939_v5 = vpack.c.bf16 %v17640_v43, %v17639_v24 }
 0x8ee   : > { %12450 = vmatprep.mubr.f32.mxu1 %v22371_v6 }
 0x8f1   : > { %17622 = vmatmul.mubr.msk.f32.gmra.mrb[38].mxu1 %vm1073_vm3, %v24631_v41  ;;  %v12492_v41 = vld [vmem:[#allocation4 + $0x46] sm:$0x3] }
 0x8f2   : > { %12456 = vmatprep.mubr.f32.mxu1 %v22371_v6 }
 0x8f5   : > { %17623 = vmatmul.mubr.msk.f32.gmra.mrb[40].mxu1 %vm1073_vm3, %v12321_v62 }
 0x8f6   : > { %12462 = vmatprep.mubr.f32.mxu1 %v22371_v6  ;;  %v12491_v6 = vld [vmem:[#allocation4 + $0x3e] sm:$0xff] }
 0x8f9   : > { %17624 = vmatmul.mubr.msk.f32.gmra.mrb[42].mxu1 %vm1073_vm3, %v12322_v35  ;;  %v12785_v35 = vld [vmem:[#allocation5 + $0x7] sm:$0xff] }
 0x8fa   : > { %19935 = vmatprep.mubr.msk.f32.mxu1 %vm1073_vm3, %v24644_v56  ;;  %v12641_v56 = vld [vmem:[#allocation6 + $0x3e] sm:$0xff] }
 0x8fd   : > { %19936 = vmatmul.mubr.msk.f32.vlgmr.msra.gmra.mrb[44].mxu1 %vm1073_vm3, %v24646_v26  ;;  %v12642_v26 = vld [vmem:[#allocation6 + $0x46] sm:$0x3] }
 0x8fe   : > { %20938 = vmatpush3.bf16.msra.mxu1 %v20935_v60  ;;  %19938 = vmatprep.mubr.msk.f32.mxu1 %vm1073_vm3, %v24658_v0  ;;  %v12786_v60 = vld [vmem:[#allocation5 + $0xf] sm:$0xff] }
 0x8ff   : > { %20940 = vmatprep.subr.bf16.mxu1 %v20939_v5 }
 0x901   : > { %19939 = vmatmul.mubr.msk.f32.gmra.mrb[46].mxu1 %vm1073_vm3, %v24660_v54 }
 0x902   : > { %19941 = vmatprep.mubr.msk.f32.mxu1 %vm1073_vm3, %v24666_v29  ;;  %20942 = vmatpush3.bf16.msra.mxu1 %v20939_v5 }
 0x905   : > { %19942 = vmatmul.mubr.msk.f32.gmra.mrb[48].mxu1 %vm1073_vm3, %v24668_v10 }
 0x906   : > { %19944 = vmatprep.mubr.msk.f32.mxu1 %vm1073_vm3, %v12491_v6 }
 0x909   : > { %19945 = vmatmul.mubr.msk.f32.gmra.mrb[50].mxu1 %vm1073_vm3, %v12492_v41 }
 0x90a   : > { %19955 = vmatprep.mubr.msk.f32.mxu1 %vm1073_vm3, %v24694_v51 }
 0x90d   : > { %19956 = vmatmul.mubr.msk.f32.vlgmr.msra.gmra.mrb[52].mxu1 %vm1073_vm3, %v24704_v45 }
 0x90e   : > { %19958 = vmatprep.mubr.msk.f32.mxu1 %vm1073_vm3, %v24708_v16 }
 0x911   : > { %19959 = vmatmul.mubr.msk.f32.gmra.mrb[54].mxu1 %vm1073_vm3, %v24712_v19 }
 0x912   : > { %19961 = vmatprep.mubr.msk.f32.mxu1 %vm1073_vm3, %v24716_v58 }
 0x915   : > { %19962 = vmatmul.mubr.msk.f32.gmra.mrb[56].mxu1 %vm1073_vm3, %v24720_v2 }
 0x916   : > { %19964 = vmatprep.mubr.msk.f32.mxu1 %vm1073_vm3, %v12641_v56 }
 0x919   : > { %19965 = vmatmul.mubr.msk.f32.gmra.mrb[58].mxu1 %vm1073_vm3, %v12642_v26 }
 0x9b0   : > { %v25131_v0 = vpop.f32.mrb[28].mxu1 }
 0x9b1   : > { %v25133_v54 = vpop.f32.mrb[29].mxu1 }
 0x9b4   : > { %v25135_v29 = vpop.f32.mrb[30].mxu1 }
 0x9b5   : > { %v25137_v10 = vpop.f32.mrb[31].mxu1 }
 0x9b8   : > { %v25139_v51 = vpop.f32.mrb[32].mxu1 }
 0x9b9   : > { %v25141_v45 = vpop.f32.mrb[33].mxu1 }
 0x9bc   : > { %v25143_v16 = vpop.f32.mrb[34].mxu1 }
 0x9bd   : > { %v25145_v19 = vpop.f32.mrb[35].mxu1 }
 0x9c0   : > { %v25147_v58 = vpop.f32.mrb[36].mxu1 }
 0x9c1   : > { %v25149_v2 = vpop.f32.mrb[37].mxu1 }
 0x9c4   : > { %v25151_v14 = vpop.f32.mrb[38].mxu1 }
 0x9c5   : > { %v25153_v22 = vpop.f32.mrb[39].mxu1 }
 0x9c8   : > { %v25155_v33 = vpop.f32.mrb[40].mxu1 }
 0x9c9   : > { %v25157_v47 = vpop.f32.mrb[41].mxu1 }
 0x9cc   : > { %v25159_v57 = vpop.f32.mrb[42].mxu1 }
 0x9cd   : > { %v25161_v44 = vpop.f32.mrb[43].mxu1 }
 0x9d0   : > { %v25163_v17 = vpop.f32.mrb[44].mxu1 }
 0x9d1   : > { %v25167_v9 = vadd.f32 %v25163_v17, %v25135_v29  ;;  %v25169_v31 = vpop.f32.mrb[45].mxu1 }
 0x9d2   : > { %v25173_v40 = vadd.f32 %v25169_v31, %v25131_v0 }
 0x9d3   : > { %v17650_v43 = vmul.f32 -1.442695, %v25167_v9 }
 0x9d4   : > { %v25175_v4 = vpop.f32.mrb[46].mxu1  ;;  %22138 = vtanh.f32 %v25173_v40  ;;  %v17649_v24 = vmul.f32 -1.442695, %v25173_v40 }
 0x9d5   : > { %v25179_v36 = vadd.f32 %v25175_v4, %v25143_v16  ;;  %v25181_v30 = vpop.f32.mrb[47].mxu1 }
 0x9d6   : > { %v25185_v46 = vadd.f32 %v25181_v30, %v25139_v51 }
 0x9d8   : > { %v25187_v1 = vpop.f32.mrb[48].mxu1  ;;  %22140 = vtanh.f32 %v25185_v46 }
 0x9d9   : > { %v25191_v34 = vadd.f32 %v25187_v1, %v25151_v14  ;;  %v25193_v52 = vpop.f32.mrb[49].mxu1  ;;  %22142 = vtanh.f32 %v25167_v9 }
 0x9da   : > { %v25197_v37 = vadd.f32 %v25193_v52, %v25147_v58  ;;  %22144 = vtanh.f32 %v25179_v36 }
 0x9dc   : > { %v25199_v53 = vpop.f32.mrb[50].mxu1  ;;  %22146 = vtanh.f32 %v25197_v37 }
 0x9dd   : > { %v25203_v3 = vadd.f32 %v25199_v53, %v25159_v57  ;;  %v25205_v42 = vpop.f32.mrb[51].mxu1  ;;  %22148 = vtanh.f32 %v25191_v34 }
 0x9de   : > { %v25209_v48 = vadd.f32 %v25205_v42, %v25155_v33  ;;  %v22139_v28 = vpop.eup %22138 }
 0x9e0   : > { %v19957_v55 = vpop.f32.mrb[52].mxu1  ;;  %22150 = vtanh.f32 %v25209_v48 }
 0x9e1   : > { %13051 = vrot.lane.b32.xlu0 %v19957_v55, %s26103_s25  ;;  %v12738_v49 = vpop.f32.mrb[53].mxu1  ;;  %22152 = vpow2.f32 %v17649_v24 }
 0x9e2   : > { %13049 = vrot.lane.b32.xlu1 %v12738_v49, %s26103_s25  ;;  %v22141_v8 = vpop.eup %22140  ;;  %22154 = vpow2.f32 %v17650_v43  ;;  %v17651_v49 = vmul.f32 -1.442695, %v25185_v46 }
 0x9e3   : > { %v22143_v7 = vpop.eup %22142 }
 0x9e4   : > { %v19960_v13 = vpop.f32.mrb[54].mxu1  ;;  %v22145_v25 = vpop.eup %22144 }
 0x9e5   : > { %13055 = vrot.lane.b32.xlu0 %v19960_v13, %s26103_s25  ;;  %v12748_v20 = vpop.f32.mrb[55].mxu1 }
 0x9e6   : > { %13053 = vrot.lane.b32.xlu1 %v12748_v20, %s26103_s25  ;;  %v22147_v18 = vpop.eup %22146 }
 0x9e7   : > { %v22149_v12 = vpop.eup %22148 }
 0x9e8   : > { %v19963_v38 = vpop.f32.mrb[56].mxu1 }
 0x9e9   : > { %13059 = vrot.lane.b32.xlu0 %v19963_v38, %s26103_s25  ;;  %v12758_v27 = vpop.f32.mrb[57].mxu1 }
 0x9ea   : > { %13057 = vrot.lane.b32.xlu1 %v12758_v27, %s26103_s25  ;;  %v22151_v62 = vpop.eup %22150 }
 0x9eb   : > { %v22153_v5 = vpop.eup %22152 }
 0x9ec   : > { %v25221_v21 = vpop.f32.mrb[58].mxu1  ;;  %v12825_v6 = vadd.f32 1.0, %v22153_v5  ;;  %v22155_v41 = vpop.eup %22154 }
 0x9ed   : > { %12961 = vrot.lane.b32.xlu0 %v22139_v28, %s22374_s21  ;;  %v12768_v63 = vpop.f32.mrb[59].mxu1  ;;  %v12826_v20 = vadd.f32 1.0, %v22155_v41 }
 0x9ee   : > { %13061 = vrot.lane.b32.xlu1 %v12768_v63, %s26103_s25  ;;  %22156 = vrcp.f32 %v12825_v6 }
 0x9ef   : > { %22158 = vpow2.f32 %v17651_v49 }
 0x9f0   : > { %22160 = vrcp.f32 %v12826_v20 }
 0x9f1   : > { %12965 = vrot.lane.b32.xlu0 %v22141_v8, %s22374_s21 }
 0x9f2   : > { %12963 = vrot.lane.b32.xlu1 %v22143_v7, %s22374_s21 }
 0x9f5   : > { %12969 = vrot.lane.b32.xlu0 %v22147_v18, %s22374_s21  ;;  %v17653_v18 = vmul.f32 -1.442695, %v25197_v37 }
 0x9f6   : > { %12967 = vrot.lane.b32.xlu1 %v22145_v25, %s22374_s21 }
 0x9f9   : > { %12973 = vrot.lane.b32.xlu0 %v22151_v62, %s22374_s21 }
 0x9fa   : > { %12971 = vrot.lane.b32.xlu1 %v22149_v12, %s22374_s21 }
 0x9fd   : > { %12921 = vrot.lane.b32.xlu0 %v12785_v35, %s26104_s2 }
 0x9fe   : > { %12923 = vrot.lane.b32.xlu1 %v12786_v60, %s26104_s2 }
 0xa53   : > { %v13052_v56 = vpop.permute.xlu0 %13051 }
 0xa54   : > { %v25239_v26 = vadd.f32 %v13052_v56, %v25135_v29  ;;  %v13050_v55 = vpop.permute.xlu1 %13049  ;;  %v25246_v38 = vadd.f32 %v13052_v56, %v25137_v10  ;;  %v17652_v56 = vmul.f32 -1.442695, %v25179_v36 }
 0xa55   : > { %v25243_v13 = vadd.f32 %v13050_v55, %v25131_v0  ;;  %v25259_v7 = vadd.f32 %v13050_v55, %v25133_v54 }
 0xa56   : > { %22162 = vtanh.f32 %v25246_v38 }
 0xa57   : > { %v13056_v27 = vpop.permute.xlu0 %13055 }
 0xa58   : > { %v25249_v28 = vadd.f32 %v13056_v27, %v25143_v16  ;;  %v13054_v63 = vpop.permute.xlu1 %13053  ;;  %v25256_v8 = vadd.f32 %v13056_v27, %v25145_v19 }
 0xa59   : > { %v25252_v29 = vadd.f32 %v13054_v63, %v25139_v51  ;;  %v22157_v51 = vpop.eup %22156  ;;  %v25270_v60 = vadd.f32 %v13054_v63, %v25141_v45  ;;  %v17654_v63 = vmul.f32 -1.442695, %v25191_v34 }
 0xa5a   : > { %22164 = vtanh.f32 %v25256_v8 }
 0xa5b   : > { %v13060_v0 = vpop.permute.xlu0 %13059  ;;  %22166 = vtanh.f32 %v25259_v7 }
 0xa5c   : > { %v25262_v25 = vadd.f32 %v13060_v0, %v25151_v14  ;;  %v13058_v16 = vpop.permute.xlu1 %13057  ;;  %v25274_v35 = vadd.f32 %v13060_v0, %v25153_v22  ;;  %22168 = vpow2.f32 %v17653_v18 }
 0xa5d   : > { %v25266_v12 = vadd.f32 %v13058_v16, %v25147_v58  ;;  %v22159_v58 = vpop.eup %22158  ;;  %22170 = vtanh.f32 %v25270_v60  ;;  %v25289_v18 = vadd.f32 %v13058_v16, %v25149_v2 }
 0xa5e   : > { %v22161_v5 = vpop.eup %22160  ;;  %22172 = vtanh.f32 %v25274_v35  ;;  %v12827_v49 = vadd.f32 1.0, %v22159_v58 }
 0xa5f   : > { %v12962_v62 = vpop.permute.xlu0 %12961  ;;  %22174 = vpow2.f32 %v17652_v56 }
 0xa60   : > { %v12985_v14 = vmul.f32 %v22157_v51, %v12962_v62  ;;  %v13062_v24 = vpop.permute.xlu1 %13061  ;;  %v22163_v41 = vpop.eup %22162  ;;  %22176 = vrcp.f32 %v12827_v49  ;;  %v12789_v49 = vld [vmem:[#allocation5 + $0x27] sm:$0xff] }
 0xa61   : > { %v25277_v43 = vadd.f32 %v13062_v24, %v25155_v33  ;;  %22178 = vpow2.f32 %v17654_v63  ;;  %v25295_v58 = vadd.f32 %v13062_v24, %v25157_v47 }
 0xa62   : > { %13001 = vrot.lane.b32.xlu0 %v12985_v14, %s26104_s2  ;;  %v12787_v14 = vld [vmem:[#allocation5 + $0x17] sm:$0xff]  ;;  %22180 = vtanh.f32 %v25289_v18 }
 0xa64   : > { %v12964_v6 = vpop.permute.xlu1 %12963  ;;  %v22165_v33 = vpop.eup %22164 }
 0xa65   : > { %v12986_v55 = vmul.f32 %v22161_v5, %v12964_v6  ;;  %v22167_v20 = vpop.eup %22166  ;;  %v17655_v5 = vmul.f32 -1.442695, %v25209_v48  ;;  %v12966_v6 = vpop.permute.xlu0 %12965 }
 0xa66   : > { %13219 = vrot.lane.b32.xlu0 %v22163_v41, %s22374_s21  ;;  %v22169_v27 = vpop.eup %22168 }
 0xa67   : > { %13003 = vrot.lane.b32.xlu1 %v12986_v55, %s26104_s2  ;;  %v22171_v0 = vpop.eup %22170  ;;  %v12829_v62 = vadd.f32 1.0, %v22169_v27 }
 0xa68   : > { %v22173_v51 = vpop.eup %22172 }
 0xa69   : > { %22182 = vrcp.f32 %v12829_v62  ;;  %v22175_v41 = vpop.eup %22174 }
 0xa6a   : > { %13223 = vrot.lane.b32.xlu0 %v22165_v33, %s22374_s21  ;;  %v22177_v16 = vpop.eup %22176  ;;  %22184 = vtanh.f32 %v25295_v58  ;;  %v12828_v55 = vadd.f32 1.0, %v22175_v41  ;;  %v12968_v41 = vpop.permute.xlu1 %12967 }
 0xa6b   : > { %13217 = vrot.lane.b32.xlu1 %v22167_v20, %s22374_s21  ;;  %v12987_v56 = vmul.f32 %v22177_v16, %v12966_v6  ;;  %22186 = vpow2.f32 %v17655_v5  ;;  %v22179_v33 = vpop.eup %22178  ;;  %v12970_v20 = vpop.permute.xlu0 %12969  ;;  %v12788_v5 = vld [vmem:[#allocation5 + $0x1f] sm:$0xff] }
 0xa6c   : > { %v22181_v24 = vpop.eup %22180  ;;  %22188 = vrcp.f32 %v12828_v55 }
 0xa6d   : > { %22190 = vtanh.f32 %v25203_v3 }
 0xa6e   : > { %13227 = vrot.lane.b32.xlu0 %v22173_v51, %s22374_s21  ;;  %v12830_v51 = vadd.f32 1.0, %v22179_v33  ;;  %v12972_v33 = vpop.permute.xlu1 %12971 }
 0xa6f   : > { %13221 = vrot.lane.b32.xlu1 %v22171_v0, %s22374_s21 }
 0xa70   : > { %22192 = vrcp.f32 %v12830_v51  ;;  %v12849_v51 = vadd.f32 1.0, %v25173_v40 }
 0xa72   : > { %12925 = vrot.lane.b32.xlu0 %v12787_v14, %s26104_s2  ;;  %v12791_v14 = vld [vmem:[#allocation5 + $0x37] sm:$0xff] }
 0xa73   : > { %v22183_v27 = vpop.eup %22182  ;;  %13225 = vrot.lane.b32.xlu1 %v22181_v24, %s22374_s21 }
 0xa74   : > { %v12989_v63 = vmul.f32 %v22183_v27, %v12970_v20  ;;  %v22185_v0 = vpop.eup %22184  ;;  %v12974_v27 = vpop.permute.xlu0 %12973 }
 0xa75   : > { %v22187_v62 = vpop.eup %22186 }
 0xa76   : > { %13005 = vrot.lane.b32.xlu0 %v12987_v56, %s26104_s2  ;;  %v12831_v6 = vadd.f32 1.0, %v22187_v62  ;;  %v22189_v16 = vpop.eup %22188  ;;  %v17666_v62 = vmul.f32 -1.442695, %v25239_v26 }
 0xa77   : > { %13229 = vrot.lane.b32.xlu1 %v22185_v0, %s22374_s21  ;;  %v22191_v56 = vpop.eup %22190  ;;  %v12988_v55 = vmul.f32 %v22189_v16, %v12968_v41  ;;  %v17667_v41 = vmul.f32 -1.442695, %v25252_v29  ;;  %v17670_v16 = vmul.f32 -1.442695, %v25262_v25  ;;  %v12853_v29 = vadd.f32 1.0, %v25197_v37 }
 0xa78   : > { %22194 = vrcp.f32 %v12831_v6  ;;  %v17668_v6 = vmul.f32 -1.442695, %v25249_v28  ;;  %v12852_v37 = vadd.f32 1.0, %v25179_v36  ;;  %v12854_v36 = vadd.f32 1.0, %v25191_v34 }
 0xa79   : > { %22196 = vpow2.f32 %v17666_v62 }
 0xa7a   : > { %12929 = vrot.lane.b32.xlu0 %v12789_v49, %s26104_s2  ;;  %v12790_v49 = vld [vmem:[#allocation5 + $0x2f] sm:$0xff]  ;;  %v22193_v20 = vpop.eup %22192 }
 0xa7b   : > { %12927 = vrot.lane.b32.xlu1 %v12788_v5, %s26104_s2  ;;  %v12990_v24 = vmul.f32 %v22193_v20, %v12972_v33  ;;  %v17665_v5 = vmul.f32 -1.442695, %v25243_v13 }
 0xa7e   : > { %13009 = vrot.lane.b32.xlu0 %v12989_v63, %s26104_s2 }
 0xa7f   : > { %13007 = vrot.lane.b32.xlu1 %v12988_v55, %s26104_s2 }
 0xa82   : > { %12933 = vrot.lane.b32.xlu0 %v12791_v14, %s26104_s2  ;;  %v22195_v63 = vpop.eup %22194  ;;  %v17657_v14 = vmul.f32 -1.442695, %v12849_v51 }
 0xa83   : > { %12931 = vrot.lane.b32.xlu1 %v12790_v49, %s26104_s2  ;;  %v12991_v0 = vmul.f32 %v22195_v63, %v12974_v27  ;;  %v22197_v40 = vpop.eup %22196  ;;  %v17669_v63 = vmul.f32 -1.442695, %v25266_v12 }
 0xa84   : > { %22198 = vpow2.f32 %v17657_v14  ;;  %v13106_v49 = vadd.f32 1.0, %v22197_v40  ;;  %v17671_v14 = vmul.f32 -1.442695, %v25277_v43 }
 0xa85   : > { %22200 = vpow2.f32 %v17665_v5 }
 0xa86   : > { %12975 = vrot.lane.b32.xlu0 %v22191_v56, %s22374_s21  ;;  %22202 = vpow2.f32 %v17668_v6  ;;  %v12851_v56 = vadd.f32 1.0, %v25185_v46  ;;  %v25327_v6 = vpop.permute.xlu1 %12923 }
 0xa87   : > { %13011 = vrot.lane.b32.xlu1 %v12990_v24, %s26104_s2  ;;  %22204 = vpow2.f32 %v17667_v41 }
 0xa88   : > { %22206 = vpow2.f32 %v17670_v16  ;;  %v17659_v26 = vmul.f32 -1.442695, %v12851_v56  ;;  %v17660_v16 = vmul.f32 -1.442695, %v12852_v37 }
 0xa8a   : > { %22208 = vpow2.f32 %v17659_v26 }
 0xa8b   : > { %13013 = vrot.lane.b32.xlu1 %v12991_v0, %s26104_s2  ;;  %22210 = vrcp.f32 %v13106_v49  ;;  %v12922_v0 = vpop.permute.xlu0 %12921  ;;  %v13405_v49 = vld [vmem:[%s26087_s14] sm:$0xff] }
 0xa8e   : > { %v22199_v55 = vpop.eup %22198 }
 0xa8f   : > { %13063 = vrot.lane.b32.xlu1 %v25221_v21, %s26103_s25  ;;  %v12850_v21 = vadd.f32 1.0, %v25167_v9  ;;  %v22201_v13 = vpop.eup %22200  ;;  %v12881_v20 = vadd.f32 1.0, %v22199_v55  ;;  %v17661_v9 = vmul.f32 -1.442695, %v12853_v29 }
 0xa90   : > { %v22203_v33 = vpop.eup %22202  ;;  %v13105_v24 = vadd.f32 1.0, %v22201_v13 }
 0xa91   : > { %v17658_v28 = vmul.f32 -1.442695, %v12850_v21  ;;  %v22205_v27 = vpop.eup %22204  ;;  %v13108_v25 = vadd.f32 1.0, %v22203_v33  ;;  %v13406_v33 = vld [vmem:[%s26087_s14 + $0x8] sm:$0xff] }
 0xa92   : > { %v22207_v46 = vpop.eup %22206  ;;  %v13107_v51 = vadd.f32 1.0, %v22205_v27  ;;  %v20943_v29 = vpack.c.bf16 %v13406_v33, %v13405_v49 }
 0xa93   : > { %22212 = vpow2.f32 %v17658_v28  ;;  %v13110_v62 = vadd.f32 1.0, %v22207_v46 }
 0xa94   : > { %22214 = vrcp.f32 %v12881_v20  ;;  %v22209_v41 = vpop.eup %22208  ;;  %20944 = vmatprep.subr.bf16.mxu0 %v20943_v29 }
 0xa95   : > { %22216 = vrcp.f32 %v13105_v24  ;;  %v22211_v12 = vpop.eup %22210  ;;  %v12883_v21 = vadd.f32 1.0, %v22209_v41  ;;  %20946 = vmatpush3.bf16.msra.mxu0 %v20943_v29 }
 0xa96   : > { %22218 = vrcp.f32 %v13108_v25 }
 0xa97   : > { %22220 = vpow2.f32 %v17669_v63 }
 0xa98   : > { %22222 = vpow2.f32 %v17661_v9  ;;  %v17662_v9 = vmul.f32 -1.442695, %v12854_v36 }
 0xa99   : > { %22224 = vrcp.f32 %v13107_v51 }
 0xa9a   : > { %22226 = vrcp.f32 %v13110_v62 }
 0xa9b   : > { %22228 = vpow2.f32 %v17671_v14 }
 0xa9c   : > { %22230 = vpow2.f32 %v17660_v16 }
 0xa9d   : > { %v22213_v40 = vpop.eup %22212  ;;  %22232 = vrcp.f32 %v12883_v21 }
 0xa9e   : > { %v22215_v13 = vpop.eup %22214  ;;  %v12882_v21 = vadd.f32 1.0, %v22213_v40  ;;  %22234 = vpow2.f32 %v17662_v9 }
 0xa9f   : > { %v22217_v43 = vpop.eup %22216  ;;  %v12945_v14 = vmul.f32 %v22215_v13, %v12922_v0 }
 0xaa0   : > { %v22219_v28 = vpop.eup %22218 }
 0xaa1   : > { %v22221_v24 = vpop.eup %22220 }
 0xaa2   : > { %v22223_v46 = vpop.eup %22222  ;;  %v13109_v62 = vadd.f32 1.0, %v22221_v24 }
 0xaa3   : > { %v22225_v63 = vpop.eup %22224  ;;  %v12885_v41 = vadd.f32 1.0, %v22223_v46 }
 0xaa4   : > { %v22227_v51 = vpop.eup %22226  ;;  %22236 = vrcp.f32 %v13109_v62 }
 0xaa5   : > { %v22229_v37 = vpop.eup %22228  ;;  %22238 = vrcp.f32 %v12885_v41 }
 0xaa6   : > { %v13111_v36 = vadd.f32 1.0, %v22229_v37  ;;  %v22231_v33 = vpop.eup %22230  ;;  %22240 = vrcp.f32 %v12882_v21 }
 0xaa8   : > { %22242 = vrcp.f32 %v13111_v36 }
 0xad4   : > { %v13002_v5 = vpop.permute.xlu0 %13001 }
 0xad8   : > { %v13220_v56 = vpop.permute.xlu0 %13219 }
 0xad9   : > { %v13242_v26 = vmul.f32 %v22211_v12, %v13220_v56  ;;  %v25329_v55 = vpop.permute.xlu1 %13003  ;;  %v12855_v12 = vadd.f32 1.0, %v25209_v48 }
 0xadb   : > { %13259 = vrot.lane.b32.xlu1 %v13242_v26, %s26104_s2  ;;  %v13025_v26 = vadd.f32 %v13002_v5, %v12945_v14  ;;  %v17663_v0 = vmul.f32 -1.442695, %v12855_v12  ;;  %v13407_v5 = vld [vmem:[%s26087_s14 + $0x10] sm:$0xff] }
 0xadc   : > { %v13224_v20 = vpop.permute.xlu0 %13223 }
 0xadd   : > { %v13244_v27 = vmul.f32 %v22219_v28, %v13224_v20  ;;  %v13218_v25 = vpop.permute.xlu1 %13217  ;;  %v13033_v48 = vmul.f32 %v13025_v26, %v23564_v11  ;;  %v22233_v28 = vpop.eup %22232  ;;  %v13408_v20 = vld [vmem:[%s26087_s14 + $0x18] sm:$0xff]  ;;  %22244 = vpow2.f32 %v17663_v0 }
 0xade   : > { %v13241_v34 = vmul.f32 %v22217_v43, %v13218_v25  ;;  %v20947_v24 = vpack.c.bf16 %v13408_v20, %v13407_v5 }
 0xadf   : > { %13263 = vrot.lane.b32.xlu1 %v13244_v27, %s26104_s2  ;;  %v12884_v27 = vadd.f32 1.0, %v22231_v33 }
 0xae0   : > { %13257 = vrot.lane.b32.xlu0 %v13241_v34, %s26104_s2  ;;  %v13228_v16 = vpop.permute.xlu0 %13227  ;;  %20948 = vmatprep.subr.bf16.mxu0 %v20947_v24  ;;  %v22235_v34 = vpop.eup %22234 }
 0xae1   : > { %v13222_v56 = vpop.permute.xlu1 %13221  ;;  %v13246_v43 = vmul.f32 %v22227_v51, %v13228_v16  ;;  %20950 = vmatpush3.bf16.msra.mxu0 %v20947_v24  ;;  %v22237_v51 = vpop.eup %22236  ;;  %22246 = vrcp.f32 %v12884_v27  ;;  %v13393_v16 = vld [vmem:[%s26086_s13] sm:$0xff]  ;;  %v12886_v36 = vadd.f32 1.0, %v22235_v34 }
 0xae2   : > { %v13243_v49 = vmul.f32 %v22225_v63, %v13222_v56  ;;  %v17656_v63 = vmul.f32 -1.442695, %v25203_v3  ;;  %v22239_v14 = vpop.eup %22238  ;;  %v13394_v56 = vld [vmem:[%s26086_s13 + $0x8] sm:$0xff] }
 0xae3   : > { %13267 = vrot.lane.b32.xlu1 %v13246_v43, %s26104_s2  ;;  %v22241_v41 = vpop.eup %22240  ;;  %v25363_v43 = vpack.c.bf16 %v13394_v56, %v13393_v16 }
 0xae4   : > { %13261 = vrot.lane.b32.xlu0 %v13243_v49, %s26104_s2  ;;  %v12926_v13 = vpop.permute.xlu0 %12925  ;;  %22248 = vpow2.f32 %v17656_v63  ;;  %v12946_v21 = vmul.f32 %v22241_v41, %v25327_v6  ;;  %v22243_v49 = vpop.eup %22242 }
 0xae5   : > { %v12947_v40 = vmul.f32 %v22233_v28, %v12926_v13  ;;  %v13226_v62 = vpop.permute.xlu1 %13225  ;;  %20952 = vmatprep.subr.bf16.mxu0 %v25363_v43  ;;  %22250 = vrcp.f32 %v12886_v36 }
 0xae6   : > { %v13245_v37 = vmul.f32 %v22237_v51, %v13226_v62 }
 0xae7   : > { %13345 = vrot.lane.b32.xlu1 %v13033_v48, %s26103_s25  ;;  %v22245_v33 = vpop.eup %22244  ;;  %v13026_v48 = vadd.f32 %v25329_v55, %v12946_v21 }
 0xae8   : > { %v13006_v29 = vpop.permute.xlu0 %13005  ;;  %13265 = vrot.lane.b32.xlu0 %v13245_v37, %s26104_s2  ;;  %v12887_v6 = vadd.f32 1.0, %v22245_v33 }
 0xae9   : > { %v13027_v25 = vadd.f32 %v13006_v29, %v12947_v40  ;;  %v13230_v0 = vpop.permute.xlu1 %13229  ;;  %v13034_v20 = vmul.f32 %v13026_v48, %v23554_v23 }
 0xaea   : > { %v13247_v28 = vmul.f32 %v22243_v49, %v13230_v0  ;;  %22252 = vrcp.f32 %v12887_v6  ;;  %v13137_v6 = vadd.f32 1.0, %v25259_v7 }
 0xaeb   : > { %v13035_v46 = vmul.f32 %v13027_v25, %v23560_v39  ;;  %v22247_v29 = vpop.eup %22246 }
 0xaec   : > { %v12930_v9 = vpop.permute.xlu0 %12929  ;;  %13269 = vrot.lane.b32.xlu0 %v13247_v28, %s26104_s2 }
 0xaed   : > { %13349 = vrot.lane.b32.xlu1 %v13035_v46, %s26103_s25  ;;  %v12949_v12 = vmul.f32 %v22239_v14, %v12930_v9  ;;  %v12928_v5 = vpop.permute.xlu1 %12927 }
 0xaee   : > { %v12948_v24 = vmul.f32 %v22247_v29, %v12928_v5  ;;  %v22249_v27 = vpop.eup %22248  ;;  %v17673_v29 = vmul.f32 -1.442695, %v13137_v6 }
 0xaef   : > { %v12832_v34 = vadd.f32 1.0, %v22249_v27  ;;  %v22251_v9 = vpop.eup %22250  ;;  %v13142_v27 = vadd.f32 1.0, %v25274_v35  ;;  %v13143_v35 = vadd.f32 1.0, %v25295_v58 }
 0xaf0   : > { %v13010_v26 = vpop.permute.xlu0 %13009  ;;  %13347 = vrot.lane.b32.xlu0 %v13034_v20, %s26103_s25  ;;  %v13140_v20 = vadd.f32 1.0, %v25256_v8 }
 0xaf1   : > { %v13029_v13 = vadd.f32 %v13010_v26, %v12949_v12  ;;  %v13008_v55 = vpop.permute.xlu1 %13007  ;;  %22254 = vrcp.f32 %v12832_v34  ;;  %v12792_v26 = vld [vmem:[#allocation5 + $0x3f] sm:$0x3] }
 0xaf2   : > { %v13028_v25 = vadd.f32 %v13008_v55, %v12948_v24  ;;  %v13139_v24 = vadd.f32 1.0, %v25270_v60  ;;  %v17676_v55 = vmul.f32 -1.442695, %v13140_v20 }
 0xaf3   : > { %v13037_v40 = vmul.f32 %v13029_v13, %v23580_v59 }
 0xaf4   : > { %v13036_v46 = vmul.f32 %v13028_v25, %v23566_v50  ;;  %v12934_v62 = vpop.permute.xlu0 %12933  ;;  %v22253_v41 = vpop.eup %22252  ;;  %v17675_v25 = vmul.f32 -1.442695, %v13139_v24 }
 0xaf5   : > { %13353 = vrot.lane.b32.xlu1 %v13037_v40, %s26103_s25  ;;  %v12932_v63 = vpop.permute.xlu1 %12931  ;;  %v12951_v12 = vmul.f32 %v22253_v41, %v12934_v62  ;;  %v13138_v40 = vadd.f32 1.0, %v25246_v38 }
 0xaf6   : > { %13351 = vrot.lane.b32.xlu0 %v13036_v46, %s26103_s25  ;;  %v12950_v51 = vmul.f32 %v22251_v9, %v12932_v63  ;;  %v17678_v46 = vmul.f32 -1.442695, %v13142_v27  ;;  %v13141_v9 = vadd.f32 1.0, %v25289_v18  ;;  %v22354_v18 = vld [vmem:[#allocation6 + $0xf] sm:$0xff] }
 0xaf7   : > { %v17674_v5 = vmul.f32 -1.442695, %v13138_v40 }
 0xaf8   : > { %v12976_v36 = vpop.permute.xlu0 %12975 }
 0xaf9   : > { %v13012_v14 = vpop.permute.xlu1 %13011 }
 0xafa   : > { %v13030_v37 = vadd.f32 %v13012_v14, %v12950_v51  ;;  %v17677_v14 = vmul.f32 -1.442695, %v13141_v9  ;;  %v22358_v9 = vld [vmem:[#allocation6 + $0x2f] sm:$0xff] }
 0xafb   : > { %v22255_v33 = vpop.eup %22254 }
 0xafc   : > { %v13038_v16 = vmul.f32 %v13030_v37, %v23622_v15  ;;  %v12992_v48 = vmul.f32 %v22255_v33, %v12976_v36 }
 0xafd   : > { %v13014_v56 = vpop.permute.xlu1 %13013 }
 0xafe   : > { %v13031_v21 = vadd.f32 %v13014_v56, %v12951_v12  ;;  %13355 = vrot.lane.b32.xlu0 %v13038_v16, %s26103_s25  ;;  %v17679_v12 = vmul.f32 -1.442695, %v13143_v35 }
 0xb00   : > { %v13039_v49 = vmul.f32 %v13031_v21, %v23651_v32 }
 0xb01   : > { %v25377_v0 = vpop.permute.xlu1 %13063 }
 0xb02   : > { %v25381_v13 = vadd.f32 %v25377_v0, %v25161_v44  ;;  %12935 = vrot.lane.b32.xlu0 %v12792_v26, %s26104_s2  ;;  %13357 = vrot.lane.b32.xlu1 %v13039_v49, %s26103_s25 }
 0xb04   : > { %22256 = vtanh.f32 %v25381_v13 }
 0xb05   : > { %22258 = vpow2.f32 %v17674_v5 }
 0xb06   : > { %13015 = vrot.lane.b32.xlu1 %v12992_v48, %s26104_s2  ;;  %22260 = vpow2.f32 %v17673_v29  ;;  %v22356_v29 = vld [vmem:[#allocation6 + $0x7] sm:$0xff] }
 0xb07   : > { %22262 = vpow2.f32 %v17676_v55 }
 0xb08   : > { %22264 = vpow2.f32 %v17675_v25 }
 0xb09   : > { %22266 = vpow2.f32 %v17678_v46 }
 0xb0e   : > { %v22257_v28 = vpop.eup %22256 }
 0xb0f   : > { %13231 = vrot.lane.b32.xlu0 %v22257_v28, %s22374_s21  ;;  %v22259_v34 = vpop.eup %22258  ;;  %v22355_v28 = vld [vmem:[#allocation6 + $0x1f] sm:$0xff] }
 0xb10   : > { %v22261_v38 = vpop.eup %22260  ;;  %v13170_v63 = vadd.f32 1.0, %v22259_v34 }
 0xb11   : > { %v22263_v7 = vpop.eup %22262  ;;  %v13169_v8 = vadd.f32 1.0, %v22261_v38  ;;  %v22357_v38 = vld [vmem:[#allocation6 + $0x17] sm:$0xff] }
 0xb12   : > { %v22265_v51 = vpop.eup %22264  ;;  %22268 = vrcp.f32 %v13170_v63  ;;  %v13172_v60 = vadd.f32 1.0, %v22263_v7 }
 0xb13   : > { %v22267_v62 = vpop.eup %22266  ;;  %22270 = vrcp.f32 %v13169_v8  ;;  %v13171_v37 = vadd.f32 1.0, %v22265_v51 }
 0xb14   : > { %22272 = vrcp.f32 %v13172_v60  ;;  %v13174_v41 = vadd.f32 1.0, %v22267_v62 }
 0xb15   : > { %22274 = vpow2.f32 %v17677_v14 }
 0xb16   : > { %22276 = vrcp.f32 %v13171_v37  ;;  %v13395_v37 = vld [vmem:[%s26086_s13 + $0x10] sm:$0xff] }
 0xb17   : > { %22278 = vrcp.f32 %v13174_v41 }
 0xb18   : > { %22280 = vpow2.f32 %v17679_v12 }
 0xb1c   : > { %v22269_v16 = vpop.eup %22268 }
 0xb1d   : > { %v22271_v56 = vpop.eup %22270  ;;  %v13202_v21 = vmul.f32 %v22354_v18, %v22269_v16  ;;  %v17697_v18 = vld [vmem:[%s26086_s13 + $0x20] sm:$0xff] }
 0xb1e   : > { %v22273_v26 = vpop.eup %22272  ;;  %v13201_v24 = vmul.f32 %v22356_v29, %v22271_v56 }
 0xb1f   : > { %v22275_v36 = vpop.eup %22274  ;;  %v13204_v40 = vmul.f32 %v22355_v28, %v22273_v26 }
 0xb20   : > { %v22277_v48 = vpop.eup %22276  ;;  %v13173_v5 = vadd.f32 1.0, %v22275_v36 }
 0xb21   : > { %v22279_v6 = vpop.eup %22278 }
 0xb22   : > { %v22281_v55 = vpop.eup %22280  ;;  %22282 = vrcp.f32 %v13173_v5  ;;  %v13206_v8 = vmul.f32 %v22358_v9, %v22279_v6 }
 0xb23   : > { %v13175_v63 = vadd.f32 1.0, %v22281_v55 }
 0xb25   : > { %22284 = vrcp.f32 %v13175_v63 }
 0xb2c   : > { %v22283_v56 = vpop.eup %22282 }
 0xb4d   : > { %v13260_v49 = vpop.permute.xlu1 %13259 }
 0xb4e   : > { %v13282_v33 = vadd.f32 %v13260_v49, %v13202_v21  ;;  %v17698_v21 = vld [vmem:[%s26086_s13 + $0x28] sm:$0xff] }
 0xb4f   : > { %v20959_v28 = vpack.c.bf16 %v17698_v21, %v17697_v18 }
 0xb50   : > { %v25396_v58 = vmul.f32 %v13282_v33, %v23554_v23  ;;  %v13203_v23 = vmul.f32 %v22357_v38, %v22277_v48 }
 0xb51   : > { %v13264_v20 = vpop.permute.xlu1 %13263 }
 0xb52   : > { %13378 = vst.msk [vmem:[#allocation6 + $0xf] sm:$0xff] %vm1073_vm3, %v25396_v58  ;;  %v13284_v27 = vadd.f32 %v13264_v20, %v13204_v40  ;;  %v13258_v25 = vpop.permute.xlu0 %13257  ;;  %v22285_v40 = vpop.eup %22284  ;;  %v22360_v20 = vld [vmem:[#allocation6 + $0x37] sm:$0xff] }
 0xb53   : > { %v13281_v46 = vadd.f32 %v13258_v25, %v13201_v24  ;;  %v13207_v29 = vmul.f32 %v22360_v20, %v22285_v40  ;;  %v13080_v24 = vadd.f32 %v25377_v0, %v25159_v57 }
 0xb54   : > { %v25401_v34 = vmul.f32 %v13284_v27, %v23566_v50 }
 0xb55   : > { %v25404_v7 = vmul.f32 %v13281_v46, %v23564_v11  ;;  %v13268_v51 = vpop.permute.xlu1 %13267 }
 0xb56   : > { %13380 = vst.msk [vmem:[#allocation6 + $0x1f] sm:$0xff] %vm1073_vm3, %v25401_v34  ;;  %v13262_v60 = vpop.permute.xlu0 %13261  ;;  %v13286_v62 = vadd.f32 %v13268_v51, %v13206_v8  ;;  %v17699_v51 = vld [vmem:[%s26086_s13 + $0x30] sm:$0xff] }
 0xb57   : > { %13377 = vst.msk [vmem:[#allocation6 + $0x7] sm:$0xff] %vm1073_vm3, %v25404_v7  ;;  %v13283_v50 = vadd.f32 %v13262_v60, %v13203_v23  ;;  %v17700_v60 = vld [vmem:[%s26086_s13 + $0x38] sm:$0xff] }
 0xb58   : > { %v25411_v14 = vmul.f32 %v13286_v62, %v23622_v15  ;;  %v12856_v15 = vadd.f32 1.0, %v25203_v3  ;;  %v22359_v3 = vld [vmem:[#allocation6 + $0x27] sm:$0xff] }
 0xb59   : > { %v25414_v35 = vmul.f32 %v13283_v50, %v23560_v39  ;;  %v25416_v11 = vpop.permute.xlu1 %13345  ;;  %v13396_v39 = vld [vmem:[%s26086_s13 + $0x18] sm:$0xff]  ;;  %v13205_v36 = vmul.f32 %v22359_v3, %v22283_v56  ;;  %v20963_v50 = vpack.c.bf16 %v17700_v60, %v17699_v51 }
 0xb5a   : > { %13382 = vst.msk [vmem:[#allocation6 + $0x2f] sm:$0xff] %vm1073_vm3, %v25411_v14  ;;  %13369 = vst.msk [vmem:[#allocation5 + $0x7] sm:$0xff] %vm1073_vm3, %v25416_v11  ;;  %v20955_v16 = vpack.c.bf16 %v13396_v39, %v13395_v37  ;;  %v17664_v26 = vmul.f32 -1.442695, %v12856_v15  ;;  %v13266_v6 = vpop.permute.xlu0 %13265  ;;  %v17709_v39 = vld [vmem:[%s26087_s14 + $0x20] sm:$0xff]  ;;  %v17710_v15 = vld [vmem:[%s26087_s14 + $0x28] sm:$0xff] }
 0xb5b   : > { %13379 = vst.msk [vmem:[#allocation6 + $0x17] sm:$0xff] %vm1073_vm3, %v25414_v35  ;;  %v13285_v5 = vadd.f32 %v13266_v6, %v13205_v36  ;;  %v20967_v18 = vpack.c.bf16 %v17710_v15, %v17709_v39  ;;  %v17722_v39 = vld [vmem:[%s26086_s13 + $0x48] sm:$0xff] }
 0xb5c   : > { %22286 = vpow2.f32 %v17664_v26 }
 0xb5e   : > { %v13397_v41 = vld [vmem:[#allocation6] sm:$0xff]  ;;  %v25431_v12 = vld [vmem:[#allocation6 + $0x8] sm:$0xff]  ;;  %v13270_v55 = vpop.permute.xlu0 %13269 }
 0xb5f   : > { %19975 = vmatprep.mubr.msk.f32.mxu0 %vm1073_vm3, %v13397_v41  ;;  %v25440_v49 = vpop.permute.xlu1 %13349  ;;  %v13287_v27 = vadd.f32 %v13270_v55, %v13207_v29 }
 0xb60   : > { %19976 = vmatmul.mubr.msk.f32.vlgmr.msra.gmra.mrb[24].mxu0 %vm1073_vm3, %v25431_v12  ;;  %13371 = vst.msk [vmem:[#allocation5 + $0x17] sm:$0xff] %vm1073_vm3, %v25440_v49 }
 0xb61   : > { %20954 = vmatpush3.bf16.msra.mxu0 %v25363_v43  ;;  %v25456_v43 = vmul.f32 %v13285_v5, %v23580_v59  ;;  %v25467_v46 = vmul.f32 %v13287_v27, %v23651_v32  ;;  %v17672_v59 = vmul.f32 -1.442695, %v13080_v24  ;;  %v13385_v62 = vld [vmem:[#allocation5] sm:$0xff] }
 0xb62   : > { %v25447_v33 = vld [vmem:[#allocation6 + $0x10] sm:$0xff]  ;;  %v25449_v48 = vld [vmem:[#allocation6 + $0x18] sm:$0xff]  ;;  %20956 = vmatprep.subr.bf16.mxu0 %v20955_v16  ;;  %v25469_v38 = vpop.permute.xlu0 %13347 }
 0xb63   : > { %19978 = vmatprep.mubr.msk.f32.mxu0 %vm1073_vm3, %v25447_v33  ;;  %13381 = vst.msk [vmem:[#allocation6 + $0x27] sm:$0xff] %vm1073_vm3, %v25456_v43  ;;  %13383 = vst.msk [vmem:[#allocation6 + $0x37] sm:$0xff] %vm1073_vm3, %v25467_v46  ;;  %22288 = vpow2.f32 %v17672_v59  ;;  %v17711_v59 = vld [vmem:[%s26087_s14 + $0x30] sm:$0xff] }
 0xb64   : > { %19979 = vmatmul.mubr.msk.f32.gmra.mrb[26].mxu0 %vm1073_vm3, %v25449_v48  ;;  %13370 = vst.msk [vmem:[#allocation5 + $0xf] sm:$0xff] %vm1073_vm3, %v25469_v38 }
 0xb65   : > { %20958 = vmatpush3.bf16.msra.mxu0 %v20955_v16 }
 0xb66   : > { %20960 = vmatprep.subr.bf16.mxu0 %v20959_v28  ;;  %v22287_v57 = vpop.eup %22286 }
 0xb67   : > { %v25462_v25 = vpop.permute.xlu1 %13353  ;;  %v12888_v32 = vadd.f32 1.0, %v22287_v57  ;;  %v17712_v57 = vld [vmem:[%s26087_s14 + $0x38] sm:$0xff] }
 0xb68   : > { %13373 = vst.msk [vmem:[#allocation5 + $0x27] sm:$0xff] %vm1073_vm3, %v25462_v25  ;;  %v25481_v63 = vpop.permute.xlu0 %13351 }
 0xb69   : > { %13372 = vst.msk [vmem:[#allocation5 + $0x1f] sm:$0xff] %vm1073_vm3, %v25481_v63  ;;  %22290 = vrcp.f32 %v12888_v32  ;;  %v13667_v32 = vld [vmem:[#allocation5 + $0x1] sm:$0xff] }
 0xb6a   : > { %v25475_v0 = vld [vmem:[#allocation6 + $0x20] sm:$0xff]  ;;  %v25477_v23 = vld [vmem:[#allocation6 + $0x28] sm:$0xff]  ;;  %v25487_v9 = vld [vmem:[#allocation6 + $0x30] sm:$0xff] }
 0xb6b   : > { %19981 = vmatprep.mubr.msk.f32.mxu0 %vm1073_vm3, %v25475_v0  ;;  %v13404_v8 = vld [vmem:[#allocation6 + $0x38] sm:$0x3]  ;;  %v25499_v37 = vld [vmem:[#allocation5 + $0x8] sm:$0xff]  ;;  %v25511_v56 = vld [vmem:[#allocation5 + $0x10] sm:$0xff] }
 0xb6c   : > { %19982 = vmatmul.mubr.msk.f32.gmra.mrb[28].mxu0 %vm1073_vm3, %v25477_v23 }
 0xb6d   : > { %19984 = vmatprep.mubr.msk.f32.mxu0 %vm1073_vm3, %v25487_v9  ;;  %v22289_v41 = vpop.eup %22288 }
 0xb6e   : > { %v13112_v21 = vadd.f32 1.0, %v22289_v41  ;;  %v13669_v41 = vld [vmem:[#allocation5 + $0x11] sm:$0xff] }
 0xb70   : > { %19985 = vmatmul.mubr.msk.f32.gmra.mrb[30].mxu0 %vm1073_vm3, %v13404_v8  ;;  %v25507_v16 = vpop.permute.xlu0 %13355  ;;  %v25517_v26 = vld [vmem:[#allocation5 + $0x18] sm:$0xff]  ;;  %v25523_v40 = vld [vmem:[#allocation5 + $0x20] sm:$0xff]  ;;  %22292 = vrcp.f32 %v13112_v21  ;;  %v20971_v8 = vpack.c.bf16 %v17712_v57, %v17711_v59  ;;  %v13821_v59 = vld [vmem:[#allocation6 + $0x21] sm:$0xff] }
 0xb71   : > { %19995 = vmatprep.mubr.msk.f32.mxu0 %vm1073_vm3, %v13385_v62  ;;  %13374 = vst.msk [vmem:[#allocation5 + $0x2f] sm:$0xff] %vm1073_vm3, %v25507_v16  ;;  %v13668_v62 = vld [vmem:[#allocation5 + $0x9] sm:$0xff]  ;;  %v13670_v21 = vld [vmem:[#allocation5 + $0x19] sm:$0xff]  ;;  %v13822_v57 = vld [vmem:[#allocation6 + $0x29] sm:$0xff] }
 0xb74   : > { %19996 = vmatmul.mubr.msk.f32.vlgmr.msra.gmra.mrb[24].mxu0 %vm1073_vm3, %v25499_v37  ;;  %v12936_v3 = vpop.permute.xlu0 %12935  ;;  %v25521_v36 = vpop.permute.xlu1 %13357 }
 0xb75   : > { %19998 = vmatprep.mubr.msk.f32.mxu0 %vm1073_vm3, %v25511_v56  ;;  %20962 = vmatpush3.bf16.msra.mxu0 %v20959_v28  ;;  %13375 = vst.msk [vmem:[#allocation5 + $0x37] sm:$0xff] %vm1073_vm3, %v25521_v36  ;;  %v22291_v28 = vpop.eup %22290 }
 0xb76   : > { %20964 = vmatprep.subr.bf16.mxu0 %v20963_v50  ;;  %v12952_v6 = vmul.f32 %v22291_v28, %v12936_v3  ;;  %v13671_v3 = vld [vmem:[#allocation5 + $0x21] sm:$0xff] }
 0xb78   : > { %19999 = vmatmul.mubr.msk.f32.gmra.mrb[26].mxu0 %vm1073_vm3, %v25517_v26  ;;  %v13016_v5 = vpop.permute.xlu1 %13015  ;;  %v25529_v20 = vld [vmem:[#allocation5 + $0x28] sm:$0xff] }
 0xb79   : > { %20001 = vmatprep.mubr.msk.f32.mxu0 %vm1073_vm3, %v25523_v40  ;;  %20966 = vmatpush3.bf16.msra.mxu0 %v20963_v50  ;;  %v13032_v29 = vadd.f32 %v13016_v5, %v12952_v6  ;;  %v17721_v50 = vld [vmem:[%s26086_s13 + $0x40] sm:$0xff]  ;;  %v13818_v5 = vld [vmem:[#allocation6 + $0x9] sm:$0xff] }
 0xb7a   : > { %20968 = vmatprep.subr.bf16.mxu0 %v20967_v18  ;;  %v22293_v51 = vpop.eup %22292  ;;  %v13817_v6 = vld [vmem:[#allocation6 + $0x1] sm:$0xff] }
 0xb7b   : > { %v13040_v24 = vmul.f32 %v13032_v29, %v23825_v61  ;;  %v17734_v29 = vld [vmem:[%s26087_s14 + $0x48] sm:$0xff] }
 0xb7c   : > { %20002 = vmatmul.mubr.msk.f32.gmra.mrb[28].mxu0 %vm1073_vm3, %v25529_v20  ;;  %v25534_v55 = vld [vmem:[#allocation5 + $0x30] sm:$0xff]  ;;  %v13392_v27 = vld [vmem:[#allocation5 + $0x38] sm:$0x3] }
 0xb7d   : > { %20004 = vmatprep.mubr.msk.f32.mxu0 %vm1073_vm3, %v25534_v55  ;;  %13359 = vrot.lane.b32.xlu1 %v13040_v24, %s26103_s25  ;;  %v13673_v28 = vld [vmem:[#allocation5 + $0x31] sm:$0xff]  ;;  %v13819_v24 = vld [vmem:[#allocation6 + $0x11] sm:$0xff] }
 0xb80   : > { %20005 = vmatmul.mubr.msk.f32.gmra.mrb[30].mxu0 %vm1073_vm3, %v13392_v27  ;;  %v13820_v27 = vld [vmem:[#allocation6 + $0x19] sm:$0xff] }
 0xb81   : > { %20015 = vmatprep.mubr.msk.f32.mxu0 %vm1073_vm3, %v13667_v32  ;;  %v13232_v60 = vpop.permute.xlu0 %13231  ;;  %13305 = vrot.lane.b32.xlu1 %v25169_v31, %s26103_s25  ;;  %v20975_v31 = vpack.c.bf16 %v17722_v39, %v17721_v50  ;;  %v13823_v32 = vld [vmem:[#allocation6 + $0x31] sm:$0xff]  ;;  %v13968_v50 = vld [vmem:[#allocation5 + $0xa] sm:$0xff] }
 0xb82   : > { %v13248_v15 = vmul.f32 %v22293_v51, %v13232_v60  ;;  %v17736_v51 = vld [vmem:[%s26087_s14 + $0x58] sm:$0xff]  ;;  %v17745_v39 = vld [vmem:[%s26086_s13 + $0x60] sm:$0xff] }
 0xb83   : > { %v13967_v60 = vld [vmem:[#allocation5 + $0x2] sm:$0xff] }
 0xb84   : > { %20016 = vmatmul.mubr.msk.f32.vlgmr.msra.gmra.mrb[24].mxu0 %vm1073_vm3, %v13668_v62  ;;  %13271 = vrot.lane.b32.xlu0 %v13248_v15, %s26104_s2  ;;  %v17746_v15 = vld [vmem:[%s26086_s13 + $0x68] sm:$0xff] }
 0xb85   : > { %20018 = vmatprep.mubr.msk.f32.mxu0 %vm1073_vm3, %v13669_v41  ;;  %20970 = vmatpush3.bf16.msra.mxu0 %v20967_v18  ;;  %v13672_v18 = vld [vmem:[#allocation5 + $0x29] sm:$0xff]  ;;  %v13969_v41 = vld [vmem:[#allocation5 + $0x12] sm:$0xff] }
 0xb86   : > { %20972 = vmatprep.subr.bf16.mxu0 %v20971_v8  ;;  %13309 = vrot.lane.b32.xlu1 %v25181_v30, %s26103_s25  ;;  %v13674_v30 = vld [vmem:[#allocation5 + $0x39] sm:$0x3] }
 0xb88   : > { %20019 = vmatmul.mubr.msk.f32.gmra.mrb[26].mxu0 %vm1073_vm3, %v13670_v21  ;;  %13307 = vrot.lane.b32.xlu0 %v25163_v17, %s26103_s25  ;;  %v17723_v17 = vld [vmem:[%s26086_s13 + $0x50] sm:$0xff] }
 0xb89   : > { %20021 = vmatprep.mubr.msk.f32.mxu0 %vm1073_vm3, %v13671_v3  ;;  %20974 = vmatpush3.bf16.msra.mxu0 %v20971_v8  ;;  %v13824_v8 = vld [vmem:[#allocation6 + $0x39] sm:$0x3] }
 0xb8a   : > { %20976 = vmatprep.subr.bf16.mxu0 %v20975_v31  ;;  %13313 = vrot.lane.b32.xlu1 %v25193_v52, %s26103_s25  ;;  %v17724_v52 = vld [vmem:[%s26086_s13 + $0x58] sm:$0xff] }
 0xb8b   : > { %v13970_v21 = vld [vmem:[#allocation5 + $0x1a] sm:$0xff]  ;;  %v13971_v3 = vld [vmem:[#allocation5 + $0x22] sm:$0xff] }
 0xb8c   : > { %20022 = vmatmul.mubr.msk.f32.gmra.mrb[28].mxu0 %vm1073_vm3, %v13672_v18  ;;  %13311 = vrot.lane.b32.xlu0 %v25175_v4, %s26103_s25  ;;  %v20979_v4 = vpack.c.bf16 %v17724_v52, %v17723_v17  ;;  %v13972_v18 = vld [vmem:[#allocation5 + $0x2a] sm:$0xff]  ;;  %v17747_v17 = vld [vmem:[%s26086_s13 + $0x70] sm:$0xff]  ;;  %v17748_v52 = vld [vmem:[%s26086_s13 + $0x78] sm:$0xff] }
 0xb8d   : > { %20024 = vmatprep.mubr.msk.f32.mxu0 %vm1073_vm3, %v13673_v28  ;;  %v13973_v28 = vld [vmem:[#allocation5 + $0x32] sm:$0xff] }
 0xb8e   : > { %13317 = vrot.lane.b32.xlu1 %v25205_v42, %s26103_s25  ;;  %v17733_v42 = vld [vmem:[%s26087_s14 + $0x40] sm:$0xff] }
 0xb90   : > { %20025 = vmatmul.mubr.msk.f32.gmra.mrb[30].mxu0 %vm1073_vm3, %v13674_v30  ;;  %13315 = vrot.lane.b32.xlu0 %v25187_v1, %s26103_s25  ;;  %v20983_v1 = vpack.c.bf16 %v17734_v29, %v17733_v42  ;;  %v13974_v30 = vld [vmem:[#allocation5 + $0x3a] sm:$0x3]  ;;  %v17757_v42 = vld [vmem:[%s26087_s14 + $0x60] sm:$0xff]  ;;  %v17758_v29 = vld [vmem:[%s26087_s14 + $0x68] sm:$0xff] }
 0xb91   : > { %20035 = vmatprep.mubr.msk.f32.mxu0 %vm1073_vm3, %v13817_v6  ;;  %v14117_v6 = vld [vmem:[#allocation6 + $0x2] sm:$0xff] }
 0xb94   : > { %20036 = vmatmul.mubr.msk.f32.vlgmr.msra.gmra.mrb[24].mxu0 %vm1073_vm3, %v13818_v5  ;;  %13319 = vrot.lane.b32.xlu0 %v25199_v53, %s26103_s25  ;;  %v17735_v53 = vld [vmem:[%s26087_s14 + $0x50] sm:$0xff] }
 0xb95   : > { %20038 = vmatprep.mubr.msk.f32.mxu0 %vm1073_vm3, %v13819_v24  ;;  %20978 = vmatpush3.bf16.msra.mxu0 %v20975_v31  ;;  %v20987_v62 = vpack.c.bf16 %v17736_v51, %v17735_v53  ;;  %v20991_v31 = vpack.c.bf16 %v17746_v15, %v17745_v39  ;;  %v14118_v5 = vld [vmem:[#allocation6 + $0xa] sm:$0xff]  ;;  %v14119_v24 = vld [vmem:[#allocation6 + $0x12] sm:$0xff]  ;;  %v17769_v39 = vld [vmem:[%s26086_s13 + $0x80] sm:$0xff] }
 0xb96   : > { %20980 = vmatprep.subr.bf16.mxu0 %v20979_v4  ;;  %v17759_v53 = vld [vmem:[%s26087_s14 + $0x70] sm:$0xff]  ;;  %v17760_v51 = vld [vmem:[%s26087_s14 + $0x78] sm:$0xff]  ;;  %v17770_v15 = vld [vmem:[%s26086_s13 + $0x88] sm:$0xff] }
 0xb98   : > { %20039 = vmatmul.mubr.msk.f32.gmra.mrb[26].mxu0 %vm1073_vm3, %v13820_v27  ;;  %v14120_v27 = vld [vmem:[#allocation6 + $0x1a] sm:$0xff] }
 0xb99   : > { %20041 = vmatprep.mubr.msk.f32.mxu0 %vm1073_vm3, %v13821_v59  ;;  %20982 = vmatpush3.bf16.msra.mxu0 %v20979_v4  ;;  %v20995_v4 = vpack.c.bf16 %v17748_v52, %v17747_v17  ;;  %v14121_v59 = vld [vmem:[#allocation6 + $0x22] sm:$0xff] }
 0xb9a   : > { %20984 = vmatprep.subr.bf16.mxu0 %v20983_v1 }
 0xb9c   : > { %20042 = vmatmul.mubr.msk.f32.gmra.mrb[28].mxu0 %vm1073_vm3, %v13822_v57  ;;  %v14122_v57 = vld [vmem:[#allocation6 + $0x2a] sm:$0xff] }
 0xb9d   : > { %20044 = vmatprep.mubr.msk.f32.mxu0 %vm1073_vm3, %v13823_v32  ;;  %v14123_v32 = vld [vmem:[#allocation6 + $0x32] sm:$0xff] }
 0xba0   : > { %20045 = vmatmul.mubr.msk.f32.gmra.mrb[30].mxu0 %vm1073_vm3, %v13824_v8  ;;  %v14124_v8 = vld [vmem:[#allocation6 + $0x3a] sm:$0x3] }
 0xba1   : > { %20055 = vmatprep.mubr.msk.f32.mxu0 %vm1073_vm3, %v13967_v60  ;;  %v14267_v60 = vld [vmem:[#allocation5 + $0x6] sm:$0xff] }
 0xba4   : > { %20056 = vmatmul.mubr.msk.f32.vlgmr.msra.gmra.mrb[24].mxu0 %vm1073_vm3, %v13968_v50  ;;  %v25644_v50 = vld [vmem:[#allocation5 + $0xe] sm:$0xff] }
 0xba5   : > { %20058 = vmatprep.mubr.msk.f32.mxu0 %vm1073_vm3, %v13969_v41  ;;  %20986 = vmatpush3.bf16.msra.mxu0 %v20983_v1  ;;  %v20999_v1 = vpack.c.bf16 %v17758_v29, %v17757_v42  ;;  %v25654_v41 = vld [vmem:[#allocation5 + $0x16] sm:$0xff]  ;;  %v22361_v42 = vld [vmem:[#allocation6 + $0x3f] sm:$0x3] }
 0xba6   : > { %20988 = vmatprep.subr.bf16.mxu0 %v20987_v62 }
 0xba8   : > { %20059 = vmatmul.mubr.msk.f32.gmra.mrb[26].mxu0 %vm1073_vm3, %v13970_v21  ;;  %v25658_v21 = vld [vmem:[#allocation5 + $0x1e] sm:$0xff] }
 0xba9   : > { %20061 = vmatprep.mubr.msk.f32.mxu0 %vm1073_vm3, %v13971_v3  ;;  %20990 = vmatpush3.bf16.msra.mxu0 %v20987_v62  ;;  %v21003_v62 = vpack.c.bf16 %v17760_v51, %v17759_v53  ;;  %v25662_v3 = vld [vmem:[#allocation5 + $0x26] sm:$0xff]  ;;  %v25692_v53 = vld [vmem:[#allocation6 + $0xe] sm:$0xff] }
 0xbaa   : > { %20992 = vmatprep.subr.bf16.mxu0 %v20991_v31  ;;  %v17781_v51 = vld [vmem:[%s26087_s14 + $0x80] sm:$0xff] }
 0xbac   : > { %20062 = vmatmul.mubr.msk.f32.gmra.mrb[28].mxu0 %vm1073_vm3, %v13972_v18  ;;  %v25666_v18 = vld [vmem:[#allocation5 + $0x2e] sm:$0xff] }
 0xbad   : > { %20064 = vmatprep.mubr.msk.f32.mxu0 %vm1073_vm3, %v13973_v28  ;;  %v25670_v28 = vld [vmem:[#allocation5 + $0x36] sm:$0xff] }
 0xbb0   : > { %20065 = vmatmul.mubr.msk.f32.gmra.mrb[30].mxu0 %vm1073_vm3, %v13974_v30  ;;  %v13144_v30 = vadd.f32 1.0, %v25381_v13  ;;  %v17771_v13 = vld [vmem:[%s26086_s13 + $0x90] sm:$0xff] }
 0xbb1   : > { %20075 = vmatprep.mubr.msk.f32.mxu0 %vm1073_vm3, %v14117_v6 }
 0xbb2   : > { %v17680_v17 = vmul.f32 -1.442695, %v13144_v30  ;;  %v25714_v30 = vld [vmem:[#allocation6 + $0x2e] sm:$0xff] }
 0xbb4   : > { %20076 = vmatmul.mubr.msk.f32.vlgmr.msra.gmra.mrb[24].mxu0 %vm1073_vm3, %v14118_v5  ;;  %22294 = vpow2.f32 %v17680_v17 }
 0xbb5   : > { %20078 = vmatprep.mubr.msk.f32.mxu0 %vm1073_vm3, %v14119_v24  ;;  %20994 = vmatpush3.bf16.msra.mxu0 %v20991_v31  ;;  %v21007_v31 = vpack.c.bf16 %v17770_v15, %v17769_v39  ;;  %v25706_v39 = vld [vmem:[#allocation6 + $0x1e] sm:$0xff]  ;;  %v25710_v15 = vld [vmem:[#allocation6 + $0x26] sm:$0xff] }
 0xbb6   : > { %20996 = vmatprep.subr.bf16.mxu0 %v20995_v4 }
 0xbb8   : > { %20079 = vmatmul.mubr.msk.f32.gmra.mrb[26].mxu0 %vm1073_vm3, %v14120_v27 }
 0xbb9   : > { %20081 = vmatprep.mubr.msk.f32.mxu0 %vm1073_vm3, %v14121_v59  ;;  %20998 = vmatpush3.bf16.msra.mxu0 %v20995_v4  ;;  %v17772_v59 = vld [vmem:[%s26086_s13 + $0x98] sm:$0xff] }
 0xbba   : > { %21000 = vmatprep.subr.bf16.mxu0 %v20999_v1 }
 0xbbc   : > { %20082 = vmatmul.mubr.msk.f32.gmra.mrb[28].mxu0 %vm1073_vm3, %v14122_v57  ;;  %v14417_v57 = vld [vmem:[#allocation6 + $0x6] sm:$0xff] }
 0xbbd   : > { %20084 = vmatprep.mubr.msk.f32.mxu0 %vm1073_vm3, %v14123_v32 }
 0xbbe   : > { %v22295_v52 = vpop.eup %22294 }
 0xbbf   : > { %v13176_v6 = vadd.f32 1.0, %v22295_v52  ;;  %v17783_v52 = vld [vmem:[%s26087_s14 + $0x90] sm:$0xff] }
 0xbc0   : > { %20085 = vmatmul.mubr.msk.f32.gmra.mrb[30].mxu0 %vm1073_vm3, %v14124_v8  ;;  %v21011_v8 = vpack.c.bf16 %v17772_v59, %v17771_v13  ;;  %v14570_v59 = vld [vmem:[#allocation5 + $0x1f] sm:$0xff] }
 0xbc1   : > { %20095 = vmatprep.mubr.msk.f32.mxu0 %vm1073_vm3, %v14267_v60  ;;  %22296 = vrcp.f32 %v13176_v6  ;;  %v17782_v60 = vld [vmem:[%s26087_s14 + $0x88] sm:$0xff]  ;;  %v17784_v6 = vld [vmem:[%s26087_s14 + $0x98] sm:$0xff] }
 0xbc4   : > { %20096 = vmatmul.mubr.msk.f32.vlgmr.msra.gmra.mrb[24].mxu0 %vm1073_vm3, %v25644_v50 }
 0xbc5   : > { %20098 = vmatprep.mubr.msk.f32.mxu0 %vm1073_vm3, %v25654_v41  ;;  %21002 = vmatpush3.bf16.msra.mxu0 %v20999_v1 }
 0xbc6   : > { %21004 = vmatprep.subr.bf16.mxu0 %v21003_v62 }
 0xbc8   : > { %20099 = vmatmul.mubr.msk.f32.gmra.mrb[26].mxu0 %vm1073_vm3, %v25658_v21 }
 0xbc9   : > { %20101 = vmatprep.mubr.msk.f32.mxu0 %vm1073_vm3, %v25662_v3  ;;  %21006 = vmatpush3.bf16.msra.mxu0 %v21003_v62  ;;  %v21015_v62 = vpack.c.bf16 %v17782_v60, %v17781_v51  ;;  %v14573_v51 = vld [vmem:[#allocation5 + $0x37] sm:$0xff] }
 0xbca   : > { %21008 = vmatprep.subr.bf16.mxu0 %v21007_v31 }
 0xbcb   : > { %v22297_v5 = vpop.eup %22296 }
 0xbcc   : > { %20102 = vmatmul.mubr.msk.f32.gmra.mrb[28].mxu0 %vm1073_vm3, %v25666_v18  ;;  %v13208_v29 = vmul.f32 %v22361_v42, %v22297_v5  ;;  %v14567_v5 = vld [vmem:[#allocation5 + $0x7] sm:$0xff]  ;;  %v21019_v42 = vpack.c.bf16 %v17784_v6, %v17783_v52  ;;  %v14717_v52 = vld [vmem:[#allocation6 + $0x7] sm:$0xff] }
 0xbcd   : > { %20104 = vmatprep.mubr.msk.f32.mxu0 %vm1073_vm3, %v25670_v28 }
 0xbef   : > { %v25675_v4 = vpop.permute.xlu1 %13359 }
 0xbf0   : > { %13376 = vst.msk [vmem:[#allocation5 + $0x3f] sm:$0x3] %vm5496_vm4, %v25675_v4 }
 0xbf6   : > { %v13272_v24 = vpop.permute.xlu0 %13271 }
 0xbf7   : > { %v13288_v1 = vadd.f32 %v13272_v24, %v13208_v29  ;;  %v14274_v27 = vld [vmem:[#allocation5 + $0x3e] sm:$0x3]  ;;  %v14568_v29 = vld [vmem:[#allocation5 + $0xf] sm:$0xff] }
 0xbf8   : > { %20105 = vmatmul.mubr.msk.f32.gmra.mrb[30].mxu0 %vm1073_vm3, %v14274_v27  ;;  %v17793_v24 = vld [vmem:[%s26086_s13 + $0xa0] sm:$0xff]  ;;  %v14569_v27 = vld [vmem:[#allocation5 + $0x17] sm:$0xff]  ;;  %v14574_v60 = vld [vmem:[#allocation5 + $0x3f] sm:$0x3] }
 0xbf9   : > { %v25687_v32 = vmul.f32 %v13288_v1, %v23825_v61  ;;  %20115 = vmatprep.mubr.msk.f32.mxu0 %vm1073_vm3, %v14417_v57  ;;  %v25702_v61 = vld [vmem:[#allocation6 + $0x16] sm:$0xff]  ;;  %v17794_v1 = vld [vmem:[%s26086_s13 + $0xa8] sm:$0xff]  ;;  %v14571_v57 = vld [vmem:[#allocation5 + $0x27] sm:$0xff] }
 0xbfa   : > { %v21023_v13 = vpack.c.bf16 %v17794_v1, %v17793_v24  ;;  %v14719_v24 = vld [vmem:[#allocation6 + $0x17] sm:$0xff] }
 0xbfb   : > { %13384 = vst.msk [vmem:[#allocation6 + $0x3f] sm:$0x3] %vm5496_vm4, %v25687_v32 }
 0xbfc   : > { %20116 = vmatmul.mubr.msk.f32.vlgmr.msra.gmra.mrb[24].mxu0 %vm1073_vm3, %v25692_v53 }
 0xbfd   : > { %21010 = vmatpush3.bf16.msra.mxu0 %v21007_v31  ;;  %20118 = vmatprep.mubr.msk.f32.mxu0 %vm1073_vm3, %v25702_v61  ;;  %v25718_v31 = vld [vmem:[#allocation6 + $0x36] sm:$0xff] }
 0xbfe   : > { %21012 = vmatprep.subr.bf16.mxu0 %v21011_v8 }
 0xc00   : > { %20119 = vmatmul.mubr.msk.f32.gmra.mrb[26].mxu0 %vm1073_vm3, %v25706_v39 }
 0xc01   : > { %20121 = vmatprep.mubr.msk.f32.mxu0 %vm1073_vm3, %v25710_v15  ;;  %21014 = vmatpush3.bf16.msra.mxu0 %v21011_v8  ;;  %v14572_v8 = vld [vmem:[#allocation5 + $0x2f] sm:$0xff] }
 0xc02   : > { %21016 = vmatprep.subr.bf16.mxu0 %v21015_v62  ;;  %v14424_v17 = vld [vmem:[#allocation6 + $0x3e] sm:$0x3] }
 0xc04   : > { %20122 = vmatmul.mubr.msk.f32.gmra.mrb[28].mxu0 %vm1073_vm3, %v25714_v30 }
 0xc05   : > { %20124 = vmatprep.mubr.msk.f32.mxu0 %vm1073_vm3, %v25718_v31 }
 0xc08   : > { %20125 = vmatmul.mubr.msk.f32.gmra.mrb[30].mxu0 %vm1073_vm3, %v14424_v17  ;;  %v17796_v17 = vld [vmem:[%s26086_s13 + $0xb8] sm:$0xff] }
 0xc09   : > { %20135 = vmatprep.mubr.msk.f32.mxu0 %vm1073_vm3, %v14567_v5  ;;  %v14718_v5 = vld [vmem:[#allocation6 + $0xf] sm:$0xff] }
 0xc0c   : > { %20136 = vmatmul.mubr.msk.f32.vlgmr.msra.gmra.mrb[24].mxu0 %vm1073_vm3, %v14568_v29  ;;  %v17806_v29 = vld [vmem:[%s26087_s14 + $0xa8] sm:$0xff] }
 0xc0d   : > { %21018 = vmatpush3.bf16.msra.mxu0 %v21015_v62  ;;  %20138 = vmatprep.mubr.msk.f32.mxu0 %vm1073_vm3, %v14569_v27  ;;  %v17795_v62 = vld [vmem:[%s26086_s13 + $0xb0] sm:$0xff]  ;;  %v14720_v27 = vld [vmem:[#allocation6 + $0x1f] sm:$0xff] }
 0xc0e   : > { %21020 = vmatprep.subr.bf16.mxu0 %v21019_v42  ;;  %v21027_v6 = vpack.c.bf16 %v17796_v17, %v17795_v62  ;;  %v17817_v17 = vld [vmem:[%s26086_s13 + $0xc0] sm:$0xff] }
 0xc10   : > { %20139 = vmatmul.mubr.msk.f32.gmra.mrb[26].mxu0 %vm1073_vm3, %v14570_v59  ;;  %v14721_v59 = vld [vmem:[#allocation6 + $0x27] sm:$0xff] }
 0xc11   : > { %20141 = vmatprep.mubr.msk.f32.mxu0 %vm1073_vm3, %v14571_v57  ;;  %21022 = vmatpush3.bf16.msra.mxu0 %v21019_v42  ;;  %v17805_v42 = vld [vmem:[%s26087_s14 + $0xa0] sm:$0xff]  ;;  %v14722_v57 = vld [vmem:[#allocation6 + $0x2f] sm:$0xff] }
 0xc12   : > { %21024 = vmatprep.subr.bf16.mxu0 %v21023_v13  ;;  %v21031_v1 = vpack.c.bf16 %v17806_v29, %v17805_v42 }
 0xc14   : > { %20142 = vmatmul.mubr.msk.f32.gmra.mrb[28].mxu0 %vm1073_vm3, %v14572_v8  ;;  %v14723_v8 = vld [vmem:[#allocation6 + $0x37] sm:$0xff] }
 0xc15   : > { %20144 = vmatprep.mubr.msk.f32.mxu0 %vm1073_vm3, %v14573_v51  ;;  %v14724_v51 = vld [vmem:[#allocation6 + $0x3f] sm:$0x3] }
 0xc18   : > { %20145 = vmatmul.mubr.msk.f32.gmra.mrb[30].mxu0 %vm1073_vm3, %v14574_v60  ;;  %v17808_v60 = vld [vmem:[%s26087_s14 + $0xb8] sm:$0xff] }
 0xc19   : > { %20155 = vmatprep.mubr.msk.f32.mxu0 %vm1073_vm3, %v14717_v52  ;;  %v17818_v52 = vld [vmem:[%s26086_s13 + $0xc8] sm:$0xff] }
 0xc1c   : > { %20156 = vmatmul.mubr.msk.f32.vlgmr.msra.gmra.mrb[24].mxu0 %vm1073_vm3, %v14718_v5  ;;  %v17830_v5 = vld [vmem:[%s26087_s14 + $0xc8] sm:$0xff] }
 0xc1d   : > { %21026 = vmatpush3.bf16.msra.mxu0 %v21023_v13  ;;  %20158 = vmatprep.mubr.msk.f32.mxu0 %vm1073_vm3, %v14719_v24  ;;  %v17807_v13 = vld [vmem:[%s26087_s14 + $0xb0] sm:$0xff] }
 0xc1e   : > { %21028 = vmatprep.subr.bf16.mxu0 %v21027_v6  ;;  %v21035_v62 = vpack.c.bf16 %v17808_v60, %v17807_v13  ;;  %v15168_v24 = vld [vmem:[#allocation5 + $0x14] sm:$0xff]  ;;  %v15173_v13 = vld [vmem:[#allocation5 + $0x3c] sm:$0xff]  ;;  %v15174_v60 = vld [vmem:[#allocation5 + $0x44] sm:$0x3] }
 0xc20   : > { %20159 = vmatmul.mubr.msk.f32.gmra.mrb[26].mxu0 %vm1073_vm3, %v14720_v27  ;;  %v15169_v27 = vld [vmem:[#allocation5 + $0x1c] sm:$0xff] }
 0xc21   : > { %20161 = vmatprep.mubr.msk.f32.mxu0 %vm1073_vm3, %v14721_v59  ;;  %21030 = vmatpush3.bf16.msra.mxu0 %v21027_v6  ;;  %v21039_v6 = vpack.c.bf16 %v17818_v52, %v17817_v17  ;;  %v17844_v17 = vld [vmem:[%s26086_s13 + $0xf8] sm:$0xff]  ;;  %v15317_v52 = vld [vmem:[#allocation6 + $0xc] sm:$0xff] }
 0xc22   : > { %21032 = vmatprep.subr.bf16.mxu0 %v21031_v1 }
 0xc24   : > { %20162 = vmatmul.mubr.msk.f32.gmra.mrb[28].mxu0 %vm1073_vm3, %v14722_v57  ;;  %v15170_v57 = vld [vmem:[#allocation5 + $0x24] sm:$0xff] }
 0xc25   : > { %20164 = vmatprep.mubr.msk.f32.mxu0 %vm1073_vm3, %v14723_v8  ;;  %v15171_v8 = vld [vmem:[#allocation5 + $0x2c] sm:$0xff] }
 0xc28   : > { %20165 = vmatmul.mubr.msk.f32.gmra.mrb[30].mxu0 %vm1073_vm3, %v14724_v51  ;;  %v15172_v51 = vld [vmem:[#allocation5 + $0x34] sm:$0xff] }
 0xc29   : > { %20175 = vmatprep.mubr.msk.f32.mxu0 %vm1073_vm3, %v25499_v37  ;;  %v14873_v37 = vld [vmem:[#allocation5 + $0x38] sm:$0xff] }
 0xc2c   : > { %20176 = vmatmul.mubr.msk.f32.vlgmr.msra.gmra.mrb[24].mxu0 %vm1073_vm3, %v25511_v56  ;;  %v14874_v56 = vld [vmem:[#allocation5 + $0x40] sm:$0x3] }
 0xc2d   : > { %21034 = vmatpush3.bf16.msra.mxu0 %v21031_v1  ;;  %20178 = vmatprep.mubr.msk.f32.mxu0 %vm1073_vm3, %v25517_v26  ;;  %v17819_v26 = vld [vmem:[%s26086_s13 + $0xd0] sm:$0xff]  ;;  %v17842_v1 = vld [vmem:[%s26086_s13 + $0xe8] sm:$0xff] }
 0xc2e   : > { %21036 = vmatprep.subr.bf16.mxu0 %v21035_v62 }
 0xc30   : > { %20179 = vmatmul.mubr.msk.f32.gmra.mrb[26].mxu0 %vm1073_vm3, %v25523_v40  ;;  %v17820_v40 = vld [vmem:[%s26086_s13 + $0xd8] sm:$0xff] }
 0xc31   : > { %20181 = vmatprep.mubr.msk.f32.mxu0 %vm1073_vm3, %v25529_v20  ;;  %21038 = vmatpush3.bf16.msra.mxu0 %v21035_v62  ;;  %v21043_v20 = vpack.c.bf16 %v17820_v40, %v17819_v26  ;;  %v17843_v62 = vld [vmem:[%s26086_s13 + $0xf0] sm:$0xff]  ;;  %v17854_v26 = vld [vmem:[%s26087_s14 + $0xe8] sm:$0xff]  ;;  %v15319_v40 = vld [vmem:[#allocation6 + $0x1c] sm:$0xff] }
 0xc32   : > { %21040 = vmatprep.subr.bf16.mxu0 %v21039_v6 }
 0xc34   : > { %20182 = vmatmul.mubr.msk.f32.gmra.mrb[28].mxu0 %vm1073_vm3, %v25534_v55  ;;  %v17829_v55 = vld [vmem:[%s26087_s14 + $0xc0] sm:$0xff] }
 0xc35   : > { %20184 = vmatprep.mubr.msk.f32.mxu0 %vm1073_vm3, %v14873_v37  ;;  %v21047_v42 = vpack.c.bf16 %v17830_v5, %v17829_v55  ;;  %v15318_v37 = vld [vmem:[#allocation6 + $0x14] sm:$0xff]  ;;  %v15320_v55 = vld [vmem:[#allocation6 + $0x24] sm:$0xff]  ;;  %v15321_v5 = vld [vmem:[#allocation6 + $0x2c] sm:$0xff] }
 0xc38   : > { %20185 = vmatmul.mubr.msk.f32.gmra.mrb[30].mxu0 %vm1073_vm3, %v14874_v56  ;;  %v17853_v56 = vld [vmem:[%s26087_s14 + $0xe0] sm:$0xff] }
 0xc39   : > { %20195 = vmatprep.mubr.msk.f32.mxu0 %vm1073_vm3, %v25431_v12  ;;  %v15023_v12 = vld [vmem:[#allocation6 + $0x38] sm:$0xff] }
 0xc3c   : > { %20196 = vmatmul.mubr.msk.f32.vlgmr.msra.gmra.mrb[24].mxu0 %vm1073_vm3, %v25447_v33  ;;  %v15024_v33 = vld [vmem:[#allocation6 + $0x40] sm:$0x3] }
 0xc3d   : > { %21042 = vmatpush3.bf16.msra.mxu0 %v21039_v6  ;;  %20198 = vmatprep.mubr.msk.f32.mxu0 %vm1073_vm3, %v25449_v48  ;;  %v17831_v48 = vld [vmem:[%s26087_s14 + $0xd0] sm:$0xff]  ;;  %v21059_v6 = vpack.c.bf16 %v17844_v17, %v17843_v62  ;;  %v17868_v17 = vld [vmem:[%s26086_s13 + $0x118] sm:$0xff] }
 0xc3e   : > { %21044 = vmatprep.subr.bf16.mxu0 %v21043_v20  ;;  %v17867_v62 = vld [vmem:[%s26086_s13 + $0x110] sm:$0xff] }
 0xc40   : > { %20199 = vmatmul.mubr.msk.f32.gmra.mrb[26].mxu0 %vm1073_vm3, %v25475_v0  ;;  %v17832_v0 = vld [vmem:[%s26087_s14 + $0xd8] sm:$0xff] }
 0xc41   : > { %20201 = vmatprep.mubr.msk.f32.mxu0 %vm1073_vm3, %v25477_v23  ;;  %21046 = vmatpush3.bf16.msra.mxu0 %v21043_v20  ;;  %v15167_v23 = vld [vmem:[#allocation5 + $0xc] sm:$0xff]  ;;  %v21051_v29 = vpack.c.bf16 %v17832_v0, %v17831_v48  ;;  %v21063_v20 = vpack.c.bf16 %v17854_v26, %v17853_v56  ;;  %v17855_v48 = vld [vmem:[%s26087_s14 + $0xf0] sm:$0xff]  ;;  %v17856_v0 = vld [vmem:[%s26087_s14 + $0xf8] sm:$0xff] }
 0xc42   : > { %21048 = vmatprep.subr.bf16.mxu0 %v21047_v42  ;;  %v17877_v56 = vld [vmem:[%s26087_s14 + $0x100] sm:$0xff]  ;;  %v17878_v26 = vld [vmem:[%s26087_s14 + $0x108] sm:$0xff] }
 0xc44   : > { %20202 = vmatmul.mubr.msk.f32.gmra.mrb[28].mxu0 %vm1073_vm3, %v25487_v9  ;;  %v17841_v9 = vld [vmem:[%s26086_s13 + $0xe0] sm:$0xff] }
 0xc45   : > { %20204 = vmatprep.mubr.msk.f32.mxu0 %vm1073_vm3, %v15023_v12  ;;  %v21055_v59 = vpack.c.bf16 %v17842_v1, %v17841_v9  ;;  %v15323_v12 = vld [vmem:[#allocation6 + $0x3c] sm:$0xff]  ;;  %v17866_v1 = vld [vmem:[%s26086_s13 + $0x108] sm:$0xff] }
 0xc46   : > { %v17865_v9 = vld [vmem:[%s26086_s13 + $0x100] sm:$0xff] }
 0xc48   : > { %20205 = vmatmul.mubr.msk.f32.gmra.mrb[30].mxu0 %vm1073_vm3, %v15024_v33  ;;  %v15324_v33 = vld [vmem:[#allocation6 + $0x44] sm:$0x3] }
 0xc49   : > { %20215 = vmatprep.mubr.msk.f32.mxu0 %vm1073_vm3, %v15167_v23  ;;  %v15467_v23 = vld [vmem:[#allocation5 + $0xd] sm:$0xff] }
 0xc4c   : > { %20216 = vmatmul.mubr.msk.f32.vlgmr.msra.gmra.mrb[24].mxu0 %vm1073_vm3, %v15168_v24  ;;  %v15468_v24 = vld [vmem:[#allocation5 + $0x15] sm:$0xff] }
 0xc4d   : > { %21050 = vmatpush3.bf16.msra.mxu0 %v21047_v42  ;;  %20218 = vmatprep.mubr.msk.f32.mxu0 %vm1073_vm3, %v15169_v27  ;;  %v15322_v42 = vld [vmem:[#allocation6 + $0x34] sm:$0xff] }
 0xc4e   : > { %21052 = vmatprep.subr.bf16.mxu0 %v21051_v29  ;;  %v15469_v27 = vld [vmem:[#allocation5 + $0x1d] sm:$0xff] }
 0xc50   : > { %20219 = vmatmul.mubr.msk.f32.gmra.mrb[26].mxu0 %vm1073_vm3, %v15170_v57  ;;  %v15470_v57 = vld [vmem:[#allocation5 + $0x25] sm:$0xff] }
 0xc51   : > { %20221 = vmatprep.mubr.msk.f32.mxu0 %vm1073_vm3, %v15171_v8  ;;  %21054 = vmatpush3.bf16.msra.mxu0 %v21051_v29  ;;  %v21067_v29 = vpack.c.bf16 %v17856_v0, %v17855_v48  ;;  %v15471_v8 = vld [vmem:[#allocation5 + $0x2d] sm:$0xff]  ;;  %v17879_v48 = vld [vmem:[%s26087_s14 + $0x110] sm:$0xff]  ;;  %v17880_v0 = vld [vmem:[%s26087_s14 + $0x118] sm:$0xff] }
 0xc52   : > { %21056 = vmatprep.subr.bf16.mxu0 %v21055_v59 }
 0xc54   : > { %20222 = vmatmul.mubr.msk.f32.gmra.mrb[28].mxu0 %vm1073_vm3, %v15172_v51  ;;  %v15472_v51 = vld [vmem:[#allocation5 + $0x35] sm:$0xff] }
 0xc55   : > { %20224 = vmatprep.mubr.msk.f32.mxu0 %vm1073_vm3, %v15173_v13  ;;  %v15473_v13 = vld [vmem:[#allocation5 + $0x3d] sm:$0xff] }
 0xc58   : > { %20225 = vmatmul.mubr.msk.f32.gmra.mrb[30].mxu0 %vm1073_vm3, %v15174_v60  ;;  %v15474_v60 = vld [vmem:[#allocation5 + $0x45] sm:$0x3] }
 0xc59   : > { %20235 = vmatprep.mubr.msk.f32.mxu0 %vm1073_vm3, %v15317_v52  ;;  %v15617_v52 = vld [vmem:[#allocation6 + $0xd] sm:$0xff] }
 0xc5c   : > { %20236 = vmatmul.mubr.msk.f32.vlgmr.msra.gmra.mrb[24].mxu0 %vm1073_vm3, %v15318_v37  ;;  %v15618_v37 = vld [vmem:[#allocation6 + $0x15] sm:$0xff] }
 0xc5d   : > { %21058 = vmatpush3.bf16.msra.mxu0 %v21055_v59  ;;  %20238 = vmatprep.mubr.msk.f32.mxu0 %vm1073_vm3, %v15319_v40  ;;  %v21071_v59 = vpack.c.bf16 %v17866_v1, %v17865_v9  ;;  %v15619_v40 = vld [vmem:[#allocation6 + $0x1d] sm:$0xff]  ;;  %v16156_v1 = vld [vmem:[%s26088_s15 + $0x8] sm:$0xff] }
 0xc5e   : > { %21060 = vmatprep.subr.bf16.mxu0 %v21059_v6 }
 0xc60   : > { %20239 = vmatmul.mubr.msk.f32.gmra.mrb[26].mxu0 %vm1073_vm3, %v15320_v55  ;;  %v15620_v55 = vld [vmem:[#allocation6 + $0x25] sm:$0xff] }
 0xc61   : > { %20241 = vmatprep.mubr.msk.f32.mxu0 %vm1073_vm3, %v15321_v5  ;;  %21062 = vmatpush3.bf16.msra.mxu0 %v21059_v6  ;;  %v21075_v6 = vpack.c.bf16 %v17868_v17, %v17867_v62  ;;  %v15621_v5 = vld [vmem:[#allocation6 + $0x2d] sm:$0xff]  ;;  %v16504_v62 = vld [vmem:[%s26090_s17 + $0x18] sm:$0xff] }
 0xc62   : > { %21064 = vmatprep.subr.bf16.mxu0 %v21063_v20 }
 0xc64   : > { %20242 = vmatmul.mubr.msk.f32.gmra.mrb[28].mxu0 %vm1073_vm3, %v15322_v42  ;;  %v15622_v42 = vld [vmem:[#allocation6 + $0x35] sm:$0xff] }
 0xc65   : > { %20244 = vmatprep.mubr.msk.f32.mxu0 %vm1073_vm3, %v15323_v12  ;;  %v15623_v12 = vld [vmem:[#allocation6 + $0x3d] sm:$0xff] }
 0xc68   : > { %20245 = vmatmul.mubr.msk.f32.gmra.mrb[30].mxu0 %vm1073_vm3, %v15324_v33  ;;  %v15624_v33 = vld [vmem:[#allocation6 + $0x45] sm:$0x3] }
 0xc69   : > { %20255 = vmatprep.mubr.msk.f32.mxu0 %vm1073_vm3, %v15467_v23  ;;  %v21083_v23 = vpack.c.bf16 %v17880_v0, %v17879_v48 }
 0xc6c   : > { %20256 = vmatmul.mubr.msk.f32.vlgmr.msra.gmra.mrb[24].mxu0 %vm1073_vm3, %v15468_v24  ;;  %v16160_v24 = vld [vmem:[%s26089_s16 + $0x8] sm:$0xff] }
 0xc6d   : > { %21066 = vmatpush3.bf16.msra.mxu0 %v21063_v20  ;;  %20258 = vmatprep.mubr.msk.f32.mxu0 %vm1073_vm3, %v15469_v27  ;;  %v21079_v20 = vpack.c.bf16 %v17878_v26, %v17877_v56 }
 0xc6e   : > { %21068 = vmatprep.subr.bf16.mxu0 %v21067_v29 }
 0xc70   : > { %20259 = vmatmul.mubr.msk.f32.gmra.mrb[26].mxu0 %vm1073_vm3, %v15470_v57  ;;  %v16501_v57 = vld [vmem:[%s26090_s17] sm:$0xff] }
 0xc71   : > { %20261 = vmatprep.mubr.msk.f32.mxu0 %vm1073_vm3, %v15471_v8  ;;  %21070 = vmatpush3.bf16.msra.mxu0 %v21067_v29  ;;  %v16159_v29 = vld [vmem:[%s26089_s16] sm:$0xff]  ;;  %v16502_v8 = vld [vmem:[%s26090_s17 + $0x8] sm:$0xff] }
 0xc72   : > { %21072 = vmatprep.subr.bf16.mxu0 %v21071_v59  ;;  %v21087_v9 = vpack.c.bf16 %v16160_v24, %v16159_v29 }
 0xc74   : > { %20262 = vmatmul.mubr.msk.f32.gmra.mrb[28].mxu0 %vm1073_vm3, %v15472_v51  ;;  %v16503_v51 = vld [vmem:[%s26090_s17 + $0x10] sm:$0xff] }
 0xc75   : > { %20264 = vmatprep.mubr.msk.f32.mxu0 %vm1073_vm3, %v15473_v13 }
 0xc78   : > { %20265 = vmatmul.mubr.msk.f32.gmra.mrb[30].mxu0 %vm1073_vm3, %v15474_v60  ;;  %v21103_v60 = vpack.c.bf16 %v16502_v8, %v16501_v57 }
 0xc79   : > { %20275 = vmatprep.mubr.msk.f32.mxu0 %vm1073_vm3, %v15617_v52  ;;  %v21107_v52 = vpack.c.bf16 %v16504_v62, %v16503_v51 }
 0xc7c   : > { %20276 = vmatmul.mubr.msk.f32.vlgmr.msra.gmra.mrb[24].mxu0 %vm1073_vm3, %v15618_v37 }
 0xc7d   : > { %21074 = vmatpush3.bf16.msra.mxu0 %v21071_v59  ;;  %20278 = vmatprep.mubr.msk.f32.mxu0 %vm1073_vm3, %v15619_v40  ;;  %v13308_v40 = vpop.permute.xlu0 %13307 }
 0xc7e   : > { %21076 = vmatprep.subr.bf16.mxu0 %v21075_v6  ;;  %v13330_v24 = vadd.f32 %v13308_v40, %v25137_v10 }
 0xc80   : > { %20279 = vmatmul.mubr.msk.f32.gmra.mrb[26].mxu0 %vm1073_vm3, %v15620_v55 }
 0xc81   : > { %20281 = vmatprep.mubr.msk.f32.mxu0 %vm1073_vm3, %v15621_v5  ;;  %21078 = vmatpush3.bf16.msra.mxu0 %v21075_v6  ;;  %v13312_v55 = vpop.permute.xlu0 %13311 }
 0xc82   : > { %21080 = vmatprep.subr.bf16.mxu0 %v21079_v20 }
 0xc84   : > { %20282 = vmatmul.mubr.msk.f32.gmra.mrb[28].mxu0 %vm1073_vm3, %v15622_v42 }
 0xc85   : > { %20284 = vmatprep.mubr.msk.f32.mxu0 %vm1073_vm3, %v15623_v12  ;;  %v13316_v42 = vpop.permute.xlu0 %13315 }
 0xc88   : > { %20285 = vmatmul.mubr.msk.f32.gmra.mrb[30].mxu0 %vm1073_vm3, %v15624_v33 }
 0xc89   : > { %20295 = vmatprep.mubr.msk.f32.mxu0 %vm1073_vm3, %v25644_v50  ;;  %v15773_v50 = vld [vmem:[#allocation5 + $0x3e] sm:$0xff]  ;;  %v13320_v33 = vpop.permute.xlu0 %13319 }
 0xc8c   : > { %20296 = vmatmul.mubr.msk.f32.vlgmr.msra.gmra.mrb[24].mxu0 %vm1073_vm3, %v25654_v41  ;;  %v15774_v41 = vld [vmem:[#allocation5 + $0x46] sm:$0x3] }
 0xc8d   : > { %21082 = vmatpush3.bf16.msra.mxu0 %v21079_v20  ;;  %20298 = vmatprep.mubr.msk.f32.mxu0 %vm1073_vm3, %v25658_v21  ;;  %v16161_v21 = vld [vmem:[%s26089_s16 + $0x10] sm:$0xff]  ;;  %v13306_v20 = vpop.permute.xlu1 %13305 }
 0xc8e   : > { %21084 = vmatprep.subr.bf16.mxu0 %v21083_v23 }
 0xc90   : > { %20299 = vmatmul.mubr.msk.f32.gmra.mrb[26].mxu0 %vm1073_vm3, %v25662_v3  ;;  %v16162_v3 = vld [vmem:[%s26089_s16 + $0x18] sm:$0xff] }
 0xc91   : > { %20301 = vmatprep.mubr.msk.f32.mxu0 %vm1073_vm3, %v25666_v18  ;;  %21086 = vmatpush3.bf16.msra.mxu0 %v21083_v23  ;;  %v21091_v18 = vpack.c.bf16 %v16162_v3, %v16161_v21  ;;  %v13310_v5 = vpop.permute.xlu1 %13309  ;;  %v13332_v3 = vadd.f32 %v13312_v55, %v25145_v19  ;;  %v13336_v19 = vadd.f32 %v13320_v33, %v25161_v44 }
 0xc92   : > { %21088 = vmatprep.subr.bf16.mxu0 %v21087_v9 }
 0xc94   : > { %20302 = vmatmul.mubr.msk.f32.gmra.mrb[28].mxu0 %vm1073_vm3, %v25670_v28  ;;  %v16155_v28 = vld [vmem:[%s26088_s15] sm:$0xff] }
 0xc95   : > { %20304 = vmatprep.mubr.msk.f32.mxu0 %vm1073_vm3, %v15773_v50  ;;  %v21095_v27 = vpack.c.bf16 %v16156_v1, %v16155_v28  ;;  %v13314_v12 = vpop.permute.xlu1 %13313  ;;  %v13329_v50 = vadd.f32 %v13306_v20, %v25133_v54 }
 0xc98   : > { %20305 = vmatmul.mubr.msk.f32.gmra.mrb[30].mxu0 %vm1073_vm3, %v15774_v41 }
 0xc99   : > { %20315 = vmatprep.mubr.msk.f32.mxu0 %vm1073_vm3, %v25692_v53  ;;  %v15923_v53 = vld [vmem:[#allocation6 + $0x3e] sm:$0xff]  ;;  %v13318_v48 = vpop.permute.xlu1 %13317 }
 0xc9c   : > { %20316 = vmatmul.mubr.msk.f32.vlgmr.msra.gmra.mrb[24].mxu0 %vm1073_vm3, %v25702_v61  ;;  %v15924_v61 = vld [vmem:[#allocation6 + $0x46] sm:$0x3] }
 0xc9d   : > { %21090 = vmatpush3.bf16.msra.mxu0 %v21087_v9  ;;  %20318 = vmatprep.mubr.msk.f32.mxu0 %vm1073_vm3, %v25706_v39  ;;  %v16157_v39 = vld [vmem:[%s26088_s15 + $0x10] sm:$0xff] }
 0xc9e   : > { %21092 = vmatprep.subr.bf16.mxu0 %v21091_v18 }
 0xca0   : > { %20319 = vmatmul.mubr.msk.f32.gmra.mrb[26].mxu0 %vm1073_vm3, %v25710_v15  ;;  %v16158_v15 = vld [vmem:[%s26088_s15 + $0x18] sm:$0xff] }
 0xca1   : > { %20321 = vmatprep.mubr.msk.f32.mxu0 %vm1073_vm3, %v25714_v30  ;;  %21094 = vmatpush3.bf16.msra.mxu0 %v21091_v18  ;;  %v21099_v30 = vpack.c.bf16 %v16158_v15, %v16157_v39  ;;  %v13331_v18 = vadd.f32 %v13310_v5, %v25141_v45  ;;  %v13334_v15 = vadd.f32 %v13316_v42, %v25153_v22 }
 0xca2   : > { %21096 = vmatprep.subr.bf16.mxu0 %v21095_v27 }
 0xca4   : > { %20322 = vmatmul.mubr.msk.f32.gmra.mrb[28].mxu0 %vm1073_vm3, %v25718_v31 }
 0xca5   : > { %20324 = vmatprep.mubr.msk.f32.mxu0 %vm1073_vm3, %v15923_v53 }
 0xca8   : > { %20325 = vmatmul.mubr.msk.f32.gmra.mrb[30].mxu0 %vm1073_vm3, %v15924_v61 }
 0xca9   : > { %20335 = vmatprep.mubr.msk.f32.mxu0 %vm1073_vm3, %v25404_v7 }
 0xcac   : > { %20336 = vmatmul.mubr.msk.f32.vlgmr.msra.gmra.mrb[32].mxu0 %vm1073_vm3, %v25396_v58 }
 0xcad   : > { %21098 = vmatpush3.bf16.msra.mxu0 %v21095_v27  ;;  %20338 = vmatprep.mubr.msk.f32.mxu0 %vm1073_vm3, %v25414_v35 }
 0xcae   : > { %21100 = vmatprep.subr.bf16.mxu0 %v21099_v30 }
 0xcb0   : > { %20339 = vmatmul.mubr.msk.f32.gmra.mrb[34].mxu0 %vm1073_vm3, %v25401_v34 }
 0xcb1   : > { %20341 = vmatprep.mubr.msk.f32.mxu0 %vm1073_vm3, %v25456_v43  ;;  %21102 = vmatpush3.bf16.msra.mxu0 %v21099_v30  ;;  %v13333_v30 = vadd.f32 %v13314_v12, %v25149_v2 }
 0xcb2   : > { %21104 = vmatprep.subr.bf16.mxu0 %v21103_v60 }
 0xcb4   : > { %20342 = vmatmul.mubr.msk.f32.gmra.mrb[36].mxu0 %vm1073_vm3, %v25411_v14 }
 0xcb5   : > { %20344 = vmatprep.mubr.msk.f32.mxu0 %vm1073_vm3, %v25467_v46 }
 0xcb8   : > { %20345 = vmatmul.mubr.msk.f32.gmra.mrb[38].mxu0 %vm1073_vm3, %v25687_v32 }
 0xcb9   : > { %20355 = vmatprep.mubr.msk.f32.mxu0 %vm1073_vm3, %v25416_v11 }
 0xcbc   : > { %20356 = vmatmul.mubr.msk.f32.vlgmr.msra.gmra.mrb[32].mxu0 %vm1073_vm3, %v25469_v38 }
 0xcbd   : > { %20358 = vmatprep.mubr.msk.f32.mxu0 %vm1073_vm3, %v25440_v49  ;;  %21106 = vmatpush3.bf16.msra.mxu0 %v21103_v60 }
 0xcbe   : > { %21108 = vmatprep.subr.bf16.mxu0 %v21107_v52 }
 0xcc0   : > { %20359 = vmatmul.mubr.msk.f32.gmra.mrb[34].mxu0 %vm1073_vm3, %v25481_v63 }
 0xcc1   : > { %20361 = vmatprep.mubr.msk.f32.mxu0 %vm1073_vm3, %v25462_v25  ;;  %21110 = vmatpush3.bf16.msra.mxu0 %v21107_v52 }
 0xcc4   : > { %20362 = vmatmul.mubr.msk.f32.gmra.mrb[36].mxu0 %vm1073_vm3, %v25507_v16 }
 0xcc5   : > { %20364 = vmatprep.mubr.msk.f32.mxu0 %vm1073_vm3, %v25521_v36 }
 0xcc8   : > { %20365 = vmatmul.mubr.msk.f32.gmra.mrb[38].mxu0 %vm1073_vm3, %v25675_v4 }
 0xd6f   : > { %v20317_v58 = vpop.f32.mrb[24].mxu0 }
 0xd70   : > { %16077 = vrot.lane.b32.xlu0 %v20317_v58, %s22374_s21  ;;  %v16020_v34 = vpop.f32.mrb[25].mxu0 }
 0xd71   : > { %16075 = vrot.lane.b32.xlu1 %v16020_v34, %s22374_s21 }
 0xd73   : > { %v20320_v7 = vpop.f32.mrb[26].mxu0 }
 0xd74   : > { %16081 = vrot.lane.b32.xlu0 %v20320_v7, %s22374_s21  ;;  %v16030_v14 = vpop.f32.mrb[27].mxu0 }
 0xd75   : > { %16079 = vrot.lane.b32.xlu1 %v16030_v14, %s22374_s21  ;;  %v13335_v14 = vadd.f32 %v13318_v48, %v25157_v47 }
 0xd77   : > { %v20323_v35 = vpop.f32.mrb[28].mxu0 }
 0xd78   : > { %16085 = vrot.lane.b32.xlu0 %v20323_v35, %s22374_s21  ;;  %v16040_v11 = vpop.f32.mrb[29].mxu0 }
 0xd79   : > { %16083 = vrot.lane.b32.xlu1 %v16040_v11, %s22374_s21 }
 0xd7b   : > { %v20326_v49 = vpop.f32.mrb[30].mxu0 }
 0xd7c   : > { %16089 = vrot.lane.b32.xlu0 %v20326_v49, %s22374_s21  ;;  %v16050_v43 = vpop.f32.mrb[31].mxu0 }
 0xd7d   : > { %16087 = vrot.lane.b32.xlu1 %v16050_v43, %s22374_s21 }
 0xd8f   : > { %v20357_v25 = vpop.f32.mrb[32].mxu0 }
 0xd90   : > { %22298 = vtanh.f32 %v20357_v25  ;;  %v16374_v46 = vpop.f32.mrb[33].mxu0 }
 0xd91   : > { %22300 = vtanh.f32 %v16374_v46 }
 0xd93   : > { %v20360_v38 = vpop.f32.mrb[34].mxu0 }
 0xd94   : > { %22302 = vtanh.f32 %v20360_v38  ;;  %v16384_v63 = vpop.f32.mrb[35].mxu0 }
 0xd95   : > { %22304 = vtanh.f32 %v16384_v63 }
 0xd97   : > { %v20363_v16 = vpop.f32.mrb[36].mxu0 }
 0xd98   : > { %22306 = vtanh.f32 %v20363_v16  ;;  %v16394_v36 = vpop.f32.mrb[37].mxu0 }
 0xd99   : > { %22308 = vtanh.f32 %v16394_v36 }
 0xd9a   : > { %v22299_v4 = vpop.eup %22298 }
 0xd9b   : > { %v22301_v32 = vpop.eup %22300  ;;  %16431 = vrot.lane.b32.xlu0 %v22299_v4, %s22374_s21  ;;  %v20366_v31 = vpop.f32.mrb[38].mxu0 }
 0xd9c   : > { %22310 = vtanh.f32 %v20366_v31  ;;  %16429 = vrot.lane.b32.xlu1 %v22301_v32, %s22374_s21  ;;  %v16404_v59 = vpop.f32.mrb[39].mxu0 }
 0xd9d   : > { %22312 = vtanh.f32 %v16404_v59 }
 0xd9e   : > { %v22303_v13 = vpop.eup %22302 }
 0xd9f   : > { %v22305_v17 = vpop.eup %22304  ;;  %16435 = vrot.lane.b32.xlu0 %v22303_v13, %s22374_s21 }
 0xda0   : > { %16433 = vrot.lane.b32.xlu1 %v22305_v17, %s22374_s21 }
 0xda2   : > { %v22307_v6 = vpop.eup %22306 }
 0xda3   : > { %v22309_v37 = vpop.eup %22308  ;;  %16439 = vrot.lane.b32.xlu0 %v22307_v6, %s22374_s21 }
 0xda4   : > { %16437 = vrot.lane.b32.xlu1 %v22309_v37, %s22374_s21 }
 0xda6   : > { %v22311_v56 = vpop.eup %22310 }
 0xda7   : > { %v22313_v26 = vpop.eup %22312  ;;  %16443 = vrot.lane.b32.xlu0 %v22311_v56, %s22374_s21 }
 0xda8   : > { %16441 = vrot.lane.b32.xlu1 %v22313_v26, %s22374_s21 }
 0xde2   : > { %v16078_v0 = vpop.permute.xlu0 %16077 }
 0xde3   : > { %v16076_v23 = vpop.permute.xlu1 %16075  ;;  %v16100_v41 = vadd.f32 %v16078_v0, %v13330_v24 }
 0xde4   : > { %v16099_v21 = vadd.f32 %v16076_v23, %v13329_v50 }
 0xde5   : > { %v17890_v1 = vmul.f32 -1.442695, %v16100_v41 }
 0xde6   : > { %v16082_v29 = vpop.permute.xlu0 %16081  ;;  %v17889_v61 = vmul.f32 -1.442695, %v16099_v21 }
 0xde7   : > { %v16080_v9 = vpop.permute.xlu1 %16079  ;;  %v16102_v27 = vadd.f32 %v16082_v29, %v13332_v3  ;;  %22314 = vpow2.f32 %v17890_v1 }
 0xde8   : > { %v16101_v39 = vadd.f32 %v16080_v9, %v13331_v18  ;;  %22316 = vpow2.f32 %v17889_v61 }
 0xde9   : > { %v17892_v10 = vmul.f32 -1.442695, %v16102_v27 }
 0xdea   : > { %v16086_v28 = vpop.permute.xlu0 %16085  ;;  %v17891_v54 = vmul.f32 -1.442695, %v16101_v39 }
 0xdeb   : > { %v16084_v53 = vpop.permute.xlu1 %16083  ;;  %v16104_v58 = vadd.f32 %v16086_v28, %v13334_v15  ;;  %22318 = vpow2.f32 %v17892_v10 }
 0xdec   : > { %v16103_v34 = vadd.f32 %v16084_v53, %v13333_v30  ;;  %22320 = vpow2.f32 %v17891_v54 }
 0xded   : > { %v17894_v35 = vmul.f32 -1.442695, %v16104_v58 }
 0xdee   : > { %v16090_v7 = vpop.permute.xlu0 %16089  ;;  %v17893_v49 = vmul.f32 -1.442695, %v16103_v34 }
 0xdef   : > { %v16088_v45 = vpop.permute.xlu1 %16087  ;;  %v16106_v11 = vadd.f32 %v16090_v7, %v13336_v19  ;;  %22322 = vpow2.f32 %v17894_v35 }
 0xdf0   : > { %v16105_v22 = vadd.f32 %v16088_v45, %v13335_v14  ;;  %22324 = vpow2.f32 %v17893_v49 }
 0xdf1   : > { %v17896_v2 = vmul.f32 -1.442695, %v16106_v11  ;;  %v22315_v25 = vpop.eup %22314 }
 0xdf2   : > { %v17895_v43 = vmul.f32 -1.442695, %v16105_v22  ;;  %v22317_v46 = vpop.eup %22316  ;;  %v16132_v38 = vadd.f32 1.0, %v22315_v25 }
 0xdf3   : > { %22326 = vpow2.f32 %v17896_v2  ;;  %v16131_v44 = vadd.f32 1.0, %v22317_v46 }
 0xdf4   : > { %22328 = vpow2.f32 %v17895_v43 }
 0xdf5   : > { %v22319_v63 = vpop.eup %22318  ;;  %22330 = vrcp.f32 %v16132_v38 }
 0xdf6   : > { %v22321_v16 = vpop.eup %22320  ;;  %v16134_v47 = vadd.f32 1.0, %v22319_v63  ;;  %22332 = vrcp.f32 %v16131_v44 }
 0xdf7   : > { %v16133_v4 = vadd.f32 1.0, %v22321_v16 }
 0xdf8   : > { %22334 = vrcp.f32 %v16134_v47 }
 0xdf9   : > { %v22323_v36 = vpop.eup %22322  ;;  %22336 = vrcp.f32 %v16133_v4 }
 0xdfa   : > { %v22325_v32 = vpop.eup %22324  ;;  %v16136_v31 = vadd.f32 1.0, %v22323_v36 }
 0xdfb   : > { %v16135_v57 = vadd.f32 1.0, %v22325_v32 }
 0xdfc   : > { %22338 = vrcp.f32 %v16136_v31 }
 0xdfd   : > { %v22327_v59 = vpop.eup %22326  ;;  %22340 = vrcp.f32 %v16135_v57 }
 0xdfe   : > { %v22329_v8 = vpop.eup %22328  ;;  %v16138_v51 = vadd.f32 1.0, %v22327_v59 }
 0xdff   : > { %v16137_v13 = vadd.f32 1.0, %v22329_v8  ;;  %v22331_v60 = vpop.eup %22330 }
 0xe00   : > { %v22333_v17 = vpop.eup %22332  ;;  %22342 = vrcp.f32 %v16138_v51 }
 0xe01   : > { %22344 = vrcp.f32 %v16137_v13 }
 0xe02   : > { %v22335_v56 = vpop.eup %22334 }
 0xe03   : > { %v22337_v40 = vpop.eup %22336 }
 0xe06   : > { %v22339_v42 = vpop.eup %22338 }
 0xe07   : > { %v22341_v33 = vpop.eup %22340 }
 0xe0a   : > { %v22343_v29 = vpop.eup %22342 }
 0xe0b   : > { %v22345_v9 = vpop.eup %22344 }
 0xe0d   : > { %v16432_v62 = vpop.permute.xlu0 %16431 }
 0xe0e   : > { %v16454_v52 = vmul.f32 %v22331_v60, %v16432_v62  ;;  %v16430_v6 = vpop.permute.xlu1 %16429 }
 0xe0f   : > { %v16453_v37 = vmul.f32 %v22333_v17, %v16430_v6 }
 0xe10   : > { %16471 = vrot.lane.b32.xlu0 %v16454_v52, %s22374_s21 }
 0xe11   : > { %v16436_v26 = vpop.permute.xlu0 %16435  ;;  %16469 = vrot.lane.b32.xlu1 %v16453_v37, %s22374_s21 }
 0xe12   : > { %v16456_v20 = vmul.f32 %v22335_v56, %v16436_v26  ;;  %v16434_v55 = vpop.permute.xlu1 %16433 }
 0xe13   : > { %v16455_v5 = vmul.f32 %v22337_v40, %v16434_v55 }
 0xe14   : > { %16475 = vrot.lane.b32.xlu0 %v16456_v20, %s22374_s21 }
 0xe15   : > { %v16440_v12 = vpop.permute.xlu0 %16439  ;;  %16473 = vrot.lane.b32.xlu1 %v16455_v5, %s22374_s21 }
 0xe16   : > { %v16458_v48 = vmul.f32 %v22339_v42, %v16440_v12  ;;  %v16438_v0 = vpop.permute.xlu1 %16437 }
 0xe17   : > { %v16457_v23 = vmul.f32 %v22341_v33, %v16438_v0 }
 0xe18   : > { %16479 = vrot.lane.b32.xlu0 %v16458_v48, %s22374_s21 }
 0xe19   : > { %v16444_v24 = vpop.permute.xlu0 %16443  ;;  %16477 = vrot.lane.b32.xlu1 %v16457_v23, %s22374_s21 }
 0xe1a   : > { %v16460_v50 = vmul.f32 %v22343_v29, %v16444_v24  ;;  %v16442_v41 = vpop.permute.xlu1 %16441 }
 0xe1b   : > { %v16459_v21 = vmul.f32 %v22345_v9, %v16442_v41 }
 0xe1c   : > { %16483 = vrot.lane.b32.xlu0 %v16460_v50, %s22374_s21 }
 0xe1d   : > { %16481 = vrot.lane.b32.xlu1 %v16459_v21, %s22374_s21 }
 0xe82   : > { %v16472_v3 = vpop.permute.xlu0 %16471 }
 0xe83   : > { %16494 = vst.msk [vmem:[#allocation4 + $0xf] sm:$0xff] %vm1073_vm3, %v16472_v3  ;;  %v16470_v18 = vpop.permute.xlu1 %16469 }
 0xe84   : > { %16493 = vst.msk [vmem:[#allocation4 + $0x7] sm:$0xff] %vm1073_vm3, %v16470_v18  ;;  %20375 = vmatprep.mubr.msk.f32.mxu0 %vm1073_vm3, %v16470_v18 }
 0xe85   : > { %20376 = vmatmul.mubr.msk.f32.vlgmr.msra.gmra.mrb[40].mxu0 %vm1073_vm3, %v16472_v3 }
 0xe86   : > { %v16476_v28 = vpop.permute.xlu0 %16475 }
 0xe87   : > { %16496 = vst.msk [vmem:[#allocation4 + $0x1f] sm:$0xff] %vm1073_vm3, %v16476_v28  ;;  %v16474_v1 = vpop.permute.xlu1 %16473 }
 0xe88   : > { %16495 = vst.msk [vmem:[#allocation4 + $0x17] sm:$0xff] %vm1073_vm3, %v16474_v1  ;;  %20378 = vmatprep.mubr.msk.f32.mxu0 %vm1073_vm3, %v16474_v1 }
 0xe89   : > { %20379 = vmatmul.mubr.msk.f32.gmra.mrb[42].mxu0 %vm1073_vm3, %v16476_v28 }
 0xe8a   : > { %v16480_v27 = vpop.permute.xlu0 %16479 }
 0xe8b   : > { %16498 = vst.msk [vmem:[#allocation4 + $0x2f] sm:$0xff] %vm1073_vm3, %v16480_v27  ;;  %v16478_v53 = vpop.permute.xlu1 %16477 }
 0xe8c   : > { %16497 = vst.msk [vmem:[#allocation4 + $0x27] sm:$0xff] %vm1073_vm3, %v16478_v53  ;;  %20381 = vmatprep.mubr.msk.f32.mxu0 %vm1073_vm3, %v16478_v53 }
 0xe8d   : > { %20382 = vmatmul.mubr.msk.f32.gmra.mrb[44].mxu0 %vm1073_vm3, %v16480_v27 }
 0xe8e   : > { %v16484_v61 = vpop.permute.xlu0 %16483 }
 0xe8f   : > { %16500 = vst.msk [vmem:[#allocation4 + $0x3f] sm:$0x3] %vm5496_vm4, %v16484_v61  ;;  %v16482_v39 = vpop.permute.xlu1 %16481 }
 0xe90   : > { %16499 = vst.msk [vmem:[#allocation4 + $0x37] sm:$0xff] %vm1073_vm3, %v16482_v39  ;;  %20384 = vmatprep.mubr.msk.f32.mxu0 %vm1073_vm3, %v16482_v39 }
 0xe91   : > { %20385 = vmatmul.mubr.msk.f32.gmra.mrb[46].mxu0 %vm1073_vm3, %v16484_v61 }
 0xf58   : > { %v20377_v15 = vpop.f32.mrb[40].mxu0 }
 0xf59   : > { %16627 = vst.msk [vmem:[#allocation7 + $0xf] sm:$0xff] %vm727_vm2, %v20377_v15  ;;  %v16587_v30 = vpop.f32.mrb[41].mxu0 }
 0xf5a   : > { %16626 = vst.msk [vmem:[#allocation7 + $0x7] sm:$0xff] %vm727_vm2, %v16587_v30 }
 0xf5c   : > { %v20380_v10 = vpop.f32.mrb[42].mxu0 }
 0xf5d   : > { %16629 = vst.msk [vmem:[#allocation7 + $0x1f] sm:$0xff] %vm727_vm2, %v20380_v10  ;;  %v16597_v58 = vpop.f32.mrb[43].mxu0 }
 0xf5e   : > { %16628 = vst.msk [vmem:[#allocation7 + $0x17] sm:$0xff] %vm727_vm2, %v16597_v58 }
 0xf60   : > { %v20383_v54 = vpop.f32.mrb[44].mxu0 }
 0xf61   : > { %v16635_v34 = vld [vmem:[#allocation7] sm:$0xff]  ;;  %v16636_v7 = vld [vmem:[#allocation7 + $0x8] sm:$0xff]  ;;  %16631 = vst.msk [vmem:[#allocation7 + $0x2f] sm:$0xff] %vm727_vm2, %v20383_v54  ;;  %v16607_v19 = vpop.f32.mrb[45].mxu0 }
 0xf62   : > { %16644 = vst.msk [vmem:[%s22492_s26] sm:$0xff] %vm727_vm2, %v16635_v34  ;;  %16645 = vst.msk [vmem:[%s22492_s26 + $0x8] sm:$0xff] %vm727_vm2, %v16636_v7 }
 0xf63   : > { %16630 = vst.msk [vmem:[#allocation7 + $0x27] sm:$0xff] %vm727_vm2, %v16607_v19 }
 0xf64   : > { %v20386_v45 = vpop.f32.mrb[46].mxu0 }
 0xf65   : > { %v16637_v14 = vld [vmem:[#allocation7 + $0x10] sm:$0xff]  ;;  %v16638_v35 = vld [vmem:[#allocation7 + $0x18] sm:$0xff]  ;;  %16634 = vst.msk [vmem:[#allocation7 + $0x3f] sm:$0x3] %vm16633_vm5, %v20386_v45  ;;  %v16617_v11 = vpop.f32.mrb[47].mxu0 }
 0xf66   : > { %16646 = vst.msk [vmem:[%s22492_s26 + $0x10] sm:$0xff] %vm727_vm2, %v16637_v14  ;;  %16647 = vst.msk [vmem:[%s22492_s26 + $0x18] sm:$0xff] %vm727_vm2, %v16638_v35 }
 0xf67   : > { %16632 = vst.msk [vmem:[#allocation7 + $0x37] sm:$0xff] %vm727_vm2, %v16617_v11 }
 0xf6a   : > { %v16639_v49 = vld [vmem:[#allocation7 + $0x20] sm:$0xff]  ;;  %v16640_v22 = vld [vmem:[#allocation7 + $0x28] sm:$0xff] }
 0xf6b   : > { %16648 = vst.msk [vmem:[%s22492_s26 + $0x20] sm:$0xff] %vm727_vm2, %v16639_v49  ;;  %16649 = vst.msk [vmem:[%s22492_s26 + $0x28] sm:$0xff] %vm727_vm2, %v16640_v22 }
 0xf6c   : > { %v16643_v2 = vld [vmem:[#allocation7 + $0x40] sm:$0xff] }
 0xf6d   : > { %16652 = vst.msk [vmem:[%s22492_s26 + $0x40] sm:$0xff] %vm727_vm2, %v16643_v2 }
 0xf6e   : > { %v16641_v43 = vld [vmem:[#allocation7 + $0x30] sm:$0xff]  ;;  %v16642_v25 = vld [vmem:[#allocation7 + $0x38] sm:$0xff] }
 0xf6f   : > { %16650 = vst.msk [vmem:[%s22492_s26 + $0x30] sm:$0xff] %vm727_vm2, %v16641_v43  ;;  %16651 = vst.msk [vmem:[%s22492_s26 + $0x38] sm:$0xff] %vm727_vm2, %v16642_v25 }
 0xf70 PF: > { %s28_s27 = sadd.s32 1, %s22368_s27  }
 0xf71   : > { %p25_p5 = scmp.ge.s32.totalorder %s28_s27, 9  }
 0xf73   :  { %27 = sbr.rel (!%p25_p5) target bundleno = 4 (0x4), region = 209 }

</bundles_post_ra>
